<compile_context>
chip_gen: v7x
topology: tpu7x:2x2x1
jax: 0.10.0
libtpu: 0.0.40
codegen_flags: <defaults>
</compile_context>

<pallas_src>
import jax
import jax.numpy as jnp
from jax import lax
from jax.experimental import pallas as pl
from jax.experimental.pallas import tpu as pltpu

LANE = 128
SUBLANE = 8


def _round_up(x, m):
    return (x + m - 1) // m * m


# ---------------------------------------------------------------------------
# Pallas kernels
# ---------------------------------------------------------------------------
def _bigru_attn_body(x_ref,
                     wih_f, whh_f, bxg_f, bhn_f,
                     wih_b, whh_b, bxg_b, bhn_b,
                     wfc_ref, bfc_ref, wctx_ref,
                     seq_scr, xgf_scr, xgb_scr):
    """Bidirectional GRU + additive-attention pooling for one batch block.

    Shapes (Hp = lane-padded hidden dim, Nb = batch block, multiple of 8):
      x_ref:        (T, Nb, D)  f32
      wih_*:        (D, 3*Hp)   bf16  input->gates, gates (r|z|n) packed on lanes
      whh_*:        (Hp, 3*Hp)  bf16  hidden->gates
      bxg_*:        (1, 3*Hp)   f32   folded biases [bih_r+bhh_r | bih_z+bhh_z | bih_n]
      bhn_*:        (1, Hp)     f32   bhh_n (applied inside r * (...))
      wfc_ref:      (2*Hp, 2*Hp) bf16 attention fc;  bfc_ref: (1, 2*Hp) f32
      wctx_ref:     (2*Hp, 1)   bf16  attention context column
      seq_scr:      (T*Nb, 2*Hp) f32  [fwd | bwd] hidden states, row = t*Nb + n
      xgf/xgb_scr:  (T*Nb, 3*Hp) f32  hoisted input-gate projections
    Returns the pooled sequence embedding, shape (Nb, 2*Hp), f32.
    """
    T, Nb, D = x_ref.shape
    Hp = whh_f.shape[0]

    # ---- Hoisted input projections for ALL timesteps, both directions:
    #      bf16 operands, f32 accumulation (native MXU path on v5e/v6e/v7x).
    x_flat = x_ref[...].reshape(T * Nb, D).astype(jnp.bfloat16)
    xgf_scr[...] = jnp.dot(x_flat, wih_f[...],
                           preferred_element_type=jnp.float32) + bxg_f[...]
    xgb_scr[...] = jnp.dot(x_flat, wih_b[...],
                           preferred_element_type=jnp.float32) + bxg_b[...]

    def gru_step(xg, h, whh_ref, bhn_ref):
        # Read the recurrent weight from VMEM every step (3 vld/cycle ~ free)
        # instead of holding a 48-vreg SSA value live across the unrolled loop.
        hg = jnp.dot(h.astype(jnp.bfloat16), whh_ref[...],
                     preferred_element_type=jnp.float32)
        r = jax.nn.sigmoid(xg[:, 0:Hp] + hg[:, 0:Hp])
        z = jax.nn.sigmoid(xg[:, Hp:2 * Hp] + hg[:, Hp:2 * Hp])
        n = jnp.tanh(xg[:, 2 * Hp:3 * Hp]
                     + r * (hg[:, 2 * Hp:3 * Hp] + bhn_ref[...]))
        return (1.0 - z) * n + z * h

    h0 = jnp.zeros((Nb, Hp), jnp.float32)

    # ---- Interleaved fwd/bwd recurrence: the two directions are independent,
    #      so pairing them per iteration lets the scheduler overlap one
    #      direction's MXU work with the other's EUP/VPU gate tail.
    def step(t, carry):
        h_f, h_b = carry
        row_f = pl.multiple_of(t * Nb, SUBLANE)
        row_b = pl.multiple_of((T - 1 - t) * Nb, SUBLANE)
        h_f = gru_step(xgf_scr[pl.ds(row_f, Nb), :], h_f, whh_f, bhn_f)
        h_b = gru_step(xgb_scr[pl.ds(row_b, Nb), :], h_b, whh_b, bhn_b)
        seq_scr[pl.ds(row_f, Nb), 0:Hp] = h_f          # disjoint column ranges:
        seq_scr[pl.ds(row_b, Nb), Hp:2 * Hp] = h_b     # safe even when rows match
        return (h_f, h_b)

    lax.fori_loop(0, T, step, (h0, h0), unroll=True if T <= 16 else 8)

    # ---- Batched attention over all timesteps: two matmuls total ----
    seq = seq_scr[...]                                              # (T*Nb, 2Hp)
    e = jnp.tanh(jnp.dot(seq.astype(jnp.bfloat16), wfc_ref[...],
                         preferred_element_type=jnp.float32) + bfc_ref[...])
    scores = jnp.dot(e.astype(jnp.bfloat16), wctx_ref[...],
                     preferred_element_type=jnp.float32)            # (T*Nb, 1)

    # ---- Softmax over time + weighted pooling (Nb % 8 == 0 so these reshapes
    #      are layout-preserving).
    s_tn = scores.reshape(T, Nb, 1)
    m = jnp.max(s_tn, axis=0, keepdims=True)
    p = jnp.exp(s_tn - m)
    alpha = p / jnp.sum(p, axis=0, keepdims=True)                   # (T, Nb, 1)
    pooled = jnp.sum(alpha * seq.reshape(T, Nb, 2 * Hp), axis=0)    # (Nb, 2Hp)
    return pooled


def _word_kernel(x_ref, wih_f, whh_f, bxg_f, bhn_f, wih_b, whh_b, bxg_b, bhn_b,
                 wfc, bfc, wctx, out_ref, seq_scr, xgf_scr, xgb_scr):
    out_ref[...] = _bigru_attn_body(x_ref, wih_f, whh_f, bxg_f, bhn_f,
                                    wih_b, whh_b, bxg_b, bhn_b,
                                    wfc, bfc, wctx, seq_scr, xgf_scr, xgb_scr)


def _sent_head_kernel(x_ref, wih_f, whh_f, bxg_f, bhn_f, wih_b, whh_b, bxg_b,
                      bhn_b, wfc, bfc, wctx, regw, regb, out_ref,
                      seq_scr, xgf_scr, xgb_scr):
    pooled = _bigru_attn_body(x_ref, wih_f, whh_f, bxg_f, bhn_f,
                              wih_b, whh_b, bxg_b, bhn_b,
                              wfc, bfc, wctx, seq_scr, xgf_scr, xgb_scr)
    # Fused 4-head regression; reg weights padded to a full 128-lane tile.
    out_ref[...] = jnp.dot(pooled.astype(jnp.bfloat16), regw[...],
                           preferred_element_type=jnp.float32) + regb[...]


# ---------------------------------------------------------------------------
# Wrappers
# ---------------------------------------------------------------------------
_WEIGHT_KEYS = ("wih_f", "whh_f", "bxg_f", "bhn_f",
                "wih_b", "whh_b", "bxg_b", "bhn_b",
                "wfc", "bfc", "wctx")


def _pick_block(n, t, hp, d, target=256, scratch_budget=40 << 20):
    """Batch block: multiple of 8 that divides round_up(n,8) (no dead padded
    rows), bounded by a VMEM scratch budget, preferring >=2 grid steps so the
    'parallel' axis can be split across v7x's two TensorCores."""
    n_req = _round_up(n, SUBLANE)
    per_seq = t * (2 * hp + 2 * 3 * hp) * 4 + 2 * t * d * 4   # scratch + dbl-buffered input
    cap = max(SUBLANE, (scratch_budget // max(per_seq, 1)) // SUBLANE * SUBLANE)
    tgt = min(target, cap, n_req)
    n_blk = SUBLANE
    c = SUBLANE
    while c <= tgt:
        if n_req % c == 0:
            n_blk = c
        c += SUBLANE
    if n_req // n_blk < 2 and n_req >= 2 * SUBLANE:
        c = n_blk - SUBLANE
        while c >= SUBLANE:
            if n_req % c == 0:      # any proper divisor gives >= 2 grid steps
                n_blk = c
                break
            c -= SUBLANE
    return n_blk, n_req


def _bigru_attention(x_tnd, p, head=None):
    """x_tnd: (T, N, D) f32 -> (N, out_w) attention-pooled biGRU embeddings."""
    T, N, D = x_tnd.shape
    Hp = p["whh_f"].shape[0]

    n_blk, n_pad = _pick_block(N, T, Hp, D)
    if n_pad != N:
        x_tnd = jnp.pad(x_tnd, ((0, 0), (0, n_pad - N), (0, 0)))

    def full(a):  # weights stay resident: same block every grid step
        return pl.BlockSpec(a.shape, lambda i: (0,) * a.ndim)

    args = [x_tnd] + [p[k] for k in _WEIGHT_KEYS]
    in_specs = [pl.BlockSpec((T, n_blk, D), lambda i: (0, i, 0))]
    in_specs += [full(p[k]) for k in _WEIGHT_KEYS]

    if head is None:
        kernel, out_w = _word_kernel, 2 * Hp
    else:
        regw, regb = head
        kernel, out_w = _sent_head_kernel, regw.shape[1]
        args += [regw, regb]
        in_specs += [full(regw), full(regb)]

    # Explicit VMEM budget: default scoped limits (16 MiB v5e / 32 MiB v6e,v7x)
    # are below what large batch blocks need; cap at 64 MiB so the request also
    # fits v7x's 64 MiB physical VMEM. (_pick_block keeps scratch under budget.)
    scratch_bytes = T * n_blk * (2 * Hp + 2 * 3 * Hp) * 4
    io_bytes = 2 * (T * n_blk * D * 4 + n_blk * out_w * 4)
    w_bytes = 2 * sum(int(a.size) * a.dtype.itemsize for a in args[1:])
    vmem_limit = int(min(64 << 20,
                         max(32 << 20,
                             (scratch_bytes + io_bytes + w_bytes) * 3 // 2
                             + (4 << 20))))

    out = pl.pallas_call(
        kernel,
        out_shape=jax.ShapeDtypeStruct((n_pad, out_w), jnp.float32),
        grid=(n_pad // n_blk,),
        in_specs=in_specs,
        out_specs=pl.BlockSpec((n_blk, out_w), lambda i: (i, 0)),
        scratch_shapes=[
            pltpu.VMEM((T * n_blk, 2 * Hp), jnp.float32),   # [fwd|bwd] hidden seq
            pltpu.VMEM((T * n_blk, 3 * Hp), jnp.float32),   # fwd input-gate proj
            pltpu.VMEM((T * n_blk, 3 * Hp), jnp.float32),   # bwd input-gate proj
        ],
        compiler_params=pltpu.CompilerParams(
            dimension_semantics=("parallel",),
            vmem_limit_bytes=vmem_limit),
    )(*args)
    return out[:N]


def han_forward(token_ids, kp):
    """token_ids: int32 (B, S, W) -> (B, 4) regression outputs."""
    B, S, W = token_ids.shape
    Hw_p = kp["word"]["whh_f"].shape[0]
    E = kp["embed"].shape[1]

    # Transpose the tiny int32 ids (not the embedded floats) so the gather
    # already lands in the word kernel's (W, S*B, E) time-major layout, and the
    # word output reshapes for FREE into the sentence kernel's (S, B, 2Hw_p)
    # input -> no HBM activation transposes between kernels.
    # TODO(synk): fuse the embedding gather itself into the word kernel via
    # PrefetchScalarGridSpec row gather to drop the remaining HBM round trip.
    ids = jnp.transpose(token_ids, (2, 1, 0)).reshape(-1)           # (W*S*B,)
    emb = jnp.take(kp["embed"], ids, axis=0)                        # (W*S*B, E)
    x_word = emb.reshape(W, S * B, E)                               # time-major

    sent_embed = _bigru_attention(x_word, kp["word"])               # (S*B, 2Hw_p), row = s*B+b
    sent_seq = sent_embed.reshape(S, B, 2 * Hw_p)                   # free reshape

    out = _bigru_attention(sent_seq, kp["sent"],
                           head=(kp["reg_w"], kp["reg_b"]))         # (B, 128)
    return out[:, :4]


# ---------------------------------------------------------------------------
# Parameter packing: raw per-gate weights -> lane-padded, gate-packed, bf16
# ---------------------------------------------------------------------------
def _pack_bigru(p, in_rows, d_in_pad, H, Hp):
    in_rows = jnp.asarray(in_rows, jnp.int32)

    def pack_dir(wih, whh, bih, bhh):
        wihg = jnp.zeros((d_in_pad, 3 * Hp), jnp.float32)
        whhg = jnp.zeros((Hp, 3 * Hp), jnp.float32)
        for g in range(3):
            wihg = wihg.at[in_rows, g * Hp:g * Hp + H].set(wih[g])
            whhg = whhg.at[0:H, g * Hp:g * Hp + H].set(whh[g])
        bxg = jnp.zeros((1, 3 * Hp), jnp.float32)
        bxg = bxg.at[0, 0:H].set(bih[0, 0] + bhh[0, 0])              # r
        bxg = bxg.at[0, Hp:Hp + H].set(bih[1, 0] + bhh[1, 0])        # z
        bxg = bxg.at[0, 2 * Hp:2 * Hp + H].set(bih[2, 0])            # n (bih only)
        bhn = jnp.zeros((1, Hp), jnp.float32).at[0, 0:H].set(bhh[2, 0])
        # bf16 MXU operands; biases stay f32 (added post-accumulation).
        return wihg.astype(jnp.bfloat16), whhg.astype(jnp.bfloat16), bxg, bhn

    wih_f, whh_f, bxg_f, bhn_f = pack_dir(p["wih_f"], p["whh_f"],
                                          p["bih_f"], p["bhh_f"])
    wih_b, whh_b, bxg_b, bhn_b = pack_dir(p["wih_b"], p["whh_b"],
                                          p["bih_b"], p["bhh_b"])

    wfc = jnp.zeros((2 * Hp, 2 * Hp), jnp.float32)
    wfc = wfc.at[0:H, 0:2 * H].set(p["wfc"][0])
    wfc = wfc.at[Hp:Hp + H, 0:2 * H].set(p["wfc"][1])
    bfc = jnp.zeros((1, 2 * Hp), jnp.float32).at[0, 0:2 * H].set(p["bfc"][0])
    wctx = jnp.zeros((2 * Hp, 1), jnp.float32).at[0:2 * H, 0].set(p["wctx"][0])

    return dict(wih_f=wih_f, whh_f=whh_f, bxg_f=bxg_f, bhn_f=bhn_f,
                wih_b=wih_b, whh_b=whh_b, bxg_b=bxg_b, bhn_b=bhn_b,
                wfc=wfc.astype(jnp.bfloat16), bfc=bfc,
                wctx=wctx.astype(jnp.bfloat16))


def pack_params(raw):
    E = raw["embed"].shape[1]
    Hw = raw["word"]["whh_f"].shape[-1]
    Hs = raw["sent"]["whh_f"].shape[-1]
    Hw_p = _round_up(Hw, LANE)
    Hs_p = _round_up(Hs, LANE)

    word = _pack_bigru(raw["word"], in_rows=jnp.arange(E), d_in_pad=E,
                       H=Hw, Hp=Hw_p)
    # Sentence GRU consumes the *padded* [fwd | bwd] word embeddings: real
    # features live at lanes [0:Hw] and [Hw_p:Hw_p+Hw].
    sent_rows = jnp.concatenate([jnp.arange(Hw), Hw_p + jnp.arange(Hw)])
    sent = _pack_bigru(raw["sent"], in_rows=sent_rows, d_in_pad=2 * Hw_p,
                       H=Hs, Hp=Hs_p)

    # 4 regression heads fused into one lane-padded (2*Hs_p, 128) matmul.
    reg_w = jnp.zeros((2 * Hs_p, LANE), jnp.float32)
    reg_w = reg_w.at[0:Hs, 0:4].set(raw["reg_w"][0:Hs])
    reg_w = reg_w.at[Hs_p:Hs_p + Hs, 0:4].set(raw["reg_w"][Hs:2 * Hs])
    reg_b = jnp.zeros((1, LANE), jnp.float32).at[0, 0:4].set(raw["reg_b"][0])

    return dict(embed=raw["embed"], word=word, sent=sent,
                reg_w=reg_w.astype(jnp.bfloat16), reg_b=reg_b)


# ---------------------------------------------------------------------------
# Pure-JAX reference (same math, unpadded f32 raw params, for verification)
# ---------------------------------------------------------------------------
def _gru_step_ref(x_t, h, wih, whh, bih, bhh):
    r = jax.nn.sigmoid(x_t @ wih[0] + bih[0] + h @ whh[0] + bhh[0])
    z = jax.nn.sigmoid(x_t @ wih[1] + bih[1] + h @ whh[1] + bhh[1])
    n = jnp.tanh(x_t @ wih[2] + bih[2] + r * (h @ whh[2] + bhh[2]))
    return (1.0 - z) * n + z * h


def bigru_attention_ref(x_tnd, p):
    T, N, _ = x_tnd.shape
    H = p["whh_f"].shape[-1]

    def run(wih, whh, bih, bhh, xs):
        def f(h, x_t):
            h2 = _gru_step_ref(x_t, h, wih, whh, bih, bhh)
            return h2, h2
        _, hs = jax.lax.scan(f, jnp.zeros((N, H), jnp.float32), xs)
        return hs

    fwd = run(p["wih_f"], p["whh_f"], p["bih_f"], p["bhh_f"], x_tnd)
    bwd = run(p["wih_b"], p["whh_b"], p["bih_b"], p["bhh_b"], x_tnd[::-1])[::-1]
    e = jnp.tanh(fwd @ p["wfc"][0] + bwd @ p["wfc"][1] + p["bfc"])
    s = jnp.sum(e * p["wctx"], axis=-1)                              # (T, N)
    alpha = jax.nn.softmax(s, axis=0)[..., None]
    return jnp.concatenate(
        [jnp.sum(alpha * fwd, axis=0), jnp.sum(alpha * bwd, axis=0)], axis=-1)


def han_forward_ref(token_ids, params):
    B, S, W = token_ids.shape
    E = params["embed"].shape[1]
    emb = jnp.take(params["embed"], token_ids.reshape(-1), axis=0).reshape(B, S, W, E)
    x_word = emb.reshape(B * S, W, E).transpose(1, 0, 2)
    sent_embed = bigru_attention_ref(x_word, params["word"])
    sent_seq = sent_embed.reshape(B, S, -1).transpose(1, 0, 2)
    doc_embed = bigru_attention_ref(sent_seq, params["sent"])
    return doc_embed @ params["reg_w"] + params["reg_b"]


# ---------------------------------------------------------------------------
# Deterministic parameter init (synthetic weights, shapes from the module)
# ---------------------------------------------------------------------------
def init_params(key, vocab, E, Hw, Hs):
    ks = iter(jax.random.split(key, 40))

    def rnd(shape, scale=0.1):
        return (jax.random.normal(next(ks), shape) * scale).astype(jnp.float32)

    def gru_attn_params(D, H):
        return dict(
            wih_f=rnd((3, D, H)), whh_f=rnd((3, H, H)),
            bih_f=rnd((3, 1, H)), bhh_f=rnd((3, 1, H)),
            wih_b=rnd((3, D, H)), whh_b=rnd((3, H, H)),
            bih_b=rnd((3, 1, H)), bhh_b=rnd((3, 1, H)),
            wfc=rnd((2, H, 2 * H)), bfc=rnd((1, 2 * H)), wctx=rnd((1, 2 * H)),
        )

    return dict(
        embed=rnd((vocab, E), 0.5),
        word=gru_attn_params(E, Hw),
        sent=gru_attn_params(2 * Hw, Hs),
        reg_w=rnd((2 * Hs, 4)),
        reg_b=rnd((1, 4)),
    )


# ---------------------------------------------------------------------------
if __name__ == "__main__":
    key = jax.random.PRNGKey(0)
    k_tok, k_par = jax.random.split(key)

    B, S, W = 2, 3, 8          # batch, sentences per doc, words per sentence
    VOCAB, E, HW, HS = 50, 16, 16, 16

    raw_params = init_params(k_par, VOCAB, E, HW, HS)
    kernel_params = pack_params(raw_params)
    token_ids = jax.random.randint(k_tok, (B, S, W), 0, VOCAB, dtype=jnp.int32)

    out = jax.block_until_ready(jax.jit(han_forward)(token_ids, kernel_params))
    with jax.default_matmul_precision("highest"):   # scoped f32 reference
        ref = jax.block_until_ready(han_forward_ref(token_ids, raw_params))

    assert out.shape == (B, 4), out.shape
    # Kernel matmuls use bf16 operands (f32 accumulation) -> looser tolerance
    # than a pure-f32 comparison.
    assert jnp.allclose(out, ref, atol=5e-2, rtol=5e-2), (out, ref)
    print("KERNEL_OK")
</pallas_src>

<mosaic_0001>
module attributes {stable_mosaic.version = 11 : i64} {
  func.func @_sent_head_kernel(%arg0: i32, %arg1: memref<3x8x256xf32, #tpu.memory_space<vmem>>, %arg2: memref<256x384xbf16, #tpu.memory_space<vmem>>, %arg3: memref<128x384xbf16, #tpu.memory_space<vmem>>, %arg4: memref<1x384xf32, #tpu.memory_space<vmem>>, %arg5: memref<1x128xf32, #tpu.memory_space<vmem>>, %arg6: memref<256x384xbf16, #tpu.memory_space<vmem>>, %arg7: memref<128x384xbf16, #tpu.memory_space<vmem>>, %arg8: memref<1x384xf32, #tpu.memory_space<vmem>>, %arg9: memref<1x128xf32, #tpu.memory_space<vmem>>, %arg10: memref<256x256xbf16, #tpu.memory_space<vmem>>, %arg11: memref<1x256xf32, #tpu.memory_space<vmem>>, %arg12: memref<256x1xbf16, #tpu.memory_space<vmem>>, %arg13: memref<256x128xbf16, #tpu.memory_space<vmem>>, %arg14: memref<1x128xf32, #tpu.memory_space<vmem>>, %arg15: memref<8x128xf32, #tpu.memory_space<vmem>>, %arg16: memref<24x256xf32, #tpu.memory_space<vmem>>, %arg17: memref<24x384xf32, #tpu.memory_space<vmem>>, %arg18: memref<24x384xf32, #tpu.memory_space<vmem>>) attributes {dimension_semantics = [#tpu.dimension_semantics<parallel>], iteration_bounds = array<i64: 1>, scalar_prefetch = 0 : i64, scratch_operands = 3 : i64, tpu.core_type = #tpu.core_type<tc>, window_params = [{transform_indices = @transform_0, window_bounds = array<i64: 3, 8, 256>}, {pipeline_mode = #tpu.pipeline_mode<synchronous>, transform_indices = @transform_1, window_bounds = array<i64: 256, 384>}, {pipeline_mode = #tpu.pipeline_mode<synchronous>, transform_indices = @transform_2, window_bounds = array<i64: 128, 384>}, {pipeline_mode = #tpu.pipeline_mode<synchronous>, transform_indices = @transform_3, window_bounds = array<i64: 1, 384>}, {pipeline_mode = #tpu.pipeline_mode<synchronous>, transform_indices = @transform_4, window_bounds = array<i64: 1, 128>}, {pipeline_mode = #tpu.pipeline_mode<synchronous>, transform_indices = @transform_5, window_bounds = array<i64: 256, 384>}, {pipeline_mode = #tpu.pipeline_mode<synchronous>, transform_indices = @transform_6, window_bounds = array<i64: 128, 384>}, {pipeline_mode = #tpu.pipeline_mode<synchronous>, transform_indices = @transform_7, window_bounds = array<i64: 1, 384>}, {pipeline_mode = #tpu.pipeline_mode<synchronous>, transform_indices = @transform_8, window_bounds = array<i64: 1, 128>}, {pipeline_mode = #tpu.pipeline_mode<synchronous>, transform_indices = @transform_9, window_bounds = array<i64: 256, 256>}, {pipeline_mode = #tpu.pipeline_mode<synchronous>, transform_indices = @transform_10, window_bounds = array<i64: 1, 256>}, {pipeline_mode = #tpu.pipeline_mode<synchronous>, transform_indices = @transform_11, window_bounds = array<i64: 256, 1>}, {pipeline_mode = #tpu.pipeline_mode<synchronous>, transform_indices = @transform_12, window_bounds = array<i64: 256, 128>}, {pipeline_mode = #tpu.pipeline_mode<synchronous>, transform_indices = @transform_13, window_bounds = array<i64: 1, 128>}, {transform_indices = @transform_14, window_bounds = array<i64: 8, 128>}]} {
    %c0 = arith.constant 0 : index
    %c0_0 = arith.constant 0 : index
    %c0_1 = arith.constant 0 : index
    %0 = vector.load %arg1[%c0, %c0_0, %c0_1] : memref<3x8x256xf32, #tpu.memory_space<vmem>>, vector<3x8x256xf32>
    %1 = vector.shape_cast %0 : vector<3x8x256xf32> to vector<24x256xf32>
    %2 = arith.truncf %1 : vector<24x256xf32> to vector<24x256xbf16>
    %c0_2 = arith.constant 0 : index
    %c0_3 = arith.constant 0 : index
    %3 = vector.load %arg2[%c0_2, %c0_3] : memref<256x384xbf16, #tpu.memory_space<vmem>>, vector<256x384xbf16>
    %cst = arith.constant dense<0.000000e+00> : vector<24x384xf32>
    %4 = tpu.matmul %2, %3, %cst {dimension_numbers = #tpu.dot_dimension_numbers<[1], [0], [0], [1], [0, 0, 1, 1], [], []>} : vector<24x256xbf16>, vector<256x384xbf16>, vector<24x384xf32> -> vector<24x384xf32>
    %c0_4 = arith.constant 0 : index
    %c0_5 = arith.constant 0 : index
    %5 = vector.load %arg4[%c0_4, %c0_5] : memref<1x384xf32, #tpu.memory_space<vmem>>, vector<1x384xf32>
    %6 = vector.broadcast %5 : vector<1x384xf32> to vector<24x384xf32>
    %7 = arith.addf %4, %6 : vector<24x384xf32>
    %c0_6 = arith.constant 0 : index
    %c0_7 = arith.constant 0 : index
    %8 = vector.load %arg17[%c0_6, %c0_7] : memref<24x384xf32, #tpu.memory_space<vmem>>, vector<24x384xf32>
    tpu.vector_store %arg17[%c0_6, %c0_7], %7 {strides = array<i32>} : memref<24x384xf32, #tpu.memory_space<vmem>>, vector<24x384xf32>,
    %c0_8 = arith.constant 0 : index
    %c0_9 = arith.constant 0 : index
    %9 = vector.load %arg6[%c0_8, %c0_9] : memref<256x384xbf16, #tpu.memory_space<vmem>>, vector<256x384xbf16>
    %cst_10 = arith.constant dense<0.000000e+00> : vector<24x384xf32>
    %10 = tpu.matmul %2, %9, %cst_10 {dimension_numbers = #tpu.dot_dimension_numbers<[1], [0], [0], [1], [0, 0, 1, 1], [], []>} : vector<24x256xbf16>, vector<256x384xbf16>, vector<24x384xf32> -> vector<24x384xf32>
    %c0_11 = arith.constant 0 : index
    %c0_12 = arith.constant 0 : index
    %11 = vector.load %arg8[%c0_11, %c0_12] : memref<1x384xf32, #tpu.memory_space<vmem>>, vector<1x384xf32>
    %12 = vector.broadcast %11 : vector<1x384xf32> to vector<24x384xf32>
    %13 = arith.addf %10, %12 : vector<24x384xf32>
    %c0_13 = arith.constant 0 : index
    %c0_14 = arith.constant 0 : index
    %14 = vector.load %arg18[%c0_13, %c0_14] : memref<24x384xf32, #tpu.memory_space<vmem>>, vector<24x384xf32>
    tpu.vector_store %arg18[%c0_13, %c0_14], %13 {strides = array<i32>} : memref<24x384xf32, #tpu.memory_space<vmem>>, vector<24x384xf32>,
    %cst_15 = arith.constant 0.000000e+00 : f32
    %15 = vector.broadcast %cst_15 : f32 to vector<8x128xf32>
    %c0_i32 = arith.constant 0 : i32
    %c8_i32 = arith.constant 8 : i32
    %16 = arith.muli %c0_i32, %c8_i32 : i32
    %17 = tpu.assume_multiple %16, 8 : i32
    %c2_i32 = arith.constant 2 : i32
    %18 = arith.subi %c2_i32, %c0_i32 : i32
    %c8_i32_16 = arith.constant 8 : i32
    %19 = arith.muli %18, %c8_i32_16 : i32
    %20 = tpu.assume_multiple %19, 8 : i32
    %21 = arith.index_cast %17 : i32 to index
    %c0_17 = arith.constant 0 : index
    %22 = vector.load %arg17[%21, %c0_17] : memref<24x384xf32, #tpu.memory_space<vmem>>, vector<8x384xf32>
    %23 = arith.truncf %15 : vector<8x128xf32> to vector<8x128xbf16>
    %c0_18 = arith.constant 0 : index
    %c0_19 = arith.constant 0 : index
    %24 = vector.load %arg3[%c0_18, %c0_19] : memref<128x384xbf16, #tpu.memory_space<vmem>>, vector<128x384xbf16>
    %cst_20 = arith.constant dense<0.000000e+00> : vector<8x384xf32>
    %25 = tpu.matmul %23, %24, %cst_20 {dimension_numbers = #tpu.dot_dimension_numbers<[1], [0], [0], [1], [0, 0, 1, 1], [], []>} : vector<8x128xbf16>, vector<128x384xbf16>, vector<8x384xf32> -> vector<8x384xf32>
    %26 = vector.extract_strided_slice %22 {offsets = [0, 0], sizes = [8, 128], strides = [1, 1]} : vector<8x384xf32> to vector<8x128xf32>
    %27 = vector.extract_strided_slice %25 {offsets = [0, 0], sizes = [8, 128], strides = [1, 1]} : vector<8x384xf32> to vector<8x128xf32>
    %28 = arith.addf %26, %27 : vector<8x128xf32>
    %29 = arith.negf %28 : vector<8x128xf32>
    %30 = math.exp %29 : vector<8x128xf32>
    %cst_21 = arith.constant 1.000000e+00 : f32
    %31 = vector.broadcast %cst_21 : f32 to vector<8x128xf32>
    %32 = arith.addf %31, %30 : vector<8x128xf32>
    %33 = arith.divf %31, %32 : vector<8x128xf32>
    %34 = vector.extract_strided_slice %22 {offsets = [0, 128], sizes = [8, 128], strides = [1, 1]} : vector<8x384xf32> to vector<8x128xf32>
    %35 = vector.extract_strided_slice %25 {offsets = [0, 128], sizes = [8, 128], strides = [1, 1]} : vector<8x384xf32> to vector<8x128xf32>
    %36 = arith.addf %34, %35 : vector<8x128xf32>
    %37 = arith.negf %36 : vector<8x128xf32>
    %38 = math.exp %37 : vector<8x128xf32>
    %cst_22 = arith.constant 1.000000e+00 : f32
    %39 = vector.broadcast %cst_22 : f32 to vector<8x128xf32>
    %40 = arith.addf %39, %38 : vector<8x128xf32>
    %41 = arith.divf %39, %40 : vector<8x128xf32>
    %42 = vector.extract_strided_slice %22 {offsets = [0, 256], sizes = [8, 128], strides = [1, 1]} : vector<8x384xf32> to vector<8x128xf32>
    %43 = vector.extract_strided_slice %25 {offsets = [0, 256], sizes = [8, 128], strides = [1, 1]} : vector<8x384xf32> to vector<8x128xf32>
    %c0_23 = arith.constant 0 : index
    %c0_24 = arith.constant 0 : index
    %44 = vector.load %arg5[%c0_23, %c0_24] : memref<1x128xf32, #tpu.memory_space<vmem>>, vector<1x128xf32>
    %45 = vector.broadcast %44 : vector<1x128xf32> to vector<8x128xf32>
    %46 = arith.addf %43, %45 : vector<8x128xf32>
    %47 = arith.mulf %33, %46 : vector<8x128xf32>
    %48 = arith.addf %42, %47 : vector<8x128xf32>
    %49 = math.tanh %48 : vector<8x128xf32>
    %cst_25 = arith.constant 1.000000e+00 : f32
    %50 = vector.broadcast %cst_25 : f32 to vector<8x128xf32>
    %51 = arith.subf %50, %41 : vector<8x128xf32>
    %52 = arith.mulf %51, %49 : vector<8x128xf32>
    %53 = arith.mulf %41, %15 : vector<8x128xf32>
    %54 = arith.addf %52, %53 : vector<8x128xf32>
    %55 = arith.index_cast %20 : i32 to index
    %c0_26 = arith.constant 0 : index
    %56 = vector.load %arg18[%55, %c0_26] : memref<24x384xf32, #tpu.memory_space<vmem>>, vector<8x384xf32>
    %57 = arith.truncf %15 : vector<8x128xf32> to vector<8x128xbf16>
    %c0_27 = arith.constant 0 : index
    %c0_28 = arith.constant 0 : index
    %58 = vector.load %arg7[%c0_27, %c0_28] : memref<128x384xbf16, #tpu.memory_space<vmem>>, vector<128x384xbf16>
    %cst_29 = arith.constant dense<0.000000e+00> : vector<8x384xf32>
    %59 = tpu.matmul %57, %58, %cst_29 {dimension_numbers = #tpu.dot_dimension_numbers<[1], [0], [0], [1], [0, 0, 1, 1], [], []>} : vector<8x128xbf16>, vector<128x384xbf16>, vector<8x384xf32> -> vector<8x384xf32>
    %60 = vector.extract_strided_slice %56 {offsets = [0, 0], sizes = [8, 128], strides = [1, 1]} : vector<8x384xf32> to vector<8x128xf32>
    %61 = vector.extract_strided_slice %59 {offsets = [0, 0], sizes = [8, 128], strides = [1, 1]} : vector<8x384xf32> to vector<8x128xf32>
    %62 = arith.addf %60, %61 : vector<8x128xf32>
    %63 = arith.negf %62 : vector<8x128xf32>
    %64 = math.exp %63 : vector<8x128xf32>
    %cst_30 = arith.constant 1.000000e+00 : f32
    %65 = vector.broadcast %cst_30 : f32 to vector<8x128xf32>
    %66 = arith.addf %65, %64 : vector<8x128xf32>
    %67 = arith.divf %65, %66 : vector<8x128xf32>
    %68 = vector.extract_strided_slice %56 {offsets = [0, 128], sizes = [8, 128], strides = [1, 1]} : vector<8x384xf32> to vector<8x128xf32>
    %69 = vector.extract_strided_slice %59 {offsets = [0, 128], sizes = [8, 128], strides = [1, 1]} : vector<8x384xf32> to vector<8x128xf32>
    %70 = arith.addf %68, %69 : vector<8x128xf32>
    %71 = arith.negf %70 : vector<8x128xf32>
    %72 = math.exp %71 : vector<8x128xf32>
    %cst_31 = arith.constant 1.000000e+00 : f32
    %73 = vector.broadcast %cst_31 : f32 to vector<8x128xf32>
    %74 = arith.addf %73, %72 : vector<8x128xf32>
    %75 = arith.divf %73, %74 : vector<8x128xf32>
    %76 = vector.extract_strided_slice %56 {offsets = [0, 256], sizes = [8, 128], strides = [1, 1]} : vector<8x384xf32> to vector<8x128xf32>
    %77 = vector.extract_strided_slice %59 {offsets = [0, 256], sizes = [8, 128], strides = [1, 1]} : vector<8x384xf32> to vector<8x128xf32>
    %c0_32 = arith.constant 0 : index
    %c0_33 = arith.constant 0 : index
    %78 = vector.load %arg9[%c0_32, %c0_33] : memref<1x128xf32, #tpu.memory_space<vmem>>, vector<1x128xf32>
    %79 = vector.broadcast %78 : vector<1x128xf32> to vector<8x128xf32>
    %80 = arith.addf %77, %79 : vector<8x128xf32>
    %81 = arith.mulf %67, %80 : vector<8x128xf32>
    %82 = arith.addf %76, %81 : vector<8x128xf32>
    %83 = math.tanh %82 : vector<8x128xf32>
    %cst_34 = arith.constant 1.000000e+00 : f32
    %84 = vector.broadcast %cst_34 : f32 to vector<8x128xf32>
    %85 = arith.subf %84, %75 : vector<8x128xf32>
    %86 = arith.mulf %85, %83 : vector<8x128xf32>
    %87 = arith.mulf %75, %15 : vector<8x128xf32>
    %88 = arith.addf %86, %87 : vector<8x128xf32>
    %89 = arith.index_cast %17 : i32 to index
    %c0_35 = arith.constant 0 : index
    %90 = vector.load %arg16[%89, %c0_35] : memref<24x256xf32, #tpu.memory_space<vmem>>, vector<8x128xf32>
    tpu.vector_store %arg16[%89, %c0_35], %54 {strides = array<i32>} : memref<24x256xf32, #tpu.memory_space<vmem>>, vector<8x128xf32>,
    %91 = arith.index_cast %20 : i32 to index
    %c128 = arith.constant 128 : index
    %92 = vector.load %arg16[%91, %c128] : memref<24x256xf32, #tpu.memory_space<vmem>>, vector<8x128xf32>
    tpu.vector_store %arg16[%91, %c128], %88 {strides = array<i32>} : memref<24x256xf32, #tpu.memory_space<vmem>>, vector<8x128xf32>,
    %c1_i32 = arith.constant 1 : i32
    %c8_i32_36 = arith.constant 8 : i32
    %93 = arith.muli %c1_i32, %c8_i32_36 : i32
    %94 = tpu.assume_multiple %93, 8 : i32
    %c2_i32_37 = arith.constant 2 : i32
    %95 = arith.subi %c2_i32_37, %c1_i32 : i32
    %c8_i32_38 = arith.constant 8 : i32
    %96 = arith.muli %95, %c8_i32_38 : i32
    %97 = tpu.assume_multiple %96, 8 : i32
    %98 = arith.index_cast %94 : i32 to index
    %c0_39 = arith.constant 0 : index
    %99 = vector.load %arg17[%98, %c0_39] : memref<24x384xf32, #tpu.memory_space<vmem>>, vector<8x384xf32>
    %100 = arith.truncf %54 : vector<8x128xf32> to vector<8x128xbf16>
    %c0_40 = arith.constant 0 : index
    %c0_41 = arith.constant 0 : index
    %101 = vector.load %arg3[%c0_40, %c0_41] : memref<128x384xbf16, #tpu.memory_space<vmem>>, vector<128x384xbf16>
    %cst_42 = arith.constant dense<0.000000e+00> : vector<8x384xf32>
    %102 = tpu.matmul %100, %101, %cst_42 {dimension_numbers = #tpu.dot_dimension_numbers<[1], [0], [0], [1], [0, 0, 1, 1], [], []>} : vector<8x128xbf16>, vector<128x384xbf16>, vector<8x384xf32> -> vector<8x384xf32>
    %103 = vector.extract_strided_slice %99 {offsets = [0, 0], sizes = [8, 128], strides = [1, 1]} : vector<8x384xf32> to vector<8x128xf32>
    %104 = vector.extract_strided_slice %102 {offsets = [0, 0], sizes = [8, 128], strides = [1, 1]} : vector<8x384xf32> to vector<8x128xf32>
    %105 = arith.addf %103, %104 : vector<8x128xf32>
    %106 = arith.negf %105 : vector<8x128xf32>
    %107 = math.exp %106 : vector<8x128xf32>
    %cst_43 = arith.constant 1.000000e+00 : f32
    %108 = vector.broadcast %cst_43 : f32 to vector<8x128xf32>
    %109 = arith.addf %108, %107 : vector<8x128xf32>
    %110 = arith.divf %108, %109 : vector<8x128xf32>
    %111 = vector.extract_strided_slice %99 {offsets = [0, 128], sizes = [8, 128], strides = [1, 1]} : vector<8x384xf32> to vector<8x128xf32>
    %112 = vector.extract_strided_slice %102 {offsets = [0, 128], sizes = [8, 128], strides = [1, 1]} : vector<8x384xf32> to vector<8x128xf32>
    %113 = arith.addf %111, %112 : vector<8x128xf32>
    %114 = arith.negf %113 : vector<8x128xf32>
    %115 = math.exp %114 : vector<8x128xf32>
    %cst_44 = arith.constant 1.000000e+00 : f32
    %116 = vector.broadcast %cst_44 : f32 to vector<8x128xf32>
    %117 = arith.addf %116, %115 : vector<8x128xf32>
    %118 = arith.divf %116, %117 : vector<8x128xf32>
    %119 = vector.extract_strided_slice %99 {offsets = [0, 256], sizes = [8, 128], strides = [1, 1]} : vector<8x384xf32> to vector<8x128xf32>
    %120 = vector.extract_strided_slice %102 {offsets = [0, 256], sizes = [8, 128], strides = [1, 1]} : vector<8x384xf32> to vector<8x128xf32>
    %c0_45 = arith.constant 0 : index
    %c0_46 = arith.constant 0 : index
    %121 = vector.load %arg5[%c0_45, %c0_46] : memref<1x128xf32, #tpu.memory_space<vmem>>, vector<1x128xf32>
    %122 = vector.broadcast %121 : vector<1x128xf32> to vector<8x128xf32>
    %123 = arith.addf %120, %122 : vector<8x128xf32>
    %124 = arith.mulf %110, %123 : vector<8x128xf32>
    %125 = arith.addf %119, %124 : vector<8x128xf32>
    %126 = math.tanh %125 : vector<8x128xf32>
    %cst_47 = arith.constant 1.000000e+00 : f32
    %127 = vector.broadcast %cst_47 : f32 to vector<8x128xf32>
    %128 = arith.subf %127, %118 : vector<8x128xf32>
    %129 = arith.mulf %128, %126 : vector<8x128xf32>
    %130 = arith.mulf %118, %54 : vector<8x128xf32>
    %131 = arith.addf %129, %130 : vector<8x128xf32>
    %132 = arith.index_cast %97 : i32 to index
    %c0_48 = arith.constant 0 : index
    %133 = vector.load %arg18[%132, %c0_48] : memref<24x384xf32, #tpu.memory_space<vmem>>, vector<8x384xf32>
    %134 = arith.truncf %88 : vector<8x128xf32> to vector<8x128xbf16>
    %c0_49 = arith.constant 0 : index
    %c0_50 = arith.constant 0 : index
    %135 = vector.load %arg7[%c0_49, %c0_50] : memref<128x384xbf16, #tpu.memory_space<vmem>>, vector<128x384xbf16>
    %cst_51 = arith.constant dense<0.000000e+00> : vector<8x384xf32>
    %136 = tpu.matmul %134, %135, %cst_51 {dimension_numbers = #tpu.dot_dimension_numbers<[1], [0], [0], [1], [0, 0, 1, 1], [], []>} : vector<8x128xbf16>, vector<128x384xbf16>, vector<8x384xf32> -> vector<8x384xf32>
    %137 = vector.extract_strided_slice %133 {offsets = [0, 0], sizes = [8, 128], strides = [1, 1]} : vector<8x384xf32> to vector<8x128xf32>
    %138 = vector.extract_strided_slice %136 {offsets = [0, 0], sizes = [8, 128], strides = [1, 1]} : vector<8x384xf32> to vector<8x128xf32>
    %139 = arith.addf %137, %138 : vector<8x128xf32>
    %140 = arith.negf %139 : vector<8x128xf32>
    %141 = math.exp %140 : vector<8x128xf32>
    %cst_52 = arith.constant 1.000000e+00 : f32
    %142 = vector.broadcast %cst_52 : f32 to vector<8x128xf32>
    %143 = arith.addf %142, %141 : vector<8x128xf32>
    %144 = arith.divf %142, %143 : vector<8x128xf32>
    %145 = vector.extract_strided_slice %133 {offsets = [0, 128], sizes = [8, 128], strides = [1, 1]} : vector<8x384xf32> to vector<8x128xf32>
    %146 = vector.extract_strided_slice %136 {offsets = [0, 128], sizes = [8, 128], strides = [1, 1]} : vector<8x384xf32> to vector<8x128xf32>
    %147 = arith.addf %145, %146 : vector<8x128xf32>
    %148 = arith.negf %147 : vector<8x128xf32>
    %149 = math.exp %148 : vector<8x128xf32>
    %cst_53 = arith.constant 1.000000e+00 : f32
    %150 = vector.broadcast %cst_53 : f32 to vector<8x128xf32>
    %151 = arith.addf %150, %149 : vector<8x128xf32>
    %152 = arith.divf %150, %151 : vector<8x128xf32>
    %153 = vector.extract_strided_slice %133 {offsets = [0, 256], sizes = [8, 128], strides = [1, 1]} : vector<8x384xf32> to vector<8x128xf32>
    %154 = vector.extract_strided_slice %136 {offsets = [0, 256], sizes = [8, 128], strides = [1, 1]} : vector<8x384xf32> to vector<8x128xf32>
    %c0_54 = arith.constant 0 : index
    %c0_55 = arith.constant 0 : index
    %155 = vector.load %arg9[%c0_54, %c0_55] : memref<1x128xf32, #tpu.memory_space<vmem>>, vector<1x128xf32>
    %156 = vector.broadcast %155 : vector<1x128xf32> to vector<8x128xf32>
    %157 = arith.addf %154, %156 : vector<8x128xf32>
    %158 = arith.mulf %144, %157 : vector<8x128xf32>
    %159 = arith.addf %153, %158 : vector<8x128xf32>
    %160 = math.tanh %159 : vector<8x128xf32>
    %cst_56 = arith.constant 1.000000e+00 : f32
    %161 = vector.broadcast %cst_56 : f32 to vector<8x128xf32>
    %162 = arith.subf %161, %152 : vector<8x128xf32>
    %163 = arith.mulf %162, %160 : vector<8x128xf32>
    %164 = arith.mulf %152, %88 : vector<8x128xf32>
    %165 = arith.addf %163, %164 : vector<8x128xf32>
    %166 = arith.index_cast %94 : i32 to index
    %c0_57 = arith.constant 0 : index
    %167 = vector.load %arg16[%166, %c0_57] : memref<24x256xf32, #tpu.memory_space<vmem>>, vector<8x128xf32>
    tpu.vector_store %arg16[%166, %c0_57], %131 {strides = array<i32>} : memref<24x256xf32, #tpu.memory_space<vmem>>, vector<8x128xf32>,
    %168 = arith.index_cast %97 : i32 to index
    %c128_58 = arith.constant 128 : index
    %169 = vector.load %arg16[%168, %c128_58] : memref<24x256xf32, #tpu.memory_space<vmem>>, vector<8x128xf32>
    tpu.vector_store %arg16[%168, %c128_58], %165 {strides = array<i32>} : memref<24x256xf32, #tpu.memory_space<vmem>>, vector<8x128xf32>,
    %c2_i32_59 = arith.constant 2 : i32
    %c8_i32_60 = arith.constant 8 : i32
    %170 = arith.muli %c2_i32_59, %c8_i32_60 : i32
    %171 = tpu.assume_multiple %170, 8 : i32
    %c2_i32_61 = arith.constant 2 : i32
    %172 = arith.subi %c2_i32_61, %c2_i32_59 : i32
    %c8_i32_62 = arith.constant 8 : i32
    %173 = arith.muli %172, %c8_i32_62 : i32
    %174 = tpu.assume_multiple %173, 8 : i32
    %175 = arith.index_cast %171 : i32 to index
    %c0_63 = arith.constant 0 : index
    %176 = vector.load %arg17[%175, %c0_63] : memref<24x384xf32, #tpu.memory_space<vmem>>, vector<8x384xf32>
    %177 = arith.truncf %131 : vector<8x128xf32> to vector<8x128xbf16>
    %c0_64 = arith.constant 0 : index
    %c0_65 = arith.constant 0 : index
    %178 = vector.load %arg3[%c0_64, %c0_65] : memref<128x384xbf16, #tpu.memory_space<vmem>>, vector<128x384xbf16>
    %cst_66 = arith.constant dense<0.000000e+00> : vector<8x384xf32>
    %179 = tpu.matmul %177, %178, %cst_66 {dimension_numbers = #tpu.dot_dimension_numbers<[1], [0], [0], [1], [0, 0, 1, 1], [], []>} : vector<8x128xbf16>, vector<128x384xbf16>, vector<8x384xf32> -> vector<8x384xf32>
    %180 = vector.extract_strided_slice %176 {offsets = [0, 0], sizes = [8, 128], strides = [1, 1]} : vector<8x384xf32> to vector<8x128xf32>
    %181 = vector.extract_strided_slice %179 {offsets = [0, 0], sizes = [8, 128], strides = [1, 1]} : vector<8x384xf32> to vector<8x128xf32>
    %182 = arith.addf %180, %181 : vector<8x128xf32>
    %183 = arith.negf %182 : vector<8x128xf32>
    %184 = math.exp %183 : vector<8x128xf32>
    %cst_67 = arith.constant 1.000000e+00 : f32
    %185 = vector.broadcast %cst_67 : f32 to vector<8x128xf32>
    %186 = arith.addf %185, %184 : vector<8x128xf32>
    %187 = arith.divf %185, %186 : vector<8x128xf32>
    %188 = vector.extract_strided_slice %176 {offsets = [0, 128], sizes = [8, 128], strides = [1, 1]} : vector<8x384xf32> to vector<8x128xf32>
    %189 = vector.extract_strided_slice %179 {offsets = [0, 128], sizes = [8, 128], strides = [1, 1]} : vector<8x384xf32> to vector<8x128xf32>
    %190 = arith.addf %188, %189 : vector<8x128xf32>
    %191 = arith.negf %190 : vector<8x128xf32>
    %192 = math.exp %191 : vector<8x128xf32>
    %cst_68 = arith.constant 1.000000e+00 : f32
    %193 = vector.broadcast %cst_68 : f32 to vector<8x128xf32>
    %194 = arith.addf %193, %192 : vector<8x128xf32>
    %195 = arith.divf %193, %194 : vector<8x128xf32>
    %196 = vector.extract_strided_slice %176 {offsets = [0, 256], sizes = [8, 128], strides = [1, 1]} : vector<8x384xf32> to vector<8x128xf32>
    %197 = vector.extract_strided_slice %179 {offsets = [0, 256], sizes = [8, 128], strides = [1, 1]} : vector<8x384xf32> to vector<8x128xf32>
    %c0_69 = arith.constant 0 : index
    %c0_70 = arith.constant 0 : index
    %198 = vector.load %arg5[%c0_69, %c0_70] : memref<1x128xf32, #tpu.memory_space<vmem>>, vector<1x128xf32>
    %199 = vector.broadcast %198 : vector<1x128xf32> to vector<8x128xf32>
    %200 = arith.addf %197, %199 : vector<8x128xf32>
    %201 = arith.mulf %187, %200 : vector<8x128xf32>
    %202 = arith.addf %196, %201 : vector<8x128xf32>
    %203 = math.tanh %202 : vector<8x128xf32>
    %cst_71 = arith.constant 1.000000e+00 : f32
    %204 = vector.broadcast %cst_71 : f32 to vector<8x128xf32>
    %205 = arith.subf %204, %195 : vector<8x128xf32>
    %206 = arith.mulf %205, %203 : vector<8x128xf32>
    %207 = arith.mulf %195, %131 : vector<8x128xf32>
    %208 = arith.addf %206, %207 : vector<8x128xf32>
    %209 = arith.index_cast %174 : i32 to index
    %c0_72 = arith.constant 0 : index
    %210 = vector.load %arg18[%209, %c0_72] : memref<24x384xf32, #tpu.memory_space<vmem>>, vector<8x384xf32>
    %211 = arith.truncf %165 : vector<8x128xf32> to vector<8x128xbf16>
    %c0_73 = arith.constant 0 : index
    %c0_74 = arith.constant 0 : index
    %212 = vector.load %arg7[%c0_73, %c0_74] : memref<128x384xbf16, #tpu.memory_space<vmem>>, vector<128x384xbf16>
    %cst_75 = arith.constant dense<0.000000e+00> : vector<8x384xf32>
    %213 = tpu.matmul %211, %212, %cst_75 {dimension_numbers = #tpu.dot_dimension_numbers<[1], [0], [0], [1], [0, 0, 1, 1], [], []>} : vector<8x128xbf16>, vector<128x384xbf16>, vector<8x384xf32> -> vector<8x384xf32>
    %214 = vector.extract_strided_slice %210 {offsets = [0, 0], sizes = [8, 128], strides = [1, 1]} : vector<8x384xf32> to vector<8x128xf32>
    %215 = vector.extract_strided_slice %213 {offsets = [0, 0], sizes = [8, 128], strides = [1, 1]} : vector<8x384xf32> to vector<8x128xf32>
    %216 = arith.addf %214, %215 : vector<8x128xf32>
    %217 = arith.negf %216 : vector<8x128xf32>
    %218 = math.exp %217 : vector<8x128xf32>
    %cst_76 = arith.constant 1.000000e+00 : f32
    %219 = vector.broadcast %cst_76 : f32 to vector<8x128xf32>
    %220 = arith.addf %219, %218 : vector<8x128xf32>
    %221 = arith.divf %219, %220 : vector<8x128xf32>
    %222 = vector.extract_strided_slice %210 {offsets = [0, 128], sizes = [8, 128], strides = [1, 1]} : vector<8x384xf32> to vector<8x128xf32>
    %223 = vector.extract_strided_slice %213 {offsets = [0, 128], sizes = [8, 128], strides = [1, 1]} : vector<8x384xf32> to vector<8x128xf32>
    %224 = arith.addf %222, %223 : vector<8x128xf32>
    %225 = arith.negf %224 : vector<8x128xf32>
    %226 = math.exp %225 : vector<8x128xf32>
    %cst_77 = arith.constant 1.000000e+00 : f32
    %227 = vector.broadcast %cst_77 : f32 to vector<8x128xf32>
    %228 = arith.addf %227, %226 : vector<8x128xf32>
    %229 = arith.divf %227, %228 : vector<8x128xf32>
    %230 = vector.extract_strided_slice %210 {offsets = [0, 256], sizes = [8, 128], strides = [1, 1]} : vector<8x384xf32> to vector<8x128xf32>
    %231 = vector.extract_strided_slice %213 {offsets = [0, 256], sizes = [8, 128], strides = [1, 1]} : vector<8x384xf32> to vector<8x128xf32>
    %c0_78 = arith.constant 0 : index
    %c0_79 = arith.constant 0 : index
    %232 = vector.load %arg9[%c0_78, %c0_79] : memref<1x128xf32, #tpu.memory_space<vmem>>, vector<1x128xf32>
    %233 = vector.broadcast %232 : vector<1x128xf32> to vector<8x128xf32>
    %234 = arith.addf %231, %233 : vector<8x128xf32>
    %235 = arith.mulf %221, %234 : vector<8x128xf32>
    %236 = arith.addf %230, %235 : vector<8x128xf32>
    %237 = math.tanh %236 : vector<8x128xf32>
    %cst_80 = arith.constant 1.000000e+00 : f32
    %238 = vector.broadcast %cst_80 : f32 to vector<8x128xf32>
    %239 = arith.subf %238, %229 : vector<8x128xf32>
    %240 = arith.mulf %239, %237 : vector<8x128xf32>
    %241 = arith.mulf %229, %165 : vector<8x128xf32>
    %242 = arith.addf %240, %241 : vector<8x128xf32>
    %243 = arith.index_cast %171 : i32 to index
    %c0_81 = arith.constant 0 : index
    %244 = vector.load %arg16[%243, %c0_81] : memref<24x256xf32, #tpu.memory_space<vmem>>, vector<8x128xf32>
    tpu.vector_store %arg16[%243, %c0_81], %208 {strides = array<i32>} : memref<24x256xf32, #tpu.memory_space<vmem>>, vector<8x128xf32>,
    %245 = arith.index_cast %174 : i32 to index
    %c128_82 = arith.constant 128 : index
    %246 = vector.load %arg16[%245, %c128_82] : memref<24x256xf32, #tpu.memory_space<vmem>>, vector<8x128xf32>
    tpu.vector_store %arg16[%245, %c128_82], %242 {strides = array<i32>} : memref<24x256xf32, #tpu.memory_space<vmem>>, vector<8x128xf32>,
    %c3_i32 = arith.constant 3 : i32
    %c0_83 = arith.constant 0 : index
    %c0_84 = arith.constant 0 : index
    %247 = vector.load %arg16[%c0_83, %c0_84] : memref<24x256xf32, #tpu.memory_space<vmem>>, vector<24x256xf32>
    %248 = arith.truncf %247 : vector<24x256xf32> to vector<24x256xbf16>
    %c0_85 = arith.constant 0 : index
    %c0_86 = arith.constant 0 : index
    %249 = vector.load %arg10[%c0_85, %c0_86] : memref<256x256xbf16, #tpu.memory_space<vmem>>, vector<256x256xbf16>
    %cst_87 = arith.constant dense<0.000000e+00> : vector<24x256xf32>
    %250 = tpu.matmul %248, %249, %cst_87 {dimension_numbers = #tpu.dot_dimension_numbers<[1], [0], [0], [1], [0, 0, 1, 1], [], []>} : vector<24x256xbf16>, vector<256x256xbf16>, vector<24x256xf32> -> vector<24x256xf32>
    %c0_88 = arith.constant 0 : index
    %c0_89 = arith.constant 0 : index
    %251 = vector.load %arg11[%c0_88, %c0_89] : memref<1x256xf32, #tpu.memory_space<vmem>>, vector<1x256xf32>
    %252 = vector.broadcast %251 : vector<1x256xf32> to vector<24x256xf32>
    %253 = arith.addf %250, %252 : vector<24x256xf32>
    %254 = math.tanh %253 : vector<24x256xf32>
    %255 = arith.truncf %254 : vector<24x256xf32> to vector<24x256xbf16>
    %c0_90 = arith.constant 0 : index
    %c0_91 = arith.constant 0 : index
    %256 = vector.load %arg12[%c0_90, %c0_91] : memref<256x1xbf16, #tpu.memory_space<vmem>>, vector<256x1xbf16>
    %cst_92 = arith.constant dense<0.000000e+00> : vector<24x1xf32>
    %257 = tpu.matmul %255, %256, %cst_92 {dimension_numbers = #tpu.dot_dimension_numbers<[1], [0], [0], [1], [0, 0, 1, 1], [], []>} : vector<24x256xbf16>, vector<256x1xbf16>, vector<24x1xf32> -> vector<24x1xf32>
    %258 = vector.shape_cast %257 : vector<24x1xf32> to vector<3x8x1xf32>
    %cst_93 = arith.constant dense<0xFF800000> : vector<8x1xf32>
    %259 = vector.multi_reduction <maximumf>, %258, %cst_93 [0] : vector<3x8x1xf32> to vector<8x1xf32>
    %260 = vector.shape_cast %259 : vector<8x1xf32> to vector<1x8x1xf32>
    %261 = vector.broadcast %260 : vector<1x8x1xf32> to vector<3x8x1xf32>
    %262 = arith.subf %258, %261 : vector<3x8x1xf32>
    %263 = math.exp %262 : vector<3x8x1xf32>
    %cst_94 = arith.constant dense<0.000000e+00> : vector<8x1xf32>
    %264 = vector.multi_reduction <add>, %263, %cst_94 [0] : vector<3x8x1xf32> to vector<8x1xf32>
    %265 = vector.shape_cast %264 : vector<8x1xf32> to vector<1x8x1xf32>
    %266 = vector.broadcast %265 : vector<1x8x1xf32> to vector<3x8x1xf32>
    %267 = arith.divf %263, %266 : vector<3x8x1xf32>
    %268 = vector.shape_cast %247 : vector<24x256xf32> to vector<3x8x256xf32>
    %269 = vector.broadcast %267 : vector<3x8x1xf32> to vector<3x8x256xf32>
    %270 = arith.mulf %269, %268 : vector<3x8x256xf32>
    %cst_95 = arith.constant dense<0.000000e+00> : vector<8x256xf32>
    %271 = vector.multi_reduction <add>, %270, %cst_95 [0] : vector<3x8x256xf32> to vector<8x256xf32>
    %272 = arith.truncf %271 : vector<8x256xf32> to vector<8x256xbf16>
    %c0_96 = arith.constant 0 : index
    %c0_97 = arith.constant 0 : index
    %273 = vector.load %arg13[%c0_96, %c0_97] : memref<256x128xbf16, #tpu.memory_space<vmem>>, vector<256x128xbf16>
    %cst_98 = arith.constant dense<0.000000e+00> : vector<8x128xf32>
    %274 = tpu.matmul %272, %273, %cst_98 {dimension_numbers = #tpu.dot_dimension_numbers<[1], [0], [0], [1], [0, 0, 1, 1], [], []>} : vector<8x256xbf16>, vector<256x128xbf16>, vector<8x128xf32> -> vector<8x128xf32>
    %c0_99 = arith.constant 0 : index
    %c0_100 = arith.constant 0 : index
    %275 = vector.load %arg14[%c0_99, %c0_100] : memref<1x128xf32, #tpu.memory_space<vmem>>, vector<1x128xf32>
    %276 = vector.broadcast %275 : vector<1x128xf32> to vector<8x128xf32>
    %277 = arith.addf %274, %276 : vector<8x128xf32>
    %c0_101 = arith.constant 0 : index
    %c0_102 = arith.constant 0 : index
    %278 = vector.load %arg15[%c0_101, %c0_102] : memref<8x128xf32, #tpu.memory_space<vmem>>, vector<8x128xf32>
    tpu.vector_store %arg15[%c0_101, %c0_102], %277 {strides = array<i32>} : memref<8x128xf32, #tpu.memory_space<vmem>>, vector<8x128xf32>,
    return
  }
  func.func @transform_0(%arg0: i32) -> (i32, i32, i32) {
    %c0_i32 = arith.constant 0 : i32
    %c0_i32_0 = arith.constant 0 : i32
    %c0_i32_1 = arith.constant 0 : i32
    return %c0_i32, %arg0, %c0_i32_0 : i32, i32, i32
  }
  func.func @transform_1(%arg0: i32) -> (i32, i32) {
    %c0_i32 = arith.constant 0 : i32
    %c0_i32_0 = arith.constant 0 : i32
    %c0_i32_1 = arith.constant 0 : i32
    return %c0_i32, %c0_i32_0 : i32, i32
  }
  func.func @transform_2(%arg0: i32) -> (i32, i32) {
    %c0_i32 = arith.constant 0 : i32
    %c0_i32_0 = arith.constant 0 : i32
    %c0_i32_1 = arith.constant 0 : i32
    return %c0_i32, %c0_i32_0 : i32, i32
  }
  func.func @transform_3(%arg0: i32) -> (i32, i32) {
    %c0_i32 = arith.constant 0 : i32
    %c0_i32_0 = arith.constant 0 : i32
    %c0_i32_1 = arith.constant 0 : i32
    return %c0_i32, %c0_i32_0 : i32, i32
  }
  func.func @transform_4(%arg0: i32) -> (i32, i32) {
    %c0_i32 = arith.constant 0 : i32
    %c0_i32_0 = arith.constant 0 : i32
    %c0_i32_1 = arith.constant 0 : i32
    return %c0_i32, %c0_i32_0 : i32, i32
  }
  func.func @transform_5(%arg0: i32) -> (i32, i32) {
    %c0_i32 = arith.constant 0 : i32
    %c0_i32_0 = arith.constant 0 : i32
    %c0_i32_1 = arith.constant 0 : i32
    return %c0_i32, %c0_i32_0 : i32, i32
  }
  func.func @transform_6(%arg0: i32) -> (i32, i32) {
    %c0_i32 = arith.constant 0 : i32
    %c0_i32_0 = arith.constant 0 : i32
    %c0_i32_1 = arith.constant 0 : i32
    return %c0_i32, %c0_i32_0 : i32, i32
  }
  func.func @transform_7(%arg0: i32) -> (i32, i32) {
    %c0_i32 = arith.constant 0 : i32
    %c0_i32_0 = arith.constant 0 : i32
    %c0_i32_1 = arith.constant 0 : i32
    return %c0_i32, %c0_i32_0 : i32, i32
  }
  func.func @transform_8(%arg0: i32) -> (i32, i32) {
    %c0_i32 = arith.constant 0 : i32
    %c0_i32_0 = arith.constant 0 : i32
    %c0_i32_1 = arith.constant 0 : i32
    return %c0_i32, %c0_i32_0 : i32, i32
  }
  func.func @transform_9(%arg0: i32) -> (i32, i32) {
    %c0_i32 = arith.constant 0 : i32
    %c0_i32_0 = arith.constant 0 : i32
    %c0_i32_1 = arith.constant 0 : i32
    return %c0_i32, %c0_i32_0 : i32, i32
  }
  func.func @transform_10(%arg0: i32) -> (i32, i32) {
    %c0_i32 = arith.constant 0 : i32
    %c0_i32_0 = arith.constant 0 : i32
    %c0_i32_1 = arith.constant 0 : i32
    return %c0_i32, %c0_i32_0 : i32, i32
  }
  func.func @transform_11(%arg0: i32) -> (i32, i32) {
    %c0_i32 = arith.constant 0 : i32
    %c0_i32_0 = arith.constant 0 : i32
    %c0_i32_1 = arith.constant 0 : i32
    return %c0_i32, %c0_i32_0 : i32, i32
  }
  func.func @transform_12(%arg0: i32) -> (i32, i32) {
    %c0_i32 = arith.constant 0 : i32
    %c0_i32_0 = arith.constant 0 : i32
    %c0_i32_1 = arith.constant 0 : i32
    return %c0_i32, %c0_i32_0 : i32, i32
  }
  func.func @transform_13(%arg0: i32) -> (i32, i32) {
    %c0_i32 = arith.constant 0 : i32
    %c0_i32_0 = arith.constant 0 : i32
    %c0_i32_1 = arith.constant 0 : i32
    return %c0_i32, %c0_i32_0 : i32, i32
  }
  func.func @transform_14(%arg0: i32) -> (i32, i32) {
    %c0_i32 = arith.constant 0 : i32
    %c0_i32_0 = arith.constant 0 : i32
    return %arg0, %c0_i32 : i32, i32
  }
}

module attributes {stable_mosaic.version = 11 : i64} {
  func.func @_word_kernel(%arg0: i32, %arg1: memref<8x8x16xf32, #tpu.memory_space<vmem>>, %arg2: memref<16x384xbf16, #tpu.memory_space<vmem>>, %arg3: memref<128x384xbf16, #tpu.memory_space<vmem>>, %arg4: memref<1x384xf32, #tpu.memory_space<vmem>>, %arg5: memref<1x128xf32, #tpu.memory_space<vmem>>, %arg6: memref<16x384xbf16, #tpu.memory_space<vmem>>, %arg7: memref<128x384xbf16, #tpu.memory_space<vmem>>, %arg8: memref<1x384xf32, #tpu.memory_space<vmem>>, %arg9: memref<1x128xf32, #tpu.memory_space<vmem>>, %arg10: memref<256x256xbf16, #tpu.memory_space<vmem>>, %arg11: memref<1x256xf32, #tpu.memory_space<vmem>>, %arg12: memref<256x1xbf16, #tpu.memory_space<vmem>>, %arg13: memref<8x256xf32, #tpu.memory_space<vmem>>, %arg14: memref<64x256xf32, #tpu.memory_space<vmem>>, %arg15: memref<64x384xf32, #tpu.memory_space<vmem>>, %arg16: memref<64x384xf32, #tpu.memory_space<vmem>>) attributes {dimension_semantics = [#tpu.dimension_semantics<parallel>], iteration_bounds = array<i64: 1>, scalar_prefetch = 0 : i64, scratch_operands = 3 : i64, tpu.core_type = #tpu.core_type<tc>, window_params = [{transform_indices = @transform_0, window_bounds = array<i64: 8, 8, 16>}, {pipeline_mode = #tpu.pipeline_mode<synchronous>, transform_indices = @transform_1, window_bounds = array<i64: 16, 384>}, {pipeline_mode = #tpu.pipeline_mode<synchronous>, transform_indices = @transform_2, window_bounds = array<i64: 128, 384>}, {pipeline_mode = #tpu.pipeline_mode<synchronous>, transform_indices = @transform_3, window_bounds = array<i64: 1, 384>}, {pipeline_mode = #tpu.pipeline_mode<synchronous>, transform_indices = @transform_4, window_bounds = array<i64: 1, 128>}, {pipeline_mode = #tpu.pipeline_mode<synchronous>, transform_indices = @transform_5, window_bounds = array<i64: 16, 384>}, {pipeline_mode = #tpu.pipeline_mode<synchronous>, transform_indices = @transform_6, window_bounds = array<i64: 128, 384>}, {pipeline_mode = #tpu.pipeline_mode<synchronous>, transform_indices = @transform_7, window_bounds = array<i64: 1, 384>}, {pipeline_mode = #tpu.pipeline_mode<synchronous>, transform_indices = @transform_8, window_bounds = array<i64: 1, 128>}, {pipeline_mode = #tpu.pipeline_mode<synchronous>, transform_indices = @transform_9, window_bounds = array<i64: 256, 256>}, {pipeline_mode = #tpu.pipeline_mode<synchronous>, transform_indices = @transform_10, window_bounds = array<i64: 1, 256>}, {pipeline_mode = #tpu.pipeline_mode<synchronous>, transform_indices = @transform_11, window_bounds = array<i64: 256, 1>}, {transform_indices = @transform_12, window_bounds = array<i64: 8, 256>}]} {
    %c0 = arith.constant 0 : index
    %c0_0 = arith.constant 0 : index
    %c0_1 = arith.constant 0 : index
    %0 = vector.load %arg1[%c0, %c0_0, %c0_1] : memref<8x8x16xf32, #tpu.memory_space<vmem>>, vector<8x8x16xf32>
    %1 = vector.shape_cast %0 : vector<8x8x16xf32> to vector<64x16xf32>
    %2 = arith.truncf %1 : vector<64x16xf32> to vector<64x16xbf16>
    %c0_2 = arith.constant 0 : index
    %c0_3 = arith.constant 0 : index
    %3 = vector.load %arg2[%c0_2, %c0_3] : memref<16x384xbf16, #tpu.memory_space<vmem>>, vector<16x384xbf16>
    %cst = arith.constant dense<0.000000e+00> : vector<64x384xf32>
    %4 = tpu.matmul %2, %3, %cst {dimension_numbers = #tpu.dot_dimension_numbers<[1], [0], [0], [1], [0, 0, 1, 1], [], []>} : vector<64x16xbf16>, vector<16x384xbf16>, vector<64x384xf32> -> vector<64x384xf32>
    %c0_4 = arith.constant 0 : index
    %c0_5 = arith.constant 0 : index
    %5 = vector.load %arg4[%c0_4, %c0_5] : memref<1x384xf32, #tpu.memory_space<vmem>>, vector<1x384xf32>
    %6 = vector.broadcast %5 : vector<1x384xf32> to vector<64x384xf32>
    %7 = arith.addf %4, %6 : vector<64x384xf32>
    %c0_6 = arith.constant 0 : index
    %c0_7 = arith.constant 0 : index
    %8 = vector.load %arg15[%c0_6, %c0_7] : memref<64x384xf32, #tpu.memory_space<vmem>>, vector<64x384xf32>
    tpu.vector_store %arg15[%c0_6, %c0_7], %7 {strides = array<i32>} : memref<64x384xf32, #tpu.memory_space<vmem>>, vector<64x384xf32>,
    %c0_8 = arith.constant 0 : index
    %c0_9 = arith.constant 0 : index
    %9 = vector.load %arg6[%c0_8, %c0_9] : memref<16x384xbf16, #tpu.memory_space<vmem>>, vector<16x384xbf16>
    %cst_10 = arith.constant dense<0.000000e+00> : vector<64x384xf32>
    %10 = tpu.matmul %2, %9, %cst_10 {dimension_numbers = #tpu.dot_dimension_numbers<[1], [0], [0], [1], [0, 0, 1, 1], [], []>} : vector<64x16xbf16>, vector<16x384xbf16>, vector<64x384xf32> -> vector<64x384xf32>
    %c0_11 = arith.constant 0 : index
    %c0_12 = arith.constant 0 : index
    %11 = vector.load %arg8[%c0_11, %c0_12] : memref<1x384xf32, #tpu.memory_space<vmem>>, vector<1x384xf32>
    %12 = vector.broadcast %11 : vector<1x384xf32> to vector<64x384xf32>
    %13 = arith.addf %10, %12 : vector<64x384xf32>
    %c0_13 = arith.constant 0 : index
    %c0_14 = arith.constant 0 : index
    %14 = vector.load %arg16[%c0_13, %c0_14] : memref<64x384xf32, #tpu.memory_space<vmem>>, vector<64x384xf32>
    tpu.vector_store %arg16[%c0_13, %c0_14], %13 {strides = array<i32>} : memref<64x384xf32, #tpu.memory_space<vmem>>, vector<64x384xf32>,
    %cst_15 = arith.constant 0.000000e+00 : f32
    %15 = vector.broadcast %cst_15 : f32 to vector<8x128xf32>
    %c0_i32 = arith.constant 0 : i32
    %c8_i32 = arith.constant 8 : i32
    %16 = arith.muli %c0_i32, %c8_i32 : i32
    %17 = tpu.assume_multiple %16, 8 : i32
    %c7_i32 = arith.constant 7 : i32
    %18 = arith.subi %c7_i32, %c0_i32 : i32
    %c8_i32_16 = arith.constant 8 : i32
    %19 = arith.muli %18, %c8_i32_16 : i32
    %20 = tpu.assume_multiple %19, 8 : i32
    %21 = arith.index_cast %17 : i32 to index
    %c0_17 = arith.constant 0 : index
    %22 = vector.load %arg15[%21, %c0_17] : memref<64x384xf32, #tpu.memory_space<vmem>>, vector<8x384xf32>
    %23 = arith.truncf %15 : vector<8x128xf32> to vector<8x128xbf16>
    %c0_18 = arith.constant 0 : index
    %c0_19 = arith.constant 0 : index
    %24 = vector.load %arg3[%c0_18, %c0_19] : memref<128x384xbf16, #tpu.memory_space<vmem>>, vector<128x384xbf16>
    %cst_20 = arith.constant dense<0.000000e+00> : vector<8x384xf32>
    %25 = tpu.matmul %23, %24, %cst_20 {dimension_numbers = #tpu.dot_dimension_numbers<[1], [0], [0], [1], [0, 0, 1, 1], [], []>} : vector<8x128xbf16>, vector<128x384xbf16>, vector<8x384xf32> -> vector<8x384xf32>
    %26 = vector.extract_strided_slice %22 {offsets = [0, 0], sizes = [8, 128], strides = [1, 1]} : vector<8x384xf32> to vector<8x128xf32>
    %27 = vector.extract_strided_slice %25 {offsets = [0, 0], sizes = [8, 128], strides = [1, 1]} : vector<8x384xf32> to vector<8x128xf32>
    %28 = arith.addf %26, %27 : vector<8x128xf32>
    %29 = arith.negf %28 : vector<8x128xf32>
    %30 = math.exp %29 : vector<8x128xf32>
    %cst_21 = arith.constant 1.000000e+00 : f32
    %31 = vector.broadcast %cst_21 : f32 to vector<8x128xf32>
    %32 = arith.addf %31, %30 : vector<8x128xf32>
    %33 = arith.divf %31, %32 : vector<8x128xf32>
    %34 = vector.extract_strided_slice %22 {offsets = [0, 128], sizes = [8, 128], strides = [1, 1]} : vector<8x384xf32> to vector<8x128xf32>
    %35 = vector.extract_strided_slice %25 {offsets = [0, 128], sizes = [8, 128], strides = [1, 1]} : vector<8x384xf32> to vector<8x128xf32>
    %36 = arith.addf %34, %35 : vector<8x128xf32>
    %37 = arith.negf %36 : vector<8x128xf32>
    %38 = math.exp %37 : vector<8x128xf32>
    %cst_22 = arith.constant 1.000000e+00 : f32
    %39 = vector.broadcast %cst_22 : f32 to vector<8x128xf32>
    %40 = arith.addf %39, %38 : vector<8x128xf32>
    %41 = arith.divf %39, %40 : vector<8x128xf32>
    %42 = vector.extract_strided_slice %22 {offsets = [0, 256], sizes = [8, 128], strides = [1, 1]} : vector<8x384xf32> to vector<8x128xf32>
    %43 = vector.extract_strided_slice %25 {offsets = [0, 256], sizes = [8, 128], strides = [1, 1]} : vector<8x384xf32> to vector<8x128xf32>
    %c0_23 = arith.constant 0 : index
    %c0_24 = arith.constant 0 : index
    %44 = vector.load %arg5[%c0_23, %c0_24] : memref<1x128xf32, #tpu.memory_space<vmem>>, vector<1x128xf32>
    %45 = vector.broadcast %44 : vector<1x128xf32> to vector<8x128xf32>
    %46 = arith.addf %43, %45 : vector<8x128xf32>
    %47 = arith.mulf %33, %46 : vector<8x128xf32>
    %48 = arith.addf %42, %47 : vector<8x128xf32>
    %49 = math.tanh %48 : vector<8x128xf32>
    %cst_25 = arith.constant 1.000000e+00 : f32
    %50 = vector.broadcast %cst_25 : f32 to vector<8x128xf32>
    %51 = arith.subf %50, %41 : vector<8x128xf32>
    %52 = arith.mulf %51, %49 : vector<8x128xf32>
    %53 = arith.mulf %41, %15 : vector<8x128xf32>
    %54 = arith.addf %52, %53 : vector<8x128xf32>
    %55 = arith.index_cast %20 : i32 to index
    %c0_26 = arith.constant 0 : index
    %56 = vector.load %arg16[%55, %c0_26] : memref<64x384xf32, #tpu.memory_space<vmem>>, vector<8x384xf32>
    %57 = arith.truncf %15 : vector<8x128xf32> to vector<8x128xbf16>
    %c0_27 = arith.constant 0 : index
    %c0_28 = arith.constant 0 : index
    %58 = vector.load %arg7[%c0_27, %c0_28] : memref<128x384xbf16, #tpu.memory_space<vmem>>, vector<128x384xbf16>
    %cst_29 = arith.constant dense<0.000000e+00> : vector<8x384xf32>
    %59 = tpu.matmul %57, %58, %cst_29 {dimension_numbers = #tpu.dot_dimension_numbers<[1], [0], [0], [1], [0, 0, 1, 1], [], []>} : vector<8x128xbf16>, vector<128x384xbf16>, vector<8x384xf32> -> vector<8x384xf32>
    %60 = vector.extract_strided_slice %56 {offsets = [0, 0], sizes = [8, 128], strides = [1, 1]} : vector<8x384xf32> to vector<8x128xf32>
    %61 = vector.extract_strided_slice %59 {offsets = [0, 0], sizes = [8, 128], strides = [1, 1]} : vector<8x384xf32> to vector<8x128xf32>
    %62 = arith.addf %60, %61 : vector<8x128xf32>
    %63 = arith.negf %62 : vector<8x128xf32>
    %64 = math.exp %63 : vector<8x128xf32>
    %cst_30 = arith.constant 1.000000e+00 : f32
    %65 = vector.broadcast %cst_30 : f32 to vector<8x128xf32>
    %66 = arith.addf %65, %64 : vector<8x128xf32>
    %67 = arith.divf %65, %66 : vector<8x128xf32>
    %68 = vector.extract_strided_slice %56 {offsets = [0, 128], sizes = [8, 128], strides = [1, 1]} : vector<8x384xf32> to vector<8x128xf32>
    %69 = vector.extract_strided_slice %59 {offsets = [0, 128], sizes = [8, 128], strides = [1, 1]} : vector<8x384xf32> to vector<8x128xf32>
    %70 = arith.addf %68, %69 : vector<8x128xf32>
    %71 = arith.negf %70 : vector<8x128xf32>
    %72 = math.exp %71 : vector<8x128xf32>
    %cst_31 = arith.constant 1.000000e+00 : f32
    %73 = vector.broadcast %cst_31 : f32 to vector<8x128xf32>
    %74 = arith.addf %73, %72 : vector<8x128xf32>
    %75 = arith.divf %73, %74 : vector<8x128xf32>
    %76 = vector.extract_strided_slice %56 {offsets = [0, 256], sizes = [8, 128], strides = [1, 1]} : vector<8x384xf32> to vector<8x128xf32>
    %77 = vector.extract_strided_slice %59 {offsets = [0, 256], sizes = [8, 128], strides = [1, 1]} : vector<8x384xf32> to vector<8x128xf32>
    %c0_32 = arith.constant 0 : index
    %c0_33 = arith.constant 0 : index
    %78 = vector.load %arg9[%c0_32, %c0_33] : memref<1x128xf32, #tpu.memory_space<vmem>>, vector<1x128xf32>
    %79 = vector.broadcast %78 : vector<1x128xf32> to vector<8x128xf32>
    %80 = arith.addf %77, %79 : vector<8x128xf32>
    %81 = arith.mulf %67, %80 : vector<8x128xf32>
    %82 = arith.addf %76, %81 : vector<8x128xf32>
    %83 = math.tanh %82 : vector<8x128xf32>
    %cst_34 = arith.constant 1.000000e+00 : f32
    %84 = vector.broadcast %cst_34 : f32 to vector<8x128xf32>
    %85 = arith.subf %84, %75 : vector<8x128xf32>
    %86 = arith.mulf %85, %83 : vector<8x128xf32>
    %87 = arith.mulf %75, %15 : vector<8x128xf32>
    %88 = arith.addf %86, %87 : vector<8x128xf32>
    %89 = arith.index_cast %17 : i32 to index
    %c0_35 = arith.constant 0 : index
    %90 = vector.load %arg14[%89, %c0_35] : memref<64x256xf32, #tpu.memory_space<vmem>>, vector<8x128xf32>
    tpu.vector_store %arg14[%89, %c0_35], %54 {strides = array<i32>} : memref<64x256xf32, #tpu.memory_space<vmem>>, vector<8x128xf32>,
    %91 = arith.index_cast %20 : i32 to index
    %c128 = arith.constant 128 : index
    %92 = vector.load %arg14[%91, %c128] : memref<64x256xf32, #tpu.memory_space<vmem>>, vector<8x128xf32>
    tpu.vector_store %arg14[%91, %c128], %88 {strides = array<i32>} : memref<64x256xf32, #tpu.memory_space<vmem>>, vector<8x128xf32>,
    %c1_i32 = arith.constant 1 : i32
    %c8_i32_36 = arith.constant 8 : i32
    %93 = arith.muli %c1_i32, %c8_i32_36 : i32
    %94 = tpu.assume_multiple %93, 8 : i32
    %c7_i32_37 = arith.constant 7 : i32
    %95 = arith.subi %c7_i32_37, %c1_i32 : i32
    %c8_i32_38 = arith.constant 8 : i32
    %96 = arith.muli %95, %c8_i32_38 : i32
    %97 = tpu.assume_multiple %96, 8 : i32
    %98 = arith.index_cast %94 : i32 to index
    %c0_39 = arith.constant 0 : index
    %99 = vector.load %arg15[%98, %c0_39] : memref<64x384xf32, #tpu.memory_space<vmem>>, vector<8x384xf32>
    %100 = arith.truncf %54 : vector<8x128xf32> to vector<8x128xbf16>
    %c0_40 = arith.constant 0 : index
    %c0_41 = arith.constant 0 : index
    %101 = vector.load %arg3[%c0_40, %c0_41] : memref<128x384xbf16, #tpu.memory_space<vmem>>, vector<128x384xbf16>
    %cst_42 = arith.constant dense<0.000000e+00> : vector<8x384xf32>
    %102 = tpu.matmul %100, %101, %cst_42 {dimension_numbers = #tpu.dot_dimension_numbers<[1], [0], [0], [1], [0, 0, 1, 1], [], []>} : vector<8x128xbf16>, vector<128x384xbf16>, vector<8x384xf32> -> vector<8x384xf32>
    %103 = vector.extract_strided_slice %99 {offsets = [0, 0], sizes = [8, 128], strides = [1, 1]} : vector<8x384xf32> to vector<8x128xf32>
    %104 = vector.extract_strided_slice %102 {offsets = [0, 0], sizes = [8, 128], strides = [1, 1]} : vector<8x384xf32> to vector<8x128xf32>
    %105 = arith.addf %103, %104 : vector<8x128xf32>
    %106 = arith.negf %105 : vector<8x128xf32>
    %107 = math.exp %106 : vector<8x128xf32>
    %cst_43 = arith.constant 1.000000e+00 : f32
    %108 = vector.broadcast %cst_43 : f32 to vector<8x128xf32>
    %109 = arith.addf %108, %107 : vector<8x128xf32>
    %110 = arith.divf %108, %109 : vector<8x128xf32>
    %111 = vector.extract_strided_slice %99 {offsets = [0, 128], sizes = [8, 128], strides = [1, 1]} : vector<8x384xf32> to vector<8x128xf32>
    %112 = vector.extract_strided_slice %102 {offsets = [0, 128], sizes = [8, 128], strides = [1, 1]} : vector<8x384xf32> to vector<8x128xf32>
    %113 = arith.addf %111, %112 : vector<8x128xf32>
    %114 = arith.negf %113 : vector<8x128xf32>
    %115 = math.exp %114 : vector<8x128xf32>
    %cst_44 = arith.constant 1.000000e+00 : f32
    %116 = vector.broadcast %cst_44 : f32 to vector<8x128xf32>
    %117 = arith.addf %116, %115 : vector<8x128xf32>
    %118 = arith.divf %116, %117 : vector<8x128xf32>
    %119 = vector.extract_strided_slice %99 {offsets = [0, 256], sizes = [8, 128], strides = [1, 1]} : vector<8x384xf32> to vector<8x128xf32>
    %120 = vector.extract_strided_slice %102 {offsets = [0, 256], sizes = [8, 128], strides = [1, 1]} : vector<8x384xf32> to vector<8x128xf32>
    %c0_45 = arith.constant 0 : index
    %c0_46 = arith.constant 0 : index
    %121 = vector.load %arg5[%c0_45, %c0_46] : memref<1x128xf32, #tpu.memory_space<vmem>>, vector<1x128xf32>
    %122 = vector.broadcast %121 : vector<1x128xf32> to vector<8x128xf32>
    %123 = arith.addf %120, %122 : vector<8x128xf32>
    %124 = arith.mulf %110, %123 : vector<8x128xf32>
    %125 = arith.addf %119, %124 : vector<8x128xf32>
    %126 = math.tanh %125 : vector<8x128xf32>
    %cst_47 = arith.constant 1.000000e+00 : f32
    %127 = vector.broadcast %cst_47 : f32 to vector<8x128xf32>
    %128 = arith.subf %127, %118 : vector<8x128xf32>
    %129 = arith.mulf %128, %126 : vector<8x128xf32>
    %130 = arith.mulf %118, %54 : vector<8x128xf32>
    %131 = arith.addf %129, %130 : vector<8x128xf32>
    %132 = arith.index_cast %97 : i32 to index
    %c0_48 = arith.constant 0 : index
    %133 = vector.load %arg16[%132, %c0_48] : memref<64x384xf32, #tpu.memory_space<vmem>>, vector<8x384xf32>
    %134 = arith.truncf %88 : vector<8x128xf32> to vector<8x128xbf16>
    %c0_49 = arith.constant 0 : index
    %c0_50 = arith.constant 0 : index
    %135 = vector.load %arg7[%c0_49, %c0_50] : memref<128x384xbf16, #tpu.memory_space<vmem>>, vector<128x384xbf16>
    %cst_51 = arith.constant dense<0.000000e+00> : vector<8x384xf32>
    %136 = tpu.matmul %134, %135, %cst_51 {dimension_numbers = #tpu.dot_dimension_numbers<[1], [0], [0], [1], [0, 0, 1, 1], [], []>} : vector<8x128xbf16>, vector<128x384xbf16>, vector<8x384xf32> -> vector<8x384xf32>
    %137 = vector.extract_strided_slice %133 {offsets = [0, 0], sizes = [8, 128], strides = [1, 1]} : vector<8x384xf32> to vector<8x128xf32>
    %138 = vector.extract_strided_slice %136 {offsets = [0, 0], sizes = [8, 128], strides = [1, 1]} : vector<8x384xf32> to vector<8x128xf32>
    %139 = arith.addf %137, %138 : vector<8x128xf32>
    %140 = arith.negf %139 : vector<8x128xf32>
    %141 = math.exp %140 : vector<8x128xf32>
    %cst_52 = arith.constant 1.000000e+00 : f32
    %142 = vector.broadcast %cst_52 : f32 to vector<8x128xf32>
    %143 = arith.addf %142, %141 : vector<8x128xf32>
    %144 = arith.divf %142, %143 : vector<8x128xf32>
    %145 = vector.extract_strided_slice %133 {offsets = [0, 128], sizes = [8, 128], strides = [1, 1]} : vector<8x384xf32> to vector<8x128xf32>
    %146 = vector.extract_strided_slice %136 {offsets = [0, 128], sizes = [8, 128], strides = [1, 1]} : vector<8x384xf32> to vector<8x128xf32>
    %147 = arith.addf %145, %146 : vector<8x128xf32>
    %148 = arith.negf %147 : vector<8x128xf32>
    %149 = math.exp %148 : vector<8x128xf32>
    %cst_53 = arith.constant 1.000000e+00 : f32
    %150 = vector.broadcast %cst_53 : f32 to vector<8x128xf32>
    %151 = arith.addf %150, %149 : vector<8x128xf32>
    %152 = arith.divf %150, %151 : vector<8x128xf32>
    %153 = vector.extract_strided_slice %133 {offsets = [0, 256], sizes = [8, 128], strides = [1, 1]} : vector<8x384xf32> to vector<8x128xf32>
    %154 = vector.extract_strided_slice %136 {offsets = [0, 256], sizes = [8, 128], strides = [1, 1]} : vector<8x384xf32> to vector<8x128xf32>
    %c0_54 = arith.constant 0 : index
    %c0_55 = arith.constant 0 : index
    %155 = vector.load %arg9[%c0_54, %c0_55] : memref<1x128xf32, #tpu.memory_space<vmem>>, vector<1x128xf32>
    %156 = vector.broadcast %155 : vector<1x128xf32> to vector<8x128xf32>
    %157 = arith.addf %154, %156 : vector<8x128xf32>
    %158 = arith.mulf %144, %157 : vector<8x128xf32>
    %159 = arith.addf %153, %158 : vector<8x128xf32>
    %160 = math.tanh %159 : vector<8x128xf32>
    %cst_56 = arith.constant 1.000000e+00 : f32
    %161 = vector.broadcast %cst_56 : f32 to vector<8x128xf32>
    %162 = arith.subf %161, %152 : vector<8x128xf32>
    %163 = arith.mulf %162, %160 : vector<8x128xf32>
    %164 = arith.mulf %152, %88 : vector<8x128xf32>
    %165 = arith.addf %163, %164 : vector<8x128xf32>
    %166 = arith.index_cast %94 : i32 to index
    %c0_57 = arith.constant 0 : index
    %167 = vector.load %arg14[%166, %c0_57] : memref<64x256xf32, #tpu.memory_space<vmem>>, vector<8x128xf32>
    tpu.vector_store %arg14[%166, %c0_57], %131 {strides = array<i32>} : memref<64x256xf32, #tpu.memory_space<vmem>>, vector<8x128xf32>,
    %168 = arith.index_cast %97 : i32 to index
    %c128_58 = arith.constant 128 : index
    %169 = vector.load %arg14[%168, %c128_58] : memref<64x256xf32, #tpu.memory_space<vmem>>, vector<8x128xf32>
    tpu.vector_store %arg14[%168, %c128_58], %165 {strides = array<i32>} : memref<64x256xf32, #tpu.memory_space<vmem>>, vector<8x128xf32>,
    %c2_i32 = arith.constant 2 : i32
    %c8_i32_59 = arith.constant 8 : i32
    %170 = arith.muli %c2_i32, %c8_i32_59 : i32
    %171 = tpu.assume_multiple %170, 8 : i32
    %c7_i32_60 = arith.constant 7 : i32
    %172 = arith.subi %c7_i32_60, %c2_i32 : i32
    %c8_i32_61 = arith.constant 8 : i32
    %173 = arith.muli %172, %c8_i32_61 : i32
    %174 = tpu.assume_multiple %173, 8 : i32
    %175 = arith.index_cast %171 : i32 to index
    %c0_62 = arith.constant 0 : index
    %176 = vector.load %arg15[%175, %c0_62] : memref<64x384xf32, #tpu.memory_space<vmem>>, vector<8x384xf32>
    %177 = arith.truncf %131 : vector<8x128xf32> to vector<8x128xbf16>
    %c0_63 = arith.constant 0 : index
    %c0_64 = arith.constant 0 : index
    %178 = vector.load %arg3[%c0_63, %c0_64] : memref<128x384xbf16, #tpu.memory_space<vmem>>, vector<128x384xbf16>
    %cst_65 = arith.constant dense<0.000000e+00> : vector<8x384xf32>
    %179 = tpu.matmul %177, %178, %cst_65 {dimension_numbers = #tpu.dot_dimension_numbers<[1], [0], [0], [1], [0, 0, 1, 1], [], []>} : vector<8x128xbf16>, vector<128x384xbf16>, vector<8x384xf32> -> vector<8x384xf32>
    %180 = vector.extract_strided_slice %176 {offsets = [0, 0], sizes = [8, 128], strides = [1, 1]} : vector<8x384xf32> to vector<8x128xf32>
    %181 = vector.extract_strided_slice %179 {offsets = [0, 0], sizes = [8, 128], strides = [1, 1]} : vector<8x384xf32> to vector<8x128xf32>
    %182 = arith.addf %180, %181 : vector<8x128xf32>
    %183 = arith.negf %182 : vector<8x128xf32>
    %184 = math.exp %183 : vector<8x128xf32>
    %cst_66 = arith.constant 1.000000e+00 : f32
    %185 = vector.broadcast %cst_66 : f32 to vector<8x128xf32>
    %186 = arith.addf %185, %184 : vector<8x128xf32>
    %187 = arith.divf %185, %186 : vector<8x128xf32>
    %188 = vector.extract_strided_slice %176 {offsets = [0, 128], sizes = [8, 128], strides = [1, 1]} : vector<8x384xf32> to vector<8x128xf32>
    %189 = vector.extract_strided_slice %179 {offsets = [0, 128], sizes = [8, 128], strides = [1, 1]} : vector<8x384xf32> to vector<8x128xf32>
    %190 = arith.addf %188, %189 : vector<8x128xf32>
    %191 = arith.negf %190 : vector<8x128xf32>
    %192 = math.exp %191 : vector<8x128xf32>
    %cst_67 = arith.constant 1.000000e+00 : f32
    %193 = vector.broadcast %cst_67 : f32 to vector<8x128xf32>
    %194 = arith.addf %193, %192 : vector<8x128xf32>
    %195 = arith.divf %193, %194 : vector<8x128xf32>
    %196 = vector.extract_strided_slice %176 {offsets = [0, 256], sizes = [8, 128], strides = [1, 1]} : vector<8x384xf32> to vector<8x128xf32>
    %197 = vector.extract_strided_slice %179 {offsets = [0, 256], sizes = [8, 128], strides = [1, 1]} : vector<8x384xf32> to vector<8x128xf32>
    %c0_68 = arith.constant 0 : index
    %c0_69 = arith.constant 0 : index
    %198 = vector.load %arg5[%c0_68, %c0_69] : memref<1x128xf32, #tpu.memory_space<vmem>>, vector<1x128xf32>
    %199 = vector.broadcast %198 : vector<1x128xf32> to vector<8x128xf32>
    %200 = arith.addf %197, %199 : vector<8x128xf32>
    %201 = arith.mulf %187, %200 : vector<8x128xf32>
    %202 = arith.addf %196, %201 : vector<8x128xf32>
    %203 = math.tanh %202 : vector<8x128xf32>
    %cst_70 = arith.constant 1.000000e+00 : f32
    %204 = vector.broadcast %cst_70 : f32 to vector<8x128xf32>
    %205 = arith.subf %204, %195 : vector<8x128xf32>
    %206 = arith.mulf %205, %203 : vector<8x128xf32>
    %207 = arith.mulf %195, %131 : vector<8x128xf32>
    %208 = arith.addf %206, %207 : vector<8x128xf32>
    %209 = arith.index_cast %174 : i32 to index
    %c0_71 = arith.constant 0 : index
    %210 = vector.load %arg16[%209, %c0_71] : memref<64x384xf32, #tpu.memory_space<vmem>>, vector<8x384xf32>
    %211 = arith.truncf %165 : vector<8x128xf32> to vector<8x128xbf16>
    %c0_72 = arith.constant 0 : index
    %c0_73 = arith.constant 0 : index
    %212 = vector.load %arg7[%c0_72, %c0_73] : memref<128x384xbf16, #tpu.memory_space<vmem>>, vector<128x384xbf16>
    %cst_74 = arith.constant dense<0.000000e+00> : vector<8x384xf32>
    %213 = tpu.matmul %211, %212, %cst_74 {dimension_numbers = #tpu.dot_dimension_numbers<[1], [0], [0], [1], [0, 0, 1, 1], [], []>} : vector<8x128xbf16>, vector<128x384xbf16>, vector<8x384xf32> -> vector<8x384xf32>
    %214 = vector.extract_strided_slice %210 {offsets = [0, 0], sizes = [8, 128], strides = [1, 1]} : vector<8x384xf32> to vector<8x128xf32>
    %215 = vector.extract_strided_slice %213 {offsets = [0, 0], sizes = [8, 128], strides = [1, 1]} : vector<8x384xf32> to vector<8x128xf32>
    %216 = arith.addf %214, %215 : vector<8x128xf32>
    %217 = arith.negf %216 : vector<8x128xf32>
    %218 = math.exp %217 : vector<8x128xf32>
    %cst_75 = arith.constant 1.000000e+00 : f32
    %219 = vector.broadcast %cst_75 : f32 to vector<8x128xf32>
    %220 = arith.addf %219, %218 : vector<8x128xf32>
    %221 = arith.divf %219, %220 : vector<8x128xf32>
    %222 = vector.extract_strided_slice %210 {offsets = [0, 128], sizes = [8, 128], strides = [1, 1]} : vector<8x384xf32> to vector<8x128xf32>
    %223 = vector.extract_strided_slice %213 {offsets = [0, 128], sizes = [8, 128], strides = [1, 1]} : vector<8x384xf32> to vector<8x128xf32>
    %224 = arith.addf %222, %223 : vector<8x128xf32>
    %225 = arith.negf %224 : vector<8x128xf32>
    %226 = math.exp %225 : vector<8x128xf32>
    %cst_76 = arith.constant 1.000000e+00 : f32
    %227 = vector.broadcast %cst_76 : f32 to vector<8x128xf32>
    %228 = arith.addf %227, %226 : vector<8x128xf32>
    %229 = arith.divf %227, %228 : vector<8x128xf32>
    %230 = vector.extract_strided_slice %210 {offsets = [0, 256], sizes = [8, 128], strides = [1, 1]} : vector<8x384xf32> to vector<8x128xf32>
    %231 = vector.extract_strided_slice %213 {offsets = [0, 256], sizes = [8, 128], strides = [1, 1]} : vector<8x384xf32> to vector<8x128xf32>
    %c0_77 = arith.constant 0 : index
    %c0_78 = arith.constant 0 : index
    %232 = vector.load %arg9[%c0_77, %c0_78] : memref<1x128xf32, #tpu.memory_space<vmem>>, vector<1x128xf32>
    %233 = vector.broadcast %232 : vector<1x128xf32> to vector<8x128xf32>
    %234 = arith.addf %231, %233 : vector<8x128xf32>
    %235 = arith.mulf %221, %234 : vector<8x128xf32>
    %236 = arith.addf %230, %235 : vector<8x128xf32>
    %237 = math.tanh %236 : vector<8x128xf32>
    %cst_79 = arith.constant 1.000000e+00 : f32
    %238 = vector.broadcast %cst_79 : f32 to vector<8x128xf32>
    %239 = arith.subf %238, %229 : vector<8x128xf32>
    %240 = arith.mulf %239, %237 : vector<8x128xf32>
    %241 = arith.mulf %229, %165 : vector<8x128xf32>
    %242 = arith.addf %240, %241 : vector<8x128xf32>
    %243 = arith.index_cast %171 : i32 to index
    %c0_80 = arith.constant 0 : index
    %244 = vector.load %arg14[%243, %c0_80] : memref<64x256xf32, #tpu.memory_space<vmem>>, vector<8x128xf32>
    tpu.vector_store %arg14[%243, %c0_80], %208 {strides = array<i32>} : memref<64x256xf32, #tpu.memory_space<vmem>>, vector<8x128xf32>,
    %245 = arith.index_cast %174 : i32 to index
    %c128_81 = arith.constant 128 : index
    %246 = vector.load %arg14[%245, %c128_81] : memref<64x256xf32, #tpu.memory_space<vmem>>, vector<8x128xf32>
    tpu.vector_store %arg14[%245, %c128_81], %242 {strides = array<i32>} : memref<64x256xf32, #tpu.memory_space<vmem>>, vector<8x128xf32>,
    %c3_i32 = arith.constant 3 : i32
    %c8_i32_82 = arith.constant 8 : i32
    %247 = arith.muli %c3_i32, %c8_i32_82 : i32
    %248 = tpu.assume_multiple %247, 8 : i32
    %c7_i32_83 = arith.constant 7 : i32
    %249 = arith.subi %c7_i32_83, %c3_i32 : i32
    %c8_i32_84 = arith.constant 8 : i32
    %250 = arith.muli %249, %c8_i32_84 : i32
    %251 = tpu.assume_multiple %250, 8 : i32
    %252 = arith.index_cast %248 : i32 to index
    %c0_85 = arith.constant 0 : index
    %253 = vector.load %arg15[%252, %c0_85] : memref<64x384xf32, #tpu.memory_space<vmem>>, vector<8x384xf32>
    %254 = arith.truncf %208 : vector<8x128xf32> to vector<8x128xbf16>
    %c0_86 = arith.constant 0 : index
    %c0_87 = arith.constant 0 : index
    %255 = vector.load %arg3[%c0_86, %c0_87] : memref<128x384xbf16, #tpu.memory_space<vmem>>, vector<128x384xbf16>
    %cst_88 = arith.constant dense<0.000000e+00> : vector<8x384xf32>
    %256 = tpu.matmul %254, %255, %cst_88 {dimension_numbers = #tpu.dot_dimension_numbers<[1], [0], [0], [1], [0, 0, 1, 1], [], []>} : vector<8x128xbf16>, vector<128x384xbf16>, vector<8x384xf32> -> vector<8x384xf32>
    %257 = vector.extract_strided_slice %253 {offsets = [0, 0], sizes = [8, 128], strides = [1, 1]} : vector<8x384xf32> to vector<8x128xf32>
    %258 = vector.extract_strided_slice %256 {offsets = [0, 0], sizes = [8, 128], strides = [1, 1]} : vector<8x384xf32> to vector<8x128xf32>
    %259 = arith.addf %257, %258 : vector<8x128xf32>
    %260 = arith.negf %259 : vector<8x128xf32>
    %261 = math.exp %260 : vector<8x128xf32>
    %cst_89 = arith.constant 1.000000e+00 : f32
    %262 = vector.broadcast %cst_89 : f32 to vector<8x128xf32>
    %263 = arith.addf %262, %261 : vector<8x128xf32>
    %264 = arith.divf %262, %263 : vector<8x128xf32>
    %265 = vector.extract_strided_slice %253 {offsets = [0, 128], sizes = [8, 128], strides = [1, 1]} : vector<8x384xf32> to vector<8x128xf32>
    %266 = vector.extract_strided_slice %256 {offsets = [0, 128], sizes = [8, 128], strides = [1, 1]} : vector<8x384xf32> to vector<8x128xf32>
    %267 = arith.addf %265, %266 : vector<8x128xf32>
    %268 = arith.negf %267 : vector<8x128xf32>
    %269 = math.exp %268 : vector<8x128xf32>
    %cst_90 = arith.constant 1.000000e+00 : f32
    %270 = vector.broadcast %cst_90 : f32 to vector<8x128xf32>
    %271 = arith.addf %270, %269 : vector<8x128xf32>
    %272 = arith.divf %270, %271 : vector<8x128xf32>
    %273 = vector.extract_strided_slice %253 {offsets = [0, 256], sizes = [8, 128], strides = [1, 1]} : vector<8x384xf32> to vector<8x128xf32>
    %274 = vector.extract_strided_slice %256 {offsets = [0, 256], sizes = [8, 128], strides = [1, 1]} : vector<8x384xf32> to vector<8x128xf32>
    %c0_91 = arith.constant 0 : index
    %c0_92 = arith.constant 0 : index
    %275 = vector.load %arg5[%c0_91, %c0_92] : memref<1x128xf32, #tpu.memory_space<vmem>>, vector<1x128xf32>
    %276 = vector.broadcast %275 : vector<1x128xf32> to vector<8x128xf32>
    %277 = arith.addf %274, %276 : vector<8x128xf32>
    %278 = arith.mulf %264, %277 : vector<8x128xf32>
    %279 = arith.addf %273, %278 : vector<8x128xf32>
    %280 = math.tanh %279 : vector<8x128xf32>
    %cst_93 = arith.constant 1.000000e+00 : f32
    %281 = vector.broadcast %cst_93 : f32 to vector<8x128xf32>
    %282 = arith.subf %281, %272 : vector<8x128xf32>
    %283 = arith.mulf %282, %280 : vector<8x128xf32>
    %284 = arith.mulf %272, %208 : vector<8x128xf32>
    %285 = arith.addf %283, %284 : vector<8x128xf32>
    %286 = arith.index_cast %251 : i32 to index
    %c0_94 = arith.constant 0 : index
    %287 = vector.load %arg16[%286, %c0_94] : memref<64x384xf32, #tpu.memory_space<vmem>>, vector<8x384xf32>
    %288 = arith.truncf %242 : vector<8x128xf32> to vector<8x128xbf16>
    %c0_95 = arith.constant 0 : index
    %c0_96 = arith.constant 0 : index
    %289 = vector.load %arg7[%c0_95, %c0_96] : memref<128x384xbf16, #tpu.memory_space<vmem>>, vector<128x384xbf16>
    %cst_97 = arith.constant dense<0.000000e+00> : vector<8x384xf32>
    %290 = tpu.matmul %288, %289, %cst_97 {dimension_numbers = #tpu.dot_dimension_numbers<[1], [0], [0], [1], [0, 0, 1, 1], [], []>} : vector<8x128xbf16>, vector<128x384xbf16>, vector<8x384xf32> -> vector<8x384xf32>
    %291 = vector.extract_strided_slice %287 {offsets = [0, 0], sizes = [8, 128], strides = [1, 1]} : vector<8x384xf32> to vector<8x128xf32>
    %292 = vector.extract_strided_slice %290 {offsets = [0, 0], sizes = [8, 128], strides = [1, 1]} : vector<8x384xf32> to vector<8x128xf32>
    %293 = arith.addf %291, %292 : vector<8x128xf32>
    %294 = arith.negf %293 : vector<8x128xf32>
    %295 = math.exp %294 : vector<8x128xf32>
    %cst_98 = arith.constant 1.000000e+00 : f32
    %296 = vector.broadcast %cst_98 : f32 to vector<8x128xf32>
    %297 = arith.addf %296, %295 : vector<8x128xf32>
    %298 = arith.divf %296, %297 : vector<8x128xf32>
    %299 = vector.extract_strided_slice %287 {offsets = [0, 128], sizes = [8, 128], strides = [1, 1]} : vector<8x384xf32> to vector<8x128xf32>
    %300 = vector.extract_strided_slice %290 {offsets = [0, 128], sizes = [8, 128], strides = [1, 1]} : vector<8x384xf32> to vector<8x128xf32>
    %301 = arith.addf %299, %300 : vector<8x128xf32>
    %302 = arith.negf %301 : vector<8x128xf32>
    %303 = math.exp %302 : vector<8x128xf32>
    %cst_99 = arith.constant 1.000000e+00 : f32
    %304 = vector.broadcast %cst_99 : f32 to vector<8x128xf32>
    %305 = arith.addf %304, %303 : vector<8x128xf32>
    %306 = arith.divf %304, %305 : vector<8x128xf32>
    %307 = vector.extract_strided_slice %287 {offsets = [0, 256], sizes = [8, 128], strides = [1, 1]} : vector<8x384xf32> to vector<8x128xf32>
    %308 = vector.extract_strided_slice %290 {offsets = [0, 256], sizes = [8, 128], strides = [1, 1]} : vector<8x384xf32> to vector<8x128xf32>
    %c0_100 = arith.constant 0 : index
    %c0_101 = arith.constant 0 : index
    %309 = vector.load %arg9[%c0_100, %c0_101] : memref<1x128xf32, #tpu.memory_space<vmem>>, vector<1x128xf32>
    %310 = vector.broadcast %309 : vector<1x128xf32> to vector<8x128xf32>
    %311 = arith.addf %308, %310 : vector<8x128xf32>
    %312 = arith.mulf %298, %311 : vector<8x128xf32>
    %313 = arith.addf %307, %312 : vector<8x128xf32>
    %314 = math.tanh %313 : vector<8x128xf32>
    %cst_102 = arith.constant 1.000000e+00 : f32
    %315 = vector.broadcast %cst_102 : f32 to vector<8x128xf32>
    %316 = arith.subf %315, %306 : vector<8x128xf32>
    %317 = arith.mulf %316, %314 : vector<8x128xf32>
    %318 = arith.mulf %306, %242 : vector<8x128xf32>
    %319 = arith.addf %317, %318 : vector<8x128xf32>
    %320 = arith.index_cast %248 : i32 to index
    %c0_103 = arith.constant 0 : index
    %321 = vector.load %arg14[%320, %c0_103] : memref<64x256xf32, #tpu.memory_space<vmem>>, vector<8x128xf32>
    tpu.vector_store %arg14[%320, %c0_103], %285 {strides = array<i32>} : memref<64x256xf32, #tpu.memory_space<vmem>>, vector<8x128xf32>,
    %322 = arith.index_cast %251 : i32 to index
    %c128_104 = arith.constant 128 : index
    %323 = vector.load %arg14[%322, %c128_104] : memref<64x256xf32, #tpu.memory_space<vmem>>, vector<8x128xf32>
    tpu.vector_store %arg14[%322, %c128_104], %319 {strides = array<i32>} : memref<64x256xf32, #tpu.memory_space<vmem>>, vector<8x128xf32>,
    %c4_i32 = arith.constant 4 : i32
    %c8_i32_105 = arith.constant 8 : i32
    %324 = arith.muli %c4_i32, %c8_i32_105 : i32
    %325 = tpu.assume_multiple %324, 8 : i32
    %c7_i32_106 = arith.constant 7 : i32
    %326 = arith.subi %c7_i32_106, %c4_i32 : i32
    %c8_i32_107 = arith.constant 8 : i32
    %327 = arith.muli %326, %c8_i32_107 : i32
    %328 = tpu.assume_multiple %327, 8 : i32
    %329 = arith.index_cast %325 : i32 to index
    %c0_108 = arith.constant 0 : index
    %330 = vector.load %arg15[%329, %c0_108] : memref<64x384xf32, #tpu.memory_space<vmem>>, vector<8x384xf32>
    %331 = arith.truncf %285 : vector<8x128xf32> to vector<8x128xbf16>
    %c0_109 = arith.constant 0 : index
    %c0_110 = arith.constant 0 : index
    %332 = vector.load %arg3[%c0_109, %c0_110] : memref<128x384xbf16, #tpu.memory_space<vmem>>, vector<128x384xbf16>
    %cst_111 = arith.constant dense<0.000000e+00> : vector<8x384xf32>
    %333 = tpu.matmul %331, %332, %cst_111 {dimension_numbers = #tpu.dot_dimension_numbers<[1], [0], [0], [1], [0, 0, 1, 1], [], []>} : vector<8x128xbf16>, vector<128x384xbf16>, vector<8x384xf32> -> vector<8x384xf32>
    %334 = vector.extract_strided_slice %330 {offsets = [0, 0], sizes = [8, 128], strides = [1, 1]} : vector<8x384xf32> to vector<8x128xf32>
    %335 = vector.extract_strided_slice %333 {offsets = [0, 0], sizes = [8, 128], strides = [1, 1]} : vector<8x384xf32> to vector<8x128xf32>
    %336 = arith.addf %334, %335 : vector<8x128xf32>
    %337 = arith.negf %336 : vector<8x128xf32>
    %338 = math.exp %337 : vector<8x128xf32>
    %cst_112 = arith.constant 1.000000e+00 : f32
    %339 = vector.broadcast %cst_112 : f32 to vector<8x128xf32>
    %340 = arith.addf %339, %338 : vector<8x128xf32>
    %341 = arith.divf %339, %340 : vector<8x128xf32>
    %342 = vector.extract_strided_slice %330 {offsets = [0, 128], sizes = [8, 128], strides = [1, 1]} : vector<8x384xf32> to vector<8x128xf32>
    %343 = vector.extract_strided_slice %333 {offsets = [0, 128], sizes = [8, 128], strides = [1, 1]} : vector<8x384xf32> to vector<8x128xf32>
    %344 = arith.addf %342, %343 : vector<8x128xf32>
    %345 = arith.negf %344 : vector<8x128xf32>
    %346 = math.exp %345 : vector<8x128xf32>
    %cst_113 = arith.constant 1.000000e+00 : f32
    %347 = vector.broadcast %cst_113 : f32 to vector<8x128xf32>
    %348 = arith.addf %347, %346 : vector<8x128xf32>
    %349 = arith.divf %347, %348 : vector<8x128xf32>
    %350 = vector.extract_strided_slice %330 {offsets = [0, 256], sizes = [8, 128], strides = [1, 1]} : vector<8x384xf32> to vector<8x128xf32>
    %351 = vector.extract_strided_slice %333 {offsets = [0, 256], sizes = [8, 128], strides = [1, 1]} : vector<8x384xf32> to vector<8x128xf32>
    %c0_114 = arith.constant 0 : index
    %c0_115 = arith.constant 0 : index
    %352 = vector.load %arg5[%c0_114, %c0_115] : memref<1x128xf32, #tpu.memory_space<vmem>>, vector<1x128xf32>
    %353 = vector.broadcast %352 : vector<1x128xf32> to vector<8x128xf32>
    %354 = arith.addf %351, %353 : vector<8x128xf32>
    %355 = arith.mulf %341, %354 : vector<8x128xf32>
    %356 = arith.addf %350, %355 : vector<8x128xf32>
    %357 = math.tanh %356 : vector<8x128xf32>
    %cst_116 = arith.constant 1.000000e+00 : f32
    %358 = vector.broadcast %cst_116 : f32 to vector<8x128xf32>
    %359 = arith.subf %358, %349 : vector<8x128xf32>
    %360 = arith.mulf %359, %357 : vector<8x128xf32>
    %361 = arith.mulf %349, %285 : vector<8x128xf32>
    %362 = arith.addf %360, %361 : vector<8x128xf32>
    %363 = arith.index_cast %328 : i32 to index
    %c0_117 = arith.constant 0 : index
    %364 = vector.load %arg16[%363, %c0_117] : memref<64x384xf32, #tpu.memory_space<vmem>>, vector<8x384xf32>
    %365 = arith.truncf %319 : vector<8x128xf32> to vector<8x128xbf16>
    %c0_118 = arith.constant 0 : index
    %c0_119 = arith.constant 0 : index
    %366 = vector.load %arg7[%c0_118, %c0_119] : memref<128x384xbf16, #tpu.memory_space<vmem>>, vector<128x384xbf16>
    %cst_120 = arith.constant dense<0.000000e+00> : vector<8x384xf32>
    %367 = tpu.matmul %365, %366, %cst_120 {dimension_numbers = #tpu.dot_dimension_numbers<[1], [0], [0], [1], [0, 0, 1, 1], [], []>} : vector<8x128xbf16>, vector<128x384xbf16>, vector<8x384xf32> -> vector<8x384xf32>
    %368 = vector.extract_strided_slice %364 {offsets = [0, 0], sizes = [8, 128], strides = [1, 1]} : vector<8x384xf32> to vector<8x128xf32>
    %369 = vector.extract_strided_slice %367 {offsets = [0, 0], sizes = [8, 128], strides = [1, 1]} : vector<8x384xf32> to vector<8x128xf32>
    %370 = arith.addf %368, %369 : vector<8x128xf32>
    %371 = arith.negf %370 : vector<8x128xf32>
    %372 = math.exp %371 : vector<8x128xf32>
    %cst_121 = arith.constant 1.000000e+00 : f32
    %373 = vector.broadcast %cst_121 : f32 to vector<8x128xf32>
    %374 = arith.addf %373, %372 : vector<8x128xf32>
    %375 = arith.divf %373, %374 : vector<8x128xf32>
    %376 = vector.extract_strided_slice %364 {offsets = [0, 128], sizes = [8, 128], strides = [1, 1]} : vector<8x384xf32> to vector<8x128xf32>
    %377 = vector.extract_strided_slice %367 {offsets = [0, 128], sizes = [8, 128], strides = [1, 1]} : vector<8x384xf32> to vector<8x128xf32>
    %378 = arith.addf %376, %377 : vector<8x128xf32>
    %379 = arith.negf %378 : vector<8x128xf32>
    %380 = math.exp %379 : vector<8x128xf32>
    %cst_122 = arith.constant 1.000000e+00 : f32
    %381 = vector.broadcast %cst_122 : f32 to vector<8x128xf32>
    %382 = arith.addf %381, %380 : vector<8x128xf32>
    %383 = arith.divf %381, %382 : vector<8x128xf32>
    %384 = vector.extract_strided_slice %364 {offsets = [0, 256], sizes = [8, 128], strides = [1, 1]} : vector<8x384xf32> to vector<8x128xf32>
    %385 = vector.extract_strided_slice %367 {offsets = [0, 256], sizes = [8, 128], strides = [1, 1]} : vector<8x384xf32> to vector<8x128xf32>
    %c0_123 = arith.constant 0 : index
    %c0_124 = arith.constant 0 : index
    %386 = vector.load %arg9[%c0_123, %c0_124] : memref<1x128xf32, #tpu.memory_space<vmem>>, vector<1x128xf32>
    %387 = vector.broadcast %386 : vector<1x128xf32> to vector<8x128xf32>
    %388 = arith.addf %385, %387 : vector<8x128xf32>
    %389 = arith.mulf %375, %388 : vector<8x128xf32>
    %390 = arith.addf %384, %389 : vector<8x128xf32>
    %391 = math.tanh %390 : vector<8x128xf32>
    %cst_125 = arith.constant 1.000000e+00 : f32
    %392 = vector.broadcast %cst_125 : f32 to vector<8x128xf32>
    %393 = arith.subf %392, %383 : vector<8x128xf32>
    %394 = arith.mulf %393, %391 : vector<8x128xf32>
    %395 = arith.mulf %383, %319 : vector<8x128xf32>
    %396 = arith.addf %394, %395 : vector<8x128xf32>
    %397 = arith.index_cast %325 : i32 to index
    %c0_126 = arith.constant 0 : index
    %398 = vector.load %arg14[%397, %c0_126] : memref<64x256xf32, #tpu.memory_space<vmem>>, vector<8x128xf32>
    tpu.vector_store %arg14[%397, %c0_126], %362 {strides = array<i32>} : memref<64x256xf32, #tpu.memory_space<vmem>>, vector<8x128xf32>,
    %399 = arith.index_cast %328 : i32 to index
    %c128_127 = arith.constant 128 : index
    %400 = vector.load %arg14[%399, %c128_127] : memref<64x256xf32, #tpu.memory_space<vmem>>, vector<8x128xf32>
    tpu.vector_store %arg14[%399, %c128_127], %396 {strides = array<i32>} : memref<64x256xf32, #tpu.memory_space<vmem>>, vector<8x128xf32>,
    %c5_i32 = arith.constant 5 : i32
    %c8_i32_128 = arith.constant 8 : i32
    %401 = arith.muli %c5_i32, %c8_i32_128 : i32
    %402 = tpu.assume_multiple %401, 8 : i32
    %c7_i32_129 = arith.constant 7 : i32
    %403 = arith.subi %c7_i32_129, %c5_i32 : i32
    %c8_i32_130 = arith.constant 8 : i32
    %404 = arith.muli %403, %c8_i32_130 : i32
    %405 = tpu.assume_multiple %404, 8 : i32
    %406 = arith.index_cast %402 : i32 to index
    %c0_131 = arith.constant 0 : index
    %407 = vector.load %arg15[%406, %c0_131] : memref<64x384xf32, #tpu.memory_space<vmem>>, vector<8x384xf32>
    %408 = arith.truncf %362 : vector<8x128xf32> to vector<8x128xbf16>
    %c0_132 = arith.constant 0 : index
    %c0_133 = arith.constant 0 : index
    %409 = vector.load %arg3[%c0_132, %c0_133] : memref<128x384xbf16, #tpu.memory_space<vmem>>, vector<128x384xbf16>
    %cst_134 = arith.constant dense<0.000000e+00> : vector<8x384xf32>
    %410 = tpu.matmul %408, %409, %cst_134 {dimension_numbers = #tpu.dot_dimension_numbers<[1], [0], [0], [1], [0, 0, 1, 1], [], []>} : vector<8x128xbf16>, vector<128x384xbf16>, vector<8x384xf32> -> vector<8x384xf32>
    %411 = vector.extract_strided_slice %407 {offsets = [0, 0], sizes = [8, 128], strides = [1, 1]} : vector<8x384xf32> to vector<8x128xf32>
    %412 = vector.extract_strided_slice %410 {offsets = [0, 0], sizes = [8, 128], strides = [1, 1]} : vector<8x384xf32> to vector<8x128xf32>
    %413 = arith.addf %411, %412 : vector<8x128xf32>
    %414 = arith.negf %413 : vector<8x128xf32>
    %415 = math.exp %414 : vector<8x128xf32>
    %cst_135 = arith.constant 1.000000e+00 : f32
    %416 = vector.broadcast %cst_135 : f32 to vector<8x128xf32>
    %417 = arith.addf %416, %415 : vector<8x128xf32>
    %418 = arith.divf %416, %417 : vector<8x128xf32>
    %419 = vector.extract_strided_slice %407 {offsets = [0, 128], sizes = [8, 128], strides = [1, 1]} : vector<8x384xf32> to vector<8x128xf32>
    %420 = vector.extract_strided_slice %410 {offsets = [0, 128], sizes = [8, 128], strides = [1, 1]} : vector<8x384xf32> to vector<8x128xf32>
    %421 = arith.addf %419, %420 : vector<8x128xf32>
    %422 = arith.negf %421 : vector<8x128xf32>
    %423 = math.exp %422 : vector<8x128xf32>
    %cst_136 = arith.constant 1.000000e+00 : f32
    %424 = vector.broadcast %cst_136 : f32 to vector<8x128xf32>
    %425 = arith.addf %424, %423 : vector<8x128xf32>
    %426 = arith.divf %424, %425 : vector<8x128xf32>
    %427 = vector.extract_strided_slice %407 {offsets = [0, 256], sizes = [8, 128], strides = [1, 1]} : vector<8x384xf32> to vector<8x128xf32>
    %428 = vector.extract_strided_slice %410 {offsets = [0, 256], sizes = [8, 128], strides = [1, 1]} : vector<8x384xf32> to vector<8x128xf32>
    %c0_137 = arith.constant 0 : index
    %c0_138 = arith.constant 0 : index
    %429 = vector.load %arg5[%c0_137, %c0_138] : memref<1x128xf32, #tpu.memory_space<vmem>>, vector<1x128xf32>
    %430 = vector.broadcast %429 : vector<1x128xf32> to vector<8x128xf32>
    %431 = arith.addf %428, %430 : vector<8x128xf32>
    %432 = arith.mulf %418, %431 : vector<8x128xf32>
    %433 = arith.addf %427, %432 : vector<8x128xf32>
    %434 = math.tanh %433 : vector<8x128xf32>
    %cst_139 = arith.constant 1.000000e+00 : f32
    %435 = vector.broadcast %cst_139 : f32 to vector<8x128xf32>
    %436 = arith.subf %435, %426 : vector<8x128xf32>
    %437 = arith.mulf %436, %434 : vector<8x128xf32>
    %438 = arith.mulf %426, %362 : vector<8x128xf32>
    %439 = arith.addf %437, %438 : vector<8x128xf32>
    %440 = arith.index_cast %405 : i32 to index
    %c0_140 = arith.constant 0 : index
    %441 = vector.load %arg16[%440, %c0_140] : memref<64x384xf32, #tpu.memory_space<vmem>>, vector<8x384xf32>
    %442 = arith.truncf %396 : vector<8x128xf32> to vector<8x128xbf16>
    %c0_141 = arith.constant 0 : index
    %c0_142 = arith.constant 0 : index
    %443 = vector.load %arg7[%c0_141, %c0_142] : memref<128x384xbf16, #tpu.memory_space<vmem>>, vector<128x384xbf16>
    %cst_143 = arith.constant dense<0.000000e+00> : vector<8x384xf32>
    %444 = tpu.matmul %442, %443, %cst_143 {dimension_numbers = #tpu.dot_dimension_numbers<[1], [0], [0], [1], [0, 0, 1, 1], [], []>} : vector<8x128xbf16>, vector<128x384xbf16>, vector<8x384xf32> -> vector<8x384xf32>
    %445 = vector.extract_strided_slice %441 {offsets = [0, 0], sizes = [8, 128], strides = [1, 1]} : vector<8x384xf32> to vector<8x128xf32>
    %446 = vector.extract_strided_slice %444 {offsets = [0, 0], sizes = [8, 128], strides = [1, 1]} : vector<8x384xf32> to vector<8x128xf32>
    %447 = arith.addf %445, %446 : vector<8x128xf32>
    %448 = arith.negf %447 : vector<8x128xf32>
    %449 = math.exp %448 : vector<8x128xf32>
    %cst_144 = arith.constant 1.000000e+00 : f32
    %450 = vector.broadcast %cst_144 : f32 to vector<8x128xf32>
    %451 = arith.addf %450, %449 : vector<8x128xf32>
    %452 = arith.divf %450, %451 : vector<8x128xf32>
    %453 = vector.extract_strided_slice %441 {offsets = [0, 128], sizes = [8, 128], strides = [1, 1]} : vector<8x384xf32> to vector<8x128xf32>
    %454 = vector.extract_strided_slice %444 {offsets = [0, 128], sizes = [8, 128], strides = [1, 1]} : vector<8x384xf32> to vector<8x128xf32>
    %455 = arith.addf %453, %454 : vector<8x128xf32>
    %456 = arith.negf %455 : vector<8x128xf32>
    %457 = math.exp %456 : vector<8x128xf32>
    %cst_145 = arith.constant 1.000000e+00 : f32
    %458 = vector.broadcast %cst_145 : f32 to vector<8x128xf32>
    %459 = arith.addf %458, %457 : vector<8x128xf32>
    %460 = arith.divf %458, %459 : vector<8x128xf32>
    %461 = vector.extract_strided_slice %441 {offsets = [0, 256], sizes = [8, 128], strides = [1, 1]} : vector<8x384xf32> to vector<8x128xf32>
    %462 = vector.extract_strided_slice %444 {offsets = [0, 256], sizes = [8, 128], strides = [1, 1]} : vector<8x384xf32> to vector<8x128xf32>
    %c0_146 = arith.constant 0 : index
    %c0_147 = arith.constant 0 : index
    %463 = vector.load %arg9[%c0_146, %c0_147] : memref<1x128xf32, #tpu.memory_space<vmem>>, vector<1x128xf32>
    %464 = vector.broadcast %463 : vector<1x128xf32> to vector<8x128xf32>
    %465 = arith.addf %462, %464 : vector<8x128xf32>
    %466 = arith.mulf %452, %465 : vector<8x128xf32>
    %467 = arith.addf %461, %466 : vector<8x128xf32>
    %468 = math.tanh %467 : vector<8x128xf32>
    %cst_148 = arith.constant 1.000000e+00 : f32
    %469 = vector.broadcast %cst_148 : f32 to vector<8x128xf32>
    %470 = arith.subf %469, %460 : vector<8x128xf32>
    %471 = arith.mulf %470, %468 : vector<8x128xf32>
    %472 = arith.mulf %460, %396 : vector<8x128xf32>
    %473 = arith.addf %471, %472 : vector<8x128xf32>
    %474 = arith.index_cast %402 : i32 to index
    %c0_149 = arith.constant 0 : index
    %475 = vector.load %arg14[%474, %c0_149] : memref<64x256xf32, #tpu.memory_space<vmem>>, vector<8x128xf32>
    tpu.vector_store %arg14[%474, %c0_149], %439 {strides = array<i32>} : memref<64x256xf32, #tpu.memory_space<vmem>>, vector<8x128xf32>,
    %476 = arith.index_cast %405 : i32 to index
    %c128_150 = arith.constant 128 : index
    %477 = vector.load %arg14[%476, %c128_150] : memref<64x256xf32, #tpu.memory_space<vmem>>, vector<8x128xf32>
    tpu.vector_store %arg14[%476, %c128_150], %473 {strides = array<i32>} : memref<64x256xf32, #tpu.memory_space<vmem>>, vector<8x128xf32>,
    %c6_i32 = arith.constant 6 : i32
    %c8_i32_151 = arith.constant 8 : i32
    %478 = arith.muli %c6_i32, %c8_i32_151 : i32
    %479 = tpu.assume_multiple %478, 8 : i32
    %c7_i32_152 = arith.constant 7 : i32
    %480 = arith.subi %c7_i32_152, %c6_i32 : i32
    %c8_i32_153 = arith.constant 8 : i32
    %481 = arith.muli %480, %c8_i32_153 : i32
    %482 = tpu.assume_multiple %481, 8 : i32
    %483 = arith.index_cast %479 : i32 to index
    %c0_154 = arith.constant 0 : index
    %484 = vector.load %arg15[%483, %c0_154] : memref<64x384xf32, #tpu.memory_space<vmem>>, vector<8x384xf32>
    %485 = arith.truncf %439 : vector<8x128xf32> to vector<8x128xbf16>
    %c0_155 = arith.constant 0 : index
    %c0_156 = arith.constant 0 : index
    %486 = vector.load %arg3[%c0_155, %c0_156] : memref<128x384xbf16, #tpu.memory_space<vmem>>, vector<128x384xbf16>
    %cst_157 = arith.constant dense<0.000000e+00> : vector<8x384xf32>
    %487 = tpu.matmul %485, %486, %cst_157 {dimension_numbers = #tpu.dot_dimension_numbers<[1], [0], [0], [1], [0, 0, 1, 1], [], []>} : vector<8x128xbf16>, vector<128x384xbf16>, vector<8x384xf32> -> vector<8x384xf32>
    %488 = vector.extract_strided_slice %484 {offsets = [0, 0], sizes = [8, 128], strides = [1, 1]} : vector<8x384xf32> to vector<8x128xf32>
    %489 = vector.extract_strided_slice %487 {offsets = [0, 0], sizes = [8, 128], strides = [1, 1]} : vector<8x384xf32> to vector<8x128xf32>
    %490 = arith.addf %488, %489 : vector<8x128xf32>
    %491 = arith.negf %490 : vector<8x128xf32>
    %492 = math.exp %491 : vector<8x128xf32>
    %cst_158 = arith.constant 1.000000e+00 : f32
    %493 = vector.broadcast %cst_158 : f32 to vector<8x128xf32>
    %494 = arith.addf %493, %492 : vector<8x128xf32>
    %495 = arith.divf %493, %494 : vector<8x128xf32>
    %496 = vector.extract_strided_slice %484 {offsets = [0, 128], sizes = [8, 128], strides = [1, 1]} : vector<8x384xf32> to vector<8x128xf32>
    %497 = vector.extract_strided_slice %487 {offsets = [0, 128], sizes = [8, 128], strides = [1, 1]} : vector<8x384xf32> to vector<8x128xf32>
    %498 = arith.addf %496, %497 : vector<8x128xf32>
    %499 = arith.negf %498 : vector<8x128xf32>
    %500 = math.exp %499 : vector<8x128xf32>
    %cst_159 = arith.constant 1.000000e+00 : f32
    %501 = vector.broadcast %cst_159 : f32 to vector<8x128xf32>
    %502 = arith.addf %501, %500 : vector<8x128xf32>
    %503 = arith.divf %501, %502 : vector<8x128xf32>
    %504 = vector.extract_strided_slice %484 {offsets = [0, 256], sizes = [8, 128], strides = [1, 1]} : vector<8x384xf32> to vector<8x128xf32>
    %505 = vector.extract_strided_slice %487 {offsets = [0, 256], sizes = [8, 128], strides = [1, 1]} : vector<8x384xf32> to vector<8x128xf32>
    %c0_160 = arith.constant 0 : index
    %c0_161 = arith.constant 0 : index
    %506 = vector.load %arg5[%c0_160, %c0_161] : memref<1x128xf32, #tpu.memory_space<vmem>>, vector<1x128xf32>
    %507 = vector.broadcast %506 : vector<1x128xf32> to vector<8x128xf32>
    %508 = arith.addf %505, %507 : vector<8x128xf32>
    %509 = arith.mulf %495, %508 : vector<8x128xf32>
    %510 = arith.addf %504, %509 : vector<8x128xf32>
    %511 = math.tanh %510 : vector<8x128xf32>
    %cst_162 = arith.constant 1.000000e+00 : f32
    %512 = vector.broadcast %cst_162 : f32 to vector<8x128xf32>
    %513 = arith.subf %512, %503 : vector<8x128xf32>
    %514 = arith.mulf %513, %511 : vector<8x128xf32>
    %515 = arith.mulf %503, %439 : vector<8x128xf32>
    %516 = arith.addf %514, %515 : vector<8x128xf32>
    %517 = arith.index_cast %482 : i32 to index
    %c0_163 = arith.constant 0 : index
    %518 = vector.load %arg16[%517, %c0_163] : memref<64x384xf32, #tpu.memory_space<vmem>>, vector<8x384xf32>
    %519 = arith.truncf %473 : vector<8x128xf32> to vector<8x128xbf16>
    %c0_164 = arith.constant 0 : index
    %c0_165 = arith.constant 0 : index
    %520 = vector.load %arg7[%c0_164, %c0_165] : memref<128x384xbf16, #tpu.memory_space<vmem>>, vector<128x384xbf16>
    %cst_166 = arith.constant dense<0.000000e+00> : vector<8x384xf32>
    %521 = tpu.matmul %519, %520, %cst_166 {dimension_numbers = #tpu.dot_dimension_numbers<[1], [0], [0], [1], [0, 0, 1, 1], [], []>} : vector<8x128xbf16>, vector<128x384xbf16>, vector<8x384xf32> -> vector<8x384xf32>
    %522 = vector.extract_strided_slice %518 {offsets = [0, 0], sizes = [8, 128], strides = [1, 1]} : vector<8x384xf32> to vector<8x128xf32>
    %523 = vector.extract_strided_slice %521 {offsets = [0, 0], sizes = [8, 128], strides = [1, 1]} : vector<8x384xf32> to vector<8x128xf32>
    %524 = arith.addf %522, %523 : vector<8x128xf32>
    %525 = arith.negf %524 : vector<8x128xf32>
    %526 = math.exp %525 : vector<8x128xf32>
    %cst_167 = arith.constant 1.000000e+00 : f32
    %527 = vector.broadcast %cst_167 : f32 to vector<8x128xf32>
    %528 = arith.addf %527, %526 : vector<8x128xf32>
    %529 = arith.divf %527, %528 : vector<8x128xf32>
    %530 = vector.extract_strided_slice %518 {offsets = [0, 128], sizes = [8, 128], strides = [1, 1]} : vector<8x384xf32> to vector<8x128xf32>
    %531 = vector.extract_strided_slice %521 {offsets = [0, 128], sizes = [8, 128], strides = [1, 1]} : vector<8x384xf32> to vector<8x128xf32>
    %532 = arith.addf %530, %531 : vector<8x128xf32>
    %533 = arith.negf %532 : vector<8x128xf32>
    %534 = math.exp %533 : vector<8x128xf32>
    %cst_168 = arith.constant 1.000000e+00 : f32
    %535 = vector.broadcast %cst_168 : f32 to vector<8x128xf32>
    %536 = arith.addf %535, %534 : vector<8x128xf32>
    %537 = arith.divf %535, %536 : vector<8x128xf32>
    %538 = vector.extract_strided_slice %518 {offsets = [0, 256], sizes = [8, 128], strides = [1, 1]} : vector<8x384xf32> to vector<8x128xf32>
    %539 = vector.extract_strided_slice %521 {offsets = [0, 256], sizes = [8, 128], strides = [1, 1]} : vector<8x384xf32> to vector<8x128xf32>
    %c0_169 = arith.constant 0 : index
    %c0_170 = arith.constant 0 : index
    %540 = vector.load %arg9[%c0_169, %c0_170] : memref<1x128xf32, #tpu.memory_space<vmem>>, vector<1x128xf32>
    %541 = vector.broadcast %540 : vector<1x128xf32> to vector<8x128xf32>
    %542 = arith.addf %539, %541 : vector<8x128xf32>
    %543 = arith.mulf %529, %542 : vector<8x128xf32>
    %544 = arith.addf %538, %543 : vector<8x128xf32>
    %545 = math.tanh %544 : vector<8x128xf32>
    %cst_171 = arith.constant 1.000000e+00 : f32
    %546 = vector.broadcast %cst_171 : f32 to vector<8x128xf32>
    %547 = arith.subf %546, %537 : vector<8x128xf32>
    %548 = arith.mulf %547, %545 : vector<8x128xf32>
    %549 = arith.mulf %537, %473 : vector<8x128xf32>
    %550 = arith.addf %548, %549 : vector<8x128xf32>
    %551 = arith.index_cast %479 : i32 to index
    %c0_172 = arith.constant 0 : index
    %552 = vector.load %arg14[%551, %c0_172] : memref<64x256xf32, #tpu.memory_space<vmem>>, vector<8x128xf32>
    tpu.vector_store %arg14[%551, %c0_172], %516 {strides = array<i32>} : memref<64x256xf32, #tpu.memory_space<vmem>>, vector<8x128xf32>,
    %553 = arith.index_cast %482 : i32 to index
    %c128_173 = arith.constant 128 : index
    %554 = vector.load %arg14[%553, %c128_173] : memref<64x256xf32, #tpu.memory_space<vmem>>, vector<8x128xf32>
    tpu.vector_store %arg14[%553, %c128_173], %550 {strides = array<i32>} : memref<64x256xf32, #tpu.memory_space<vmem>>, vector<8x128xf32>,
    %c7_i32_174 = arith.constant 7 : i32
    %c8_i32_175 = arith.constant 8 : i32
    %555 = arith.muli %c7_i32_174, %c8_i32_175 : i32
    %556 = tpu.assume_multiple %555, 8 : i32
    %c7_i32_176 = arith.constant 7 : i32
    %557 = arith.subi %c7_i32_176, %c7_i32_174 : i32
    %c8_i32_177 = arith.constant 8 : i32
    %558 = arith.muli %557, %c8_i32_177 : i32
    %559 = tpu.assume_multiple %558, 8 : i32
    %560 = arith.index_cast %556 : i32 to index
    %c0_178 = arith.constant 0 : index
    %561 = vector.load %arg15[%560, %c0_178] : memref<64x384xf32, #tpu.memory_space<vmem>>, vector<8x384xf32>
    %562 = arith.truncf %516 : vector<8x128xf32> to vector<8x128xbf16>
    %c0_179 = arith.constant 0 : index
    %c0_180 = arith.constant 0 : index
    %563 = vector.load %arg3[%c0_179, %c0_180] : memref<128x384xbf16, #tpu.memory_space<vmem>>, vector<128x384xbf16>
    %cst_181 = arith.constant dense<0.000000e+00> : vector<8x384xf32>
    %564 = tpu.matmul %562, %563, %cst_181 {dimension_numbers = #tpu.dot_dimension_numbers<[1], [0], [0], [1], [0, 0, 1, 1], [], []>} : vector<8x128xbf16>, vector<128x384xbf16>, vector<8x384xf32> -> vector<8x384xf32>
    %565 = vector.extract_strided_slice %561 {offsets = [0, 0], sizes = [8, 128], strides = [1, 1]} : vector<8x384xf32> to vector<8x128xf32>
    %566 = vector.extract_strided_slice %564 {offsets = [0, 0], sizes = [8, 128], strides = [1, 1]} : vector<8x384xf32> to vector<8x128xf32>
    %567 = arith.addf %565, %566 : vector<8x128xf32>
    %568 = arith.negf %567 : vector<8x128xf32>
    %569 = math.exp %568 : vector<8x128xf32>
    %cst_182 = arith.constant 1.000000e+00 : f32
    %570 = vector.broadcast %cst_182 : f32 to vector<8x128xf32>
    %571 = arith.addf %570, %569 : vector<8x128xf32>
    %572 = arith.divf %570, %571 : vector<8x128xf32>
    %573 = vector.extract_strided_slice %561 {offsets = [0, 128], sizes = [8, 128], strides = [1, 1]} : vector<8x384xf32> to vector<8x128xf32>
    %574 = vector.extract_strided_slice %564 {offsets = [0, 128], sizes = [8, 128], strides = [1, 1]} : vector<8x384xf32> to vector<8x128xf32>
    %575 = arith.addf %573, %574 : vector<8x128xf32>
    %576 = arith.negf %575 : vector<8x128xf32>
    %577 = math.exp %576 : vector<8x128xf32>
    %cst_183 = arith.constant 1.000000e+00 : f32
    %578 = vector.broadcast %cst_183 : f32 to vector<8x128xf32>
    %579 = arith.addf %578, %577 : vector<8x128xf32>
    %580 = arith.divf %578, %579 : vector<8x128xf32>
    %581 = vector.extract_strided_slice %561 {offsets = [0, 256], sizes = [8, 128], strides = [1, 1]} : vector<8x384xf32> to vector<8x128xf32>
    %582 = vector.extract_strided_slice %564 {offsets = [0, 256], sizes = [8, 128], strides = [1, 1]} : vector<8x384xf32> to vector<8x128xf32>
    %c0_184 = arith.constant 0 : index
    %c0_185 = arith.constant 0 : index
    %583 = vector.load %arg5[%c0_184, %c0_185] : memref<1x128xf32, #tpu.memory_space<vmem>>, vector<1x128xf32>
    %584 = vector.broadcast %583 : vector<1x128xf32> to vector<8x128xf32>
    %585 = arith.addf %582, %584 : vector<8x128xf32>
    %586 = arith.mulf %572, %585 : vector<8x128xf32>
    %587 = arith.addf %581, %586 : vector<8x128xf32>
    %588 = math.tanh %587 : vector<8x128xf32>
    %cst_186 = arith.constant 1.000000e+00 : f32
    %589 = vector.broadcast %cst_186 : f32 to vector<8x128xf32>
    %590 = arith.subf %589, %580 : vector<8x128xf32>
    %591 = arith.mulf %590, %588 : vector<8x128xf32>
    %592 = arith.mulf %580, %516 : vector<8x128xf32>
    %593 = arith.addf %591, %592 : vector<8x128xf32>
    %594 = arith.index_cast %559 : i32 to index
    %c0_187 = arith.constant 0 : index
    %595 = vector.load %arg16[%594, %c0_187] : memref<64x384xf32, #tpu.memory_space<vmem>>, vector<8x384xf32>
    %596 = arith.truncf %550 : vector<8x128xf32> to vector<8x128xbf16>
    %c0_188 = arith.constant 0 : index
    %c0_189 = arith.constant 0 : index
    %597 = vector.load %arg7[%c0_188, %c0_189] : memref<128x384xbf16, #tpu.memory_space<vmem>>, vector<128x384xbf16>
    %cst_190 = arith.constant dense<0.000000e+00> : vector<8x384xf32>
    %598 = tpu.matmul %596, %597, %cst_190 {dimension_numbers = #tpu.dot_dimension_numbers<[1], [0], [0], [1], [0, 0, 1, 1], [], []>} : vector<8x128xbf16>, vector<128x384xbf16>, vector<8x384xf32> -> vector<8x384xf32>
    %599 = vector.extract_strided_slice %595 {offsets = [0, 0], sizes = [8, 128], strides = [1, 1]} : vector<8x384xf32> to vector<8x128xf32>
    %600 = vector.extract_strided_slice %598 {offsets = [0, 0], sizes = [8, 128], strides = [1, 1]} : vector<8x384xf32> to vector<8x128xf32>
    %601 = arith.addf %599, %600 : vector<8x128xf32>
    %602 = arith.negf %601 : vector<8x128xf32>
    %603 = math.exp %602 : vector<8x128xf32>
    %cst_191 = arith.constant 1.000000e+00 : f32
    %604 = vector.broadcast %cst_191 : f32 to vector<8x128xf32>
    %605 = arith.addf %604, %603 : vector<8x128xf32>
    %606 = arith.divf %604, %605 : vector<8x128xf32>
    %607 = vector.extract_strided_slice %595 {offsets = [0, 128], sizes = [8, 128], strides = [1, 1]} : vector<8x384xf32> to vector<8x128xf32>
    %608 = vector.extract_strided_slice %598 {offsets = [0, 128], sizes = [8, 128], strides = [1, 1]} : vector<8x384xf32> to vector<8x128xf32>
    %609 = arith.addf %607, %608 : vector<8x128xf32>
    %610 = arith.negf %609 : vector<8x128xf32>
    %611 = math.exp %610 : vector<8x128xf32>
    %cst_192 = arith.constant 1.000000e+00 : f32
    %612 = vector.broadcast %cst_192 : f32 to vector<8x128xf32>
    %613 = arith.addf %612, %611 : vector<8x128xf32>
    %614 = arith.divf %612, %613 : vector<8x128xf32>
    %615 = vector.extract_strided_slice %595 {offsets = [0, 256], sizes = [8, 128], strides = [1, 1]} : vector<8x384xf32> to vector<8x128xf32>
    %616 = vector.extract_strided_slice %598 {offsets = [0, 256], sizes = [8, 128], strides = [1, 1]} : vector<8x384xf32> to vector<8x128xf32>
    %c0_193 = arith.constant 0 : index
    %c0_194 = arith.constant 0 : index
    %617 = vector.load %arg9[%c0_193, %c0_194] : memref<1x128xf32, #tpu.memory_space<vmem>>, vector<1x128xf32>
    %618 = vector.broadcast %617 : vector<1x128xf32> to vector<8x128xf32>
    %619 = arith.addf %616, %618 : vector<8x128xf32>
    %620 = arith.mulf %606, %619 : vector<8x128xf32>
    %621 = arith.addf %615, %620 : vector<8x128xf32>
    %622 = math.tanh %621 : vector<8x128xf32>
    %cst_195 = arith.constant 1.000000e+00 : f32
    %623 = vector.broadcast %cst_195 : f32 to vector<8x128xf32>
    %624 = arith.subf %623, %614 : vector<8x128xf32>
    %625 = arith.mulf %624, %622 : vector<8x128xf32>
    %626 = arith.mulf %614, %550 : vector<8x128xf32>
    %627 = arith.addf %625, %626 : vector<8x128xf32>
    %628 = arith.index_cast %556 : i32 to index
    %c0_196 = arith.constant 0 : index
    %629 = vector.load %arg14[%628, %c0_196] : memref<64x256xf32, #tpu.memory_space<vmem>>, vector<8x128xf32>
    tpu.vector_store %arg14[%628, %c0_196], %593 {strides = array<i32>} : memref<64x256xf32, #tpu.memory_space<vmem>>, vector<8x128xf32>,
    %630 = arith.index_cast %559 : i32 to index
    %c128_197 = arith.constant 128 : index
    %631 = vector.load %arg14[%630, %c128_197] : memref<64x256xf32, #tpu.memory_space<vmem>>, vector<8x128xf32>
    tpu.vector_store %arg14[%630, %c128_197], %627 {strides = array<i32>} : memref<64x256xf32, #tpu.memory_space<vmem>>, vector<8x128xf32>,
    %c8_i32_198 = arith.constant 8 : i32
    %c0_199 = arith.constant 0 : index
    %c0_200 = arith.constant 0 : index
    %632 = vector.load %arg14[%c0_199, %c0_200] : memref<64x256xf32, #tpu.memory_space<vmem>>, vector<64x256xf32>
    %633 = arith.truncf %632 : vector<64x256xf32> to vector<64x256xbf16>
    %c0_201 = arith.constant 0 : index
    %c0_202 = arith.constant 0 : index
    %634 = vector.load %arg10[%c0_201, %c0_202] : memref<256x256xbf16, #tpu.memory_space<vmem>>, vector<256x256xbf16>
    %cst_203 = arith.constant dense<0.000000e+00> : vector<64x256xf32>
    %635 = tpu.matmul %633, %634, %cst_203 {dimension_numbers = #tpu.dot_dimension_numbers<[1], [0], [0], [1], [0, 0, 1, 1], [], []>} : vector<64x256xbf16>, vector<256x256xbf16>, vector<64x256xf32> -> vector<64x256xf32>
    %c0_204 = arith.constant 0 : index
    %c0_205 = arith.constant 0 : index
    %636 = vector.load %arg11[%c0_204, %c0_205] : memref<1x256xf32, #tpu.memory_space<vmem>>, vector<1x256xf32>
    %637 = vector.broadcast %636 : vector<1x256xf32> to vector<64x256xf32>
    %638 = arith.addf %635, %637 : vector<64x256xf32>
    %639 = math.tanh %638 : vector<64x256xf32>
    %640 = arith.truncf %639 : vector<64x256xf32> to vector<64x256xbf16>
    %c0_206 = arith.constant 0 : index
    %c0_207 = arith.constant 0 : index
    %641 = vector.load %arg12[%c0_206, %c0_207] : memref<256x1xbf16, #tpu.memory_space<vmem>>, vector<256x1xbf16>
    %cst_208 = arith.constant dense<0.000000e+00> : vector<64x1xf32>
    %642 = tpu.matmul %640, %641, %cst_208 {dimension_numbers = #tpu.dot_dimension_numbers<[1], [0], [0], [1], [0, 0, 1, 1], [], []>} : vector<64x256xbf16>, vector<256x1xbf16>, vector<64x1xf32> -> vector<64x1xf32>
    %643 = vector.shape_cast %642 : vector<64x1xf32> to vector<8x8x1xf32>
    %cst_209 = arith.constant dense<0xFF800000> : vector<8x1xf32>
    %644 = vector.multi_reduction <maximumf>, %643, %cst_209 [0] : vector<8x8x1xf32> to vector<8x1xf32>
    %645 = vector.shape_cast %644 : vector<8x1xf32> to vector<1x8x1xf32>
    %646 = vector.broadcast %645 : vector<1x8x1xf32> to vector<8x8x1xf32>
    %647 = arith.subf %643, %646 : vector<8x8x1xf32>
    %648 = math.exp %647 : vector<8x8x1xf32>
    %cst_210 = arith.constant dense<0.000000e+00> : vector<8x1xf32>
    %649 = vector.multi_reduction <add>, %648, %cst_210 [0] : vector<8x8x1xf32> to vector<8x1xf32>
    %650 = vector.shape_cast %649 : vector<8x1xf32> to vector<1x8x1xf32>
    %651 = vector.broadcast %650 : vector<1x8x1xf32> to vector<8x8x1xf32>
    %652 = arith.divf %648, %651 : vector<8x8x1xf32>
    %653 = vector.shape_cast %632 : vector<64x256xf32> to vector<8x8x256xf32>
    %654 = vector.broadcast %652 : vector<8x8x1xf32> to vector<8x8x256xf32>
    %655 = arith.mulf %654, %653 : vector<8x8x256xf32>
    %cst_211 = arith.constant dense<0.000000e+00> : vector<8x256xf32>
    %656 = vector.multi_reduction <add>, %655, %cst_211 [0] : vector<8x8x256xf32> to vector<8x256xf32>
    %c0_212 = arith.constant 0 : index
    %c0_213 = arith.constant 0 : index
    %657 = vector.load %arg13[%c0_212, %c0_213] : memref<8x256xf32, #tpu.memory_space<vmem>>, vector<8x256xf32>
    tpu.vector_store %arg13[%c0_212, %c0_213], %656 {strides = array<i32>} : memref<8x256xf32, #tpu.memory_space<vmem>>, vector<8x256xf32>,
    return
  }
  func.func @transform_0(%arg0: i32) -> (i32, i32, i32) {
    %c0_i32 = arith.constant 0 : i32
    %c0_i32_0 = arith.constant 0 : i32
    %c0_i32_1 = arith.constant 0 : i32
    return %c0_i32, %arg0, %c0_i32_0 : i32, i32, i32
  }
  func.func @transform_1(%arg0: i32) -> (i32, i32) {
    %c0_i32 = arith.constant 0 : i32
    %c0_i32_0 = arith.constant 0 : i32
    %c0_i32_1 = arith.constant 0 : i32
    return %c0_i32, %c0_i32_0 : i32, i32
  }
  func.func @transform_2(%arg0: i32) -> (i32, i32) {
    %c0_i32 = arith.constant 0 : i32
    %c0_i32_0 = arith.constant 0 : i32
    %c0_i32_1 = arith.constant 0 : i32
    return %c0_i32, %c0_i32_0 : i32, i32
  }
  func.func @transform_3(%arg0: i32) -> (i32, i32) {
    %c0_i32 = arith.constant 0 : i32
    %c0_i32_0 = arith.constant 0 : i32
    %c0_i32_1 = arith.constant 0 : i32
    return %c0_i32, %c0_i32_0 : i32, i32
  }
  func.func @transform_4(%arg0: i32) -> (i32, i32) {
    %c0_i32 = arith.constant 0 : i32
    %c0_i32_0 = arith.constant 0 : i32
    %c0_i32_1 = arith.constant 0 : i32
    return %c0_i32, %c0_i32_0 : i32, i32
  }
  func.func @transform_5(%arg0: i32) -> (i32, i32) {
    %c0_i32 = arith.constant 0 : i32
    %c0_i32_0 = arith.constant 0 : i32
    %c0_i32_1 = arith.constant 0 : i32
    return %c0_i32, %c0_i32_0 : i32, i32
  }
  func.func @transform_6(%arg0: i32) -> (i32, i32) {
    %c0_i32 = arith.constant 0 : i32
    %c0_i32_0 = arith.constant 0 : i32
    %c0_i32_1 = arith.constant 0 : i32
    return %c0_i32, %c0_i32_0 : i32, i32
  }
  func.func @transform_7(%arg0: i32) -> (i32, i32) {
    %c0_i32 = arith.constant 0 : i32
    %c0_i32_0 = arith.constant 0 : i32
    %c0_i32_1 = arith.constant 0 : i32
    return %c0_i32, %c0_i32_0 : i32, i32
  }
  func.func @transform_8(%arg0: i32) -> (i32, i32) {
    %c0_i32 = arith.constant 0 : i32
    %c0_i32_0 = arith.constant 0 : i32
    %c0_i32_1 = arith.constant 0 : i32
    return %c0_i32, %c0_i32_0 : i32, i32
  }
  func.func @transform_9(%arg0: i32) -> (i32, i32) {
    %c0_i32 = arith.constant 0 : i32
    %c0_i32_0 = arith.constant 0 : i32
    %c0_i32_1 = arith.constant 0 : i32
    return %c0_i32, %c0_i32_0 : i32, i32
  }
  func.func @transform_10(%arg0: i32) -> (i32, i32) {
    %c0_i32 = arith.constant 0 : i32
    %c0_i32_0 = arith.constant 0 : i32
    %c0_i32_1 = arith.constant 0 : i32
    return %c0_i32, %c0_i32_0 : i32, i32
  }
  func.func @transform_11(%arg0: i32) -> (i32, i32) {
    %c0_i32 = arith.constant 0 : i32
    %c0_i32_0 = arith.constant 0 : i32
    %c0_i32_1 = arith.constant 0 : i32
    return %c0_i32, %c0_i32_0 : i32, i32
  }
  func.func @transform_12(%arg0: i32) -> (i32, i32) {
    %c0_i32 = arith.constant 0 : i32
    %c0_i32_0 = arith.constant 0 : i32
    return %arg0, %c0_i32 : i32, i32
  }
}

</mosaic_0001>

<bundles_post_ra>
// kernel: han_forward.3
= control target key start
LH: loop header
LB: loop body
LE: loop exit
PB: predicated region body
PF: predicated region fallthrough
CT: control target
= control target key end

     0   :  { %19 = vsyncpa [#allocation6], 0  ;;  %s4399_s29 = smov [#allocation5]   ;;  %s5651_s0 = inlined_call_operand.vmem [shape: f32[3,8,256], index: 0, kind: input, shape index: {}]   ;;  %s5652_s1 = inlined_call_operand.vmem [shape: bf16[256,384], index: 1, kind: input, shape index: {}]   ;;  %s5653_s2 = inlined_call_operand.vmem [shape: bf16[128,384], index: 2, kind: input, shape index: {}]   ;;  %s5654_s3 = inlined_call_operand.vmem [shape: f32[1,384], index: 3, kind: input, shape index: {}]   ;;  %s5655_s4 = inlined_call_operand.vmem [shape: f32[1,128], index: 4, kind: input, shape index: {}]   ;;  %s5656_s5 = inlined_call_operand.vmem [shape: bf16[256,384], index: 5, kind: input, shape index: {}]   ;;  %s5657_s6 = inlined_call_operand.vmem [shape: bf16[128,384], index: 6, kind: input, shape index: {}]   ;;  %s5658_s7 = inlined_call_operand.vmem [shape: f32[1,384], index: 7, kind: input, shape index: {}]   ;;  %s5659_s8 = inlined_call_operand.vmem [shape: f32[1,128], index: 8, kind: input, shape index: {}]   ;;  %s5660_s9 = inlined_call_operand.vmem [shape: bf16[256,256], index: 9, kind: input, shape index: {}]   ;;  %s5661_s10 = inlined_call_operand.vmem [shape: f32[1,256], index: 10, kind: input, shape index: {}]   ;;  %s5662_s11 = inlined_call_operand.vmem [shape: bf16[256,1], index: 11, kind: input, shape index: {}]   ;;  %s5663_s12 = inlined_call_operand.hbm [shape: bf16[256,128], index: 12, kind: input, shape index: {}]   ;;  %s5664_s13 = inlined_call_operand.vmem [shape: f32[1,128], index: 13, kind: input, shape index: {}]   ;;  %s5665_s14 = inlined_call_operand.vmem [shape: f32[8,128], index: 14, kind: output, shape index: {}]  }
   0x1   :  { %s49_s30 = sshll.u32 %s4399_s29, 4  ;;  %s4375_s17 = scalar_lea.hbm %s5663_s12, 2048  ;;  %s50_s30 = int_to_ptr.vmem [resolvable:$true] %s49_s30 }
   0x2   :  { %p4376_p0 = scmp.ne.s32.totalorder %s5663_s12, %s4375_s17  ;;  %p4379_p1 = scmp.lt.u32.totalorder %s4375_s17, %s5663_s12 }
   0x4   :  { %p4381_p2 = pnand %p4379_p1, %p4376_p0 }
   0x6   :  { %4384 = shalt.err (!%p4381_p2)
}
   0x7   :  { %s4385_s22 = scalar_lea.vmem %s50_s30, 2048  ;;  %p4390_p4 = scmp.lt.s32.totalorder %s50_s30, %s50_s30 }
   0x8   :  { %p4386_p3 = scmp.ne.s32.totalorder %s50_s30, %s4385_s22  ;;  %p4391_p5 = scmp.lt.s32.totalorder %s4385_s22, %s4385_s22 }
   0xa   :  { %p4392_p6 = por %p4391_p5, %p4390_p4 }
   0xc   :  { %p4393_p7 = pnand %p4392_p6, %p4386_p3 }
   0xe   :  { %4396 = shalt.err (!%p4393_p7)
}
   0xf   :  { %s4400_s23 = smov 64   ;;  %s4401_s24 = smov 4  }
  0x10   :  { %55 = dma.hbm_to_vmem [thread:$0]  %s5663_s12, 2048, %s50_s30, [#allocation6], %s4400_s23, %s4400_s23, %s4401_s24  }
  0x11   :  { %4397 = dma.done.wait [#allocation6], 2048  }
  0x12   :  { %4398 = vsyncadd [#allocation6], 4294965248  ;;  %v3946_v0 = vld [vmem:[%s5652_s1 + $0x4] ss:$12 sps:$4 sm:$0xff]   ;;  %v3948_v1 = vld [vmem:[%s5652_s1 + $0xc8] ss:$12 sps:$4 sm:$0xff]  }
  0x13   :  { %409 = vmatprep.subr.bf16.mxu0 %v3946_v0  ;;  %v3949_v2 = vld [vmem:[%s5652_s1] ss:$12 sps:$4 sm:$0xff]   ;;  %3646 = vmatprep.subr.bf16.mxu1 %v3948_v1  ;;  %v3950_v3 = vld [vmem:[%s5652_s1 + $0x8] ss:$12 sps:$4 sm:$0xff]   ;;  %v4402_v5 = vmov 0   ;;  %v65_v33 = vld [vmem:[%s5651_s0 + $0x18] sm:$0xff] }
  0x14   :  { %410 = vmatpush1.bf16.msra.mxu0 %v3949_v2  ;;  %v3951_v4 = vld [vmem:[%s5652_s1 + $0x1c] ss:$12 sps:$4 sm:$0xff]   ;;  %3945 = vset.pattern.permute.xlu1 %v4402_v5  ;;  %v3953_v6 = vld [vmem:[%s5652_s1 + $0xe0] ss:$12 sps:$4 sm:$0xff]   ;;  %v3954_v7 = vld [vmem:[%s5652_s1 + $0x18] ss:$12 sps:$4 sm:$0xff]  }
  0x15   :  { %3647 = vmatpush3.bf16.msra.mxu1 %v3950_v3  ;;  %3944 = vset.pattern.permute.xlu0 %v4402_v5  ;;  %v3955_v8 = vld [vmem:[%s5652_s1 + $0x20] ss:$12 sps:$4 sm:$0xff]   ;;  %v3958_v10 = vld [vmem:[%s5652_s1 + $0xf8] ss:$12 sps:$4 sm:$0xff]   ;;  %v3959_v11 = vld [vmem:[%s5652_s1 + $0x30] ss:$12 sps:$4 sm:$0xff]  }
  0x16   :  { %411 = vmatprep.subr.bf16.mxu0 %v3951_v4  ;;  %3648 = vmatprep.subr.bf16.mxu1 %v3953_v6  ;;  %v3956_v9 = vld [vmem:[%s5652_s1 + $0x34] ss:$12 sps:$4 sm:$0xff]   ;;  %v3960_v12 = vld [vmem:[%s5652_s1 + $0x38] ss:$12 sps:$4 sm:$0xff]   ;;  %v3963_v14 = vld [vmem:[%s5652_s1 + $0x110] ss:$12 sps:$4 sm:$0xff]  }
  0x17   :  { %v3961_v13 = vld [vmem:[%s5652_s1 + $0x4c] ss:$12 sps:$4 sm:$0xff]   ;;  %v3964_v15 = vld [vmem:[%s5652_s1 + $0x48] ss:$12 sps:$4 sm:$0xff]   ;;  %v3965_v16 = vld [vmem:[%s5652_s1 + $0x50] ss:$12 sps:$4 sm:$0xff]  }
  0x18   :  { %412 = vmatpush1.bf16.msra.mxu0 %v3954_v7  ;;  %v3966_v17 = vld [vmem:[%s5652_s1 + $0x64] ss:$12 sps:$4 sm:$0xff]   ;;  %v3968_v18 = vld [vmem:[%s5652_s1 + $0x128] ss:$12 sps:$4 sm:$0xff]   ;;  %v3969_v19 = vld [vmem:[%s5652_s1 + $0x60] ss:$12 sps:$4 sm:$0xff]  }
  0x19   :  { %3649 = vmatpush3.bf16.msra.mxu1 %v3955_v8  ;;  %413 = vmatprep.subr.bf16.mxu0 %v3956_v9  ;;  %v3970_v20 = vld [vmem:[%s5652_s1 + $0x68] ss:$12 sps:$4 sm:$0xff]   ;;  %v3973_v22 = vld [vmem:[%s5652_s1 + $0x140] ss:$12 sps:$4 sm:$0xff]   ;;  %v3974_v23 = vld [vmem:[%s5652_s1 + $0x78] ss:$12 sps:$4 sm:$0xff]  }
  0x1a   :  { %3650 = vmatprep.subr.bf16.mxu1 %v3958_v10  ;;  %v3971_v21 = vld [vmem:[%s5652_s1 + $0x7c] ss:$12 sps:$4 sm:$0xff]   ;;  %v3975_v24 = vld [vmem:[%s5652_s1 + $0x80] ss:$12 sps:$4 sm:$0xff]   ;;  %v3978_v26 = vld [vmem:[%s5652_s1 + $0x158] ss:$12 sps:$4 sm:$0xff]  }
  0x1b   :  { %v3976_v25 = vld [vmem:[%s5652_s1 + $0x94] ss:$12 sps:$4 sm:$0xff]   ;;  %v3979_v27 = vld [vmem:[%s5652_s1 + $0x90] ss:$12 sps:$4 sm:$0xff]   ;;  %v3980_v28 = vld [vmem:[%s5652_s1 + $0x98] ss:$12 sps:$4 sm:$0xff]  }
  0x1c   :  { %414 = vmatpush1.bf16.msra.mxu0 %v3959_v11  ;;  %v3981_v29 = vld [vmem:[%s5652_s1 + $0xac] ss:$12 sps:$4 sm:$0xff]   ;;  %v3983_v30 = vld [vmem:[%s5652_s1 + $0x170] ss:$12 sps:$4 sm:$0xff]   ;;  %v3984_v31 = vld [vmem:[%s5652_s1 + $0xa8] ss:$12 sps:$4 sm:$0xff]  }
  0x1d   :  { %3651 = vmatpush3.bf16.msra.mxu1 %v3960_v12  ;;  %415 = vmatprep.subr.bf16.mxu0 %v3961_v13  ;;  %v63_v32 = vld [vmem:[%s5651_s0 + $0x8] sm:$0xff]  ;;  %v3985_v34 = vld [vmem:[%s5652_s1 + $0xb0] ss:$12 sps:$4 sm:$0xff]   ;;  %v62_v37 = vld [vmem:[%s5651_s0] sm:$0xff]  ;;  %vm4404_vm0 = vmmov 0   ;;  %vm3085_vm1 = vcmask 7168  }
  0x1e   :  { %3652 = vmatprep.subr.bf16.mxu1 %v3963_v14  ;;  %v4596_v35 = vpack.c.bf16 %v65_v33, %v63_v32  ;;  %v3986_v36 = vld [vmem:[%s5652_s1 + $0xc4] ss:$12 sps:$4 sm:$0xff]   ;;  %v3988_v41 = vld [vmem:[%s5656_s5] ss:$12 sps:$4 sm:$0xff]   ;;  %v3992_v43 = vld [vmem:[%s5652_s1 + $0xdc] ss:$12 sps:$4 sm:$0xff]  }
  0x1f   :  { %v64_v38 = vld [vmem:[%s5651_s0 + $0x10] sm:$0xff]  ;;  %v3991_v42 = vld [vmem:[%s5652_s1 + $0xc0] ss:$12 sps:$4 sm:$0xff]   ;;  %v3996_v44 = vld [vmem:[%s5656_s5 + $0x1c] ss:$12 sps:$4 sm:$0xff]  }
  0x20   :  { %416 = vmatpush1.bf16.msra.mxu0 %v3964_v15  ;;  %492 = vmatprep.mubr.bf16.mxu1 %v4596_v35  ;;  %v3990_v39 = vld [vmem:[%s5656_s5 + $0x4] ss:$12 sps:$4 sm:$0xff]   ;;  %v4612_v40 = vpack.c.bf16 %v64_v38, %v62_v37  ;;  %v3998_v47 = vld [vmem:[%s5652_s1 + $0xf4] ss:$12 sps:$4 sm:$0xff]   ;;  %v4004_v51 = vld [vmem:[%s5652_s1 + $0x10c] ss:$12 sps:$4 sm:$0xff]  }
  0x21   :  { %3653 = vmatpush3.bf16.msra.mxu1 %v3965_v16  ;;  %417 = vmatprep.subr.bf16.mxu0 %v3966_v17  ;;  %v3994_v45 = vld [vmem:[%s5656_s5 + $0x18] ss:$12 sps:$4 sm:$0xff]   ;;  %v4002_v48 = vld [vmem:[%s5656_s5 + $0x34] ss:$12 sps:$4 sm:$0xff]   ;;  %v4000_v49 = vld [vmem:[%s5656_s5 + $0x30] ss:$12 sps:$4 sm:$0xff]  }
  0x22   :  { %3654 = vmatprep.subr.bf16.mxu1 %v3968_v18  ;;  %441 = vmatprep.mubr.bf16.mxu0 %v4596_v35  ;;  %v3997_v46 = vld [vmem:[%s5652_s1 + $0xd8] ss:$12 sps:$4 sm:$0xff]   ;;  %v4003_v50 = vld [vmem:[%s5652_s1 + $0xf0] ss:$12 sps:$4 sm:$0xff]   ;;  %v4006_v53 = vld [vmem:[%s5656_s5 + $0x48] ss:$12 sps:$4 sm:$0xff]  }
  0x23   :  { %v4008_v52 = vld [vmem:[%s5656_s5 + $0x4c] ss:$12 sps:$4 sm:$0xff]   ;;  %v4009_v54 = vld [vmem:[%s5652_s1 + $0x108] ss:$12 sps:$4 sm:$0xff]   ;;  %v4010_v55 = vld [vmem:[%s5652_s1 + $0x124] ss:$12 sps:$4 sm:$0xff]  }
  0x24   :  { %418 = vmatpush1.bf16.msra.mxu0 %v3969_v19  ;;  %v4014_v56 = vld [vmem:[%s5656_s5 + $0x64] ss:$12 sps:$4 sm:$0xff]   ;;  %v4012_v57 = vld [vmem:[%s5656_s5 + $0x60] ss:$12 sps:$4 sm:$0xff]   ;;  %v4016_v59 = vld [vmem:[%s5652_s1 + $0x13c] ss:$12 sps:$4 sm:$0xff]  }
  0x25   :  { %3655 = vmatpush3.bf16.msra.mxu1 %v3970_v20  ;;  %419 = vmatprep.subr.bf16.mxu0 %v3971_v21  ;;  %v4015_v58 = vld [vmem:[%s5652_s1 + $0x120] ss:$12 sps:$4 sm:$0xff]   ;;  %v4020_v60 = vld [vmem:[%s5656_s5 + $0x7c] ss:$12 sps:$4 sm:$0xff]   ;;  %v4021_v61 = vld [vmem:[%s5652_s1 + $0x138] ss:$12 sps:$4 sm:$0xff]  }
  0x26   :  { %3656 = vmatprep.subr.bf16.mxu1 %v3973_v22  ;;  %v4018_v62 = vld [vmem:[%s5656_s5 + $0x78] ss:$12 sps:$4 sm:$0xff]   ;;  %v4022_v63 = vld [vmem:[%s5652_s1 + $0x154] ss:$12 sps:$4 sm:$0xff]   ;;  %v4024_v1 = vld [vmem:[%s5656_s5 + $0x90] ss:$12 sps:$4 sm:$0xff]  }
  0x27   :  { %v4026_v0 = vld [vmem:[%s5656_s5 + $0x94] ss:$12 sps:$4 sm:$0xff]   ;;  %v4027_v2 = vld [vmem:[%s5652_s1 + $0x150] ss:$12 sps:$4 sm:$0xff]   ;;  %v4028_v3 = vld [vmem:[%s5652_s1 + $0x16c] ss:$12 sps:$4 sm:$0xff]  }
  0x28   :  { %420 = vmatpush1.bf16.msra.mxu0 %v3974_v23  ;;  %v4032_v4 = vld [vmem:[%s5656_s5 + $0xac] ss:$12 sps:$4 sm:$0xff]   ;;  %v4030_v6 = vld [vmem:[%s5656_s5 + $0xa8] ss:$12 sps:$4 sm:$0xff]   ;;  %v4036_v9 = vld [vmem:[%s5656_s5 + $0xc4] ss:$12 sps:$4 sm:$0xff]  }
  0x29   :  { %3657 = vmatpush3.bf16.msra.mxu1 %v3975_v24  ;;  %421 = vmatprep.subr.bf16.mxu0 %v3976_v25  ;;  %v4033_v7 = vld [vmem:[%s5652_s1 + $0x168] ss:$12 sps:$4 sm:$0xff]   ;;  %v4034_v10 = vld [vmem:[%s5656_s5 + $0xc0] ss:$12 sps:$4 sm:$0xff]   ;;  %v4039_v14 = vld [vmem:[%s5656_s5 + $0xd8] ss:$12 sps:$4 sm:$0xff]  }
  0x2a   :  { %3658 = vmatprep.subr.bf16.mxu1 %v3978_v26  ;;  %v4037_v8 = vld [vmem:[%s5656_s5 + $0xc8] ss:$12 sps:$4 sm:$0xff]   ;;  %v4042_v12 = vld [vmem:[%s5656_s5 + $0xe0] ss:$12 sps:$4 sm:$0xff]   ;;  %v4047_v17 = vld [vmem:[%s5656_s5 + $0xf8] ss:$12 sps:$4 sm:$0xff]  }
  0x2b   :  { %v4038_v11 = vld [vmem:[%s5656_s5 + $0x8] ss:$12 sps:$4 sm:$0xff]   ;;  %v4043_v15 = vld [vmem:[%s5656_s5 + $0x20] ss:$12 sps:$4 sm:$0xff]   ;;  %v4044_v22 = vld [vmem:[%s5656_s5 + $0xf0] ss:$12 sps:$4 sm:$0xff]  }
  0x2c   :  { %422 = vmatpush1.bf16.msra.mxu0 %v3979_v27  ;;  %v4041_v13 = vld [vmem:[%s5656_s5 + $0xdc] ss:$12 sps:$4 sm:$0xff]   ;;  %v66_v19 = vld [vmem:[%s5651_s0 + $0x20] sm:$0xff]  ;;  %v4051_v25 = vld [vmem:[%s5656_s5 + $0x10c] ss:$12 sps:$4 sm:$0xff]  }
  0x2d   :  { %3659 = vmatpush3.bf16.msra.mxu1 %v3980_v28  ;;  %423 = vmatprep.subr.bf16.mxu0 %v3981_v29  ;;  %v67_v16 = vld [vmem:[%s5651_s0 + $0x28] sm:$0xff]  ;;  %v4046_v20 = vld [vmem:[%s5656_s5 + $0xf4] ss:$12 sps:$4 sm:$0xff]   ;;  %v4744_v21 = vpack.c.bf16 %v66_v19, %v66_v19  ;;  %v4048_v23 = vld [vmem:[%s5656_s5 + $0x38] ss:$12 sps:$4 sm:$0xff]  }
  0x2e   :  { %3660 = vmatprep.subr.bf16.mxu1 %v3983_v30  ;;  %v4736_v18 = vpack.c.bf16 %v67_v16, %v67_v16  ;;  %v4052_v24 = vld [vmem:[%s5656_s5 + $0x110] ss:$12 sps:$4 sm:$0xff]   ;;  %v4049_v27 = vld [vmem:[%s5656_s5 + $0x108] ss:$12 sps:$4 sm:$0xff]   ;;  %v4054_v30 = vld [vmem:[%s5656_s5 + $0x120] ss:$12 sps:$4 sm:$0xff]  }
  0x2f   :  { %v4053_v26 = vld [vmem:[%s5656_s5 + $0x50] ss:$12 sps:$4 sm:$0xff]   ;;  %v4057_v28 = vld [vmem:[%s5656_s5 + $0x128] ss:$12 sps:$4 sm:$0xff]   ;;  %v4062_v32 = vld [vmem:[%s5656_s5 + $0x140] ss:$12 sps:$4 sm:$0xff]  }
  0x30   :  { %424 = vmatpush1.bf16.msra.mxu0 %v3984_v31  ;;  %v4056_v29 = vld [vmem:[%s5656_s5 + $0x124] ss:$12 sps:$4 sm:$0xff]   ;;  %v4058_v31 = vld [vmem:[%s5656_s5 + $0x68] ss:$12 sps:$4 sm:$0xff]  }
  0x31   :  { %3661 = vmatpush3.bf16.msra.mxu1 %v3985_v34  ;;  %425 = vmatprep.subr.bf16.mxu0 %v3986_v36  ;;  %v4061_v33 = vld [vmem:[%s5656_s5 + $0x13c] ss:$12 sps:$4 sm:$0xff]   ;;  %v4059_v34 = vld [vmem:[%s5656_s5 + $0x138] ss:$12 sps:$4 sm:$0xff]   ;;  %v4066_v37 = vld [vmem:[%s5656_s5 + $0x154] ss:$12 sps:$4 sm:$0xff]  }
  0x32   :  { %854 = vmatprep.subr.bf16.mxu1 %v3990_v39  ;;  %v4067_v36 = vld [vmem:[%s5656_s5 + $0x158] ss:$12 sps:$4 sm:$0xff]   ;;  %v4064_v39 = vld [vmem:[%s5656_s5 + $0x150] ss:$12 sps:$4 sm:$0xff]   ;;  %v4134_v19 = vld [vmem:[%s5657_s6 + $0x68] ss:$12 sps:$4 sm:$0xff]  }
  0x33   :  { %v4068_v38 = vld [vmem:[%s5656_s5 + $0x98] ss:$12 sps:$4 sm:$0xff]   ;;  %v4133_v16 = vld [vmem:[%s5657_s6 + $0x50] ss:$12 sps:$4 sm:$0xff]  }
  0x34   :  { %493 = vmatmul.mubr.bf16.vlgmr.msra.gmra.mrb[0].mxu1 %v4612_v40  ;;  %426 = vmatpush1.bf16.msra.mxu0 %v3991_v42  ;;  %v4071_v42 = vld [vmem:[%s5656_s5 + $0x16c] ss:$12 sps:$4 sm:$0xff]  }
  0x35   :  { %855 = vmatpush1.bf16.msra.mxu1 %v3988_v41  ;;  %427 = vmatprep.subr.bf16.mxu0 %v3992_v43  ;;  %v4072_v41 = vld [vmem:[%s5656_s5 + $0x170] ss:$12 sps:$4 sm:$0xff]   ;;  %v4069_v43 = vld [vmem:[%s5656_s5 + $0x168] ss:$12 sps:$4 sm:$0xff]  }
  0x36   :  { %856 = vmatprep.subr.bf16.mxu1 %v3996_v44  ;;  %500 = vmatprep.mubr.bf16.mxu1 %v4736_v18  ;;  %v4073_v44 = vld [vmem:[%s5656_s5 + $0xb0] ss:$12 sps:$4 sm:$0xff]  }
  0x38   :  { %428 = vmatpush1.bf16.msra.mxu0 %v3997_v46  ;;  %v4826_v46 = vld [vmem:[%s5653_s2] ss:$12 sps:$4 sm:$0xff]  }
  0x39   :  { %857 = vmatpush1.bf16.msra.mxu1 %v3994_v45  ;;  %429 = vmatprep.subr.bf16.mxu0 %v3998_v47  ;;  %v4821_v45 = vld [vmem:[%s5653_s2 + $0x4] ss:$12 sps:$4 sm:$0xff]   ;;  %v4077_v47 = vld [vmem:[%s5653_s2 + $0x8] ss:$12 sps:$4 sm:$0xff]  }
  0x3a   :  { %858 = vmatprep.subr.bf16.mxu1 %v4002_v48  ;;  %v4835_v48 = vld [vmem:[%s5653_s2 + $0x1c] ss:$12 sps:$4 sm:$0xff]  }
  0x3c   :  { %430 = vmatpush1.bf16.msra.mxu0 %v4003_v50  ;;  %501 = vmatmul.mubr.bf16.gmra.mrb[4].mxu1 %v4744_v21  ;;  %v4844_v50 = vld [vmem:[%s5653_s2 + $0x18] ss:$12 sps:$4 sm:$0xff]  }
  0x3d   :  { %859 = vmatpush1.bf16.msra.mxu1 %v4000_v49  ;;  %431 = vmatprep.subr.bf16.mxu0 %v4004_v51  ;;  %v4403_v49 = vmov 0.0   ;;  %v4081_v51 = vld [vmem:[%s5653_s2 + $0x20] ss:$12 sps:$4 sm:$0xff]  }
  0x3e   :  { %860 = vmatprep.subr.bf16.mxu1 %v4008_v52  ;;  %886 = vmatprep.mubr.bf16.mxu1 %v4596_v35  ;;  %v4853_v52 = vld [vmem:[%s5653_s2 + $0x34] ss:$12 sps:$4 sm:$0xff]  }
  0x40   :  { %432 = vmatpush1.bf16.msra.mxu0 %v4009_v54  ;;  %v4871_v54 = vld [vmem:[%s5653_s2 + $0x4c] ss:$12 sps:$4 sm:$0xff]  }
  0x41   :  { %861 = vmatpush1.bf16.msra.mxu1 %v4006_v53  ;;  %433 = vmatprep.subr.bf16.mxu0 %v4010_v55  ;;  %v4085_v53 = vld [vmem:[%s5653_s2 + $0x38] ss:$12 sps:$4 sm:$0xff]   ;;  %v4877_v55 = vld [vmem:[%s5653_s2 + $0x48] ss:$12 sps:$4 sm:$0xff]  }
  0x42   :  { %862 = vmatprep.subr.bf16.mxu1 %v4014_v56  ;;  %v4089_v56 = vld [vmem:[%s5653_s2 + $0x50] ss:$12 sps:$4 sm:$0xff]  }
  0x44   :  { %434 = vmatpush1.bf16.msra.mxu0 %v4015_v58  ;;  %v4896_v58 = vld [vmem:[%s5653_s2 + $0x60] ss:$12 sps:$4 sm:$0xff]  }
  0x45   :  { %863 = vmatpush1.bf16.msra.mxu1 %v4012_v57  ;;  %435 = vmatprep.subr.bf16.mxu0 %v4016_v59  ;;  %v4889_v57 = vld [vmem:[%s5653_s2 + $0x64] ss:$12 sps:$4 sm:$0xff]   ;;  %v4093_v59 = vld [vmem:[%s5653_s2 + $0x68] ss:$12 sps:$4 sm:$0xff]  }
  0x46   :  { %864 = vmatprep.subr.bf16.mxu1 %v4020_v60  ;;  %v4908_v60 = vld [vmem:[%s5653_s2 + $0x7c] ss:$12 sps:$4 sm:$0xff]  }
  0x48   :  { %436 = vmatpush1.bf16.msra.mxu0 %v4021_v61  ;;  %v4914_v61 = vld [vmem:[%s5653_s2 + $0x78] ss:$12 sps:$4 sm:$0xff]  }
  0x49   :  { %865 = vmatpush1.bf16.msra.mxu1 %v4018_v62  ;;  %437 = vmatprep.subr.bf16.mxu0 %v4022_v63  ;;  %v4097_v62 = vld [vmem:[%s5653_s2 + $0x80] ss:$12 sps:$4 sm:$0xff]  }
  0x4a   :  { %866 = vmatprep.subr.bf16.mxu1 %v4026_v0  ;;  %v4922_v63 = vld [vmem:[%s5653_s2 + $0x94] ss:$12 sps:$4 sm:$0xff]   ;;  %v4930_v0 = vld [vmem:[%s5653_s2 + $0x90] ss:$12 sps:$4 sm:$0xff]  }
  0x4c   :  { %438 = vmatpush1.bf16.msra.mxu0 %v4027_v2  ;;  %v4938_v2 = vld [vmem:[%s5653_s2 + $0xac] ss:$12 sps:$4 sm:$0xff]  }
  0x4d   :  { %867 = vmatpush1.bf16.msra.mxu1 %v4024_v1  ;;  %439 = vmatprep.subr.bf16.mxu0 %v4028_v3  ;;  %v4101_v1 = vld [vmem:[%s5653_s2 + $0x98] ss:$12 sps:$4 sm:$0xff]   ;;  %v4946_v3 = vld [vmem:[%s5653_s2 + $0xa8] ss:$12 sps:$4 sm:$0xff]  }
  0x4e   :  { %868 = vmatprep.subr.bf16.mxu1 %v4032_v4  ;;  %v4105_v4 = vld [vmem:[%s5653_s2 + $0xb0] ss:$12 sps:$4 sm:$0xff]  }
  0x50   :  { %440 = vmatpush1.bf16.msra.mxu0 %v4033_v7  ;;  %v4127_v7 = vld [vmem:[%s5657_s6 + $0x8] ss:$12 sps:$4 sm:$0xff]  }
  0x51   :  { %869 = vmatpush1.bf16.msra.mxu1 %v4030_v6  ;;  %3674 = vmatprep.subr.bf16.mxu0 %v4037_v8  ;;  %v4955_v6 = vld [vmem:[%s5657_s6 + $0x4] ss:$12 sps:$4 sm:$0xff]   ;;  %v4965_v8 = vld [vmem:[%s5657_s6] ss:$12 sps:$4 sm:$0xff]  }
  0x52   :  { %870 = vmatprep.subr.bf16.mxu1 %v4036_v9  ;;  %v4971_v9 = vld [vmem:[%s5657_s6 + $0x1c] ss:$12 sps:$4 sm:$0xff]  }
  0x53   :  { %442 = vmatmul.mubr.bf16.vlgmr.msra.gmra.mrb[0].mxu0 %v4612_v40 }
  0x54   :  { %3675 = vmatpush3.bf16.msra.mxu0 %v4038_v11  ;;  %451 = vmatprep.mubr.bf16.mxu0 %v4736_v18  ;;  %v4982_v11 = vld [vmem:[%s5657_s6 + $0x18] ss:$12 sps:$4 sm:$0xff]  }
  0x55   :  { %871 = vmatpush1.bf16.msra.mxu1 %v4034_v10  ;;  %3676 = vmatprep.subr.bf16.mxu0 %v4042_v12  ;;  %v4131_v10 = vld [vmem:[%s5657_s6 + $0x20] ss:$12 sps:$4 sm:$0xff]  }
  0x56   :  { %872 = vmatprep.subr.bf16.mxu1 %v4041_v13  ;;  %v4988_v12 = vld [vmem:[%s5657_s6 + $0x34] ss:$12 sps:$4 sm:$0xff]   ;;  %v4132_v13 = vld [vmem:[%s5657_s6 + $0x38] ss:$12 sps:$4 sm:$0xff]  }
  0x58   :  { %3677 = vmatpush3.bf16.msra.mxu0 %v4043_v15  ;;  %v5007_v15 = vld [vmem:[%s5657_s6 + $0x4c] ss:$12 sps:$4 sm:$0xff]  }
  0x59   :  { %873 = vmatpush1.bf16.msra.mxu1 %v4039_v14  ;;  %3678 = vmatprep.subr.bf16.mxu0 %v4047_v17  ;;  %v5000_v14 = vld [vmem:[%s5657_s6 + $0x30] ss:$12 sps:$4 sm:$0xff]   ;;  %v5018_v17 = vld [vmem:[%s5657_s6 + $0x48] ss:$12 sps:$4 sm:$0xff]  }
  0x5a   :  { %874 = vmatprep.subr.bf16.mxu1 %v4046_v20  ;;  %v5034_v20 = vld [vmem:[%s5657_s6 + $0x60] ss:$12 sps:$4 sm:$0xff]  }
  0x5b   :  { %452 = vmatmul.mubr.bf16.gmra.mrb[4].mxu0 %v4744_v21 }
  0x5c   :  { %3679 = vmatpush3.bf16.msra.mxu0 %v4048_v23  ;;  %937 = vmatprep.mubr.bf16.mxu0 %v4596_v35  ;;  %v4063_v35 = vld [vmem:[%s5656_s5 + $0x80] ss:$12 sps:$4 sm:$0xff]   ;;  %v5050_v23 = vld [vmem:[%s5657_s6 + $0x78] ss:$12 sps:$4 sm:$0xff]  }
  0x5d   :  { %875 = vmatpush1.bf16.msra.mxu1 %v4044_v22  ;;  %3680 = vmatprep.subr.bf16.mxu0 %v4052_v24  ;;  %v4135_v22 = vld [vmem:[%s5657_s6 + $0x80] ss:$12 sps:$4 sm:$0xff]  }
  0x5e   :  { %876 = vmatprep.subr.bf16.mxu1 %v4051_v25  ;;  %v5055_v24 = vld [vmem:[%s5657_s6 + $0x94] ss:$12 sps:$4 sm:$0xff]   ;;  %v4136_v25 = vld [vmem:[%s5657_s6 + $0x98] ss:$12 sps:$4 sm:$0xff]  }
  0x60   :  { %3681 = vmatpush3.bf16.msra.mxu0 %v4053_v26  ;;  %v5066_v26 = vld [vmem:[%s5657_s6 + $0x90] ss:$12 sps:$4 sm:$0xff]  }
  0x61   :  { %877 = vmatpush1.bf16.msra.mxu1 %v4049_v27  ;;  %3682 = vmatprep.subr.bf16.mxu0 %v4057_v28  ;;  %v5071_v27 = vld [vmem:[%s5657_s6 + $0xac] ss:$12 sps:$4 sm:$0xff]   ;;  %v4137_v28 = vld [vmem:[%s5657_s6 + $0xb0] ss:$12 sps:$4 sm:$0xff]  }
  0x62   :  { %878 = vmatprep.subr.bf16.mxu1 %v4056_v29  ;;  %v5082_v29 = vld [vmem:[%s5657_s6 + $0xa8] ss:$12 sps:$4 sm:$0xff]  }
  0x64   :  { %3683 = vmatpush3.bf16.msra.mxu0 %v4058_v31  ;;  %v4139_v31 = vld [vmem:[%s5653_s2 + $0x20] ss:$12 sps:$4 sm:$0xff]  }
  0x65   :  { %879 = vmatpush1.bf16.msra.mxu1 %v4054_v30  ;;  %3684 = vmatprep.subr.bf16.mxu0 %v4062_v32  ;;  %v4138_v30 = vld [vmem:[%s5653_s2 + $0x8] ss:$12 sps:$4 sm:$0xff]   ;;  %v138_v32 = vlaneseq }
  0x66   :  { %880 = vmatprep.subr.bf16.mxu1 %v4061_v33  ;;  %v4140_v33 = vld [vmem:[%s5653_s2 + $0x38] ss:$12 sps:$4 sm:$0xff]  }
  0x68   :  { %3685 = vmatpush3.bf16.msra.mxu0 %v4063_v35  ;;  %v4141_v35 = vld [vmem:[%s5653_s2 + $0x50] ss:$12 sps:$4 sm:$0xff]  }
  0x69   :  { %881 = vmatpush1.bf16.msra.mxu1 %v4059_v34  ;;  %3686 = vmatprep.subr.bf16.mxu0 %v4067_v36  ;;  %v139_v34 = vshrl.u32 %v138_v32, 7 }
  0x6a   :  { %882 = vmatprep.subr.bf16.mxu1 %v4066_v37 }
  0x6b   :  { %v148_v37 = vsub.s32 2, %v139_v34 }
  0x6c   :  { %3687 = vmatpush3.bf16.msra.mxu0 %v4068_v38  ;;  %v136_v38 = vld [vmem:[%s5654_s3] sm:$0x7] }
  0x6d   :  { %883 = vmatpush1.bf16.msra.mxu1 %v4064_v39  ;;  %3688 = vmatprep.subr.bf16.mxu0 %v4072_v41  ;;  %v4142_v41 = vld [vmem:[%s5653_s2 + $0x68] ss:$12 sps:$4 sm:$0xff]  }
  0x6e   :  { %884 = vmatprep.subr.bf16.mxu1 %v4071_v42 }
  0x70   :  { %3689 = vmatpush3.bf16.msra.mxu0 %v4073_v44 }
  0x71   :  { %885 = vmatpush1.bf16.msra.mxu1 %v4069_v43  ;;  %1128 = vmatprep.subr.bf16.mxu0 %v4821_v45 }
  0x72   :  { %3806 = vmatprep.subr.bf16.mxu1 %v4403_v49 }
  0x73   :  { %938 = vmatmul.mubr.bf16.vlgmr.msra.gmra.mrb[8].mxu0 %v4612_v40 }
  0x74   :  { %887 = vmatmul.mubr.bf16.vlgmr.msra.gmra.mrb[8].mxu1 %v4612_v40  ;;  %1129 = vmatpush1.bf16.msra.mxu0 %v4826_v46  ;;  %v4862_v40 = vld [vmem:[%s5653_s2 + $0x30] ss:$12 sps:$4 sm:$0xff]  }
  0x75   :  { %3807 = vmatpush3.bf16.msra.mxu1 %v4077_v47  ;;  %1130 = vmatprep.subr.bf16.mxu0 %v4835_v48  ;;  %v4143_v47 = vld [vmem:[%s5653_s2 + $0x80] ss:$12 sps:$4 sm:$0xff]  }
  0x76   :  { %3808 = vmatprep.subr.bf16.mxu1 %v4403_v49  ;;  %945 = vmatprep.mubr.bf16.mxu0 %v4736_v18 }
  0x77   :  { %896 = vmatprep.mubr.bf16.mxu1 %v4736_v18  ;;  %v5023_v18 = vld [vmem:[%s5657_s6 + $0x64] ss:$12 sps:$4 sm:$0xff]  }
  0x78   :  { %1131 = vmatpush1.bf16.msra.mxu0 %v4844_v50 }
  0x79   :  { %3809 = vmatpush3.bf16.msra.mxu1 %v4081_v51  ;;  %1132 = vmatprep.subr.bf16.mxu0 %v4853_v52  ;;  %v4145_v51 = vld [vmem:[%s5653_s2 + $0xb0] ss:$12 sps:$4 sm:$0xff]  }
  0x7a   :  { %3810 = vmatprep.subr.bf16.mxu1 %v4403_v49 }
  0x7b   :  { %946 = vmatmul.mubr.bf16.gmra.mrb[12].mxu0 %v4744_v21 }
  0x7c   :  { %1133 = vmatpush1.bf16.msra.mxu0 %v4862_v40  ;;  %897 = vmatmul.mubr.bf16.gmra.mrb[12].mxu1 %v4744_v21  ;;  %v5039_v21 = vld [vmem:[%s5657_s6 + $0x7c] ss:$12 sps:$4 sm:$0xff]  }
  0x7d   :  { %3811 = vmatpush3.bf16.msra.mxu1 %v4085_v53  ;;  %1134 = vmatprep.subr.bf16.mxu0 %v4871_v54 }
  0x7e   :  { %3812 = vmatprep.subr.bf16.mxu1 %v4403_v49  ;;  %1160 = vmatprep.mubr.bf16.mxu0 %v4402_v5 }
  0x7f   :  { %3822 = vmatprep.mubr.msk.bf16.mxu1 %vm4404_vm0, %v4403_v49 }
  0x80   :  { %1135 = vmatpush1.bf16.msra.mxu0 %v4877_v55 }
  0x81   :  { %3813 = vmatpush3.bf16.msra.mxu1 %v4089_v56  ;;  %1136 = vmatprep.subr.bf16.mxu0 %v4889_v57 }
  0x82   :  { %3814 = vmatprep.subr.bf16.mxu1 %v4403_v49 }
  0x84   :  { %1137 = vmatpush1.bf16.msra.mxu0 %v4896_v58 }
  0x85   :  { %3815 = vmatpush3.bf16.msra.mxu1 %v4093_v59  ;;  %1138 = vmatprep.subr.bf16.mxu0 %v4908_v60 }
  0x86   :  { %3816 = vmatprep.subr.bf16.mxu1 %v4403_v49 }
  0x88   :  { %1139 = vmatpush1.bf16.msra.mxu0 %v4914_v61 }
  0x89   :  { %3817 = vmatpush3.bf16.msra.mxu1 %v4097_v62  ;;  %1140 = vmatprep.subr.bf16.mxu0 %v4922_v63  ;;  %v5163_v62 = vsub.s32 0, %v139_v34 }
  0x8a   :  { %3818 = vmatprep.subr.bf16.mxu1 %v4403_v49 }
  0x8c   :  { %1141 = vmatpush1.bf16.msra.mxu0 %v4930_v0 }
  0x8d   :  { %3819 = vmatpush3.bf16.msra.mxu1 %v4101_v1  ;;  %1142 = vmatprep.subr.bf16.mxu0 %v4938_v2 }
  0x8e   :  { %3820 = vmatprep.subr.bf16.mxu1 %v4403_v49 }
  0x90   :  { %1143 = vmatpush1.bf16.msra.mxu0 %v4946_v3 }
  0x91   :  { %3821 = vmatpush3.bf16.msra.mxu1 %v4105_v4  ;;  %3826 = vmatprep.subr.bf16.mxu0 %v4403_v49 }
  0x92   :  { %1404 = vmatprep.subr.bf16.mxu1 %v4955_v6 }
  0x93   :  { %1161 = vmatmul.mubr.bf16.vlgmr.msra.gmra.mrb[16].mxu0 %v4402_v5 }
  0x94   :  { %3823 = vmatmul.mubr.bf16.vlgmr.msra.gmra.mrb[16].mxu1 %v4402_v5  ;;  %3827 = vmatpush3.bf16.msra.mxu0 %v4127_v7 }
  0x95   :  { %1405 = vmatpush1.bf16.msra.mxu1 %v4965_v8  ;;  %3828 = vmatprep.subr.bf16.mxu0 %v4403_v49 }
  0x96   :  { %1406 = vmatprep.subr.bf16.mxu1 %v4971_v9  ;;  %1436 = vmatprep.mubr.bf16.mxu1 %v4402_v5 }
  0x97   :  { %3842 = vmatprep.mubr.msk.bf16.mxu0 %vm4404_vm0, %v4403_v49 }
  0x98   :  { %3829 = vmatpush3.bf16.msra.mxu0 %v4131_v10 }
  0x99   :  { %1407 = vmatpush1.bf16.msra.mxu1 %v4982_v11  ;;  %3830 = vmatprep.subr.bf16.mxu0 %v4403_v49 }
  0x9a   :  { %1408 = vmatprep.subr.bf16.mxu1 %v4988_v12 }
  0x9c   :  { %3831 = vmatpush3.bf16.msra.mxu0 %v4132_v13 }
  0x9d   :  { %1409 = vmatpush1.bf16.msra.mxu1 %v5000_v14  ;;  %3832 = vmatprep.subr.bf16.mxu0 %v4403_v49 }
  0x9e   :  { %1410 = vmatprep.subr.bf16.mxu1 %v5007_v15 }
  0xa0   :  { %3833 = vmatpush3.bf16.msra.mxu0 %v4133_v16 }
  0xa1   :  { %1411 = vmatpush1.bf16.msra.mxu1 %v5018_v17  ;;  %3834 = vmatprep.subr.bf16.mxu0 %v4403_v49 }
  0xa2   :  { %1412 = vmatprep.subr.bf16.mxu1 %v5023_v18 }
  0xa4   :  { %3835 = vmatpush3.bf16.msra.mxu0 %v4134_v19 }
  0xa5   :  { %1413 = vmatpush1.bf16.msra.mxu1 %v5034_v20  ;;  %3836 = vmatprep.subr.bf16.mxu0 %v4403_v49 }
  0xa6   :  { %1414 = vmatprep.subr.bf16.mxu1 %v5039_v21 }
  0xa8   :  { %3837 = vmatpush3.bf16.msra.mxu0 %v4135_v22 }
  0xa9   :  { %1415 = vmatpush1.bf16.msra.mxu1 %v5050_v23  ;;  %3838 = vmatprep.subr.bf16.mxu0 %v4403_v49 }
  0xaa   :  { %1416 = vmatprep.subr.bf16.mxu1 %v5055_v24 }
  0xac   :  { %3839 = vmatpush3.bf16.msra.mxu0 %v4136_v25 }
  0xad   :  { %1417 = vmatpush1.bf16.msra.mxu1 %v5066_v26  ;;  %3840 = vmatprep.subr.bf16.mxu0 %v4403_v49 }
  0xae   :  { %1418 = vmatprep.subr.bf16.mxu1 %v5071_v27 }
  0xb0   :  { %3841 = vmatpush3.bf16.msra.mxu0 %v4137_v28 }
  0xb1   :  { %1419 = vmatpush1.bf16.msra.mxu1 %v5082_v29  ;;  %1689 = vmatprep.subr.bf16.mxu0 %v4821_v45  ;;  %v5135_v45 = vrot.slane %v136_v38, %v148_v37 }
  0xb2   :  { %3846 = vmatprep.subr.bf16.mxu1 %v4403_v49 }
  0xb3   :  { %3843 = vmatmul.mubr.bf16.vlgmr.msra.gmra.mrb[20].mxu0 %v4402_v5 }
  0xb4   :  { %1437 = vmatmul.mubr.bf16.vlgmr.msra.gmra.mrb[12].mxu1 %v4402_v5  ;;  %1690 = vmatpush1.bf16.msra.mxu0 %v4826_v46 }
  0xb5   :  { %1691 = vmatprep.subr.bf16.mxu0 %v4835_v48  ;;  %1721 = vmatprep.mubr.bf16.mxu0 %v4402_v5 }
  0xb6   :  { %3862 = vmatprep.mubr.msk.bf16.mxu1 %vm4404_vm0, %v4403_v49  ;;  %3847 = vmatpush3.bf16.msra.mxu1 %v4138_v30 }
  0xb7   :  { %3848 = vmatprep.subr.bf16.mxu1 %v4403_v49 }
  0xb8   :  { %1692 = vmatpush1.bf16.msra.mxu0 %v4844_v50  ;;  %v4144_v50 = vld [vmem:[%s5653_s2 + $0x98] ss:$12 sps:$4 sm:$0xff]  }
  0xb9   :  { %1693 = vmatprep.subr.bf16.mxu0 %v4853_v52 }
  0xba   :  { %3849 = vmatpush3.bf16.msra.mxu1 %v4139_v31 }
  0xbb   :  { %3850 = vmatprep.subr.bf16.mxu1 %v4403_v49 }
  0xbc   :  { %1694 = vmatpush1.bf16.msra.mxu0 %v4862_v40 }
  0xbd   :  { %1695 = vmatprep.subr.bf16.mxu0 %v4871_v54 }
  0xbe   :  { %3851 = vmatpush3.bf16.msra.mxu1 %v4140_v33 }
  0xbf   :  { %3852 = vmatprep.subr.bf16.mxu1 %v4403_v49 }
  0xc0   :  { %1696 = vmatpush1.bf16.msra.mxu0 %v4877_v55 }
  0xc1   :  { %1697 = vmatprep.subr.bf16.mxu0 %v4889_v57 }
  0xc2   :  { %3853 = vmatpush3.bf16.msra.mxu1 %v4141_v35 }
  0xc3   :  { %3854 = vmatprep.subr.bf16.mxu1 %v4403_v49 }
  0xc4   :  { %1698 = vmatpush1.bf16.msra.mxu0 %v4896_v58 }
  0xc5   :  { %1699 = vmatprep.subr.bf16.mxu0 %v4908_v60 }
  0xc6   :  { %3855 = vmatpush3.bf16.msra.mxu1 %v4142_v41 }
  0xc7   :  { %3856 = vmatprep.subr.bf16.mxu1 %v4403_v49 }
  0xc8   :  { %1700 = vmatpush1.bf16.msra.mxu0 %v4914_v61  ;;  %v581_v61 = vld [vmem:[%s5658_s7] sm:$0x7] }
  0xc9   :  { %1701 = vmatprep.subr.bf16.mxu0 %v4922_v63  ;;  %v5165_v63 = vsub.s32 1, %v139_v34 }
  0xca   :  { %3857 = vmatpush3.bf16.msra.mxu1 %v4143_v47 }
  0xcb   :  { %3858 = vmatprep.subr.bf16.mxu1 %v4403_v49  ;;  %v5169_v1 = vrot.slane %v581_v61, %v5165_v63 }
  0xcc   :  { %1702 = vmatpush1.bf16.msra.mxu0 %v4930_v0  ;;  %v586_v0 = vrot.slane %v581_v61, %v5163_v62 }
  0xcd   :  { %1703 = vmatprep.subr.bf16.mxu0 %v4938_v2 }
  0xce   :  { %3859 = vmatpush3.bf16.msra.mxu1 %v4144_v50 }
  0xcf   :  { %3860 = vmatprep.subr.bf16.mxu1 %v4403_v49 }
  0xd0   :  { %1704 = vmatpush1.bf16.msra.mxu0 %v4946_v3  ;;  %v5171_v3 = vrot.slane %v581_v61, %v148_v37 }
  0xd1   :  { %1965 = vmatprep.subr.bf16.mxu0 %v4955_v6 }
  0xd2   :  { %3861 = vmatpush3.bf16.msra.mxu1 %v4145_v51 }
  0xd3   :  { %3866 = vmatprep.subr.bf16.mxu1 %v4403_v49 }
 0x107   :  { %v3662_v36 = vpop.f32.mrb[0].mxu1 }
 0x108   :  { %v3663_v39 = vpop.f32.mrb[1].mxu1 }
 0x109   :  { %v5133_v42 = vadd.f32 %v3663_v39, %v3662_v36  ;;  %v3665_v43 = vpop.f32.mrb[2].mxu1 }
 0x10a   :  { %v3666_v44 = vpop.f32.mrb[3].mxu1 }
 0x10b   :  { %v3667_v46 = vadd.f32 %v3666_v44, %v3665_v43  ;;  %v5192_v43 = vrot.slane %v136_v38, %v5163_v62  ;;  %v5195_v44 = vrot.slane %v136_v38, %v5165_v63 }
 0x10d   :  { %v5142_v48 = vadd.f32 %v3667_v46, %v5135_v45 }
 0x10f   :  { %v3668_v55 = vpop.f32.mrb[4].mxu1 }
 0x110   :  { %v3669_v56 = vpop.f32.mrb[5].mxu1 }
 0x111   :  { %v3670_v57 = vadd.f32 %v3669_v56, %v3668_v55  ;;  %v3671_v58 = vpop.f32.mrb[6].mxu1 }
 0x112   :  { %v3672_v59 = vpop.f32.mrb[7].mxu1 }
 0x113   :  { %v5158_v60 = vadd.f32 %v3670_v57, %v5135_v45 }
 0x126   :  { %v443_v52 = vpop.f32.mrb[0].mxu0 }
 0x127   :  { %v445_v40 = vpop.f32.mrb[1].mxu0  ;;  %v444_v46 = vadd.f32 %v443_v52, %v5192_v43 }
 0x128   :  { %v5153_v53 = vpop.f32.mrb[2].mxu0  ;;  %v446_v47 = vadd.f32 %v445_v40, %v5195_v44  ;;  %v5202_v40 = vld [vmem:[%s5655_s4] ss:$0 sm:$0xff] }
 0x129   :  { %v5155_v54 = vpop.f32.mrb[3].mxu0 }
 0x146   :  { %v3690_v2 = vpop.f32.mrb[8].mxu0 }
 0x147   :  { %v888_v4 = vpop.f32.mrb[8].mxu1  ;;  %v3691_v6 = vpop.f32.mrb[9].mxu0 }
 0x148   :  { %v5173_v7 = vadd.f32 %v888_v4, %v586_v0  ;;  %v890_v10 = vpop.f32.mrb[9].mxu1  ;;  %v3692_v13 = vadd.f32 %v3691_v6, %v3690_v2  ;;  %v3693_v16 = vpop.f32.mrb[10].mxu0 }
 0x149   :  { %v5176_v19 = vadd.f32 %v890_v10, %v5169_v1  ;;  %v892_v22 = vpop.f32.mrb[10].mxu1  ;;  %v3694_v25 = vpop.f32.mrb[11].mxu0 }
 0x14a   :  { %v5179_v28 = vadd.f32 %v3692_v13, %v5171_v3  ;;  %v5181_v30 = vadd.f32 %v892_v22, %v586_v0  ;;  %v894_v31 = vpop.f32.mrb[11].mxu1  ;;  %v3695_v32 = vadd.f32 %v3694_v25, %v3693_v16 }
 0x14b   :  { %v5184_v33 = vadd.f32 %v894_v31, %v5169_v1  ;;  %v495_v31 = vadd.f32 %v5133_v42, %v5135_v45 }
 0x14c   :  { %v5187_v34 = vadd.f32 %v3695_v32, %v5171_v3 }
 0x14e   :  { %v3696_v35 = vpop.f32.mrb[12].mxu0 }
 0x14f   :  { %v3697_v36 = vpop.f32.mrb[13].mxu0 }
 0x150   :  { %v5189_v37 = vadd.f32 %v3697_v36, %v3696_v35  ;;  %v3699_v39 = vpop.f32.mrb[14].mxu0 }
 0x151   :  { %v3700_v41 = vpop.f32.mrb[15].mxu0 }
 0x166   :  { %v1162_v50 = vpop.f32.mrb[16].mxu0 }
 0x167   :  { %v1209_v51 = vadd.f32 %v1162_v50, %v444_v46  ;;  %v1203_v55 = vpop.f32.mrb[16].mxu1  ;;  %v1164_v56 = vpop.f32.mrb[17].mxu0 }
 0x168   :  { %v1216_v57 = vadd.f32 %v1164_v56, %v446_v47  ;;  %v3824_v58 = vpop.f32.mrb[17].mxu1  ;;  %v1166_v59 = vpop.f32.mrb[18].mxu0  ;;  %v1230_v22 = vadd.f32 %v5202_v40, %v1203_v55 }
 0x169   :  { %v3443_v61 = vmul.f32 -1.442695, %v1209_v51  ;;  %v1206_v2 = vpop.f32.mrb[18].mxu1  ;;  %v1167_v4 = vpop.f32.mrb[19].mxu0 }
 0x16a   :  { %v3825_v6 = vpop.f32.mrb[19].mxu1  ;;  %v3444_v10 = vmul.f32 -1.442695, %v1216_v57 }
 0x16b   :  { %4289 = vpow2.f32 %v3443_v61 }
 0x16c   :  { %4291 = vpow2.f32 %v3444_v10 }
 0x175   :  { %v4290_v38 = vpop.eup %4289 }
 0x176   :  { %v1213_v13 = vadd.f32 1.0, %v4290_v38  ;;  %v4292_v52 = vpop.eup %4291 }
 0x177   :  { %v1220_v16 = vadd.f32 1.0, %v4292_v52 }
 0x178   :  { %4293 = vrcp.f32 %v1213_v13 }
 0x179   :  { %4295 = vrcp.f32 %v1220_v16  ;;  %v5227_v16 = vld [vmem:[%s5659_s8] ss:$0 sm:$0xff] }
 0x182   :  { %v4294_v25 = vpop.eup %4293 }
 0x183   :  { %v1231_v32 = vmul.f32 %v4294_v25, %v1230_v22  ;;  %v4296_v59 = vpop.eup %4295  ;;  %v4149_v25 = vld [vmem:[%s5657_s6 + $0x50] ss:$12 sps:$4 sm:$0xff]  }
 0x184   :  { %v1234_v42 = vsub.f32 1.0, %v4296_v59  ;;  %v1236_v2 = vmul.f32 0.0, %v4296_v59  ;;  %v4164_v59 = vld [vmem:[%s5653_s2 + $0x68] ss:$12 sps:$4 sm:$0xff]  }
 0x185   :  { %v1232_v35 = vadd.f32 %v1231_v32, %v495_v31 }
 0x186   :  { %v1479_v36 = vpop.f32.mrb[20].mxu0 }
 0x187   :  { %4297 = vtanh.f32 %v1232_v35  ;;  %v1438_v39 = vpop.f32.mrb[12].mxu1  ;;  %v3844_v41 = vpop.f32.mrb[21].mxu0  ;;  %v1506_v22 = vadd.f32 %v5227_v16, %v1479_v36  ;;  %v4157_v35 = vld [vmem:[%s5653_s2 + $0x8] ss:$12 sps:$4 sm:$0xff]  }
 0x188   :  { %v3928_v46 = vadd.f32 %v1438_v39, %v586_v0  ;;  %v1440_v47 = vpop.f32.mrb[13].mxu1  ;;  %v1482_v50 = vpop.f32.mrb[22].mxu0  ;;  %v4146_v0 = vld [vmem:[%s5657_s6 + $0x8] ss:$12 sps:$4 sm:$0xff]   ;;  %v4158_v39 = vld [vmem:[%s5653_s2 + $0x20] ss:$12 sps:$4 sm:$0xff]  }
 0x189   :  { %v1442_v51 = vpop.f32.mrb[14].mxu1  ;;  %v3845_v56 = vpop.f32.mrb[23].mxu0  ;;  %v3929_v55 = vadd.f32 %v1440_v47, %v5169_v1  ;;  %v4147_v1 = vld [vmem:[%s5657_s6 + $0x20] ss:$12 sps:$4 sm:$0xff]   ;;  %v4369_v36 = vld [vmem:[%s5653_s2 + $0x1c] ss:$12 sps:$4 sm:$0xff]  }
 0x18a   :  { %v3470_v57 = vmul.f32 -1.442695, %v3928_v46  ;;  %v1443_v58 = vpop.f32.mrb[15].mxu1  ;;  %v4370_v41 = vld [vmem:[%s5653_s2 + $0x18] ss:$12 sps:$4 sm:$0xff]  }
 0x18b   :  { %v3471_v61 = vmul.f32 -1.442695, %v3929_v55  ;;  %v4371_v46 = vld [vmem:[%s5653_s2 + $0x34] ss:$12 sps:$4 sm:$0xff]   ;;  %v4159_v47 = vld [vmem:[%s5653_s2 + $0x38] ss:$12 sps:$4 sm:$0xff]  }
 0x18c   :  { %4299 = vpow2.f32 %v3470_v57  ;;  %v4372_v50 = vld [vmem:[%s5653_s2 + $0x30] ss:$12 sps:$4 sm:$0xff]   ;;  %v4373_v51 = vld [vmem:[%s5653_s2 + $0x4c] ss:$12 sps:$4 sm:$0xff]   ;;  %v4374_v57 = vld [vmem:[%s5653_s2 + $0x48] ss:$12 sps:$4 sm:$0xff]  }
 0x18d   :  { %4301 = vpow2.f32 %v3471_v61  ;;  %v4160_v56 = vld [vmem:[%s5653_s2 + $0x50] ss:$12 sps:$4 sm:$0xff]   ;;  %v4161_v55 = vld [vmem:[%s5653_s2 + $0x60] ss:$12 sps:$4 sm:$0xff]  }
 0x18e   :  { %v4163_v58 = vld [vmem:[%s5653_s2 + $0x64] ss:$12 sps:$4 sm:$0xff]   ;;  %v4167_v61 = vld [vmem:[%s5653_s2 + $0x7c] ss:$12 sps:$4 sm:$0xff]  }
 0x191   :  { %v4298_v45 = vpop.eup %4297 }
 0x192   :  { %v1235_v4 = vmul.f32 %v4298_v45, %v1234_v42  ;;  %v4165_v42 = vld [vmem:[%s5653_s2 + $0x78] ss:$12 sps:$4 sm:$0xff]   ;;  %v4168_v45 = vld [vmem:[%s5653_s2 + $0x80] ss:$12 sps:$4 sm:$0xff]  }
 0x194   :  { %v5208_v6 = vadd.f32 %v1236_v2, %v1235_v4  ;;  %v4171_v2 = vld [vmem:[%s5653_s2 + $0x94] ss:$12 sps:$4 sm:$0xff]   ;;  %v4169_v4 = vld [vmem:[%s5653_s2 + $0x90] ss:$12 sps:$4 sm:$0xff]  }
 0x196   :  { %v4300_v10 = vpop.eup %4299  ;;  %v1528_v38 = vpack.c.bf16 %v5208_v6, %v5208_v6 }
 0x197   :  { %v1489_v13 = vadd.f32 1.0, %v4300_v10  ;;  %v4302_v52 = vpop.eup %4301  ;;  %v4175_v10 = vld [vmem:[%s5653_s2 + $0xac] ss:$12 sps:$4 sm:$0xff]  }
 0x198   :  { %1722 = vmatmul.mubr.bf16.vlgmr.msra.gmra.mrb[24].mxu0 %v1528_v38  ;;  %3863 = vmatmul.mubr.bf16.vlgmr.msra.gmra.mrb[20].mxu1 %v1528_v38  ;;  %v4173_v38 = vld [vmem:[%s5653_s2 + $0xa8] ss:$12 sps:$4 sm:$0xff]  }
 0x199   :  { %4303 = vrcp.f32 %v1489_v13  ;;  %1966 = vmatpush1.bf16.msra.mxu0 %v4965_v8  ;;  %3867 = vmatpush3.bf16.msra.mxu1 %v4146_v0  ;;  %v4148_v8 = vld [vmem:[%s5657_s6 + $0x38] ss:$12 sps:$4 sm:$0xff]   ;;  %v4176_v13 = vld [vmem:[%s5653_s2 + $0xb0] ss:$12 sps:$4 sm:$0xff]  }
 0x19a   :  { %1967 = vmatprep.subr.bf16.mxu0 %v4971_v9  ;;  %3868 = vmatprep.subr.bf16.mxu1 %v4403_v49  ;;  %v1496_v9 = vadd.f32 1.0, %v4302_v52  ;;  %v4172_v0 = vld [vmem:[%s5653_s2 + $0x98] ss:$12 sps:$4 sm:$0xff]   ;;  %v448_v52 = vadd.f32 %v5153_v53, %v5192_v43 }
 0x19b   :  { %1997 = vmatprep.mubr.bf16.mxu0 %v4402_v5  ;;  %3882 = vmatprep.mubr.msk.bf16.mxu1 %vm4404_vm0, %v4403_v49 }
 0x19c   :  { %4305 = vrcp.f32 %v1496_v9 }
 0x19d   :  { %1968 = vmatpush1.bf16.msra.mxu0 %v4982_v11  ;;  %3869 = vmatpush3.bf16.msra.mxu1 %v4147_v1  ;;  %v4179_v1 = vld [vmem:[%s5657_s6 + $0x4] ss:$12 sps:$4 sm:$0xff]  }
 0x19e   :  { %1969 = vmatprep.subr.bf16.mxu0 %v4988_v12  ;;  %3870 = vmatprep.subr.bf16.mxu1 %v4403_v49  ;;  %v948_v12 = vadd.f32 %v5189_v37, %v5171_v3 }
 0x1a1   :  { %1970 = vmatpush1.bf16.msra.mxu0 %v5000_v14  ;;  %3871 = vmatpush3.bf16.msra.mxu1 %v4148_v8  ;;  %v4150_v14 = vld [vmem:[%s5657_s6 + $0x68] ss:$12 sps:$4 sm:$0xff]   ;;  %v450_v8 = vadd.f32 %v5155_v54, %v5195_v44 }
 0x1a2   :  { %1971 = vmatprep.subr.bf16.mxu0 %v5007_v15  ;;  %3872 = vmatprep.subr.bf16.mxu1 %v4403_v49  ;;  %v4151_v15 = vld [vmem:[%s5657_s6 + $0x80] ss:$12 sps:$4 sm:$0xff]  }
 0x1a3   :  { %v4304_v11 = vpop.eup %4303 }
 0x1a4   :  { %v1507_v31 = vmul.f32 %v4304_v11, %v1506_v22 }
 0x1a5   :  { %1972 = vmatpush1.bf16.msra.mxu0 %v5018_v17  ;;  %3873 = vmatpush3.bf16.msra.mxu1 %v4149_v25  ;;  %v4152_v17 = vld [vmem:[%s5657_s6 + $0x98] ss:$12 sps:$4 sm:$0xff]  }
 0x1a6   :  { %v1508_v32 = vadd.f32 %v1507_v31, %v948_v12  ;;  %1973 = vmatprep.subr.bf16.mxu0 %v5023_v18  ;;  %3874 = vmatprep.subr.bf16.mxu1 %v4403_v49  ;;  %v4306_v18 = vpop.eup %4305 }
 0x1a7   :  { %v1512_v37 = vmul.f32 0.0, %v4306_v18 }
 0x1a8   :  { %4307 = vtanh.f32 %v1508_v32 }
 0x1a9   :  { %1974 = vmatpush1.bf16.msra.mxu0 %v5034_v20  ;;  %3875 = vmatpush3.bf16.msra.mxu1 %v4150_v14  ;;  %v1510_v20 = vsub.f32 1.0, %v4306_v18 }
 0x1aa   :  { %1975 = vmatprep.subr.bf16.mxu0 %v5039_v21  ;;  %3876 = vmatprep.subr.bf16.mxu1 %v4403_v49  ;;  %v4153_v21 = vld [vmem:[%s5657_s6 + $0xb0] ss:$12 sps:$4 sm:$0xff]  }
 0x1ad   :  { %1976 = vmatpush1.bf16.msra.mxu0 %v5050_v23  ;;  %3877 = vmatpush3.bf16.msra.mxu1 %v4151_v15 }
 0x1ae   :  { %1977 = vmatprep.subr.bf16.mxu0 %v5055_v24  ;;  %3878 = vmatprep.subr.bf16.mxu1 %v4403_v49 }
 0x1b1   :  { %1978 = vmatpush1.bf16.msra.mxu0 %v5066_v26  ;;  %3879 = vmatpush3.bf16.msra.mxu1 %v4152_v17 }
 0x1b2   :  { %v4308_v3 = vpop.eup %4307  ;;  %1979 = vmatprep.subr.bf16.mxu0 %v5071_v27  ;;  %3880 = vmatprep.subr.bf16.mxu1 %v4403_v49  ;;  %v4156_v27 = vld [vmem:[%s5653_s2 + $0x4] ss:$12 sps:$4 sm:$0xff]  }
 0x1b3   :  { %v1511_v23 = vmul.f32 %v4308_v3, %v1510_v20 }
 0x1b5   :  { %1980 = vmatpush1.bf16.msra.mxu0 %v5082_v29  ;;  %3881 = vmatpush3.bf16.msra.mxu1 %v4153_v21  ;;  %v5269_v24 = vadd.f32 %v1512_v37, %v1511_v23  ;;  %v4154_v29 = vld [vmem:[%s5653_s2] ss:$12 sps:$4 sm:$0xff]  }
 0x1b6   :  { %3886 = vmatprep.subr.bf16.mxu1 %v4403_v49  ;;  %2246 = vmatprep.subr.bf16.mxu0 %v4156_v27 }
 0x1b7   :  { %v5274_v26 = vpack.c.bf16 %v5269_v24, %v5269_v24 }
 0x1b9   :  { %1998 = vmatmul.mubr.bf16.vlgmr.msra.gmra.mrb[28].mxu0 %v5274_v26  ;;  %3883 = vmatmul.mubr.bf16.vlgmr.msra.gmra.mrb[24].mxu1 %v5274_v26 }
 0x1ba   :  { %2278 = vmatprep.mubr.bf16.mxu0 %v4402_v5  ;;  %3902 = vmatprep.mubr.msk.bf16.mxu1 %vm4404_vm0, %v4403_v49 }
 0x1bb   :  { %2247 = vmatpush1.bf16.msra.mxu0 %v4154_v29  ;;  %3887 = vmatpush3.bf16.msra.mxu1 %v4157_v35 }
 0x1bc   :  { %2248 = vmatprep.subr.bf16.mxu0 %v4369_v36  ;;  %3888 = vmatprep.subr.bf16.mxu1 %v4403_v49 }
 0x1bf   :  { %2249 = vmatpush1.bf16.msra.mxu0 %v4370_v41  ;;  %3889 = vmatpush3.bf16.msra.mxu1 %v4158_v39 }
 0x1c0   :  { %2250 = vmatprep.subr.bf16.mxu0 %v4371_v46  ;;  %3890 = vmatprep.subr.bf16.mxu1 %v4403_v49 }
 0x1c3   :  { %2251 = vmatpush1.bf16.msra.mxu0 %v4372_v50  ;;  %3891 = vmatpush3.bf16.msra.mxu1 %v4159_v47 }
 0x1c4   :  { %2252 = vmatprep.subr.bf16.mxu0 %v4373_v51  ;;  %3892 = vmatprep.subr.bf16.mxu1 %v4403_v49 }
 0x1c7   :  { %2253 = vmatpush1.bf16.msra.mxu0 %v4374_v57  ;;  %3893 = vmatpush3.bf16.msra.mxu1 %v4160_v56 }
 0x1c8   :  { %3894 = vmatprep.subr.bf16.mxu1 %v4403_v49  ;;  %2254 = vmatprep.subr.bf16.mxu0 %v4163_v58 }
 0x1cb   :  { %2255 = vmatpush1.bf16.msra.mxu0 %v4161_v55  ;;  %3895 = vmatpush3.bf16.msra.mxu1 %v4164_v59 }
 0x1cc   :  { %3896 = vmatprep.subr.bf16.mxu1 %v4403_v49  ;;  %2256 = vmatprep.subr.bf16.mxu0 %v4167_v61 }
 0x1cf   :  { %2257 = vmatpush1.bf16.msra.mxu0 %v4165_v42  ;;  %3897 = vmatpush3.bf16.msra.mxu1 %v4168_v45 }
 0x1d0   :  { %3898 = vmatprep.subr.bf16.mxu1 %v4403_v49  ;;  %2258 = vmatprep.subr.bf16.mxu0 %v4171_v2 }
 0x1d3   :  { %2259 = vmatpush1.bf16.msra.mxu0 %v4169_v4  ;;  %3899 = vmatpush3.bf16.msra.mxu1 %v4172_v0 }
 0x1d4   :  { %3900 = vmatprep.subr.bf16.mxu1 %v4403_v49  ;;  %2260 = vmatprep.subr.bf16.mxu0 %v4175_v10  ;;  %v4183_v10 = vld [vmem:[%s5657_s6 + $0x1c] ss:$12 sps:$4 sm:$0xff]  }
 0x1d7   :  { %2261 = vmatpush1.bf16.msra.mxu0 %v4173_v38  ;;  %3901 = vmatpush3.bf16.msra.mxu1 %v4176_v13  ;;  %v4181_v13 = vld [vmem:[%s5657_s6 + $0x18] ss:$12 sps:$4 sm:$0xff]  }
 0x1d8   :  { %3906 = vmatprep.subr.bf16.mxu1 %v4403_v49  ;;  %2522 = vmatprep.subr.bf16.mxu0 %v4179_v1  ;;  %v4184_v1 = vld [vmem:[%s5657_s6 + $0x20] ss:$12 sps:$4 sm:$0xff]  }
 0x26b   :  { %v1723_v9 = vpop.f32.mrb[24].mxu0  ;;  %v1764_v22 = vpop.f32.mrb[20].mxu1 }
 0x26c   :  { %v1770_v25 = vadd.f32 %v1723_v9, %v448_v52  ;;  %v1725_v11 = vpop.f32.mrb[25].mxu0  ;;  %v3864_v12 = vpop.f32.mrb[21].mxu1  ;;  %v1791_v54 = vadd.f32 %v5202_v40, %v1764_v22  ;;  %v4187_v52 = vld [vmem:[%s5657_s6 + $0x34] ss:$12 sps:$4 sm:$0xff]   ;;  %v4185_v9 = vld [vmem:[%s5657_s6 + $0x30] ss:$12 sps:$4 sm:$0xff]  }
 0x26d   :  { %v1777_v31 = vadd.f32 %v1725_v11, %v450_v8  ;;  %v1727_v14 = vpop.f32.mrb[26].mxu0  ;;  %v1767_v32 = vpop.f32.mrb[22].mxu1  ;;  %v4188_v22 = vld [vmem:[%s5657_s6 + $0x38] ss:$12 sps:$4 sm:$0xff]   ;;  %v4189_v11 = vld [vmem:[%s5657_s6 + $0x48] ss:$12 sps:$4 sm:$0xff]  }
 0x26e   :  { %v3497_v15 = vmul.f32 -1.442695, %v1770_v25  ;;  %v1728_v17 = vpop.f32.mrb[27].mxu0  ;;  %v3865_v18 = vpop.f32.mrb[23].mxu1  ;;  %v4192_v12 = vld [vmem:[%s5657_s6 + $0x50] ss:$12 sps:$4 sm:$0xff]  }
 0x26f   :  { %v3498_v20 = vmul.f32 -1.442695, %v1777_v31  ;;  %v4195_v14 = vld [vmem:[%s5657_s6 + $0x64] ss:$12 sps:$4 sm:$0xff]   ;;  %v4193_v17 = vld [vmem:[%s5657_s6 + $0x60] ss:$12 sps:$4 sm:$0xff]  }
 0x270   :  { %4309 = vpow2.f32 %v3497_v15  ;;  %v4196_v18 = vld [vmem:[%s5657_s6 + $0x68] ss:$12 sps:$4 sm:$0xff]  }
 0x271   :  { %4311 = vpow2.f32 %v3498_v20 }
 0x27a   :  { %v4310_v21 = vpop.eup %4309 }
 0x27b   :  { %v1774_v3 = vadd.f32 1.0, %v4310_v21  ;;  %v4312_v53 = vpop.eup %4311  ;;  %v4199_v21 = vld [vmem:[%s5657_s6 + $0x7c] ss:$12 sps:$4 sm:$0xff]  }
 0x27c   :  { %v1781_v23 = vadd.f32 1.0, %v4312_v53  ;;  %v4200_v53 = vld [vmem:[%s5657_s6 + $0x80] ss:$12 sps:$4 sm:$0xff]  }
 0x27d   :  { %4313 = vrcp.f32 %v1774_v3  ;;  %v4197_v3 = vld [vmem:[%s5657_s6 + $0x78] ss:$12 sps:$4 sm:$0xff]  }
 0x27e   :  { %4315 = vrcp.f32 %v1781_v23  ;;  %v4201_v23 = vld [vmem:[%s5657_s6 + $0x90] ss:$12 sps:$4 sm:$0xff]  }
 0x287   :  { %v4314_v37 = vpop.eup %4313 }
 0x288   :  { %v1792_v27 = vmul.f32 %v4314_v37, %v1791_v54  ;;  %v4316_v55 = vpop.eup %4315  ;;  %v4204_v54 = vld [vmem:[%s5657_s6 + $0x98] ss:$12 sps:$4 sm:$0xff]  }
 0x289   :  { %v1795_v61 = vsub.f32 1.0, %v4316_v55 }
 0x28a   :  { %v1793_v29 = vadd.f32 %v1792_v27, %v5142_v48  ;;  %v1797_v48 = vmul.f32 %v4316_v55, %v5208_v6  ;;  %v4207_v27 = vld [vmem:[%s5657_s6 + $0xac] ss:$12 sps:$4 sm:$0xff]   ;;  %v4215_v55 = vld [vmem:[%s5660_s9 + $0x20] ss:$8 sps:$4 sm:$0xff]  }
 0x28c   :  { %4317 = vtanh.f32 %v1793_v29  ;;  %v1999_v35 = vpop.f32.mrb[28].mxu0  ;;  %v2040_v36 = vpop.f32.mrb[24].mxu1 }
 0x28d   :  { %v2046_v39 = vadd.f32 %v1999_v35, %v5181_v30  ;;  %v2001_v41 = vpop.f32.mrb[29].mxu0  ;;  %v3884_v46 = vpop.f32.mrb[25].mxu1  ;;  %v4177_v30 = vld [vmem:[%s5657_s6] ss:$12 sps:$4 sm:$0xff]   ;;  %v2067_v31 = vadd.f32 %v5227_v16, %v2040_v36  ;;  %v4205_v35 = vld [vmem:[%s5657_s6 + $0xa8] ss:$12 sps:$4 sm:$0xff]  }
 0x28e   :  { %v2053_v47 = vadd.f32 %v2001_v41, %v5184_v33  ;;  %v2003_v50 = vpop.f32.mrb[30].mxu0  ;;  %v2043_v51 = vpop.f32.mrb[26].mxu1  ;;  %v4180_v33 = vld [vmem:[%s5657_s6 + $0x8] ss:$12 sps:$4 sm:$0xff]   ;;  %v4208_v36 = vld [vmem:[%s5657_s6 + $0xb0] ss:$12 sps:$4 sm:$0xff]  }
 0x28f   :  { %v3524_v56 = vmul.f32 -1.442695, %v2046_v39  ;;  %v2004_v57 = vpop.f32.mrb[31].mxu0  ;;  %v3885_v58 = vpop.f32.mrb[27].mxu1  ;;  %v4211_v51 = vld [vmem:[%s5660_s9 + $0x4] ss:$8 sps:$4 sm:$0xff]  }
 0x290   :  { %v3525_v59 = vmul.f32 -1.442695, %v2053_v47  ;;  %v4212_v57 = vld [vmem:[%s5660_s9 + $0x10] ss:$8 sps:$4 sm:$0xff]   ;;  %v4217_v58 = vld [vmem:[%s5660_s9 + $0x24] ss:$8 sps:$4 sm:$0xff]  }
 0x291   :  { %4319 = vpow2.f32 %v3524_v56  ;;  %v4214_v56 = vld [vmem:[%s5660_s9 + $0x14] ss:$8 sps:$4 sm:$0xff]  }
 0x292   :  { %4321 = vpow2.f32 %v3525_v59  ;;  %v4220_v59 = vld [vmem:[%s5660_s9 + $0x34] ss:$8 sps:$4 sm:$0xff]  }
 0x296   :  { %v4318_v42 = vpop.eup %4317 }
 0x297   :  { %v1796_v45 = vmul.f32 %v4318_v42, %v1795_v61  ;;  %v4218_v61 = vld [vmem:[%s5660_s9 + $0x30] ss:$8 sps:$4 sm:$0xff]   ;;  %v4223_v42 = vld [vmem:[%s5660_s9 + $0x44] ss:$8 sps:$4 sm:$0xff]  }
 0x299   :  { %v5373_v2 = vadd.f32 %v1797_v48, %v1796_v45  ;;  %v4221_v48 = vld [vmem:[%s5660_s9 + $0x40] ss:$8 sps:$4 sm:$0xff]   ;;  %v4226_v45 = vld [vmem:[%s5660_s9 + $0x54] ss:$8 sps:$4 sm:$0xff]  }
 0x29b   :  { %v4320_v4 = vpop.eup %4319  ;;  %v2085_v0 = vpack.c.bf16 %v5373_v2, %v5373_v2 }
 0x29c   :  { %v2050_v38 = vadd.f32 1.0, %v4320_v4  ;;  %v4322_v8 = vpop.eup %4321  ;;  %v4227_v4 = vld [vmem:[%s5660_s9 + $0x60] ss:$8 sps:$4 sm:$0xff]  }
 0x29d   :  { %2279 = vmatmul.mubr.bf16.vlgmr.msra.gmra.mrb[4].mxu0 %v2085_v0  ;;  %3903 = vmatmul.mubr.bf16.vlgmr.msra.gmra.mrb[28].mxu1 %v2085_v0  ;;  %v2057_v25 = vadd.f32 1.0, %v4322_v8  ;;  %v4232_v0 = vld [vmem:[%s5660_s9 + $0x74] ss:$8 sps:$4 sm:$0xff]   ;;  %v4241_v8 = vld [vmem:[%s5660_s9 + $0xa4] ss:$8 sps:$4 sm:$0xff]  }
 0x29e   :  { %4323 = vrcp.f32 %v2050_v38  ;;  %2523 = vmatpush1.bf16.msra.mxu0 %v4177_v30  ;;  %3907 = vmatpush3.bf16.msra.mxu1 %v4180_v33  ;;  %v4224_v30 = vld [vmem:[%s5660_s9 + $0x50] ss:$8 sps:$4 sm:$0xff]   ;;  %v4229_v33 = vld [vmem:[%s5660_s9 + $0x64] ss:$8 sps:$4 sm:$0xff]  }
 0x29f   :  { %2524 = vmatprep.subr.bf16.mxu0 %v4183_v10  ;;  %3908 = vmatprep.subr.bf16.mxu1 %v4403_v49  ;;  %4325 = vrcp.f32 %v2057_v25  ;;  %v4230_v10 = vld [vmem:[%s5660_s9 + $0x70] ss:$8 sps:$4 sm:$0xff]   ;;  %v4235_v38 = vld [vmem:[%s5660_s9 + $0x84] ss:$8 sps:$4 sm:$0xff]   ;;  %v4245_v25 = vld [vmem:[%s5660_s9 + $0xc0] ss:$8 sps:$4 sm:$0xff]  }
 0x2a0   :  { %2554 = vmatprep.mubr.bf16.mxu0 %v4402_v5  ;;  %3922 = vmatprep.mubr.msk.bf16.mxu1 %vm4404_vm0, %v4403_v49  ;;  %v4191_v5 = vld [vmem:[%s5657_s6 + $0x4c] ss:$12 sps:$4 sm:$0xff]  }
 0x2a2   :  { %2525 = vmatpush1.bf16.msra.mxu0 %v4181_v13  ;;  %3909 = vmatpush3.bf16.msra.mxu1 %v4184_v1  ;;  %v4233_v13 = vld [vmem:[%s5660_s9 + $0x80] ss:$8 sps:$4 sm:$0xff]   ;;  %v4238_v1 = vld [vmem:[%s5660_s9 + $0x94] ss:$8 sps:$4 sm:$0xff]  }
 0x2a3   :  { %2526 = vmatprep.subr.bf16.mxu0 %v4187_v52  ;;  %3910 = vmatprep.subr.bf16.mxu1 %v4403_v49  ;;  %v4236_v52 = vld [vmem:[%s5660_s9 + $0x90] ss:$8 sps:$4 sm:$0xff]  }
 0x2a6   :  { %2527 = vmatpush1.bf16.msra.mxu0 %v4185_v9  ;;  %3911 = vmatpush3.bf16.msra.mxu1 %v4188_v22  ;;  %v4239_v9 = vld [vmem:[%s5660_s9 + $0xa0] ss:$8 sps:$4 sm:$0xff]   ;;  %v4244_v22 = vld [vmem:[%s5660_s9 + $0xb4] ss:$8 sps:$4 sm:$0xff]  }
 0x2a7   :  { %2528 = vmatprep.subr.bf16.mxu0 %v4191_v5  ;;  %3912 = vmatprep.subr.bf16.mxu1 %v4403_v49  ;;  %v4242_v5 = vld [vmem:[%s5660_s9 + $0xb0] ss:$8 sps:$4 sm:$0xff]  }
 0x2a8   :  { %v4324_v32 = vpop.eup %4323 }
 0x2a9   :  { %v2068_v15 = vmul.f32 %v4324_v32, %v2067_v31  ;;  %v4326_v37 = vpop.eup %4325  ;;  %v4248_v31 = vld [vmem:[%s5660_s9 + $0xd0] ss:$8 sps:$4 sm:$0xff]   ;;  %v4251_v32 = vld [vmem:[%s5660_s9 + $0xe0] ss:$8 sps:$4 sm:$0xff]  }
 0x2aa   :  { %2529 = vmatpush1.bf16.msra.mxu0 %v4189_v11  ;;  %3913 = vmatpush3.bf16.msra.mxu1 %v4192_v12  ;;  %v2071_v29 = vsub.f32 1.0, %v4326_v37  ;;  %v2073_v41 = vmul.f32 %v4326_v37, %v5269_v24  ;;  %v4247_v11 = vld [vmem:[%s5660_s9 + $0xc4] ss:$8 sps:$4 sm:$0xff]   ;;  %v4250_v12 = vld [vmem:[%s5660_s9 + $0xd4] ss:$8 sps:$4 sm:$0xff]  }
 0x2ab   :  { %v2069_v20 = vadd.f32 %v2068_v15, %v5187_v34  ;;  %2530 = vmatprep.subr.bf16.mxu0 %v4195_v14  ;;  %3914 = vmatprep.subr.bf16.mxu1 %v4403_v49  ;;  %v4203_v34 = vld [vmem:[%s5657_s6 + $0x94] ss:$12 sps:$4 sm:$0xff]   ;;  %v4253_v14 = vld [vmem:[%s5660_s9 + $0xe4] ss:$8 sps:$4 sm:$0xff]  }
 0x2ac   :  { %v4256_v15 = vld [vmem:[%s5660_s9 + $0xf4] ss:$8 sps:$4 sm:$0xff]  }
 0x2ad   :  { %4327 = vtanh.f32 %v2069_v20  ;;  %v4258_v20 = vld [vmem:[%s5662_s11] sm:$0xff]  }
 0x2ae   :  { %2531 = vmatpush1.bf16.msra.mxu0 %v4193_v17  ;;  %3915 = vmatpush3.bf16.msra.mxu1 %v4196_v18  ;;  %v4254_v17 = vld [vmem:[%s5660_s9 + $0xf0] ss:$8 sps:$4 sm:$0xff]   ;;  %v4257_v18 = vld [vmem:[%s5662_s11 + $0x40] sm:$0xff]  }
 0x2af   :  { %2532 = vmatprep.subr.bf16.mxu0 %v4199_v21  ;;  %3916 = vmatprep.subr.bf16.mxu1 %v4403_v49  ;;  %v4259_v21 = vld [vmem:[%s5662_s11 + $0x48] sm:$0xff]  }
 0x2b2   :  { %2533 = vmatpush1.bf16.msra.mxu0 %v4197_v3  ;;  %3917 = vmatpush3.bf16.msra.mxu1 %v4200_v53  ;;  %v4260_v3 = vld [vmem:[%s5662_s11 + $0x8] sm:$0xff]   ;;  %v4261_v53 = vld [vmem:[%s5662_s11 + $0x50] sm:$0xff]  }
 0x2b3   :  { %2534 = vmatprep.subr.bf16.mxu0 %v4203_v34  ;;  %3918 = vmatprep.subr.bf16.mxu1 %v4403_v49  ;;  %v4262_v34 = vld [vmem:[%s5662_s11 + $0x10] sm:$0xff]  }
 0x2b6   :  { %2535 = vmatpush1.bf16.msra.mxu0 %v4201_v23  ;;  %3919 = vmatpush3.bf16.msra.mxu1 %v4204_v54 }
 0x2b7   :  { %v4328_v39 = vpop.eup %4327  ;;  %2536 = vmatprep.subr.bf16.mxu0 %v4207_v27  ;;  %3920 = vmatprep.subr.bf16.mxu1 %v4403_v49  ;;  %v4209_v49 = vld [vmem:[%s5660_s9] ss:$8 sps:$4 sm:$0xff]  }
 0x2b8   :  { %v2072_v46 = vmul.f32 %v4328_v39, %v2071_v29 }
 0x2ba   :  { %2537 = vmatpush1.bf16.msra.mxu0 %v4205_v35  ;;  %3921 = vmatpush3.bf16.msra.mxu1 %v4208_v36  ;;  %v5459_v47 = vadd.f32 %v2073_v41, %v2072_v46 }
 0x2bb   :  { %2848 = vmatprep.subr.bf16.mxu0 %v4211_v51  ;;  %3756 = vmatprep.subr.bf16.mxu1 %v4257_v18 }
 0x2bc   :  { %v2361_v50 = vpack.c.bf16 %v5459_v47, %v5459_v47 }
 0x2be   :  { %2555 = vmatmul.mubr.bf16.vlgmr.msra.gmra.mrb[32].mxu0 %v2361_v50  ;;  %3923 = vmatmul.mubr.bf16.vlgmr.msra.gmra.mrb[32].mxu1 %v2361_v50 }
 0x2bf   :  { %2849 = vmatpush1.bf16.msra.mxu0 %v4209_v49  ;;  %3757 = vmatpush3.bf16.msra.mxu1 %v4258_v20 }
 0x2c0   :  { %2850 = vmatprep.subr.bf16.mxu0 %v4214_v56  ;;  %3758 = vmatprep.subr.bf16.mxu1 %v4259_v21 }
 0x2c3   :  { %2851 = vmatpush1.bf16.msra.mxu0 %v4212_v57  ;;  %3759 = vmatpush3.bf16.msra.mxu1 %v4260_v3 }
 0x2c4   :  { %2852 = vmatprep.subr.bf16.mxu0 %v4217_v58  ;;  %3760 = vmatprep.subr.bf16.mxu1 %v4261_v53  ;;  %v4263_v53 = vld [vmem:[%s5662_s11 + $0x58] sm:$0xff]  }
 0x2c7   :  { %2853 = vmatpush1.bf16.msra.mxu0 %v4215_v55  ;;  %3761 = vmatpush3.bf16.msra.mxu1 %v4262_v34  ;;  %v4264_v34 = vld [vmem:[%s5662_s11 + $0x18] sm:$0xff]  }
 0x2c8   :  { %2854 = vmatprep.subr.bf16.mxu0 %v4220_v59  ;;  %3762 = vmatprep.subr.bf16.mxu1 %v4263_v53 }
 0x2cb   :  { %2855 = vmatpush1.bf16.msra.mxu0 %v4218_v61  ;;  %3763 = vmatpush3.bf16.msra.mxu1 %v4264_v34 }
 0x2cc   :  { %2856 = vmatprep.subr.bf16.mxu0 %v4223_v42 }
 0x2cf   :  { %2857 = vmatpush1.bf16.msra.mxu0 %v4221_v48 }
 0x2d0   :  { %2858 = vmatprep.subr.bf16.mxu0 %v4226_v45 }
 0x2d3   :  { %2859 = vmatpush1.bf16.msra.mxu0 %v4224_v30 }
 0x2d4   :  { %2860 = vmatprep.subr.bf16.mxu0 %v4229_v33 }
 0x2d7   :  { %2861 = vmatpush1.bf16.msra.mxu0 %v4227_v4 }
 0x2d8   :  { %2862 = vmatprep.subr.bf16.mxu0 %v4232_v0 }
 0x2db   :  { %2863 = vmatpush1.bf16.msra.mxu0 %v4230_v10 }
 0x2dc   :  { %2864 = vmatprep.subr.bf16.mxu0 %v4235_v38 }
 0x2df   :  { %2865 = vmatpush1.bf16.msra.mxu0 %v4233_v13 }
 0x2e0   :  { %2866 = vmatprep.subr.bf16.mxu0 %v4238_v1 }
 0x2e3   :  { %2867 = vmatpush1.bf16.msra.mxu0 %v4236_v52 }
 0x2e4   :  { %2868 = vmatprep.subr.bf16.mxu0 %v4241_v8 }
 0x2e7   :  { %2869 = vmatpush1.bf16.msra.mxu0 %v4239_v9 }
 0x2e8   :  { %2870 = vmatprep.subr.bf16.mxu0 %v4244_v22 }
 0x2eb   :  { %2871 = vmatpush1.bf16.msra.mxu0 %v4242_v5 }
 0x2ec   :  { %2872 = vmatprep.subr.bf16.mxu0 %v4247_v11 }
 0x2ef   :  { %2873 = vmatpush1.bf16.msra.mxu0 %v4245_v25 }
 0x2f0   :  { %2874 = vmatprep.subr.bf16.mxu0 %v4250_v12 }
 0x2f3   :  { %2875 = vmatpush1.bf16.msra.mxu0 %v4248_v31 }
 0x2f4   :  { %2876 = vmatprep.subr.bf16.mxu0 %v4253_v14 }
 0x2f7   :  { %2877 = vmatpush1.bf16.msra.mxu0 %v4251_v32 }
 0x2f8   :  { %2878 = vmatprep.subr.bf16.mxu0 %v4256_v15 }
 0x2fb   :  { %2879 = vmatpush1.bf16.msra.mxu0 %v4254_v17 }
 0x370   :  { %v2280_v23 = vpop.f32.mrb[4].mxu0  ;;  %v2321_v54 = vpop.f32.mrb[28].mxu1 }
 0x371   :  { %v3926_v37 = vadd.f32 %v2280_v23, %v5192_v43  ;;  %v2282_v27 = vpop.f32.mrb[5].mxu0  ;;  %v3904_v29 = vpop.f32.mrb[29].mxu1  ;;  %v2348_v55 = vadd.f32 %v5202_v40, %v2321_v54  ;;  %v4265_v23 = vld [vmem:[%s5662_s11 + $0x60] sm:$0xff]   ;;  %v4267_v54 = vld [vmem:[%s5662_s11 + $0x68] sm:$0xff]  }
 0x372   :  { %v2284_v35 = vpop.f32.mrb[6].mxu0  ;;  %v2324_v36 = vpop.f32.mrb[30].mxu1  ;;  %v3927_v50 = vadd.f32 %v2282_v27, %v5195_v44  ;;  %3764 = vmatprep.subr.bf16.mxu1 %v4265_v23  ;;  %v4269_v27 = vld [vmem:[%s5662_s11 + $0x70] sm:$0xff]  }
 0x373   :  { %v3551_v39 = vmul.f32 -1.442695, %v3926_v37  ;;  %v2285_v41 = vpop.f32.mrb[7].mxu0  ;;  %v3905_v46 = vpop.f32.mrb[31].mxu1  ;;  %v4268_v37 = vld [vmem:[%s5662_s11 + $0x28] sm:$0xff]   ;;  %v4270_v29 = vld [vmem:[%s5662_s11 + $0x30] sm:$0xff]  }
 0x374   :  { %v3552_v51 = vmul.f32 -1.442695, %v3927_v50  ;;  %v4271_v35 = vld [vmem:[%s5662_s11 + $0x78] sm:$0xff]  }
 0x375   :  { %4329 = vpow2.f32 %v3551_v39  ;;  %v4272_v36 = vld [vmem:[%s5662_s11 + $0x38] sm:$0xff]   ;;  %v2676_v39 = vld [vmem:[%s5661_s10] sm:$0x3] }
 0x376   :  { %4331 = vpow2.f32 %v3552_v51  ;;  %v2681_v41 = vrot.slane %v2676_v39, %v5163_v62  ;;  %v2685_v46 = vrot.slane %v2676_v39, %v5165_v63 }
 0x37f   :  { %v4330_v49 = vpop.eup %4329 }
 0x380   :  { %v2331_v56 = vadd.f32 1.0, %v4330_v49  ;;  %v4332_v57 = vpop.eup %4331 }
 0x381   :  { %v2338_v58 = vadd.f32 1.0, %v4332_v57 }
 0x382   :  { %4333 = vrcp.f32 %v2331_v56 }
 0x383   :  { %4335 = vrcp.f32 %v2338_v58 }
 0x38c   :  { %v4334_v43 = vpop.eup %4333 }
 0x38d   :  { %v2349_v59 = vmul.f32 %v4334_v43, %v2348_v55  ;;  %v4336_v40 = vpop.eup %4335 }
 0x38e   :  { %v2352_v52 = vsub.f32 1.0, %v4336_v40  ;;  %v2354_v9 = vmul.f32 %v4336_v40, %v5373_v2 }
 0x38f   :  { %v2350_v61 = vadd.f32 %v2349_v59, %v5158_v60 }
 0x391   :  { %4337 = vtanh.f32 %v2350_v61  ;;  %v2556_v42 = vpop.f32.mrb[32].mxu0  ;;  %v2597_v48 = vpop.f32.mrb[32].mxu1 }
 0x392   :  { %v2603_v44 = vadd.f32 %v2556_v42, %v5173_v7  ;;  %v2558_v45 = vpop.f32.mrb[33].mxu0  ;;  %v3924_v30 = vpop.f32.mrb[33].mxu1  ;;  %v2624_v11 = vadd.f32 %v5227_v16, %v2597_v48  ;;  %v2640_v16 = vpack.c.bf16 %v5373_v2, %v5208_v6 }
 0x393   :  { %v2610_v33 = vadd.f32 %v2558_v45, %v5176_v19  ;;  %v2560_v4 = vpop.f32.mrb[34].mxu0  ;;  %v2600_v0 = vpop.f32.mrb[34].mxu1 }
 0x394   :  { %v3578_v10 = vmul.f32 -1.442695, %v2603_v44  ;;  %v2561_v38 = vpop.f32.mrb[35].mxu0  ;;  %v3925_v13 = vpop.f32.mrb[35].mxu1 }
 0x395   :  { %v3579_v1 = vmul.f32 -1.442695, %v2610_v33 }
 0x396   :  { %4339 = vpow2.f32 %v3578_v10 }
 0x397   :  { %4341 = vpow2.f32 %v3579_v1  ;;  %v4273_v1 = vld [vmem:[#allocation5 + $0x40] sm:$0xff]  }
 0x39b   :  { %v4338_v8 = vpop.eup %4337 }
 0x39c   :  { %v2353_v60 = vmul.f32 %v4338_v8, %v2352_v52  ;;  %v4274_v52 = vld [vmem:[#allocation5] sm:$0xff]   ;;  %v4275_v8 = vld [vmem:[#allocation5 + $0x48] sm:$0xff]  }
 0x39e   :  { %v5584_v22 = vadd.f32 %v2354_v9, %v2353_v60  ;;  %v4276_v60 = vld [vmem:[#allocation5 + $0x8] sm:$0xff]   ;;  %v4277_v9 = vld [vmem:[#allocation5 + $0x50] sm:$0xff]  }
 0x3a0   :  { %v4340_v7 = vpop.eup %4339 }
 0x3a1   :  { %v2607_v5 = vadd.f32 1.0, %v4340_v7  ;;  %v4342_v19 = vpop.eup %4341  ;;  %v4278_v7 = vld [vmem:[#allocation5 + $0x10] sm:$0xff]  }
 0x3a2   :  { %v2614_v25 = vadd.f32 1.0, %v4342_v19  ;;  %v4280_v19 = vld [vmem:[#allocation5 + $0x18] sm:$0xff]  }
 0x3a3   :  { %4343 = vrcp.f32 %v2607_v5  ;;  %v4279_v5 = vld [vmem:[#allocation5 + $0x58] sm:$0xff]  }
 0x3a4   :  { %4345 = vrcp.f32 %v2614_v25  ;;  %v4281_v25 = vld [vmem:[#allocation5 + $0x60] sm:$0xff]  }
 0x3ad   :  { %v4344_v12 = vpop.eup %4343 }
 0x3ae   :  { %v2625_v31 = vmul.f32 %v4344_v12, %v2624_v11  ;;  %v4346_v32 = vpop.eup %4345  ;;  %v4282_v11 = vld [vmem:[#allocation5 + $0x20] sm:$0xff]  }
 0x3af   :  { %v2628_v15 = vsub.f32 1.0, %v4346_v32  ;;  %v2630_v20 = vmul.f32 %v4346_v32, %v5459_v47 }
 0x3b0   :  { %v2626_v14 = vadd.f32 %v2625_v31, %v5179_v28  ;;  %v2642_v28 = vpack.c.bf16 %v5584_v22, %v5584_v22 }
 0x3b2   :  { %4347 = vtanh.f32 %v2626_v14 }
 0x3bc   :  { %v4348_v17 = vpop.eup %4347 }
 0x3bd   :  { %v2629_v18 = vmul.f32 %v4348_v17, %v2628_v15 }
 0x3bf   :  { %v5589_v21 = vadd.f32 %v2630_v20, %v2629_v18 }
 0x3c1   :  { %v2641_v3 = vpack.c.bf16 %v5459_v47, %v5589_v21 }
 0x3c3   :  { %2880 = vmatprep.mubr.bf16.mxu0 %v2641_v3 }
 0x3c4   :  { %2881 = vmatmul.mubr.bf16.vlgmr.msra.gmra.mrb[36].mxu0 %v2640_v16 }
 0x3c5   :  { %2890 = vmatprep.mubr.bf16.mxu0 %v5274_v26  ;;  %v4266_v26 = vld [vmem:[%s5662_s11 + $0x20] sm:$0xff]  }
 0x3c6   :  { %3765 = vmatpush3.bf16.msra.mxu1 %v4266_v26 }
 0x3c7   :  { %3766 = vmatprep.subr.bf16.mxu1 %v4267_v54 }
 0x3ca   :  { %3767 = vmatpush3.bf16.msra.mxu1 %v4268_v37 }
 0x3cb   :  { %3768 = vmatprep.subr.bf16.mxu1 %v4269_v27 }
 0x3cc   :  { %2891 = vmatmul.mubr.bf16.gmra.mrb[40].mxu0 %v2642_v28 }
 0x3ce   :  { %3769 = vmatpush3.bf16.msra.mxu1 %v4270_v29 }
 0x3cf   :  { %3770 = vmatprep.subr.bf16.mxu1 %v4271_v35 }
 0x3d2   :  { %3771 = vmatpush3.bf16.msra.mxu1 %v4272_v36 }
 0x3d3   :  { %3784 = vmatprep.subr.bf16.mxu1 %v4273_v1 }
 0x497   :  { %v2882_v50 = vpop.f32.mrb[36].mxu0 }
 0x498   :  { %v2883_v51 = vadd.f32 %v2882_v50, %v2681_v41  ;;  %v2884_v49 = vpop.f32.mrb[37].mxu0 }
 0x499   :  { %v2885_v56 = vadd.f32 %v2884_v49, %v2685_v46  ;;  %v2886_v57 = vpop.f32.mrb[38].mxu0 }
 0x49a   :  { %4349 = vtanh.f32 %v2883_v51  ;;  %v2887_v58 = vadd.f32 %v2886_v57, %v2681_v41  ;;  %v2888_v55 = vpop.f32.mrb[39].mxu0 }
 0x49b   :  { %4351 = vtanh.f32 %v2885_v56  ;;  %v2889_v43 = vadd.f32 %v2888_v55, %v2685_v46 }
 0x49c   :  { %4353 = vtanh.f32 %v2887_v58 }
 0x49d   :  { %4355 = vtanh.f32 %v2889_v43 }
 0x49f   :  { %v2892_v59 = vpop.f32.mrb[40].mxu0 }
 0x4a0   :  { %v2893_v61 = vadd.f32 %v2892_v59, %v2681_v41  ;;  %v2894_v42 = vpop.f32.mrb[41].mxu0 }
 0x4a1   :  { %v2895_v48 = vadd.f32 %v2894_v42, %v2685_v46  ;;  %v2896_v44 = vpop.f32.mrb[42].mxu0  ;;  %v4283_v42 = vld [vmem:[#allocation5 + $0x68] sm:$0xff]  }
 0x4a2   :  { %v2897_v62 = vpop.f32.mrb[43].mxu0  ;;  %v4285_v44 = vld [vmem:[#allocation5 + $0x70] sm:$0xff]  }
 0x4a3   :  { %4357 = vtanh.f32 %v2895_v48  ;;  %v4284_v48 = vld [vmem:[#allocation5 + $0x28] sm:$0xff]   ;;  %v4286_v62 = vld [vmem:[#allocation5 + $0x30] sm:$0xff]  }
 0x4a4   :  { %v4350_v63 = vpop.eup %4349  ;;  %4359 = vtanh.f32 %v2893_v61 }
 0x4a5   :  { %v4352_v45 = vpop.eup %4351 }
 0x4a6   :  { %v4354_v30 = vpop.eup %4353 }
 0x4a7   :  { %v4356_v33 = vpop.eup %4355  ;;  %v2905_v4 = vpack.c.bf16 %v4354_v30, %v4350_v63  ;;  %v4287_v63 = vld [vmem:[#allocation5 + $0x78] sm:$0xff]  }
 0x4a8   :  { %v2906_v0 = vpack.c.bf16 %v4356_v33, %v4352_v45  ;;  %v4288_v45 = vld [vmem:[#allocation5 + $0x38] sm:$0xff]  }
 0x4aa   :  { %3069 = vmatprep.mubr.bf16.mxu1 %v2906_v0 }
 0x4ab   :  { %3070 = vmatmul.mubr.bf16.vlgmr.msra.gmra.mrb[36].mxu1 %v2905_v4 }
 0x4ac   :  { %3785 = vmatpush3.bf16.msra.mxu1 %v4274_v52 }
 0x4ad   :  { %v4358_v10 = vpop.eup %4357  ;;  %3786 = vmatprep.subr.bf16.mxu1 %v4275_v8 }
 0x4ae   :  { %v4360_v38 = vpop.eup %4359  ;;  %v2908_v13 = vpack.c.bf16 %v4358_v10, %v4358_v10 }
 0x4af   :  { %v2907_v40 = vpack.c.bf16 %v4360_v38, %v4360_v38 }
 0x4b0   :  { %3077 = vmatprep.mubr.bf16.mxu1 %v2908_v13  ;;  %3787 = vmatpush3.bf16.msra.mxu1 %v4276_v60 }
 0x4b1   :  { %3788 = vmatprep.subr.bf16.mxu1 %v4277_v9 }
 0x4b3   :  { %3078 = vmatmul.mubr.bf16.gmra.mrb[40].mxu1 %v2907_v40 }
 0x4b4   :  { %3789 = vmatpush3.bf16.msra.mxu1 %v4278_v7 }
 0x4b5   :  { %3790 = vmatprep.subr.bf16.mxu1 %v4279_v5 }
 0x4b8   :  { %3791 = vmatpush3.bf16.msra.mxu1 %v4280_v19 }
 0x4b9   :  { %3792 = vmatprep.subr.bf16.mxu1 %v4281_v25 }
 0x4bc   :  { %3793 = vmatpush3.bf16.msra.mxu1 %v4282_v11 }
 0x4bd   :  { %3794 = vmatprep.subr.bf16.mxu1 %v4283_v42 }
 0x4c0   :  { %3795 = vmatpush3.bf16.msra.mxu1 %v4284_v48 }
 0x4c1   :  { %3796 = vmatprep.subr.bf16.mxu1 %v4285_v44 }
 0x4c4   :  { %3797 = vmatpush3.bf16.msra.mxu1 %v4286_v62 }
 0x4c5   :  { %3798 = vmatprep.subr.bf16.mxu1 %v4287_v63 }
 0x4c8   :  { %3799 = vmatpush3.bf16.msra.mxu1 %v4288_v45 }
 0x57e   :  { %v3772_v12 = vpop.f32.mrb[36].mxu1 }
 0x57f   :  { %v3773_v31 = vpop.f32.mrb[37].mxu1 }
 0x580   :  { %v3774_v14 = vadd.f32 %v3773_v31, %v3772_v12  ;;  %v3775_v32 = vpop.f32.mrb[38].mxu1 }
 0x581   :  { %v3776_v15 = vpop.f32.mrb[39].mxu1 }
 0x582   :  { %v3777_v17 = vadd.f32 %v3776_v15, %v3775_v32  ;;  %v3086_v18 = vsel %vm3085_vm1, %v3774_v14, -inf }
 0x584   :  { %v3087_v20 = vsel %vm3085_vm1, %v3777_v17, -inf }
 0x585   :  { %v3089_v3 = vmax.f32 %v3086_v18, %v3087_v20 }
 0x586   :  { %v3778_v16 = vpop.f32.mrb[40].mxu1 }
 0x587   :  { %v3779_v28 = vpop.f32.mrb[41].mxu1 }
 0x588   :  { %v3780_v53 = vadd.f32 %v3779_v28, %v3778_v16  ;;  %v3781_v34 = vpop.f32.mrb[42].mxu1 }
 0x589   :  { %v3782_v23 = vpop.f32.mrb[43].mxu1 }
 0x58a   :  { %v3088_v26 = vsel %vm3085_vm1, %v3780_v53, -inf }
 0x58b   :  { %v3090_v54 = vmax.f32 %v3089_v3, %v3088_v26 }
 0x58d   :  { %v3091_v37 = vsub.f32 %v3774_v14, %v3090_v54  ;;  %v3092_v27 = vsub.f32 %v3777_v17, %v3090_v54  ;;  %v3093_v29 = vsub.f32 %v3780_v53, %v3090_v54 }
 0x58f   :  { %v3094_v35 = vmul.f32 1.442695, %v3091_v37  ;;  %v3096_v36 = vmul.f32 1.442695, %v3092_v27  ;;  %v3098_v39 = vmul.f32 1.442695, %v3093_v29 }
 0x591   :  { %4361 = vpow2.f32 %v3094_v35 }
 0x592   :  { %4363 = vpow2.f32 %v3096_v36 }
 0x593   :  { %4365 = vpow2.f32 %v3098_v39 }
 0x59b   :  { %v4362_v41 = vpop.eup %4361 }
 0x59c   :  { %v4364_v46 = vpop.eup %4363  ;;  %v3100_v50 = vsel %vm3085_vm1, %v4362_v41, 0.0 }
 0x59d   :  { %v4366_v51 = vpop.eup %4365  ;;  %v3101_v49 = vsel %vm3085_vm1, %v4364_v46, 0.0 }
 0x59e   :  { %v3102_v56 = vadd.f32 %v3101_v49, %v3100_v50  ;;  %v3103_v57 = vsel %vm3085_vm1, %v4366_v51, 0.0 }
 0x5a0   :  { %v3104_v58 = vadd.f32 %v3103_v57, %v3102_v56 }
 0x5a2   :  { %4367 = vrcp.f32 %v3104_v58 }
 0x5ac   :  { %v4368_v55 = vpop.eup %4367 }
 0x5ad   :  { %v3108_v43 = vmul.f32 %v4368_v55, %v4366_v51  ;;  %v3106_v59 = vmul.f32 %v4368_v55, %v4362_v41  ;;  %v3107_v61 = vmul.f32 %v4368_v55, %v4364_v46 }
 0x5af   :  { %3121 = vperm.xlu1 %3945, %v3108_v43   ;;  %3111 = vperm.xlu0 %3944, %v3106_v59  }
 0x5b3   :  { %3116 = vperm.xlu0 %3944, %v3107_v61  }
 0x62e   :  { %v3112_v30 = vpop.permute.xlu0 %3111  ;;  %v3122_v33 = vpop.permute.xlu1 %3121 }
 0x62f   :  { %v3124_v0 = vmul.f32 %v3112_v30, %v5208_v6  ;;  %v3125_v10 = vmul.f32 %v3112_v30, %v5589_v21  ;;  %v3128_v40 = vmul.f32 %v3122_v33, %v5584_v22  ;;  %v3129_v1 = vmul.f32 %v3122_v33, %v5269_v24  ;;  %v3629_v6 = vld [vmem:[%s5664_s13] ss:$0 sm:$0xff] }
 0x632   :  { %v3117_v4 = vpop.permute.xlu0 %3116 }
 0x633   :  { %v3126_v38 = vmul.f32 %v3117_v4, %v5373_v2  ;;  %v3127_v13 = vmul.f32 %v3117_v4, %v5459_v47 }
 0x635   :  { %v3130_v52 = vadd.f32 %v3126_v38, %v3124_v0  ;;  %v3132_v8 = vadd.f32 %v3127_v13, %v3125_v10 }
 0x637   :  { %v3131_v60 = vadd.f32 %v3130_v52, %v3128_v40  ;;  %v3133_v9 = vadd.f32 %v3132_v8, %v3129_v1 }
 0x639   :  { %v3134_v7 = vpack.c.bf16 %v3131_v60, %v3131_v60  ;;  %v3135_v5 = vpack.c.bf16 %v3133_v9, %v3133_v9 }
 0x63b   :  { %3303 = vmatprep.mubr.bf16.mxu1 %v3135_v5 }
 0x63c   :  { %3304 = vmatmul.mubr.bf16.vlgmr.msra.gmra.mrb[44].mxu1 %v3134_v7 }
 0x70f   :  { %v3800_v19 = vpop.f32.mrb[44].mxu1 }
 0x710   :  { %v3801_v2 = vpop.f32.mrb[45].mxu1 }
 0x711   :  { %v3802_v21 = vadd.f32 %v3801_v2, %v3800_v19  ;;  %v3803_v47 = vpop.f32.mrb[46].mxu1 }
 0x712   :  { %v3804_v25 = vpop.f32.mrb[47].mxu1 }
 0x713   :  { %v3306_v22 = vadd.f32 %v3802_v21, %v3629_v6 }
 0x715   :  { %3311 = vst [vmem:[%s5665_s14] sm:$0xff] %v3306_v22 }
 0x716   :  { %3316 = vsyncpa [#allocation6], 1 }

// kernel: han_forward.2
= control target key start
LH: loop header
LB: loop body
LE: loop exit
PB: predicated region body
PF: predicated region fallthrough
CT: control target
= control target key end

     0   :  { %v9216_v1 = vmov 0   ;;  %vm91_vm0 = vcmask 130048   ;;  %v9218_v36 = vmov 0.0   ;;  %vm7219_vm1 = vmmov 0   ;;  %s9203_s1 = inlined_call_operand.vmem [shape: bf16[16,384], index: 1, kind: input, shape index: {}]   ;;  %s9204_s0 = inlined_call_operand.vmem [shape: f32[8,8,16], index: 0, kind: input, shape index: {}]   ;;  %s9205_s5 = inlined_call_operand.vmem [shape: bf16[16,384], index: 5, kind: input, shape index: {}]   ;;  %s9206_s2 = inlined_call_operand.vmem [shape: bf16[128,384], index: 2, kind: input, shape index: {}]   ;;  %s9207_s6 = inlined_call_operand.vmem [shape: bf16[128,384], index: 6, kind: input, shape index: {}]   ;;  %s9208_s3 = inlined_call_operand.vmem [shape: f32[1,384], index: 3, kind: input, shape index: {}]   ;;  %s9209_s7 = inlined_call_operand.vmem [shape: f32[1,384], index: 7, kind: input, shape index: {}]   ;;  %s9210_s4 = inlined_call_operand.vmem [shape: f32[1,128], index: 4, kind: input, shape index: {}]   ;;  %s9211_s8 = inlined_call_operand.vmem [shape: f32[1,128], index: 8, kind: input, shape index: {}]   ;;  %s9212_s9 = inlined_call_operand.vmem [shape: bf16[256,256], index: 9, kind: input, shape index: {}]   ;;  %s9213_s11 = inlined_call_operand.vmem [shape: bf16[256,1], index: 11, kind: input, shape index: {}]   ;;  %s9214_s10 = inlined_call_operand.vmem [shape: f32[1,256], index: 10, kind: input, shape index: {}]   ;;  %s9215_s12 = inlined_call_operand.vmem [shape: f32[8,256], index: 12, kind: output, shape index: {}]  }
   0x1   :  { %v6649_v0 = vld [vmem:[%s9203_s1 + $0x4] ss:$12 sps:$4 sm:$0xff]   ;;  %136 = vmatprep.mubr.bf16.mxu0 %v9216_v1  ;;  %6648 = vset.pattern.permute.xlu1 %v9216_v1  ;;  %v6651_v2 = vld [vmem:[%s9203_s1 + $0x8] ss:$12 sps:$4 sm:$0xff]   ;;  %v6652_v3 = vld [vmem:[%s9203_s1] ss:$12 sps:$4 sm:$0xff]  }
   0x2   :  { %6647 = vset.pattern.permute.xlu0 %v9216_v1  ;;  %104 = vmatprep.subr.bf16.mxu0 %v6649_v0  ;;  %v46_v4 = vld [vmem:[%s9204_s0 + $0x20] sm:$0xff]  ;;  %v47_v5 = vld [vmem:[%s9204_s0 + $0x28] sm:$0xff]  ;;  %v48_v9 = vld [vmem:[%s9204_s0 + $0x30] sm:$0xff]  ;;  %vm5445_vm2 = vcmask 7168  }
   0x3   :  { %6642 = vmatprep.subr.bf16.mxu1 %v6651_v2  ;;  %v7303_v6 = vpack.c.bf16 %v47_v5, %v46_v4  ;;  %v42_v7 = vld [vmem:[%s9204_s0] sm:$0xff]  ;;  %v43_v8 = vld [vmem:[%s9204_s0 + $0x8] sm:$0xff]  ;;  %105 = vmatpush1.bf16.msra.mxu0 %v6652_v3  ;;  %v49_v11 = vld [vmem:[%s9204_s0 + $0x38] sm:$0xff] }
   0x4   :  { %6643 = vmatpush3.bf16.msra.mxu1 %v6651_v2  ;;  %v7314_v10 = vpack.c.bf16 %v43_v8, %v42_v7  ;;  %6302 = vmatprep.subr.bf16.mxu0 %v6651_v2  ;;  %v7321_v12 = vpack.c.bf16 %v49_v11, %v48_v9  ;;  %v6653_v13 = vld [vmem:[%s9205_s5] ss:$12 sps:$4 sm:$0xff]   ;;  %v6655_v14 = vld [vmem:[%s9205_s5 + $0x4] ss:$12 sps:$4 sm:$0xff]   ;;  %v45_v17 = vld [vmem:[%s9204_s0 + $0x18] sm:$0xff] }
   0x5   :  { %6308 = vmatprep.mubr.msk.bf16.mxu1 %vm91_vm0, %v7303_v6  ;;  %v7332_v15 = vld [vmem:[%s9206_s2 + $0x4] ss:$12 sps:$4 sm:$0xff]   ;;  %303 = vmatprep.subr.bf16.mxu1 %v6655_v14  ;;  %v7350_v19 = vld [vmem:[%s9206_s2] ss:$12 sps:$4 sm:$0xff]   ;;  %v7355_v20 = vld [vmem:[%s9206_s2 + $0x1c] ss:$12 sps:$4 sm:$0xff]  }
   0x6   :  { %5609 = vmatmul.mubr.msk.bf16.vlgmr.msra.gmra.mrb[0].mxu0 %vm91_vm0, %v7314_v10  ;;  %v44_v16 = vld [vmem:[%s9204_s0 + $0x10] sm:$0xff]  ;;  %v7363_v21 = vld [vmem:[%s9206_s2 + $0x18] ss:$12 sps:$4 sm:$0xff]   ;;  %v7410_v28 = vld [vmem:[%s9206_s2 + $0x60] ss:$12 sps:$4 sm:$0xff]  }
   0x7   :  { %6309 = vmatmul.mubr.msk.bf16.vlgmr.msra.gmra.mrb[0].mxu1 %vm91_vm0, %v7321_v12  ;;  %6303 = vmatpush3.bf16.msra.mxu0 %v6651_v2  ;;  %v51_v18 = vpack.c.bf16 %v45_v17, %v44_v16  ;;  %v6677_v22 = vld [vmem:[%s9205_s5 + $0x8] ss:$12 sps:$4 sm:$0xff]   ;;  %v7381_v24 = vld [vmem:[%s9206_s2 + $0x30] ss:$12 sps:$4 sm:$0xff]   ;;  %v7387_v25 = vld [vmem:[%s9206_s2 + $0x4c] ss:$12 sps:$4 sm:$0xff]  }
   0x8   :  { %304 = vmatpush1.bf16.msra.mxu1 %v6653_v13  ;;  %146 = vmatprep.mubr.bf16.mxu0 %v9216_v1  ;;  %v7375_v23 = vld [vmem:[%s9206_s2 + $0x34] ss:$12 sps:$4 sm:$0xff]   ;;  %v7404_v27 = vld [vmem:[%s9206_s2 + $0x64] ss:$12 sps:$4 sm:$0xff]   ;;  %v7416_v29 = vld [vmem:[%s9206_s2 + $0x7c] ss:$12 sps:$4 sm:$0xff]   ;;  %v60_v13 = vlaneseq }
   0x9   :  { %335 = vmatprep.mubr.bf16.mxu1 %v9216_v1  ;;  %631 = vmatprep.subr.bf16.mxu1 %v7332_v15  ;;  %v7396_v26 = vld [vmem:[%s9206_s2 + $0x48] ss:$12 sps:$4 sm:$0xff]   ;;  %v7426_v30 = vld [vmem:[%s9206_s2 + $0x78] ss:$12 sps:$4 sm:$0xff]   ;;  %v7441_v32 = vld [vmem:[%s9206_s2 + $0x90] ss:$12 sps:$4 sm:$0xff]  }
   0xa   :  { %6312 = vmatprep.subr.bf16.mxu0 %v6677_v22  ;;  %v7435_v31 = vld [vmem:[%s9206_s2 + $0x94] ss:$12 sps:$4 sm:$0xff]   ;;  %v7447_v33 = vld [vmem:[%s9206_s2 + $0xac] ss:$12 sps:$4 sm:$0xff]   ;;  %v7464_v35 = vld [vmem:[%s9207_s6 + $0x4] ss:$12 sps:$4 sm:$0xff]  }
   0xb   :  { %v7456_v34 = vld [vmem:[%s9206_s2 + $0xa8] ss:$12 sps:$4 sm:$0xff]   ;;  %v6681_v37 = vld [vmem:[%s9207_s6] ss:$12 sps:$4 sm:$0xff]   ;;  %v6685_v40 = vld [vmem:[%s9207_s6 + $0x18] ss:$12 sps:$4 sm:$0xff]  }
   0xc   :  { %v6684_v38 = vld [vmem:[%s9206_s2 + $0x8] ss:$12 sps:$4 sm:$0xff]   ;;  %v6688_v41 = vld [vmem:[%s9206_s2 + $0x20] ss:$12 sps:$4 sm:$0xff]   ;;  %v6689_v43 = vld [vmem:[%s9207_s6 + $0x30] ss:$12 sps:$4 sm:$0xff]  }
   0xd   :  { %v6687_v39 = vld [vmem:[%s9207_s6 + $0x1c] ss:$12 sps:$4 sm:$0xff]   ;;  %v6691_v42 = vld [vmem:[%s9207_s6 + $0x34] ss:$12 sps:$4 sm:$0xff]   ;;  %v6692_v44 = vld [vmem:[%s9206_s2 + $0x38] ss:$12 sps:$4 sm:$0xff]  }
   0xe   :  { %5610 = vmatmul.mubr.msk.bf16.gmra.mrb[4].mxu0 %vm91_vm0, %v51_v18  ;;  %v6695_v45 = vld [vmem:[%s9207_s6 + $0x4c] ss:$12 sps:$4 sm:$0xff]   ;;  %v6693_v46 = vld [vmem:[%s9207_s6 + $0x48] ss:$12 sps:$4 sm:$0xff]   ;;  %v6696_v47 = vld [vmem:[%s9206_s2 + $0x50] ss:$12 sps:$4 sm:$0xff]  }
   0xf   :  { %5620 = vmatmul.mubr.msk.bf16.vlgmr.msra.gmra.mrb[4].mxu1 %vm91_vm0, %v7314_v10  ;;  %156 = vmatprep.mubr.bf16.mxu0 %v9216_v1  ;;  %v6699_v48 = vld [vmem:[%s9207_s6 + $0x64] ss:$12 sps:$4 sm:$0xff]   ;;  %v6697_v49 = vld [vmem:[%s9207_s6 + $0x60] ss:$12 sps:$4 sm:$0xff]   ;;  %v6700_v50 = vld [vmem:[%s9206_s2 + $0x68] ss:$12 sps:$4 sm:$0xff]  }
  0x10   :  { %632 = vmatpush1.bf16.msra.mxu1 %v7350_v19  ;;  %345 = vmatprep.mubr.bf16.mxu1 %v9216_v1  ;;  %v6703_v51 = vld [vmem:[%s9207_s6 + $0x7c] ss:$12 sps:$4 sm:$0xff]   ;;  %v6701_v52 = vld [vmem:[%s9207_s6 + $0x78] ss:$12 sps:$4 sm:$0xff]   ;;  %v6704_v53 = vld [vmem:[%s9206_s2 + $0x80] ss:$12 sps:$4 sm:$0xff]  }
  0x11   :  { %633 = vmatprep.subr.bf16.mxu1 %v7355_v20  ;;  %v6707_v54 = vld [vmem:[%s9207_s6 + $0x94] ss:$12 sps:$4 sm:$0xff]   ;;  %v6705_v55 = vld [vmem:[%s9207_s6 + $0x90] ss:$12 sps:$4 sm:$0xff]   ;;  %v6708_v56 = vld [vmem:[%s9206_s2 + $0x98] ss:$12 sps:$4 sm:$0xff]  }
  0x12   :  { %v6711_v57 = vld [vmem:[%s9207_s6 + $0xac] ss:$12 sps:$4 sm:$0xff]   ;;  %v7551_v58 = vld [vmem:[%s9207_s6 + $0xa8] ss:$12 sps:$4 sm:$0xff]   ;;  %v6712_v59 = vld [vmem:[%s9206_s2 + $0xb0] ss:$12 sps:$4 sm:$0xff]  }
  0x13   :  { %v6713_v60 = vld [vmem:[%s9207_s6 + $0x8] ss:$12 sps:$4 sm:$0xff]   ;;  %v6714_v61 = vld [vmem:[%s9207_s6 + $0x20] ss:$12 sps:$4 sm:$0xff]   ;;  %v6715_v62 = vld [vmem:[%s9207_s6 + $0x38] ss:$12 sps:$4 sm:$0xff]  }
  0x14   :  { %634 = vmatpush1.bf16.msra.mxu1 %v7363_v21  ;;  %v6716_v63 = vld [vmem:[%s9207_s6 + $0x50] ss:$12 sps:$4 sm:$0xff]   ;;  %v6717_v0 = vld [vmem:[%s9207_s6 + $0x68] ss:$12 sps:$4 sm:$0xff]   ;;  %v6718_v2 = vld [vmem:[%s9207_s6 + $0x80] ss:$12 sps:$4 sm:$0xff]  }
  0x15   :  { %635 = vmatprep.subr.bf16.mxu1 %v7375_v23  ;;  %v6719_v3 = vld [vmem:[%s9207_s6 + $0x98] ss:$12 sps:$4 sm:$0xff]   ;;  %v6720_v4 = vld [vmem:[%s9207_s6 + $0xb0] ss:$12 sps:$4 sm:$0xff]   ;;  %v6721_v5 = vld [vmem:[%s9206_s2 + $0x8] ss:$12 sps:$4 sm:$0xff]  }
  0x16   :  { %5611 = vmatmul.mubr.msk.bf16.gmra.mrb[8].mxu0 %vm91_vm0, %v7303_v6  ;;  %v6723_v7 = vld [vmem:[%s9206_s2 + $0x38] ss:$12 sps:$4 sm:$0xff]   ;;  %v6724_v8 = vld [vmem:[%s9206_s2 + $0x50] ss:$12 sps:$4 sm:$0xff]   ;;  %v6725_v9 = vld [vmem:[%s9206_s2 + $0x68] ss:$12 sps:$4 sm:$0xff]  }
  0x17   :  { %5621 = vmatmul.mubr.msk.bf16.gmra.mrb[8].mxu1 %vm91_vm0, %v51_v18  ;;  %166 = vmatprep.mubr.bf16.mxu0 %v9216_v1  ;;  %v6727_v11 = vld [vmem:[%s9206_s2 + $0x98] ss:$12 sps:$4 sm:$0xff]   ;;  %v7648_v14 = vshrl.u32 %v60_v13, 7  ;;  %v58_v16 = vld [vmem:[%s9208_s3] sm:$0x7] }
  0x18   :  { %636 = vmatpush1.bf16.msra.mxu1 %v7381_v24  ;;  %355 = vmatprep.mubr.bf16.mxu1 %v9216_v1 }
  0x19   :  { %637 = vmatprep.subr.bf16.mxu1 %v7387_v25  ;;  %v7655_v17 = vsub.s32 0, %v7648_v14 }
  0x1b   :  { %9226 = vst [vmem:[#allocation5_spill] sm:$0xff] %v7655_v17 }
  0x1c   :  { %638 = vmatpush1.bf16.msra.mxu1 %v7396_v26 }
  0x1d   :  { %639 = vmatprep.subr.bf16.mxu1 %v7404_v27 }
  0x1e   :  { %5612 = vmatmul.mubr.msk.bf16.gmra.mrb[12].mxu0 %vm91_vm0, %v7321_v12 }
  0x1f   :  { %5622 = vmatmul.mubr.msk.bf16.gmra.mrb[12].mxu1 %vm91_vm0, %v7303_v6  ;;  %6304 = vmatprep.mubr.msk.bf16.mxu0 %vm91_vm0, %v7314_v10 }
  0x20   :  { %640 = vmatpush1.bf16.msra.mxu1 %v7410_v28  ;;  %365 = vmatprep.mubr.bf16.mxu1 %v9216_v1 }
  0x21   :  { %641 = vmatprep.subr.bf16.mxu1 %v7416_v29 }
  0x24   :  { %642 = vmatpush1.bf16.msra.mxu1 %v7426_v30 }
  0x25   :  { %643 = vmatprep.subr.bf16.mxu1 %v7435_v31 }
  0x26   :  { %6305 = vmatmul.mubr.msk.bf16.vlgmr.msra.gmra.mrb[16].mxu0 %vm91_vm0, %v51_v18 }
  0x27   :  { %5623 = vmatmul.mubr.msk.bf16.gmra.mrb[16].mxu1 %vm91_vm0, %v7321_v12  ;;  %6313 = vmatpush3.bf16.msra.mxu0 %v6677_v22  ;;  %v7667_v22 = vrot.slane %v58_v16, %v7655_v17 }
  0x28   :  { %644 = vmatpush1.bf16.msra.mxu1 %v7441_v32  ;;  %6314 = vmatprep.mubr.msk.bf16.mxu0 %vm91_vm0, %v7314_v10  ;;  %v6726_v10 = vld [vmem:[%s9206_s2 + $0x80] ss:$12 sps:$4 sm:$0xff]  }
  0x29   :  { %645 = vmatprep.subr.bf16.mxu1 %v7447_v33  ;;  %663 = vmatprep.mubr.bf16.mxu1 %v9216_v1 }
  0x2a   :  { %6322 = vmatprep.subr.bf16.mxu0 %v9218_v36 }
  0x2c   :  { %646 = vmatpush1.bf16.msra.mxu1 %v7456_v34 }
  0x2d   :  { %907 = vmatprep.subr.bf16.mxu1 %v7464_v35 }
  0x2e   :  { %6315 = vmatmul.mubr.msk.bf16.vlgmr.msra.gmra.mrb[20].mxu0 %vm91_vm0, %v51_v18 }
  0x2f   :  { %664 = vmatmul.mubr.bf16.vlgmr.msra.gmra.mrb[20].mxu1 %v9216_v1  ;;  %6323 = vmatpush3.bf16.msra.mxu0 %v6684_v38 }
  0x30   :  { %908 = vmatpush1.bf16.msra.mxu1 %v6681_v37  ;;  %6324 = vmatprep.subr.bf16.mxu0 %v9218_v36 }
  0x31   :  { %909 = vmatprep.subr.bf16.mxu1 %v6687_v39  ;;  %6318 = vmatprep.mubr.msk.bf16.mxu0 %vm91_vm0, %v7303_v6  ;;  %v6722_v6 = vld [vmem:[%s9206_s2 + $0x20] ss:$12 sps:$4 sm:$0xff]  }
  0x32   :  { %939 = vmatprep.mubr.bf16.mxu1 %v9216_v1 }
  0x33   :  { %6325 = vmatpush3.bf16.msra.mxu0 %v6688_v41 }
  0x34   :  { %910 = vmatpush1.bf16.msra.mxu1 %v6685_v40  ;;  %6326 = vmatprep.subr.bf16.mxu0 %v9218_v36 }
  0x35   :  { %911 = vmatprep.subr.bf16.mxu1 %v6691_v42 }
  0x36   :  { %6319 = vmatmul.mubr.msk.bf16.gmra.mrb[24].mxu0 %vm91_vm0, %v7321_v12  ;;  %v6728_v12 = vld [vmem:[%s9206_s2 + $0xb0] ss:$12 sps:$4 sm:$0xff]  }
  0x37   :  { %6327 = vmatpush3.bf16.msra.mxu0 %v6692_v44  ;;  %6338 = vmatprep.mubr.msk.bf16.mxu0 %vm7219_vm1, %v9218_v36 }
  0x38   :  { %912 = vmatpush1.bf16.msra.mxu1 %v6689_v43  ;;  %6328 = vmatprep.subr.bf16.mxu0 %v9218_v36 }
  0x39   :  { %913 = vmatprep.subr.bf16.mxu1 %v6695_v45 }
  0x3b   :  { %6329 = vmatpush3.bf16.msra.mxu0 %v6696_v47 }
  0x3c   :  { %914 = vmatpush1.bf16.msra.mxu1 %v6693_v46  ;;  %6330 = vmatprep.subr.bf16.mxu0 %v9218_v36 }
  0x3d   :  { %915 = vmatprep.subr.bf16.mxu1 %v6699_v48 }
  0x3f   :  { %6331 = vmatpush3.bf16.msra.mxu0 %v6700_v50 }
  0x40   :  { %916 = vmatpush1.bf16.msra.mxu1 %v6697_v49  ;;  %6332 = vmatprep.subr.bf16.mxu0 %v9218_v36 }
  0x41   :  { %917 = vmatprep.subr.bf16.mxu1 %v6703_v51 }
  0x43   :  { %6333 = vmatpush3.bf16.msra.mxu0 %v6704_v53 }
  0x44   :  { %918 = vmatpush1.bf16.msra.mxu1 %v6701_v52  ;;  %6334 = vmatprep.subr.bf16.mxu0 %v9218_v36 }
  0x45   :  { %919 = vmatprep.subr.bf16.mxu1 %v6707_v54 }
  0x47   :  { %6335 = vmatpush3.bf16.msra.mxu0 %v6708_v56 }
  0x48   :  { %920 = vmatpush1.bf16.msra.mxu1 %v6705_v55  ;;  %6336 = vmatprep.subr.bf16.mxu0 %v9218_v36 }
  0x49   :  { %921 = vmatprep.subr.bf16.mxu1 %v6711_v57 }
  0x4b   :  { %6337 = vmatpush3.bf16.msra.mxu0 %v6712_v59 }
  0x4c   :  { %922 = vmatpush1.bf16.msra.mxu1 %v7551_v58  ;;  %6342 = vmatprep.subr.bf16.mxu0 %v9218_v36 }
  0x4d   :  { %1192 = vmatprep.subr.bf16.mxu1 %v7332_v15  ;;  %v70_v15 = vsub.s32 2, %v7648_v14 }
  0x4e   :  { %6339 = vmatmul.mubr.bf16.vlgmr.msra.gmra.mrb[28].mxu0 %v9216_v1 }
  0x4f   :  { %940 = vmatmul.mubr.bf16.vlgmr.msra.gmra.mrb[24].mxu1 %v9216_v1  ;;  %6343 = vmatpush3.bf16.msra.mxu0 %v6713_v60  ;;  %v7659_v18 = vrot.slane %v58_v16, %v70_v15 }
  0x50   :  { %6358 = vmatprep.mubr.msk.bf16.mxu0 %vm7219_vm1, %v9218_v36  ;;  %6344 = vmatprep.subr.bf16.mxu0 %v9218_v36 }
  0x51   :  { %1193 = vmatpush1.bf16.msra.mxu1 %v7350_v19  ;;  %1224 = vmatprep.mubr.bf16.mxu1 %v9216_v1  ;;  %v7662_v19 = vsub.s32 1, %v7648_v14 }
  0x52   :  { %1194 = vmatprep.subr.bf16.mxu1 %v7355_v20 }
  0x53   :  { %6345 = vmatpush3.bf16.msra.mxu0 %v6714_v61  ;;  %9227 = vst [vmem:[#allocation6_spill] sm:$0xff] %v7662_v19 }
  0x54   :  { %6346 = vmatprep.subr.bf16.mxu0 %v9218_v36 }
  0x55   :  { %1195 = vmatpush1.bf16.msra.mxu1 %v7363_v21 }
  0x56   :  { %1196 = vmatprep.subr.bf16.mxu1 %v7375_v23 }
  0x57   :  { %6347 = vmatpush3.bf16.msra.mxu0 %v6715_v62 }
  0x58   :  { %6348 = vmatprep.subr.bf16.mxu0 %v9218_v36 }
  0x59   :  { %1197 = vmatpush1.bf16.msra.mxu1 %v7381_v24 }
  0x5a   :  { %1198 = vmatprep.subr.bf16.mxu1 %v7387_v25 }
  0x5b   :  { %6349 = vmatpush3.bf16.msra.mxu0 %v6716_v63 }
  0x5c   :  { %6350 = vmatprep.subr.bf16.mxu0 %v9218_v36 }
  0x5d   :  { %1199 = vmatpush1.bf16.msra.mxu1 %v7396_v26  ;;  %v7675_v26 = vrot.slane %v58_v16, %v7662_v19 }
  0x5e   :  { %1200 = vmatprep.subr.bf16.mxu1 %v7404_v27 }
  0x5f   :  { %6351 = vmatpush3.bf16.msra.mxu0 %v6717_v0 }
  0x60   :  { %6352 = vmatprep.subr.bf16.mxu0 %v9218_v36 }
  0x61   :  { %1201 = vmatpush1.bf16.msra.mxu1 %v7410_v28 }
  0x62   :  { %1202 = vmatprep.subr.bf16.mxu1 %v7416_v29 }
  0x63   :  { %6353 = vmatpush3.bf16.msra.mxu0 %v6718_v2 }
  0x64   :  { %6354 = vmatprep.subr.bf16.mxu0 %v9218_v36 }
  0x65   :  { %1203 = vmatpush1.bf16.msra.mxu1 %v7426_v30  ;;  %v7683_v30 = vld [vmem:[%s9209_s7] sm:$0x7] }
  0x66   :  { %1204 = vmatprep.subr.bf16.mxu1 %v7435_v31  ;;  %v7699_v38 = vrot.slane %v7683_v30, %v7655_v17  ;;  %v7703_v39 = vrot.slane %v7683_v30, %v7662_v19 }
  0x67   :  { %6355 = vmatpush3.bf16.msra.mxu0 %v6719_v3 }
  0x68   :  { %6356 = vmatprep.subr.bf16.mxu0 %v9218_v36 }
  0x69   :  { %1205 = vmatpush1.bf16.msra.mxu1 %v7441_v32 }
  0x6a   :  { %1206 = vmatprep.subr.bf16.mxu1 %v7447_v33 }
  0x6b   :  { %6357 = vmatpush3.bf16.msra.mxu0 %v6720_v4 }
  0x6c   :  { %6362 = vmatprep.subr.bf16.mxu0 %v9218_v36 }
  0x6d   :  { %1207 = vmatpush1.bf16.msra.mxu1 %v7456_v34 }
  0x6e   :  { %1469 = vmatprep.subr.bf16.mxu1 %v7464_v35  ;;  %6359 = vmatmul.mubr.bf16.vlgmr.msra.gmra.mrb[32].mxu0 %v9216_v1 }
  0x6f   :  { %6378 = vmatprep.mubr.msk.bf16.mxu0 %vm7219_vm1, %v9218_v36  ;;  %6363 = vmatpush3.bf16.msra.mxu0 %v6721_v5 }
  0x70   :  { %6364 = vmatprep.subr.bf16.mxu0 %v9218_v36 }
  0x73   :  { %6365 = vmatpush3.bf16.msra.mxu0 %v6722_v6 }
  0x74   :  { %6366 = vmatprep.subr.bf16.mxu0 %v9218_v36 }
  0x77   :  { %6367 = vmatpush3.bf16.msra.mxu0 %v6723_v7 }
  0x78   :  { %6368 = vmatprep.subr.bf16.mxu0 %v9218_v36 }
  0x7b   :  { %6369 = vmatpush3.bf16.msra.mxu0 %v6724_v8 }
  0x7c   :  { %6370 = vmatprep.subr.bf16.mxu0 %v9218_v36 }
  0x7f   :  { %6371 = vmatpush3.bf16.msra.mxu0 %v6725_v9 }
  0x80   :  { %6372 = vmatprep.subr.bf16.mxu0 %v9218_v36 }
  0x83   :  { %6373 = vmatpush3.bf16.msra.mxu0 %v6726_v10 }
  0x84   :  { %6374 = vmatprep.subr.bf16.mxu0 %v9218_v36 }
  0x87   :  { %6375 = vmatpush3.bf16.msra.mxu0 %v6727_v11 }
  0x88   :  { %6376 = vmatprep.subr.bf16.mxu0 %v9218_v36 }
  0x8b   :  { %6377 = vmatpush3.bf16.msra.mxu0 %v6728_v12 }
  0x8c   :  { %6382 = vmatprep.subr.bf16.mxu0 %v9218_v36 }
  0xd9   :  { %v7664_v20 = vpop.f32.mrb[0].mxu0 }
  0xda   :  { %v6310_v21 = vpop.f32.mrb[0].mxu1  ;;  %v7669_v23 = vpop.f32.mrb[1].mxu0 }
  0xdb   :  { %v7672_v24 = vadd.f32 %v6310_v21, %v7659_v18  ;;  %v227_v25 = vpop.f32.mrb[1].mxu1  ;;  %v142_v27 = vpop.f32.mrb[2].mxu0 }
  0xdc   :  { %v7678_v28 = vadd.f32 %v227_v25, %v7659_v18  ;;  %v6311_v29 = vpop.f32.mrb[2].mxu1  ;;  %v7686_v31 = vadd.f32 %v142_v27, %v7667_v22  ;;  %v144_v32 = vpop.f32.mrb[3].mxu0 }
  0xdd   :  { %9228 = vst [vmem:[#allocation7_spill] sm:$0xff] %v7672_v24  ;;  %v7689_v33 = vadd.f32 %v6311_v29, %v7659_v18  ;;  %v230_v34 = vpop.f32.mrb[3].mxu1  ;;  %v7692_v35 = vadd.f32 %v144_v32, %v7675_v26 }
  0xde   :  { %9229 = vst [vmem:[#allocation8_spill] sm:$0xff] %v7678_v28  ;;  %v7695_v37 = vadd.f32 %v230_v34, %v7659_v18 }
  0xdf   :  { %9230 = vst [vmem:[#allocation9_spill] sm:$0xff] %v7689_v33 }
  0xe0   :  { %9231 = vst [vmem:[#allocation10_spill] sm:$0xff] %v7695_v37 }
  0xe1   :  { %v148_v40 = vpop.f32.mrb[4].mxu0 }
  0xe2   :  { %v337_v41 = vpop.f32.mrb[4].mxu1  ;;  %v7706_v42 = vadd.f32 %v148_v40, %v7667_v22  ;;  %v150_v43 = vpop.f32.mrb[5].mxu0 }
  0xe3   :  { %v7709_v44 = vadd.f32 %v337_v41, %v7699_v38  ;;  %v339_v45 = vpop.f32.mrb[5].mxu1  ;;  %v7712_v46 = vadd.f32 %v150_v43, %v7675_v26  ;;  %v152_v47 = vpop.f32.mrb[6].mxu0 }
  0xe4   :  { %v7715_v48 = vadd.f32 %v339_v45, %v7703_v39  ;;  %v341_v49 = vpop.f32.mrb[6].mxu1  ;;  %v7718_v50 = vadd.f32 %v152_v47, %v7667_v22  ;;  %v154_v51 = vpop.f32.mrb[7].mxu0 }
  0xe5   :  { %9232 = vst [vmem:[#allocation11_spill] sm:$0xff] %v7709_v44  ;;  %v7721_v52 = vadd.f32 %v341_v49, %v7699_v38  ;;  %v343_v53 = vpop.f32.mrb[7].mxu1  ;;  %v7724_v54 = vadd.f32 %v154_v51, %v7675_v26 }
  0xe6   :  { %9233 = vst [vmem:[#allocation12_spill] sm:$0xff] %v7715_v48  ;;  %v7727_v55 = vadd.f32 %v343_v53, %v7703_v39 }
  0xe7   :  { %9234 = vst [vmem:[#allocation13_spill] sm:$0xff] %v7721_v52 }
  0xe8   :  { %9235 = vst [vmem:[#allocation14_spill] sm:$0xff] %v7727_v55 }
  0xe9   :  { %v158_v56 = vpop.f32.mrb[8].mxu0 }
  0xea   :  { %v347_v57 = vpop.f32.mrb[8].mxu1  ;;  %v7730_v59 = vadd.f32 %v158_v56, %v7667_v22  ;;  %v160_v60 = vpop.f32.mrb[9].mxu0 }
  0xeb   :  { %v7733_v61 = vadd.f32 %v347_v57, %v7699_v38  ;;  %v349_v62 = vpop.f32.mrb[9].mxu1  ;;  %v7736_v63 = vadd.f32 %v160_v60, %v7675_v26  ;;  %v162_v0 = vpop.f32.mrb[10].mxu0 }
  0xec   :  { %9236 = vst [vmem:[#allocation15_spill] sm:$0xff] %v7730_v59  ;;  %v7739_v2 = vadd.f32 %v349_v62, %v7703_v39  ;;  %v351_v3 = vpop.f32.mrb[10].mxu1  ;;  %v7742_v4 = vadd.f32 %v162_v0, %v7667_v22  ;;  %v164_v5 = vpop.f32.mrb[11].mxu0 }
  0xed   :  { %9237 = vst [vmem:[#allocation16_spill] sm:$0xff] %v7733_v61  ;;  %9238 = vst [vmem:[#allocation17_spill] sm:$0xff] %v7736_v63  ;;  %v7745_v6 = vadd.f32 %v351_v3, %v7699_v38  ;;  %v353_v7 = vpop.f32.mrb[11].mxu1  ;;  %v7748_v8 = vadd.f32 %v164_v5, %v7675_v26 }
  0xee   :  { %9239 = vst [vmem:[#allocation18_spill] sm:$0xff] %v7739_v2  ;;  %9240 = vst [vmem:[#allocation19_spill] sm:$0xff] %v7742_v4  ;;  %v7751_v9 = vadd.f32 %v353_v7, %v7703_v39 }
  0xef   :  { %9241 = vst [vmem:[#allocation20_spill] sm:$0xff] %v7745_v6  ;;  %9242 = vst [vmem:[#allocation21_spill] sm:$0xff] %v7748_v8 }
  0xf0   :  { %9243 = vst [vmem:[#allocation22_spill] sm:$0xff] %v7751_v9 }
  0xf1   :  { %v168_v10 = vpop.f32.mrb[12].mxu0 }
  0xf2   :  { %v357_v11 = vpop.f32.mrb[12].mxu1  ;;  %v7754_v12 = vadd.f32 %v168_v10, %v7667_v22  ;;  %v170_v13 = vpop.f32.mrb[13].mxu0 }
  0xf3   :  { %v7757_v16 = vadd.f32 %v357_v11, %v7699_v38  ;;  %v359_v21 = vpop.f32.mrb[13].mxu1  ;;  %v7760_v25 = vadd.f32 %v170_v13, %v7675_v26  ;;  %v172_v27 = vpop.f32.mrb[14].mxu0  ;;  %v7795_v13 = vrot.slane %v7683_v30, %v70_v15 }
  0xf4   :  { %9244 = vst [vmem:[#allocation23_spill] sm:$0xff] %v7754_v12  ;;  %v7763_v29 = vadd.f32 %v359_v21, %v7703_v39  ;;  %v361_v32 = vpop.f32.mrb[14].mxu1  ;;  %v7766_v34 = vadd.f32 %v172_v27, %v7667_v22  ;;  %v174_v40 = vpop.f32.mrb[15].mxu0  ;;  %v139_v21 = vadd.f32 %v7664_v20, %v7667_v22  ;;  %v141_v27 = vadd.f32 %v7669_v23, %v7675_v26 }
  0xf5   :  { %9245 = vst [vmem:[#allocation24_spill] sm:$0xff] %v7757_v16  ;;  %9246 = vst [vmem:[#allocation25_spill] sm:$0xff] %v7760_v25  ;;  %v7769_v41 = vadd.f32 %v361_v32, %v7699_v38  ;;  %v363_v43 = vpop.f32.mrb[15].mxu1  ;;  %v7772_v45 = vadd.f32 %v174_v40, %v7675_v26 }
  0xf6   :  { %9247 = vst [vmem:[#allocation26_spill] sm:$0xff] %v7763_v29  ;;  %9248 = vst [vmem:[#allocation27_spill] sm:$0xff] %v7766_v34  ;;  %v7775_v47 = vadd.f32 %v363_v43, %v7703_v39 }
  0xf7   :  { %9249 = vst [vmem:[#allocation28_spill] sm:$0xff] %v7772_v45 }
  0xf9   :  { %v6306_v49 = vpop.f32.mrb[16].mxu0 }
  0xfa   :  { %v367_v51 = vpop.f32.mrb[16].mxu1  ;;  %v7778_v53 = vadd.f32 %v6306_v49, %v7659_v18  ;;  %v211_v56 = vpop.f32.mrb[17].mxu0 }
  0xfb   :  { %v7781_v57 = vadd.f32 %v367_v51, %v7699_v38  ;;  %v369_v60 = vpop.f32.mrb[17].mxu1  ;;  %v6307_v62 = vpop.f32.mrb[18].mxu0  ;;  %v212_v44 = vadd.f32 %v211_v56, %v7659_v18  ;;  %v9256_v56 = vmov 0.0  }
  0xfc   :  { %v7784_v0 = vadd.f32 %v369_v60, %v7703_v39  ;;  %v371_v3 = vpop.f32.mrb[18].mxu1  ;;  %v7787_v5 = vadd.f32 %v6307_v62, %v7659_v18  ;;  %v214_v7 = vpop.f32.mrb[19].mxu0 }
  0xfd   :  { %v373_v10 = vpop.f32.mrb[19].mxu1  ;;  %v7790_v11 = vadd.f32 %v214_v7, %v7659_v18  ;;  %v6729_v18 = vld [vmem:[%s9207_s6 + $0x8] ss:$12 sps:$4 sm:$0xff]  }
  0xfe   :  { %v374_v1 = vadd.f32 %v373_v10, %v7703_v39 }
 0x101   :  { %v6316_v32 = vpop.f32.mrb[20].mxu0 }
 0x102   :  { %v665_v40 = vpop.f32.mrb[20].mxu1  ;;  %v7802_v43 = vadd.f32 %v6316_v32, %v7795_v13  ;;  %v410_v51 = vpop.f32.mrb[21].mxu0 }
 0x103   :  { %v712_v49 = vadd.f32 %v665_v40, %v139_v21  ;;  %v667_v60 = vpop.f32.mrb[21].mxu1  ;;  %v7805_v62 = vadd.f32 %v410_v51, %v7795_v13  ;;  %v6317_v15 = vpop.f32.mrb[22].mxu0 }
 0x104   :  { %9250 = vst [vmem:[#allocation29_spill] sm:$0xff] %v7802_v43  ;;  %v719_v14 = vadd.f32 %v667_v60, %v141_v27  ;;  %v669_v30 = vpop.f32.mrb[22].mxu1  ;;  %v7808_v20 = vadd.f32 %v6317_v15, %v7795_v13  ;;  %v413_v22 = vpop.f32.mrb[23].mxu0 }
 0x105   :  { %9251 = vst [vmem:[#allocation30_spill] sm:$0xff] %v7805_v62  ;;  %v5652_v7 = vmul.f32 -1.442695, %v712_v49  ;;  %v670_v23 = vpop.f32.mrb[23].mxu1  ;;  %v7811_v26 = vadd.f32 %v413_v22, %v7795_v13 }
 0x106   :  { %9252 = vst [vmem:[#allocation31_spill] sm:$0xff] %v7808_v20  ;;  %v5653_v15 = vmul.f32 -1.442695, %v719_v14  ;;  %v7827_v23 = vld [vmem:[%s9210_s4] ss:$0 sm:$0xff] }
 0x107   :  { %9253 = vst [vmem:[#allocation32_spill] sm:$0xff] %v7811_v26  ;;  %6993 = vpow2.f32 %v5652_v7 }
 0x108   :  { %6995 = vpow2.f32 %v5653_v15 }
 0x109   :  { %v6320_v32 = vpop.f32.mrb[24].mxu0 }
 0x10a   :  { %v7814_v21 = vadd.f32 %v6320_v32, %v7795_v13  ;;  %v426_v40 = vpop.f32.mrb[25].mxu0  ;;  %v372_v32 = vadd.f32 %v371_v3, %v7699_v38 }
 0x10b   :  { %v7817_v51 = vadd.f32 %v426_v40, %v7795_v13  ;;  %v7819_v27 = vpop.f32.mrb[26].mxu0 }
 0x10c   :  { %v429_v49 = vpop.f32.mrb[27].mxu0 }
 0x10d   :  { %9254 = vst [vmem:[#allocation33_spill] sm:$0xff] %v7817_v51  ;;  %v7822_v60 = vadd.f32 %v429_v49, %v7795_v13 }
 0x111   :  { %v6994_v30 = vpop.eup %6993 }
 0x112   :  { %v716_v22 = vadd.f32 1.0, %v6994_v30  ;;  %v6996_v7 = vpop.eup %6995 }
 0x113   :  { %v723_v40 = vadd.f32 1.0, %v6996_v7 }
 0x114   :  { %6997 = vrcp.f32 %v716_v22 }
 0x115   :  { %6999 = vrcp.f32 %v723_v40 }
 0x11e   :  { %v6998_v30 = vpop.eup %6997 }
 0x11f   :  { %v7000_v39 = vpop.eup %6999 }
 0x121   :  { %v706_v36 = vpop.f32.mrb[28].mxu0 }
 0x122   :  { %v941_v19 = vpop.f32.mrb[24].mxu1  ;;  %v733_v49 = vadd.f32 %v7827_v23, %v706_v36  ;;  %v6340_v17 = vpop.f32.mrb[29].mxu0 }
 0x123   :  { %v988_v14 = vadd.f32 %v941_v19, %v372_v32  ;;  %v943_v15 = vpop.f32.mrb[25].mxu1  ;;  %v709_v62 = vpop.f32.mrb[30].mxu0  ;;  %v737_v19 = vsub.f32 1.0, %v7000_v39  ;;  %v739_v32 = vmul.f32 0.0, %v7000_v39  ;;  %v7207_v39 = vld [vmem:[%s9207_s6 + $0x30] ss:$12 sps:$4 sm:$0xff]  }
 0x124   :  { %v995_v22 = vadd.f32 %v943_v15, %v374_v1  ;;  %v945_v48 = vpop.f32.mrb[26].mxu1  ;;  %v734_v33 = vmul.f32 %v6998_v30, %v733_v49  ;;  %v6341_v38 = vpop.f32.mrb[31].mxu0  ;;  %v9257_v62 = vmov 0   ;;  %v7205_v49 = vld [vmem:[%s9207_s6 + $0x18] ss:$12 sps:$4 sm:$0xff]  }
 0x125   :  { %v5679_v45 = vmul.f32 -1.442695, %v988_v14  ;;  %v946_v3 = vpop.f32.mrb[27].mxu1  ;;  %v6731_v14 = vld [vmem:[%s9207_s6 + $0x38] ss:$12 sps:$4 sm:$0xff]  }
 0x126   :  { %v735_v7 = vadd.f32 %v734_v33, %v212_v44  ;;  %v5680_v10 = vmul.f32 -1.442695, %v995_v22  ;;  %v7203_v44 = vld [vmem:[%s9207_s6] ss:$12 sps:$4 sm:$0xff]  }
 0x127   :  { %7001 = vpow2.f32 %v5679_v45  ;;  %v7204_v45 = vld [vmem:[%s9207_s6 + $0x1c] ss:$12 sps:$4 sm:$0xff]   ;;  %v7862_v15 = vld [vmem:[%s9211_s8] ss:$0 sm:$0xff] }
 0x128   :  { %7003 = vtanh.f32 %v735_v7  ;;  %v7206_v30 = vld [vmem:[%s9207_s6 + $0x34] ss:$12 sps:$4 sm:$0xff]  }
 0x129   :  { %7005 = vpow2.f32 %v5680_v10  ;;  %v6732_v10 = vld [vmem:[%s9207_s6 + $0x50] ss:$12 sps:$4 sm:$0xff]  }
 0x131   :  { %v7002_v36 = vpop.eup %7001 }
 0x132   :  { %v7004_v17 = vpop.eup %7003  ;;  %v992_v1 = vadd.f32 1.0, %v7002_v36 }
 0x133   :  { %v738_v34 = vmul.f32 %v7004_v17, %v737_v19  ;;  %v7006_v40 = vpop.eup %7005  ;;  %v7208_v17 = vld [vmem:[%s9207_s6 + $0x4c] ss:$12 sps:$4 sm:$0xff]  }
 0x134   :  { %7007 = vrcp.f32 %v992_v1  ;;  %v999_v22 = vadd.f32 1.0, %v7006_v40  ;;  %v7212_v40 = vld [vmem:[%s9207_s6 + $0x7c] ss:$12 sps:$4 sm:$0xff]  }
 0x135   :  { %v7833_v48 = vadd.f32 %v739_v32, %v738_v34  ;;  %v6730_v34 = vld [vmem:[%s9207_s6 + $0x20] ss:$12 sps:$4 sm:$0xff]   ;;  %v438_v32 = vadd.f32 %v7819_v27, %v7795_v13 }
 0x136   :  { %7009 = vrcp.f32 %v999_v22  ;;  %v7211_v13 = vld [vmem:[%s9207_s6 + $0x60] ss:$12 sps:$4 sm:$0xff]  }
 0x137   :  { %9255 = vst [vmem:[#allocation34_spill] sm:$0xff] %v7833_v48  ;;  %v1031_v33 = vpack.c.bf16 %v7833_v48, %v7833_v48  ;;  %v6734_v27 = vld [vmem:[%s9207_s6 + $0x80] ss:$12 sps:$4 sm:$0xff]  }
 0x138   :  { %v7214_v22 = vld [vmem:[%s9207_s6 + $0x94] ss:$12 sps:$4 sm:$0xff]  }
 0x139   :  { %1225 = vmatmul.mubr.bf16.vlgmr.msra.gmra.mrb[28].mxu1 %v1031_v33  ;;  %6379 = vmatmul.mubr.bf16.vlgmr.msra.gmra.mrb[36].mxu0 %v1031_v33 }
 0x13a   :  { %1470 = vmatpush1.bf16.msra.mxu1 %v7203_v44  ;;  %6383 = vmatpush3.bf16.msra.mxu0 %v6729_v18  ;;  %v7209_v44 = vld [vmem:[%s9207_s6 + $0x48] ss:$12 sps:$4 sm:$0xff]  }
 0x13b   :  { %1471 = vmatprep.subr.bf16.mxu1 %v7204_v45  ;;  %6384 = vmatprep.subr.bf16.mxu0 %v9256_v56  ;;  %v7210_v45 = vld [vmem:[%s9207_s6 + $0x64] ss:$12 sps:$4 sm:$0xff]  }
 0x13c   :  { %1501 = vmatprep.mubr.bf16.mxu1 %v9257_v62  ;;  %6398 = vmatprep.mubr.msk.bf16.mxu0 %vm7219_vm1, %v9256_v56 }
 0x13e   :  { %1472 = vmatpush1.bf16.msra.mxu1 %v7205_v49  ;;  %6385 = vmatpush3.bf16.msra.mxu0 %v6730_v34  ;;  %v7008_v36 = vpop.eup %7007  ;;  %v6733_v34 = vld [vmem:[%s9207_s6 + $0x68] ss:$12 sps:$4 sm:$0xff]  }
 0x13f   :  { %1473 = vmatprep.subr.bf16.mxu1 %v7206_v30  ;;  %6386 = vmatprep.subr.bf16.mxu0 %v9256_v56  ;;  %v6735_v30 = vld [vmem:[%s9207_s6 + $0x98] ss:$12 sps:$4 sm:$0xff]  }
 0x140   :  { %v7010_v49 = vpop.eup %7009 }
 0x141   :  { %v982_v38 = vpop.f32.mrb[32].mxu0 }
 0x142   :  { %v1009_v3 = vadd.f32 %v7862_v15, %v982_v38  ;;  %v6360_v7 = vpop.f32.mrb[33].mxu0  ;;  %1474 = vmatpush1.bf16.msra.mxu1 %v7207_v39  ;;  %6387 = vmatpush3.bf16.msra.mxu0 %v6731_v14  ;;  %v7213_v14 = vld [vmem:[%s9207_s6 + $0x78] ss:$12 sps:$4 sm:$0xff]   ;;  %v1013_v38 = vsub.f32 1.0, %v7010_v49  ;;  %v6736_v39 = vld [vmem:[%s9207_s6 + $0xb0] ss:$12 sps:$4 sm:$0xff]  }
 0x143   :  { %v985_v19 = vpop.f32.mrb[34].mxu0  ;;  %1475 = vmatprep.subr.bf16.mxu1 %v7208_v17  ;;  %6388 = vmatprep.subr.bf16.mxu0 %v9256_v56  ;;  %v7215_v7 = vld [vmem:[%s9207_s6 + $0x90] ss:$12 sps:$4 sm:$0xff]  }
 0x144   :  { %v1010_v1 = vmul.f32 %v7008_v36, %v1009_v3  ;;  %v6361_v18 = vpop.f32.mrb[35].mxu0  ;;  %v7216_v19 = vld [vmem:[%s9207_s6 + $0xac] ss:$12 sps:$4 sm:$0xff]  }
 0x145   :  { %v6740_v18 = vld [vmem:[%s9206_s2 + $0x8] ss:$12 sps:$4 sm:$0xff]  }
 0x146   :  { %v1011_v33 = vadd.f32 %v1010_v1, %v438_v32  ;;  %1476 = vmatpush1.bf16.msra.mxu1 %v7209_v44  ;;  %6389 = vmatpush3.bf16.msra.mxu0 %v6732_v10  ;;  %v1015_v10 = vmul.f32 0.0, %v7010_v49  ;;  %v7933_v1 = vld [vmem:[%s9206_s2 + $0x4] ss:$12 sps:$4 sm:$0xff]   ;;  %v7986_v49 = vld [vmem:[%s9206_s2 + $0x48] ss:$12 sps:$4 sm:$0xff]  }
 0x147   :  { %1477 = vmatprep.subr.bf16.mxu1 %v7210_v45  ;;  %6390 = vmatprep.subr.bf16.mxu0 %v9256_v56  ;;  %v7954_v44 = vld [vmem:[%s9206_s2 + $0x18] ss:$12 sps:$4 sm:$0xff]   ;;  %v7964_v45 = vld [vmem:[%s9206_s2 + $0x34] ss:$12 sps:$4 sm:$0xff]  }
 0x148   :  { %7011 = vtanh.f32 %v1011_v33  ;;  %v7948_v33 = vld [vmem:[%s9206_s2 + $0x1c] ss:$12 sps:$4 sm:$0xff]  }
 0x14a   :  { %1478 = vmatpush1.bf16.msra.mxu1 %v7211_v13  ;;  %6391 = vmatpush3.bf16.msra.mxu0 %v6733_v34  ;;  %v6744_v34 = vld [vmem:[%s9206_s2 + $0x20] ss:$12 sps:$4 sm:$0xff]   ;;  %v7970_v13 = vld [vmem:[%s9206_s2 + $0x30] ss:$12 sps:$4 sm:$0xff]  }
 0x14b   :  { %1479 = vmatprep.subr.bf16.mxu1 %v7212_v40  ;;  %6392 = vmatprep.subr.bf16.mxu0 %v9256_v56  ;;  %v7980_v40 = vld [vmem:[%s9206_s2 + $0x4c] ss:$12 sps:$4 sm:$0xff]  }
 0x14e   :  { %1480 = vmatpush1.bf16.msra.mxu1 %v7213_v14  ;;  %6393 = vmatpush3.bf16.msra.mxu0 %v6734_v27  ;;  %v6748_v27 = vld [vmem:[%s9206_s2 + $0x38] ss:$12 sps:$4 sm:$0xff]   ;;  %v6752_v14 = vld [vmem:[%s9206_s2 + $0x50] ss:$12 sps:$4 sm:$0xff]  }
 0x14f   :  { %1481 = vmatprep.subr.bf16.mxu1 %v7214_v22  ;;  %6394 = vmatprep.subr.bf16.mxu0 %v9256_v56  ;;  %v8002_v22 = vld [vmem:[%s9206_s2 + $0x60] ss:$12 sps:$4 sm:$0xff]  }
 0x152   :  { %v7012_v3 = vpop.eup %7011  ;;  %1482 = vmatpush1.bf16.msra.mxu1 %v7215_v7  ;;  %6395 = vmatpush3.bf16.msra.mxu0 %v6735_v30  ;;  %v7996_v30 = vld [vmem:[%s9206_s2 + $0x64] ss:$12 sps:$4 sm:$0xff]  }
 0x153   :  { %v1014_v36 = vmul.f32 %v7012_v3, %v1013_v38  ;;  %1483 = vmatprep.subr.bf16.mxu1 %v7216_v19  ;;  %6396 = vmatprep.subr.bf16.mxu0 %v9256_v56  ;;  %v6756_v38 = vld [vmem:[%s9206_s2 + $0x68] ss:$12 sps:$4 sm:$0xff]   ;;  %v8018_v7 = vld [vmem:[%s9206_s2 + $0x78] ss:$12 sps:$4 sm:$0xff]  }
 0x154   :  { %v8012_v3 = vld [vmem:[%s9206_s2 + $0x7c] ss:$12 sps:$4 sm:$0xff]   ;;  %v6764_v19 = vld [vmem:[%s9206_s2 + $0x98] ss:$12 sps:$4 sm:$0xff]  }
 0x155   :  { %v7921_v17 = vadd.f32 %v1015_v10, %v1014_v36  ;;  %v8028_v10 = vld [vmem:[%s9206_s2 + $0x94] ss:$12 sps:$4 sm:$0xff]   ;;  %v8034_v36 = vld [vmem:[%s9206_s2 + $0x90] ss:$12 sps:$4 sm:$0xff]  }
 0x156   :  { %1484 = vmatpush1.bf16.msra.mxu1 %v7551_v58  ;;  %6397 = vmatpush3.bf16.msra.mxu0 %v6736_v39  ;;  %v7938_v58 = vld [vmem:[%s9206_s2] ss:$12 sps:$4 sm:$0xff]  }
 0x157   :  { %9258 = vst [vmem:[#allocation35_spill] sm:$0xff] %v7921_v17  ;;  %v1308_v32 = vpack.c.bf16 %v7921_v17, %v7921_v17  ;;  %6402 = vmatprep.subr.bf16.mxu0 %v9256_v56  ;;  %1754 = vmatprep.subr.bf16.mxu1 %v7933_v1  ;;  %v6760_v39 = vld [vmem:[%s9206_s2 + $0x80] ss:$12 sps:$4 sm:$0xff]  }
 0x159   :  { %1502 = vmatmul.mubr.bf16.vlgmr.msra.gmra.mrb[32].mxu1 %v1308_v32  ;;  %6399 = vmatmul.mubr.bf16.vlgmr.msra.gmra.mrb[40].mxu0 %v1308_v32  ;;  %v8044_v32 = vld [vmem:[%s9206_s2 + $0xac] ss:$12 sps:$4 sm:$0xff]  }
 0x15a   :  { %1786 = vmatprep.mubr.bf16.mxu1 %v9257_v62  ;;  %6418 = vmatprep.mubr.msk.bf16.mxu0 %vm7219_vm1, %v9256_v56 }
 0x15b   :  { %1755 = vmatpush1.bf16.msra.mxu1 %v7938_v58  ;;  %6403 = vmatpush3.bf16.msra.mxu0 %v6740_v18  ;;  %v8050_v18 = vld [vmem:[%s9206_s2 + $0xa8] ss:$12 sps:$4 sm:$0xff]  }
 0x15c   :  { %6404 = vmatprep.subr.bf16.mxu0 %v9256_v56  ;;  %1756 = vmatprep.subr.bf16.mxu1 %v7948_v33 }
 0x15f   :  { %1757 = vmatpush1.bf16.msra.mxu1 %v7954_v44  ;;  %6405 = vmatpush3.bf16.msra.mxu0 %v6744_v34  ;;  %v6768_v34 = vld [vmem:[%s9206_s2 + $0xb0] ss:$12 sps:$4 sm:$0xff]  }
 0x160   :  { %6406 = vmatprep.subr.bf16.mxu0 %v9256_v56  ;;  %1758 = vmatprep.subr.bf16.mxu1 %v7964_v45 }
 0x163   :  { %1759 = vmatpush1.bf16.msra.mxu1 %v7970_v13  ;;  %6407 = vmatpush3.bf16.msra.mxu0 %v6748_v27  ;;  %v8060_v27 = vld [vmem:[%s9207_s6 + $0x4] ss:$12 sps:$4 sm:$0xff]  }
 0x164   :  { %6408 = vmatprep.subr.bf16.mxu0 %v9256_v56  ;;  %1760 = vmatprep.subr.bf16.mxu1 %v7980_v40 }
 0x167   :  { %1761 = vmatpush1.bf16.msra.mxu1 %v7986_v49  ;;  %6409 = vmatpush3.bf16.msra.mxu0 %v6752_v14 }
 0x168   :  { %6410 = vmatprep.subr.bf16.mxu0 %v9256_v56  ;;  %1762 = vmatprep.subr.bf16.mxu1 %v7996_v30 }
 0x16b   :  { %1763 = vmatpush1.bf16.msra.mxu1 %v8002_v22  ;;  %6411 = vmatpush3.bf16.msra.mxu0 %v6756_v38 }
 0x16c   :  { %6412 = vmatprep.subr.bf16.mxu0 %v9256_v56  ;;  %1764 = vmatprep.subr.bf16.mxu1 %v8012_v3 }
 0x16f   :  { %1765 = vmatpush1.bf16.msra.mxu1 %v8018_v7  ;;  %6413 = vmatpush3.bf16.msra.mxu0 %v6760_v39 }
 0x170   :  { %6414 = vmatprep.subr.bf16.mxu0 %v9256_v56  ;;  %1766 = vmatprep.subr.bf16.mxu1 %v8028_v10 }
 0x173   :  { %1767 = vmatpush1.bf16.msra.mxu1 %v8034_v36  ;;  %6415 = vmatpush3.bf16.msra.mxu0 %v6764_v19 }
 0x174   :  { %6416 = vmatprep.subr.bf16.mxu0 %v9256_v56  ;;  %1768 = vmatprep.subr.bf16.mxu1 %v8044_v32 }
 0x177   :  { %1769 = vmatpush1.bf16.msra.mxu1 %v8050_v18  ;;  %6417 = vmatpush3.bf16.msra.mxu0 %v6768_v34 }
 0x178   :  { %6422 = vmatprep.subr.bf16.mxu0 %v9256_v56  ;;  %2031 = vmatprep.subr.bf16.mxu1 %v8060_v27 }
 0x20c   :  { %v1226_v14 = vpop.f32.mrb[28].mxu1  ;;  %v1267_v38 = vpop.f32.mrb[36].mxu0 }
 0x20d   :  { %v1273_v39 = vadd.f32 %v1226_v14, %v7686_v31  ;;  %v1228_v19 = vpop.f32.mrb[29].mxu1  ;;  %v6380_v26 = vpop.f32.mrb[37].mxu0  ;;  %v1294_v4 = vadd.f32 %v7827_v23, %v1267_v38 }
 0x20e   :  { %v1280_v55 = vadd.f32 %v1228_v19, %v7692_v35  ;;  %v1230_v52 = vpop.f32.mrb[30].mxu1  ;;  %v1270_v24 = vpop.f32.mrb[38].mxu0 }
 0x20f   :  { %v5706_v34 = vmul.f32 -1.442695, %v1273_v39  ;;  %v1231_v25 = vpop.f32.mrb[31].mxu1  ;;  %v6381_v12 = vpop.f32.mrb[39].mxu0 }
 0x210   :  { %v5707_v43 = vmul.f32 -1.442695, %v1280_v55 }
 0x211   :  { %7013 = vpow2.f32 %v5706_v34 }
 0x212   :  { %7015 = vpow2.f32 %v5707_v43 }
 0x21b   :  { %v7014_v2 = vpop.eup %7013 }
 0x21c   :  { %v1277_v61 = vadd.f32 1.0, %v7014_v2  ;;  %v7016_v37 = vpop.eup %7015 }
 0x21d   :  { %v1284_v8 = vadd.f32 1.0, %v7016_v37 }
 0x21e   :  { %7017 = vrcp.f32 %v1277_v61 }
 0x21f   :  { %7019 = vrcp.f32 %v1284_v8 }
 0x228   :  { %v7018_v31 = vpop.eup %7017 }
 0x229   :  { %v1295_v14 = vmul.f32 %v7018_v31, %v1294_v4  ;;  %v7020_v38 = vpop.eup %7019 }
 0x22a   :  { %v1298_v8 = vsub.f32 1.0, %v7020_v38 }
 0x22b   :  { %v1296_v35 = vadd.f32 %v1295_v14, %v7790_v11  ;;  %v1300_v11 = vmul.f32 %v7020_v38, %v7833_v48  ;;  %v6772_v14 = vld [vmem:[%s9207_s6 + $0x8] ss:$12 sps:$4 sm:$0xff]  }
 0x22c   :  { %v1503_v52 = vpop.f32.mrb[32].mxu1  ;;  %v1544_v24 = vpop.f32.mrb[40].mxu0 }
 0x22d   :  { %7021 = vtanh.f32 %v1296_v35  ;;  %v1550_v12 = vadd.f32 %v1503_v52, %v7781_v57  ;;  %v1505_v25 = vpop.f32.mrb[33].mxu1  ;;  %v6400_v55 = vpop.f32.mrb[41].mxu0  ;;  %v1571_v38 = vadd.f32 %v7862_v15, %v1544_v24  ;;  %v8138_v24 = vld [vmem:[%s9207_s6 + $0x64] ss:$12 sps:$4 sm:$0xff]  }
 0x22e   :  { %v1557_v43 = vadd.f32 %v1505_v25, %v7784_v0  ;;  %v1507_v2 = vpop.f32.mrb[34].mxu1  ;;  %v1547_v61 = vpop.f32.mrb[42].mxu0  ;;  %v8076_v0 = vld [vmem:[%s9207_s6] ss:$12 sps:$4 sm:$0xff]   ;;  %v8092_v25 = vld [vmem:[%s9207_s6 + $0x18] ss:$12 sps:$4 sm:$0xff]  }
 0x22f   :  { %v5733_v26 = vmul.f32 -1.442695, %v1550_v12  ;;  %v1508_v37 = vpop.f32.mrb[35].mxu1  ;;  %v6401_v39 = vpop.f32.mrb[43].mxu0  ;;  %v8086_v12 = vld [vmem:[%s9207_s6 + $0x1c] ss:$12 sps:$4 sm:$0xff]  }
 0x230   :  { %v5734_v4 = vmul.f32 -1.442695, %v1557_v43  ;;  %v6776_v55 = vld [vmem:[%s9207_s6 + $0x20] ss:$12 sps:$4 sm:$0xff]   ;;  %v8111_v61 = vld [vmem:[%s9207_s6 + $0x30] ss:$12 sps:$4 sm:$0xff]  }
 0x231   :  { %7023 = vpow2.f32 %v5733_v26  ;;  %v8102_v43 = vld [vmem:[%s9207_s6 + $0x34] ss:$12 sps:$4 sm:$0xff]   ;;  %v6780_v26 = vld [vmem:[%s9207_s6 + $0x38] ss:$12 sps:$4 sm:$0xff]  }
 0x232   :  { %7025 = vpow2.f32 %v5734_v4  ;;  %v8121_v37 = vld [vmem:[%s9207_s6 + $0x4c] ss:$12 sps:$4 sm:$0xff]   ;;  %v8128_v4 = vld [vmem:[%s9207_s6 + $0x48] ss:$12 sps:$4 sm:$0xff]  }
 0x237   :  { %v7022_v19 = vpop.eup %7021 }
 0x238   :  { %v1299_v34 = vmul.f32 %v7022_v19, %v1298_v8  ;;  %v6784_v8 = vld [vmem:[%s9207_s6 + $0x50] ss:$12 sps:$4 sm:$0xff]  }
 0x23a   :  { %v8071_v31 = vadd.f32 %v1300_v11, %v1299_v34 }
 0x23b   :  { %v7024_v57 = vpop.eup %7023 }
 0x23c   :  { %v1554_v35 = vadd.f32 1.0, %v7024_v57  ;;  %v1593_v52 = vpack.c.bf16 %v8071_v31, %v8071_v31  ;;  %v7026_v2 = vpop.eup %7025  ;;  %v8145_v57 = vld [vmem:[%s9207_s6 + $0x60] ss:$12 sps:$4 sm:$0xff]  }
 0x23d   :  { %v1561_v39 = vadd.f32 1.0, %v7026_v2 }
 0x23e   :  { %7027 = vrcp.f32 %v1554_v35  ;;  %1787 = vmatmul.mubr.bf16.vlgmr.msra.gmra.mrb[36].mxu1 %v1593_v52  ;;  %6419 = vmatmul.mubr.bf16.vlgmr.msra.gmra.mrb[44].mxu0 %v1593_v52  ;;  %v8161_v35 = vld [vmem:[%s9207_s6 + $0x78] ss:$12 sps:$4 sm:$0xff]   ;;  %v6792_v52 = vld [vmem:[%s9207_s6 + $0x80] ss:$12 sps:$4 sm:$0xff]  }
 0x23f   :  { %2032 = vmatpush1.bf16.msra.mxu1 %v8076_v0  ;;  %6423 = vmatpush3.bf16.msra.mxu0 %v6772_v14  ;;  %7029 = vrcp.f32 %v1561_v39  ;;  %v6788_v14 = vld [vmem:[%s9207_s6 + $0x68] ss:$12 sps:$4 sm:$0xff]   ;;  %v6796_v39 = vld [vmem:[%s9207_s6 + $0x98] ss:$12 sps:$4 sm:$0xff]  }
 0x240   :  { %2033 = vmatprep.subr.bf16.mxu1 %v8086_v12  ;;  %6424 = vmatprep.subr.bf16.mxu0 %v9256_v56 }
 0x241   :  { %2063 = vmatprep.mubr.bf16.mxu1 %v9257_v62  ;;  %6438 = vmatprep.mubr.msk.bf16.mxu0 %vm7219_vm1, %v9256_v56 }
 0x243   :  { %2034 = vmatpush1.bf16.msra.mxu1 %v8092_v25  ;;  %6425 = vmatpush3.bf16.msra.mxu0 %v6776_v55  ;;  %v8171_v55 = vld [vmem:[%s9207_s6 + $0x94] ss:$12 sps:$4 sm:$0xff]  }
 0x244   :  { %2035 = vmatprep.subr.bf16.mxu1 %v8102_v43  ;;  %6426 = vmatprep.subr.bf16.mxu0 %v9256_v56 }
 0x247   :  { %2036 = vmatpush1.bf16.msra.mxu1 %v8111_v61  ;;  %6427 = vmatpush3.bf16.msra.mxu0 %v6780_v26  ;;  %v8177_v26 = vld [vmem:[%s9207_s6 + $0x90] ss:$12 sps:$4 sm:$0xff]  }
 0x248   :  { %v7028_v19 = vpop.eup %7027  ;;  %2037 = vmatprep.subr.bf16.mxu1 %v8121_v37  ;;  %6428 = vmatprep.subr.bf16.mxu0 %v9256_v56 }
 0x249   :  { %v1572_v11 = vmul.f32 %v7028_v19, %v1571_v38  ;;  %v7030_v2 = vpop.eup %7029  ;;  %v8187_v38 = vld [vmem:[%s9207_s6 + $0xac] ss:$12 sps:$4 sm:$0xff]  }
 0x24b   :  { %v1573_v34 = vadd.f32 %v1572_v11, %v7814_v21  ;;  %2038 = vmatpush1.bf16.msra.mxu1 %v8128_v4  ;;  %6429 = vmatpush3.bf16.msra.mxu0 %v6784_v8  ;;  %v8155_v21 = vld [vmem:[%s9207_s6 + $0x7c] ss:$12 sps:$4 sm:$0xff]   ;;  %v1575_v8 = vsub.f32 1.0, %v7030_v2 }
 0x24c   :  { %2039 = vmatprep.subr.bf16.mxu1 %v8138_v24  ;;  %6430 = vmatprep.subr.bf16.mxu0 %v9256_v56  ;;  %v8193_v11 = vld [vmem:[%s9207_s6 + $0xa8] ss:$12 sps:$4 sm:$0xff]  }
 0x24d   :  { %7031 = vtanh.f32 %v1573_v34  ;;  %v6800_v34 = vld [vmem:[%s9207_s6 + $0xb0] ss:$12 sps:$4 sm:$0xff]  }
 0x24f   :  { %2040 = vmatpush1.bf16.msra.mxu1 %v8145_v57  ;;  %6431 = vmatpush3.bf16.msra.mxu0 %v6788_v14  ;;  %v1577_v14 = vmul.f32 %v7030_v2, %v7921_v17  ;;  %v6801_v2 = vld [vmem:[%s9206_s2 + $0x8] ss:$12 sps:$4 sm:$0xff]  }
 0x250   :  { %2041 = vmatprep.subr.bf16.mxu1 %v8155_v21  ;;  %6432 = vmatprep.subr.bf16.mxu0 %v9256_v56 }
 0x253   :  { %2042 = vmatpush1.bf16.msra.mxu1 %v8161_v35  ;;  %6433 = vmatpush3.bf16.msra.mxu0 %v6792_v52 }
 0x254   :  { %2043 = vmatprep.subr.bf16.mxu1 %v8171_v55  ;;  %6434 = vmatprep.subr.bf16.mxu0 %v9256_v56 }
 0x257   :  { %v7032_v19 = vpop.eup %7031  ;;  %2044 = vmatpush1.bf16.msra.mxu1 %v8177_v26  ;;  %6435 = vmatpush3.bf16.msra.mxu0 %v6796_v39 }
 0x258   :  { %2045 = vmatprep.subr.bf16.mxu1 %v8187_v38  ;;  %6436 = vmatprep.subr.bf16.mxu0 %v9256_v56  ;;  %v1576_v52 = vmul.f32 %v7032_v19, %v1575_v8  ;;  %v6802_v8 = vld [vmem:[%s9206_s2 + $0x20] ss:$12 sps:$4 sm:$0xff]   ;;  %v6803_v19 = vld [vmem:[%s9206_s2 + $0x38] ss:$12 sps:$4 sm:$0xff]  }
 0x25a   :  { %v8201_v48 = vadd.f32 %v1577_v14, %v1576_v52  ;;  %v6805_v14 = vld [vmem:[%s9206_s2 + $0x68] ss:$12 sps:$4 sm:$0xff]   ;;  %v6806_v52 = vld [vmem:[%s9206_s2 + $0x80] ss:$12 sps:$4 sm:$0xff]  }
 0x25b   :  { %2046 = vmatpush1.bf16.msra.mxu1 %v8193_v11  ;;  %6437 = vmatpush3.bf16.msra.mxu0 %v6800_v34  ;;  %v6804_v34 = vld [vmem:[%s9206_s2 + $0x50] ss:$12 sps:$4 sm:$0xff]  }
 0x25c   :  { %v1870_v39 = vpack.c.bf16 %v8201_v48, %v8201_v48  ;;  %2316 = vmatprep.subr.bf16.mxu1 %v7933_v1  ;;  %6442 = vmatprep.subr.bf16.mxu0 %v9256_v56 }
 0x25e   :  { %2064 = vmatmul.mubr.bf16.vlgmr.msra.gmra.mrb[40].mxu1 %v1870_v39  ;;  %6439 = vmatmul.mubr.bf16.vlgmr.msra.gmra.mrb[48].mxu0 %v1870_v39  ;;  %v6807_v39 = vld [vmem:[%s9206_s2 + $0x98] ss:$12 sps:$4 sm:$0xff]  }
 0x25f   :  { %2317 = vmatpush1.bf16.msra.mxu1 %v7938_v58  ;;  %2348 = vmatprep.mubr.bf16.mxu1 %v9257_v62 }
 0x260   :  { %2318 = vmatprep.subr.bf16.mxu1 %v7948_v33  ;;  %6458 = vmatprep.mubr.msk.bf16.mxu0 %vm7219_vm1, %v9256_v56 }
 0x261   :  { %6443 = vmatpush3.bf16.msra.mxu0 %v6801_v2  ;;  %v6808_v2 = vld [vmem:[%s9206_s2 + $0xb0] ss:$12 sps:$4 sm:$0xff]  }
 0x262   :  { %6444 = vmatprep.subr.bf16.mxu0 %v9256_v56 }
 0x263   :  { %2319 = vmatpush1.bf16.msra.mxu1 %v7954_v44 }
 0x264   :  { %2320 = vmatprep.subr.bf16.mxu1 %v7964_v45 }
 0x265   :  { %6445 = vmatpush3.bf16.msra.mxu0 %v6802_v8 }
 0x266   :  { %6446 = vmatprep.subr.bf16.mxu0 %v9256_v56 }
 0x267   :  { %2321 = vmatpush1.bf16.msra.mxu1 %v7970_v13 }
 0x268   :  { %2322 = vmatprep.subr.bf16.mxu1 %v7980_v40 }
 0x269   :  { %6447 = vmatpush3.bf16.msra.mxu0 %v6803_v19 }
 0x26a   :  { %6448 = vmatprep.subr.bf16.mxu0 %v9256_v56 }
 0x26b   :  { %2323 = vmatpush1.bf16.msra.mxu1 %v7986_v49 }
 0x26c   :  { %2324 = vmatprep.subr.bf16.mxu1 %v7996_v30 }
 0x26d   :  { %6449 = vmatpush3.bf16.msra.mxu0 %v6804_v34 }
 0x26e   :  { %6450 = vmatprep.subr.bf16.mxu0 %v9256_v56 }
 0x26f   :  { %2325 = vmatpush1.bf16.msra.mxu1 %v8002_v22 }
 0x270   :  { %2326 = vmatprep.subr.bf16.mxu1 %v8012_v3 }
 0x271   :  { %6451 = vmatpush3.bf16.msra.mxu0 %v6805_v14 }
 0x272   :  { %6452 = vmatprep.subr.bf16.mxu0 %v9256_v56 }
 0x273   :  { %2327 = vmatpush1.bf16.msra.mxu1 %v8018_v7 }
 0x274   :  { %2328 = vmatprep.subr.bf16.mxu1 %v8028_v10 }
 0x275   :  { %6453 = vmatpush3.bf16.msra.mxu0 %v6806_v52 }
 0x276   :  { %6454 = vmatprep.subr.bf16.mxu0 %v9256_v56 }
 0x277   :  { %2329 = vmatpush1.bf16.msra.mxu1 %v8034_v36 }
 0x278   :  { %2330 = vmatprep.subr.bf16.mxu1 %v8044_v32 }
 0x279   :  { %6455 = vmatpush3.bf16.msra.mxu0 %v6807_v39 }
 0x27a   :  { %6456 = vmatprep.subr.bf16.mxu0 %v9256_v56 }
 0x27b   :  { %2331 = vmatpush1.bf16.msra.mxu1 %v8050_v18 }
 0x27c   :  { %2593 = vmatprep.subr.bf16.mxu1 %v8060_v27 }
 0x27d   :  { %6457 = vmatpush3.bf16.msra.mxu0 %v6808_v2 }
 0x27e   :  { %6462 = vmatprep.subr.bf16.mxu0 %v9256_v56 }
 0x311   :  { %v1788_v8 = vpop.f32.mrb[36].mxu1  ;;  %v1829_v19 = vpop.f32.mrb[44].mxu0 }
 0x312   :  { %v1835_v34 = vadd.f32 %v1788_v8, %v7706_v42  ;;  %v1790_v14 = vpop.f32.mrb[37].mxu1  ;;  %v6420_v52 = vpop.f32.mrb[45].mxu0  ;;  %v1856_v16 = vadd.f32 %v7827_v23, %v1829_v19 }
 0x313   :  { %v1842_v17 = vadd.f32 %v1790_v14, %v7712_v46  ;;  %v1792_v20 = vpop.f32.mrb[38].mxu1  ;;  %v1832_v9 = vpop.f32.mrb[46].mxu0 }
 0x314   :  { %v5760_v39 = vmul.f32 -1.442695, %v1835_v34  ;;  %v1793_v6 = vpop.f32.mrb[39].mxu1  ;;  %v6421_v28 = vpop.f32.mrb[47].mxu0 }
 0x315   :  { %v5761_v63 = vmul.f32 -1.442695, %v1842_v17 }
 0x316   :  { %7033 = vpow2.f32 %v5760_v39 }
 0x317   :  { %7035 = vpow2.f32 %v5761_v63 }
 0x320   :  { %v7034_v59 = vpop.eup %7033 }
 0x321   :  { %v1839_v2 = vadd.f32 1.0, %v7034_v59  ;;  %v7036_v51 = vpop.eup %7035 }
 0x322   :  { %v1846_v29 = vadd.f32 1.0, %v7036_v51 }
 0x323   :  { %7037 = vrcp.f32 %v1839_v2 }
 0x324   :  { %7039 = vrcp.f32 %v1846_v29 }
 0x32d   :  { %v7038_v42 = vpop.eup %7037 }
 0x32e   :  { %v1857_v8 = vmul.f32 %v7038_v42, %v1856_v16  ;;  %v7040_v23 = vpop.eup %7039 }
 0x32f   :  { %v1860_v29 = vsub.f32 1.0, %v7040_v23 }
 0x330   :  { %v1858_v46 = vadd.f32 %v1857_v8, %v7778_v53  ;;  %v1862_v53 = vmul.f32 %v7040_v23, %v8071_v31 }
 0x331   :  { %v2065_v20 = vpop.f32.mrb[40].mxu1  ;;  %v2106_v9 = vpop.f32.mrb[48].mxu0 }
 0x332   :  { %7041 = vtanh.f32 %v1858_v46  ;;  %v2112_v28 = vadd.f32 %v2065_v20, %v7769_v41  ;;  %v2067_v6 = vpop.f32.mrb[41].mxu1  ;;  %v6440_v17 = vpop.f32.mrb[49].mxu0  ;;  %v6810_v46 = vld [vmem:[%s9207_s6 + $0x20] ss:$12 sps:$4 sm:$0xff]  }
 0x333   :  { %v2119_v63 = vadd.f32 %v2067_v6, %v7775_v47  ;;  %v2069_v59 = vpop.f32.mrb[42].mxu1  ;;  %v2109_v34 = vpop.f32.mrb[50].mxu0  ;;  %v6809_v47 = vld [vmem:[%s9207_s6 + $0x8] ss:$12 sps:$4 sm:$0xff]   ;;  %v2133_v17 = vadd.f32 %v7862_v15, %v2106_v9  ;;  %v6814_v9 = vld [vmem:[%s9207_s6 + $0x80] ss:$12 sps:$4 sm:$0xff]  }
 0x334   :  { %v5787_v14 = vmul.f32 -1.442695, %v2112_v28  ;;  %v2070_v51 = vpop.f32.mrb[43].mxu1  ;;  %v6441_v52 = vpop.f32.mrb[51].mxu0  ;;  %v6811_v28 = vld [vmem:[%s9207_s6 + $0x38] ss:$12 sps:$4 sm:$0xff]  }
 0x335   :  { %v5788_v16 = vmul.f32 -1.442695, %v2119_v63  ;;  %v6812_v63 = vld [vmem:[%s9207_s6 + $0x50] ss:$12 sps:$4 sm:$0xff]   ;;  %v6813_v15 = vld [vmem:[%s9207_s6 + $0x68] ss:$12 sps:$4 sm:$0xff]  }
 0x336   :  { %7043 = vpow2.f32 %v5787_v14  ;;  %v6815_v51 = vld [vmem:[%s9207_s6 + $0x98] ss:$12 sps:$4 sm:$0xff]  }
 0x337   :  { %7045 = vpow2.f32 %v5788_v16  ;;  %v6816_v16 = vld [vmem:[%s9207_s6 + $0xb0] ss:$12 sps:$4 sm:$0xff]  }
 0x33c   :  { %v7042_v19 = vpop.eup %7041 }
 0x33d   :  { %v1861_v39 = vmul.f32 %v7042_v19, %v1860_v29 }
 0x33f   :  { %v8266_v2 = vadd.f32 %v1862_v53, %v1861_v39 }
 0x340   :  { %v7044_v41 = vpop.eup %7043 }
 0x341   :  { %v2116_v42 = vadd.f32 1.0, %v7044_v41  ;;  %v2155_v8 = vpack.c.bf16 %v8266_v2, %v8266_v2  ;;  %v7046_v20 = vpop.eup %7045 }
 0x342   :  { %v2123_v6 = vadd.f32 1.0, %v7046_v20 }
 0x343   :  { %7047 = vrcp.f32 %v2116_v42  ;;  %2349 = vmatmul.mubr.bf16.vlgmr.msra.gmra.mrb[44].mxu1 %v2155_v8  ;;  %6459 = vmatmul.mubr.bf16.vlgmr.msra.gmra.mrb[52].mxu0 %v2155_v8 }
 0x344   :  { %2594 = vmatpush1.bf16.msra.mxu1 %v8076_v0  ;;  %6463 = vmatpush3.bf16.msra.mxu0 %v6809_v47  ;;  %7049 = vrcp.f32 %v2123_v6 }
 0x345   :  { %2595 = vmatprep.subr.bf16.mxu1 %v8086_v12  ;;  %6464 = vmatprep.subr.bf16.mxu0 %v9256_v56 }
 0x346   :  { %2625 = vmatprep.mubr.bf16.mxu1 %v9257_v62  ;;  %6478 = vmatprep.mubr.msk.bf16.mxu0 %vm7219_vm1, %v9256_v56 }
 0x348   :  { %2596 = vmatpush1.bf16.msra.mxu1 %v8092_v25  ;;  %6465 = vmatpush3.bf16.msra.mxu0 %v6810_v46 }
 0x349   :  { %2597 = vmatprep.subr.bf16.mxu1 %v8102_v43  ;;  %6466 = vmatprep.subr.bf16.mxu0 %v9256_v56 }
 0x34c   :  { %2598 = vmatpush1.bf16.msra.mxu1 %v8111_v61  ;;  %6467 = vmatpush3.bf16.msra.mxu0 %v6811_v28 }
 0x34d   :  { %v7048_v59 = vpop.eup %7047  ;;  %2599 = vmatprep.subr.bf16.mxu1 %v8121_v37  ;;  %6468 = vmatprep.subr.bf16.mxu0 %v9256_v56 }
 0x34e   :  { %v2134_v34 = vmul.f32 %v7048_v59, %v2133_v17 }
 0x350   :  { %v2135_v14 = vadd.f32 %v2134_v34, %v7822_v60  ;;  %2600 = vmatpush1.bf16.msra.mxu1 %v8128_v4  ;;  %6469 = vmatpush3.bf16.msra.mxu0 %v6812_v63  ;;  %v7050_v60 = vpop.eup %7049 }
 0x351   :  { %2601 = vmatprep.subr.bf16.mxu1 %v8138_v24  ;;  %6470 = vmatprep.subr.bf16.mxu0 %v9256_v56  ;;  %v2137_v52 = vsub.f32 1.0, %v7050_v60  ;;  %v2139_v29 = vmul.f32 %v7050_v60, %v8201_v48 }
 0x352   :  { %7051 = vtanh.f32 %v2135_v14  ;;  %v9259_v14 = vld [vmem:[#allocation24_spill] sm:$0xff] }
 0x354   :  { %2602 = vmatpush1.bf16.msra.mxu1 %v8145_v57  ;;  %6471 = vmatpush3.bf16.msra.mxu0 %v6813_v15 }
 0x355   :  { %2603 = vmatprep.subr.bf16.mxu1 %v8155_v21  ;;  %6472 = vmatprep.subr.bf16.mxu0 %v9256_v56 }
 0x358   :  { %2604 = vmatpush1.bf16.msra.mxu1 %v8161_v35  ;;  %6473 = vmatpush3.bf16.msra.mxu0 %v6814_v9 }
 0x359   :  { %2605 = vmatprep.subr.bf16.mxu1 %v8171_v55  ;;  %6474 = vmatprep.subr.bf16.mxu0 %v9256_v56 }
 0x35c   :  { %v7052_v23 = vpop.eup %7051  ;;  %2606 = vmatpush1.bf16.msra.mxu1 %v8177_v26  ;;  %6475 = vmatpush3.bf16.msra.mxu0 %v6815_v51  ;;  %v9260_v51 = vld [vmem:[#allocation26_spill] sm:$0xff] }
 0x35d   :  { %2607 = vmatprep.subr.bf16.mxu1 %v8187_v38  ;;  %6476 = vmatprep.subr.bf16.mxu0 %v9256_v56  ;;  %v2138_v19 = vmul.f32 %v7052_v23, %v2137_v52 }
 0x35f   :  { %v8321_v53 = vadd.f32 %v2139_v29, %v2138_v19 }
 0x360   :  { %2608 = vmatpush1.bf16.msra.mxu1 %v8193_v11  ;;  %6477 = vmatpush3.bf16.msra.mxu0 %v6816_v16 }
 0x361   :  { %v2432_v39 = vpack.c.bf16 %v8321_v53, %v8321_v53  ;;  %2877 = vmatprep.subr.bf16.mxu1 %v7933_v1  ;;  %6482 = vmatprep.subr.bf16.mxu0 %v9256_v56  ;;  %v6817_v1 = vld [vmem:[%s9206_s2 + $0x8] ss:$12 sps:$4 sm:$0xff]  }
 0x363   :  { %2626 = vmatmul.mubr.bf16.vlgmr.msra.gmra.mrb[48].mxu1 %v2432_v39  ;;  %6479 = vmatmul.mubr.bf16.vlgmr.msra.gmra.mrb[56].mxu0 %v2432_v39 }
 0x364   :  { %2878 = vmatpush1.bf16.msra.mxu1 %v7938_v58  ;;  %2909 = vmatprep.mubr.bf16.mxu1 %v9257_v62  ;;  %v6818_v58 = vld [vmem:[%s9206_s2 + $0x20] ss:$12 sps:$4 sm:$0xff]  }
 0x365   :  { %2879 = vmatprep.subr.bf16.mxu1 %v7948_v33  ;;  %6498 = vmatprep.mubr.msk.bf16.mxu0 %vm7219_vm1, %v9256_v56  ;;  %v6819_v33 = vld [vmem:[%s9206_s2 + $0x38] ss:$12 sps:$4 sm:$0xff]  }
 0x366   :  { %6483 = vmatpush3.bf16.msra.mxu0 %v6817_v1 }
 0x367   :  { %6484 = vmatprep.subr.bf16.mxu0 %v9256_v56 }
 0x368   :  { %2880 = vmatpush1.bf16.msra.mxu1 %v7954_v44  ;;  %v6820_v44 = vld [vmem:[%s9206_s2 + $0x50] ss:$12 sps:$4 sm:$0xff]  }
 0x369   :  { %2881 = vmatprep.subr.bf16.mxu1 %v7964_v45  ;;  %v6821_v45 = vld [vmem:[%s9206_s2 + $0x68] ss:$12 sps:$4 sm:$0xff]  }
 0x36a   :  { %6485 = vmatpush3.bf16.msra.mxu0 %v6818_v58 }
 0x36b   :  { %6486 = vmatprep.subr.bf16.mxu0 %v9256_v56 }
 0x36c   :  { %2882 = vmatpush1.bf16.msra.mxu1 %v7970_v13  ;;  %v6822_v13 = vld [vmem:[%s9206_s2 + $0x80] ss:$12 sps:$4 sm:$0xff]  }
 0x36d   :  { %2883 = vmatprep.subr.bf16.mxu1 %v7980_v40  ;;  %v6823_v40 = vld [vmem:[%s9206_s2 + $0x98] ss:$12 sps:$4 sm:$0xff]  }
 0x36e   :  { %6487 = vmatpush3.bf16.msra.mxu0 %v6819_v33 }
 0x36f   :  { %6488 = vmatprep.subr.bf16.mxu0 %v9256_v56 }
 0x370   :  { %2884 = vmatpush1.bf16.msra.mxu1 %v7986_v49  ;;  %v6824_v49 = vld [vmem:[%s9206_s2 + $0xb0] ss:$12 sps:$4 sm:$0xff]  }
 0x371   :  { %2885 = vmatprep.subr.bf16.mxu1 %v7996_v30 }
 0x372   :  { %6489 = vmatpush3.bf16.msra.mxu0 %v6820_v44 }
 0x373   :  { %6490 = vmatprep.subr.bf16.mxu0 %v9256_v56 }
 0x374   :  { %2886 = vmatpush1.bf16.msra.mxu1 %v8002_v22 }
 0x375   :  { %2887 = vmatprep.subr.bf16.mxu1 %v8012_v3 }
 0x376   :  { %6491 = vmatpush3.bf16.msra.mxu0 %v6821_v45 }
 0x377   :  { %6492 = vmatprep.subr.bf16.mxu0 %v9256_v56 }
 0x378   :  { %2888 = vmatpush1.bf16.msra.mxu1 %v8018_v7 }
 0x379   :  { %2889 = vmatprep.subr.bf16.mxu1 %v8028_v10 }
 0x37a   :  { %6493 = vmatpush3.bf16.msra.mxu0 %v6822_v13 }
 0x37b   :  { %6494 = vmatprep.subr.bf16.mxu0 %v9256_v56 }
 0x37c   :  { %2890 = vmatpush1.bf16.msra.mxu1 %v8034_v36 }
 0x37d   :  { %2891 = vmatprep.subr.bf16.mxu1 %v8044_v32 }
 0x37e   :  { %6495 = vmatpush3.bf16.msra.mxu0 %v6823_v40 }
 0x37f   :  { %6496 = vmatprep.subr.bf16.mxu0 %v9256_v56 }
 0x380   :  { %2892 = vmatpush1.bf16.msra.mxu1 %v8050_v18 }
 0x381   :  { %3153 = vmatprep.subr.bf16.mxu1 %v8060_v27 }
 0x382   :  { %6497 = vmatpush3.bf16.msra.mxu0 %v6824_v49  ;;  %v6825_v49 = vld [vmem:[%s9207_s6 + $0x8] ss:$12 sps:$4 sm:$0xff]  }
 0x383   :  { %6502 = vmatprep.subr.bf16.mxu0 %v9256_v56 }
 0x416   :  { %v2350_v30 = vpop.f32.mrb[44].mxu1  ;;  %v2391_v22 = vpop.f32.mrb[52].mxu0 }
 0x417   :  { %v2397_v3 = vadd.f32 %v2350_v30, %v7718_v50  ;;  %v2352_v7 = vpop.f32.mrb[45].mxu1  ;;  %v6460_v10 = vpop.f32.mrb[53].mxu0  ;;  %v8384_v50 = vld [vmem:[%s9210_s4] ss:$0 sm:$0xff] }
 0x418   :  { %v2404_v36 = vadd.f32 %v2352_v7, %v7724_v54  ;;  %v2354_v32 = vpop.f32.mrb[46].mxu1  ;;  %v2394_v18 = vpop.f32.mrb[54].mxu0  ;;  %v2418_v54 = vadd.f32 %v8384_v50, %v2391_v22  ;;  %v8414_v10 = vld [vmem:[%s9211_s8] ss:$0 sm:$0xff] }
 0x419   :  { %v5814_v27 = vmul.f32 -1.442695, %v2397_v3  ;;  %v2355_v41 = vpop.f32.mrb[47].mxu1  ;;  %v6461_v47 = vpop.f32.mrb[55].mxu0  ;;  %v6826_v3 = vld [vmem:[%s9207_s6 + $0x20] ss:$12 sps:$4 sm:$0xff]  }
 0x41a   :  { %v5815_v42 = vmul.f32 -1.442695, %v2404_v36 }
 0x41b   :  { %7053 = vpow2.f32 %v5814_v27 }
 0x41c   :  { %7055 = vpow2.f32 %v5815_v42 }
 0x425   :  { %v7054_v8 = vpop.eup %7053 }
 0x426   :  { %v2401_v46 = vadd.f32 1.0, %v7054_v8  ;;  %v7056_v20 = vpop.eup %7055  ;;  %v8478_v8 = vld [vmem:[%s9206_s2 + $0x1c] ss:$12 sps:$4 sm:$0xff]  }
 0x427   :  { %v2408_v28 = vadd.f32 1.0, %v7056_v20  ;;  %v6840_v20 = vld [vmem:[%s9206_s2 + $0x20] ss:$12 sps:$4 sm:$0xff]  }
 0x428   :  { %7057 = vrcp.f32 %v2401_v46  ;;  %v8484_v46 = vld [vmem:[%s9206_s2 + $0x18] ss:$12 sps:$4 sm:$0xff]  }
 0x429   :  { %7059 = vrcp.f32 %v2408_v28  ;;  %v8494_v28 = vld [vmem:[%s9206_s2 + $0x34] ss:$12 sps:$4 sm:$0xff]  }
 0x432   :  { %v7058_v6 = vpop.eup %7057 }
 0x433   :  { %v2419_v17 = vmul.f32 %v7058_v6, %v2418_v54  ;;  %v7060_v1 = vpop.eup %7059  ;;  %v8500_v54 = vld [vmem:[%s9206_s2 + $0x30] ss:$12 sps:$4 sm:$0xff]   ;;  %v6844_v6 = vld [vmem:[%s9206_s2 + $0x38] ss:$12 sps:$4 sm:$0xff]  }
 0x434   :  { %v2422_v33 = vsub.f32 1.0, %v7060_v1 }
 0x435   :  { %v2420_v63 = vadd.f32 %v2419_v17, %v7787_v5  ;;  %v2424_v5 = vmul.f32 %v7060_v1, %v8266_v2  ;;  %v8510_v17 = vld [vmem:[%s9206_s2 + $0x4c] ss:$12 sps:$4 sm:$0xff]   ;;  %v8590_v1 = vld [vmem:[%s9207_s6 + $0x4] ss:$12 sps:$4 sm:$0xff]  }
 0x436   :  { %v2627_v59 = vpop.f32.mrb[48].mxu1  ;;  %v2668_v34 = vpop.f32.mrb[56].mxu0 }
 0x437   :  { %7061 = vtanh.f32 %v2420_v63  ;;  %v2674_v15 = vadd.f32 %v2627_v59, %v9259_v14  ;;  %v2629_v9 = vpop.f32.mrb[49].mxu1  ;;  %v6480_v60 = vpop.f32.mrb[57].mxu0  ;;  %v2695_v36 = vadd.f32 %v8414_v10, %v2668_v34  ;;  %v8516_v63 = vld [vmem:[%s9206_s2 + $0x48] ss:$12 sps:$4 sm:$0xff]   ;;  %v6848_v59 = vld [vmem:[%s9206_s2 + $0x50] ss:$12 sps:$4 sm:$0xff]  }
 0x438   :  { %v2681_v52 = vadd.f32 %v2629_v9, %v9260_v51  ;;  %v2631_v23 = vpop.f32.mrb[50].mxu1  ;;  %v2671_v16 = vpop.f32.mrb[58].mxu0  ;;  %v8526_v34 = vld [vmem:[%s9206_s2 + $0x64] ss:$12 sps:$4 sm:$0xff]   ;;  %v8532_v14 = vld [vmem:[%s9206_s2 + $0x60] ss:$12 sps:$4 sm:$0xff]  }
 0x439   :  { %v5841_v29 = vmul.f32 -1.442695, %v2674_v15  ;;  %v2632_v19 = vpop.f32.mrb[51].mxu1  ;;  %v6481_v39 = vpop.f32.mrb[59].mxu0  ;;  %v6852_v15 = vld [vmem:[%s9206_s2 + $0x68] ss:$12 sps:$4 sm:$0xff]  }
 0x43a   :  { %v5842_v58 = vmul.f32 -1.442695, %v2681_v52  ;;  %v8542_v9 = vld [vmem:[%s9206_s2 + $0x7c] ss:$12 sps:$4 sm:$0xff]   ;;  %v8548_v60 = vld [vmem:[%s9206_s2 + $0x78] ss:$12 sps:$4 sm:$0xff]  }
 0x43b   :  { %7063 = vpow2.f32 %v5841_v29  ;;  %v6856_v51 = vld [vmem:[%s9206_s2 + $0x80] ss:$12 sps:$4 sm:$0xff]   ;;  %v8564_v23 = vld [vmem:[%s9206_s2 + $0x90] ss:$12 sps:$4 sm:$0xff]   ;;  %v6860_v16 = vld [vmem:[%s9206_s2 + $0x98] ss:$12 sps:$4 sm:$0xff]  }
 0x43c   :  { %7065 = vpow2.f32 %v5842_v58  ;;  %v8558_v52 = vld [vmem:[%s9206_s2 + $0x94] ss:$12 sps:$4 sm:$0xff]   ;;  %v8574_v29 = vld [vmem:[%s9206_s2 + $0xac] ss:$12 sps:$4 sm:$0xff]   ;;  %v6864_v39 = vld [vmem:[%s9206_s2 + $0xb0] ss:$12 sps:$4 sm:$0xff]  }
 0x43d   :  { %v8580_v19 = vld [vmem:[%s9206_s2 + $0xa8] ss:$12 sps:$4 sm:$0xff]  }
 0x441   :  { %v7062_v44 = vpop.eup %7061 }
 0x442   :  { %v2423_v45 = vmul.f32 %v7062_v44, %v2422_v33  ;;  %v9262_v44 = vld [vmem:[#allocation15_spill] sm:$0xff] }
 0x444   :  { %v8391_v13 = vadd.f32 %v2424_v5, %v2423_v45 }
 0x445   :  { %v7064_v40 = vpop.eup %7063 }
 0x446   :  { %v2678_v30 = vadd.f32 1.0, %v7064_v40  ;;  %v2716_v22 = vpack.c.bf16 %v8391_v13, %v8391_v13  ;;  %v7066_v7 = vpop.eup %7065 }
 0x448   :  { %7067 = vrcp.f32 %v2678_v30  ;;  %2910 = vmatmul.mubr.bf16.vlgmr.msra.gmra.mrb[52].mxu1 %v2716_v22  ;;  %6499 = vmatmul.mubr.bf16.vlgmr.msra.gmra.mrb[60].mxu0 %v2716_v22 }
 0x449   :  { %3154 = vmatpush1.bf16.msra.mxu1 %v8076_v0  ;;  %6503 = vmatpush3.bf16.msra.mxu0 %v6825_v49  ;;  %v6827_v0 = vld [vmem:[%s9207_s6 + $0x38] ss:$12 sps:$4 sm:$0xff]  }
 0x44a   :  { %3155 = vmatprep.subr.bf16.mxu1 %v8086_v12  ;;  %6504 = vmatprep.subr.bf16.mxu0 %v9256_v56  ;;  %v2685_v12 = vadd.f32 1.0, %v7066_v7  ;;  %v9263_v49 = vld [vmem:[#allocation17_spill] sm:$0xff] }
 0x44b   :  { %3185 = vmatprep.mubr.bf16.mxu1 %v9257_v62  ;;  %6518 = vmatprep.mubr.msk.bf16.mxu0 %vm7219_vm1, %v9256_v56 }
 0x44c   :  { %7069 = vrcp.f32 %v2685_v12 }
 0x44d   :  { %3156 = vmatpush1.bf16.msra.mxu1 %v8092_v25  ;;  %6505 = vmatpush3.bf16.msra.mxu0 %v6826_v3  ;;  %v6828_v25 = vld [vmem:[%s9207_s6 + $0x50] ss:$12 sps:$4 sm:$0xff]  }
 0x44e   :  { %3157 = vmatprep.subr.bf16.mxu1 %v8102_v43  ;;  %6506 = vmatprep.subr.bf16.mxu0 %v9256_v56  ;;  %v9261_v43 = vld [vmem:[#allocation33_spill] sm:$0xff] }
 0x451   :  { %3158 = vmatpush1.bf16.msra.mxu1 %v8111_v61  ;;  %6507 = vmatpush3.bf16.msra.mxu0 %v6827_v0  ;;  %v6829_v61 = vld [vmem:[%s9207_s6 + $0x68] ss:$12 sps:$4 sm:$0xff]  }
 0x452   :  { %v7068_v32 = vpop.eup %7067  ;;  %3159 = vmatprep.subr.bf16.mxu1 %v8121_v37  ;;  %6508 = vmatprep.subr.bf16.mxu0 %v9256_v56  ;;  %v6830_v37 = vld [vmem:[%s9207_s6 + $0x80] ss:$12 sps:$4 sm:$0xff]  }
 0x453   :  { %v2696_v18 = vmul.f32 %v7068_v32, %v2695_v36 }
 0x455   :  { %v2697_v27 = vadd.f32 %v2696_v18, %v9261_v43  ;;  %3160 = vmatpush1.bf16.msra.mxu1 %v8128_v4  ;;  %6509 = vmatpush3.bf16.msra.mxu0 %v6828_v25 }
 0x456   :  { %3161 = vmatprep.subr.bf16.mxu1 %v8138_v24  ;;  %6510 = vmatprep.subr.bf16.mxu0 %v9256_v56  ;;  %v7070_v4 = vpop.eup %7069  ;;  %v6831_v24 = vld [vmem:[%s9207_s6 + $0x98] ss:$12 sps:$4 sm:$0xff]  }
 0x457   :  { %7071 = vtanh.f32 %v2697_v27 }
 0x459   :  { %3162 = vmatpush1.bf16.msra.mxu1 %v8145_v57  ;;  %6511 = vmatpush3.bf16.msra.mxu0 %v6829_v61  ;;  %v2699_v57 = vsub.f32 1.0, %v7070_v4 }
 0x45a   :  { %3163 = vmatprep.subr.bf16.mxu1 %v8155_v21  ;;  %6512 = vmatprep.subr.bf16.mxu0 %v9256_v56  ;;  %v6832_v21 = vld [vmem:[%s9207_s6 + $0xb0] ss:$12 sps:$4 sm:$0xff]  }
 0x45d   :  { %3164 = vmatpush1.bf16.msra.mxu1 %v8161_v35  ;;  %6513 = vmatpush3.bf16.msra.mxu0 %v6830_v37  ;;  %v2701_v35 = vmul.f32 %v7070_v4, %v8321_v53  ;;  %v9264_v4 = vld [vmem:[#allocation8_spill] sm:$0xff] }
 0x45e   :  { %3165 = vmatprep.subr.bf16.mxu1 %v8171_v55  ;;  %6514 = vmatprep.subr.bf16.mxu0 %v9256_v56 }
 0x461   :  { %v7072_v41 = vpop.eup %7071  ;;  %3166 = vmatpush1.bf16.msra.mxu1 %v8177_v26  ;;  %6515 = vmatpush3.bf16.msra.mxu0 %v6831_v24  ;;  %v8463_v26 = vld [vmem:[%s9206_s2 + $0x4] ss:$12 sps:$4 sm:$0xff]  }
 0x462   :  { %3167 = vmatprep.subr.bf16.mxu1 %v8187_v38  ;;  %6516 = vmatprep.subr.bf16.mxu0 %v9256_v56  ;;  %v2700_v47 = vmul.f32 %v7072_v41, %v2699_v57  ;;  %v8468_v38 = vld [vmem:[%s9206_s2] ss:$12 sps:$4 sm:$0xff]  }
 0x464   :  { %v8451_v42 = vadd.f32 %v2701_v35, %v2700_v47 }
 0x465   :  { %3168 = vmatpush1.bf16.msra.mxu1 %v8193_v11  ;;  %6517 = vmatpush3.bf16.msra.mxu0 %v6832_v21  ;;  %v6836_v11 = vld [vmem:[%s9206_s2 + $0x8] ss:$12 sps:$4 sm:$0xff]   ;;  %v9265_v21 = vld [vmem:[#allocation20_spill] sm:$0xff] }
 0x466   :  { %v2992_v55 = vpack.c.bf16 %v8451_v42, %v8451_v42  ;;  %6522 = vmatprep.subr.bf16.mxu0 %v9256_v56  ;;  %3431 = vmatprep.subr.bf16.mxu1 %v8463_v26 }
 0x468   :  { %3186 = vmatmul.mubr.bf16.vlgmr.msra.gmra.mrb[56].mxu1 %v2992_v55  ;;  %6519 = vmatmul.mubr.bf16.vlgmr.msra.gmra.mrb[64].mxu0 %v2992_v55 }
 0x469   :  { %3463 = vmatprep.mubr.bf16.mxu1 %v9257_v62  ;;  %6538 = vmatprep.mubr.msk.bf16.mxu0 %vm7219_vm1, %v9256_v56 }
 0x46a   :  { %3432 = vmatpush1.bf16.msra.mxu1 %v8468_v38  ;;  %6523 = vmatpush3.bf16.msra.mxu0 %v6836_v11  ;;  %v9266_v11 = vld [vmem:[#allocation22_spill] sm:$0xff] }
 0x46b   :  { %6524 = vmatprep.subr.bf16.mxu0 %v9256_v56  ;;  %3433 = vmatprep.subr.bf16.mxu1 %v8478_v8 }
 0x46e   :  { %3434 = vmatpush1.bf16.msra.mxu1 %v8484_v46  ;;  %6525 = vmatpush3.bf16.msra.mxu0 %v6840_v20 }
 0x46f   :  { %6526 = vmatprep.subr.bf16.mxu0 %v9256_v56  ;;  %3435 = vmatprep.subr.bf16.mxu1 %v8494_v28 }
 0x472   :  { %3436 = vmatpush1.bf16.msra.mxu1 %v8500_v54  ;;  %6527 = vmatpush3.bf16.msra.mxu0 %v6844_v6 }
 0x473   :  { %6528 = vmatprep.subr.bf16.mxu0 %v9256_v56  ;;  %3437 = vmatprep.subr.bf16.mxu1 %v8510_v17 }
 0x476   :  { %3438 = vmatpush1.bf16.msra.mxu1 %v8516_v63  ;;  %6529 = vmatpush3.bf16.msra.mxu0 %v6848_v59 }
 0x477   :  { %6530 = vmatprep.subr.bf16.mxu0 %v9256_v56  ;;  %3439 = vmatprep.subr.bf16.mxu1 %v8526_v34 }
 0x47a   :  { %3440 = vmatpush1.bf16.msra.mxu1 %v8532_v14  ;;  %6531 = vmatpush3.bf16.msra.mxu0 %v6852_v15 }
 0x47b   :  { %6532 = vmatprep.subr.bf16.mxu0 %v9256_v56  ;;  %3441 = vmatprep.subr.bf16.mxu1 %v8542_v9 }
 0x47e   :  { %3442 = vmatpush1.bf16.msra.mxu1 %v8548_v60  ;;  %6533 = vmatpush3.bf16.msra.mxu0 %v6856_v51 }
 0x47f   :  { %6534 = vmatprep.subr.bf16.mxu0 %v9256_v56  ;;  %3443 = vmatprep.subr.bf16.mxu1 %v8558_v52 }
 0x482   :  { %3444 = vmatpush1.bf16.msra.mxu1 %v8564_v23  ;;  %6535 = vmatpush3.bf16.msra.mxu0 %v6860_v16 }
 0x483   :  { %6536 = vmatprep.subr.bf16.mxu0 %v9256_v56  ;;  %3445 = vmatprep.subr.bf16.mxu1 %v8574_v29 }
 0x486   :  { %3446 = vmatpush1.bf16.msra.mxu1 %v8580_v19  ;;  %6537 = vmatpush3.bf16.msra.mxu0 %v6864_v39 }
 0x487   :  { %6542 = vmatprep.subr.bf16.mxu0 %v9256_v56  ;;  %3707 = vmatprep.subr.bf16.mxu1 %v8590_v1 }
 0x51b   :  { %v2911_v58 = vpop.f32.mrb[52].mxu1  ;;  %v2952_v33 = vpop.f32.mrb[60].mxu0 }
 0x51c   :  { %v2958_v5 = vadd.f32 %v2911_v58, %v9262_v44  ;;  %v2913_v45 = vpop.f32.mrb[53].mxu1  ;;  %v6500_v40 = vpop.f32.mrb[61].mxu0  ;;  %v2979_v27 = vadd.f32 %v8384_v50, %v2952_v33 }
 0x51d   :  { %v2965_v30 = vadd.f32 %v2913_v45, %v9263_v49  ;;  %v2915_v22 = vpop.f32.mrb[54].mxu1  ;;  %v2955_v3 = vpop.f32.mrb[62].mxu0 }
 0x51e   :  { %v5868_v7 = vmul.f32 -1.442695, %v2958_v5  ;;  %v2916_v0 = vpop.f32.mrb[55].mxu1  ;;  %v6501_v12 = vpop.f32.mrb[63].mxu0  ;;  %v6868_v22 = vld [vmem:[%s9207_s6 + $0x8] ss:$12 sps:$4 sm:$0xff]  }
 0x51f   :  { %v5869_v36 = vmul.f32 -1.442695, %v2965_v30  ;;  %v8606_v30 = vld [vmem:[%s9207_s6] ss:$12 sps:$4 sm:$0xff]   ;;  %v8616_v0 = vld [vmem:[%s9207_s6 + $0x1c] ss:$12 sps:$4 sm:$0xff]  }
 0x520   :  { %7073 = vpow2.f32 %v5868_v7  ;;  %v8622_v12 = vld [vmem:[%s9207_s6 + $0x18] ss:$12 sps:$4 sm:$0xff]  }
 0x521   :  { %7075 = vpow2.f32 %v5869_v36  ;;  %v6872_v36 = vld [vmem:[%s9207_s6 + $0x20] ss:$12 sps:$4 sm:$0xff]  }
 0x52a   :  { %v7074_v25 = vpop.eup %7073 }
 0x52b   :  { %v2962_v32 = vadd.f32 1.0, %v7074_v25  ;;  %v7076_v18 = vpop.eup %7075  ;;  %v8632_v25 = vld [vmem:[%s9207_s6 + $0x34] ss:$12 sps:$4 sm:$0xff]  }
 0x52c   :  { %v2969_v43 = vadd.f32 1.0, %v7076_v18  ;;  %v8641_v18 = vld [vmem:[%s9207_s6 + $0x30] ss:$12 sps:$4 sm:$0xff]  }
 0x52d   :  { %7077 = vrcp.f32 %v2962_v32 }
 0x52e   :  { %7079 = vrcp.f32 %v2969_v43  ;;  %v6876_v43 = vld [vmem:[%s9207_s6 + $0x38] ss:$12 sps:$4 sm:$0xff]  }
 0x537   :  { %v7078_v61 = vpop.eup %7077 }
 0x538   :  { %v2980_v37 = vmul.f32 %v7078_v61, %v2979_v27  ;;  %v7080_v39 = vpop.eup %7079  ;;  %v8651_v27 = vld [vmem:[%s9207_s6 + $0x4c] ss:$12 sps:$4 sm:$0xff]  }
 0x539   :  { %v2983_v33 = vsub.f32 1.0, %v7080_v39  ;;  %v2985_v5 = vmul.f32 %v7080_v39, %v8391_v13  ;;  %v6892_v39 = vld [vmem:[%s9207_s6 + $0x98] ss:$12 sps:$4 sm:$0xff]  }
 0x53a   :  { %v2981_v24 = vadd.f32 %v2980_v37, %v9264_v4  ;;  %v8658_v4 = vld [vmem:[%s9207_s6 + $0x48] ss:$12 sps:$4 sm:$0xff]  }
 0x53b   :  { %v3187_v57 = vpop.f32.mrb[56].mxu1  ;;  %v3228_v41 = vpop.f32.mrb[64].mxu0 }
 0x53c   :  { %7081 = vtanh.f32 %v2981_v24  ;;  %v3234_v35 = vadd.f32 %v3187_v57, %v9265_v21  ;;  %v3189_v47 = vpop.f32.mrb[57].mxu1  ;;  %v6520_v55 = vpop.f32.mrb[65].mxu0  ;;  %v3255_v37 = vadd.f32 %v8414_v10, %v3228_v41  ;;  %v6880_v24 = vld [vmem:[%s9207_s6 + $0x50] ss:$12 sps:$4 sm:$0xff]  }
 0x53d   :  { %v3241_v20 = vadd.f32 %v3189_v47, %v9266_v11  ;;  %v3191_v6 = vpop.f32.mrb[58].mxu1  ;;  %v3231_v59 = vpop.f32.mrb[66].mxu0  ;;  %v8668_v41 = vld [vmem:[%s9207_s6 + $0x64] ss:$12 sps:$4 sm:$0xff]   ;;  %v8675_v55 = vld [vmem:[%s9207_s6 + $0x60] ss:$12 sps:$4 sm:$0xff]  }
 0x53e   :  { %v5895_v15 = vmul.f32 -1.442695, %v3234_v35  ;;  %v3192_v51 = vpop.f32.mrb[59].mxu1  ;;  %v6521_v16 = vpop.f32.mrb[67].mxu0  ;;  %v9267_v35 = vld [vmem:[#allocation31_spill] sm:$0xff] }
 0x53f   :  { %v5896_v58 = vmul.f32 -1.442695, %v3241_v20  ;;  %v6884_v11 = vld [vmem:[%s9207_s6 + $0x68] ss:$12 sps:$4 sm:$0xff]   ;;  %v8691_v6 = vld [vmem:[%s9207_s6 + $0x78] ss:$12 sps:$4 sm:$0xff]  }
 0x540   :  { %7083 = vpow2.f32 %v5895_v15  ;;  %v8685_v20 = vld [vmem:[%s9207_s6 + $0x7c] ss:$12 sps:$4 sm:$0xff]   ;;  %v6888_v59 = vld [vmem:[%s9207_s6 + $0x80] ss:$12 sps:$4 sm:$0xff]  }
 0x541   :  { %7085 = vpow2.f32 %v5896_v58  ;;  %v8701_v15 = vld [vmem:[%s9207_s6 + $0x94] ss:$12 sps:$4 sm:$0xff]   ;;  %v8707_v16 = vld [vmem:[%s9207_s6 + $0x90] ss:$12 sps:$4 sm:$0xff]   ;;  %v8717_v58 = vld [vmem:[%s9207_s6 + $0xac] ss:$12 sps:$4 sm:$0xff]  }
 0x546   :  { %v7082_v44 = vpop.eup %7081 }
 0x547   :  { %v2984_v45 = vmul.f32 %v7082_v44, %v2983_v33 }
 0x549   :  { %v8601_v40 = vadd.f32 %v2985_v5, %v2984_v45  ;;  %v8723_v5 = vld [vmem:[%s9207_s6 + $0xa8] ss:$12 sps:$4 sm:$0xff]   ;;  %v6896_v45 = vld [vmem:[%s9207_s6 + $0xb0] ss:$12 sps:$4 sm:$0xff]  }
 0x54a   :  { %v7084_v49 = vpop.eup %7083 }
 0x54b   :  { %v3238_v3 = vadd.f32 1.0, %v7084_v49  ;;  %v3270_v7 = vpack.c.bf16 %v8601_v40, %v8601_v40  ;;  %v7086_v32 = vpop.eup %7085 }
 0x54c   :  { %v3245_v61 = vadd.f32 1.0, %v7086_v32  ;;  %v6898_v32 = vld [vmem:[%s9206_s2 + $0x20] ss:$12 sps:$4 sm:$0xff]  }
 0x54d   :  { %7087 = vrcp.f32 %v3238_v3  ;;  %3464 = vmatmul.mubr.bf16.vlgmr.msra.gmra.mrb[60].mxu1 %v3270_v7  ;;  %6539 = vmatmul.mubr.bf16.vlgmr.msra.gmra.mrb[68].mxu0 %v3270_v7 }
 0x54e   :  { %3708 = vmatpush1.bf16.msra.mxu1 %v8606_v30  ;;  %6543 = vmatpush3.bf16.msra.mxu0 %v6868_v22  ;;  %7089 = vrcp.f32 %v3245_v61  ;;  %v6900_v61 = vld [vmem:[%s9206_s2 + $0x50] ss:$12 sps:$4 sm:$0xff]  }
 0x54f   :  { %3709 = vmatprep.subr.bf16.mxu1 %v8616_v0  ;;  %6544 = vmatprep.subr.bf16.mxu0 %v9256_v56 }
 0x550   :  { %3739 = vmatprep.mubr.bf16.mxu1 %v9257_v62  ;;  %6558 = vmatprep.mubr.msk.bf16.mxu0 %vm7219_vm1, %v9256_v56 }
 0x552   :  { %3710 = vmatpush1.bf16.msra.mxu1 %v8622_v12  ;;  %6545 = vmatpush3.bf16.msra.mxu0 %v6872_v36  ;;  %v6897_v36 = vld [vmem:[%s9206_s2 + $0x8] ss:$12 sps:$4 sm:$0xff]  }
 0x553   :  { %3711 = vmatprep.subr.bf16.mxu1 %v8632_v25  ;;  %6546 = vmatprep.subr.bf16.mxu0 %v9256_v56 }
 0x556   :  { %3712 = vmatpush1.bf16.msra.mxu1 %v8641_v18  ;;  %6547 = vmatpush3.bf16.msra.mxu0 %v6876_v43  ;;  %v6899_v43 = vld [vmem:[%s9206_s2 + $0x38] ss:$12 sps:$4 sm:$0xff]  }
 0x557   :  { %v7088_v57 = vpop.eup %7087  ;;  %3713 = vmatprep.subr.bf16.mxu1 %v8651_v27  ;;  %6548 = vmatprep.subr.bf16.mxu0 %v9256_v56 }
 0x558   :  { %v3256_v21 = vmul.f32 %v7088_v57, %v3255_v37  ;;  %v7090_v51 = vpop.eup %7089  ;;  %v6901_v37 = vld [vmem:[%s9206_s2 + $0x68] ss:$12 sps:$4 sm:$0xff]   ;;  %v6903_v57 = vld [vmem:[%s9206_s2 + $0x98] ss:$12 sps:$4 sm:$0xff]  }
 0x559   :  { %v3259_v33 = vsub.f32 1.0, %v7090_v51  ;;  %v3261_v49 = vmul.f32 %v7090_v51, %v8451_v42 }
 0x55a   :  { %v3257_v47 = vadd.f32 %v3256_v21, %v9267_v35  ;;  %3714 = vmatpush1.bf16.msra.mxu1 %v8658_v4  ;;  %6549 = vmatpush3.bf16.msra.mxu0 %v6880_v24  ;;  %v6902_v24 = vld [vmem:[%s9206_s2 + $0x80] ss:$12 sps:$4 sm:$0xff]   ;;  %v6904_v21 = vld [vmem:[%s9206_s2 + $0xb0] ss:$12 sps:$4 sm:$0xff]  }
 0x55b   :  { %3715 = vmatprep.subr.bf16.mxu1 %v8668_v41  ;;  %6550 = vmatprep.subr.bf16.mxu0 %v9256_v56 }
 0x55c   :  { %7091 = vtanh.f32 %v3257_v47 }
 0x55e   :  { %3716 = vmatpush1.bf16.msra.mxu1 %v8675_v55  ;;  %6551 = vmatpush3.bf16.msra.mxu0 %v6884_v11  ;;  %v9268_v11 = vld [vmem:[#allocation19_spill] sm:$0xff] }
 0x55f   :  { %3717 = vmatprep.subr.bf16.mxu1 %v8685_v20  ;;  %6552 = vmatprep.subr.bf16.mxu0 %v9256_v56 }
 0x562   :  { %3718 = vmatpush1.bf16.msra.mxu1 %v8691_v6  ;;  %6553 = vmatpush3.bf16.msra.mxu0 %v6888_v59 }
 0x563   :  { %3719 = vmatprep.subr.bf16.mxu1 %v8701_v15  ;;  %6554 = vmatprep.subr.bf16.mxu0 %v9256_v56 }
 0x566   :  { %v7092_v44 = vpop.eup %7091  ;;  %3720 = vmatpush1.bf16.msra.mxu1 %v8707_v16  ;;  %6555 = vmatpush3.bf16.msra.mxu0 %v6892_v39 }
 0x567   :  { %3721 = vmatprep.subr.bf16.mxu1 %v8717_v58  ;;  %6556 = vmatprep.subr.bf16.mxu0 %v9256_v56  ;;  %v3260_v22 = vmul.f32 %v7092_v44, %v3259_v33  ;;  %v9269_v33 = vld [vmem:[#allocation21_spill] sm:$0xff] }
 0x569   :  { %v8731_v3 = vadd.f32 %v3261_v49, %v3260_v22 }
 0x56a   :  { %3722 = vmatpush1.bf16.msra.mxu1 %v8723_v5  ;;  %6557 = vmatpush3.bf16.msra.mxu0 %v6896_v45 }
 0x56b   :  { %v3546_v7 = vpack.c.bf16 %v8731_v3, %v8731_v3  ;;  %3985 = vmatprep.subr.bf16.mxu1 %v8463_v26  ;;  %6562 = vmatprep.subr.bf16.mxu0 %v9256_v56 }
 0x56d   :  { %3740 = vmatmul.mubr.bf16.vlgmr.msra.gmra.mrb[64].mxu1 %v3546_v7  ;;  %6559 = vmatmul.mubr.bf16.vlgmr.msra.gmra.mrb[72].mxu0 %v3546_v7 }
 0x56e   :  { %3986 = vmatpush1.bf16.msra.mxu1 %v8468_v38  ;;  %4017 = vmatprep.mubr.bf16.mxu1 %v9257_v62 }
 0x56f   :  { %3987 = vmatprep.subr.bf16.mxu1 %v8478_v8  ;;  %6578 = vmatprep.mubr.msk.bf16.mxu0 %vm7219_vm1, %v9256_v56 }
 0x570   :  { %6563 = vmatpush3.bf16.msra.mxu0 %v6897_v36 }
 0x571   :  { %6564 = vmatprep.subr.bf16.mxu0 %v9256_v56 }
 0x572   :  { %3988 = vmatpush1.bf16.msra.mxu1 %v8484_v46 }
 0x573   :  { %3989 = vmatprep.subr.bf16.mxu1 %v8494_v28 }
 0x574   :  { %6565 = vmatpush3.bf16.msra.mxu0 %v6898_v32 }
 0x575   :  { %6566 = vmatprep.subr.bf16.mxu0 %v9256_v56 }
 0x576   :  { %3990 = vmatpush1.bf16.msra.mxu1 %v8500_v54 }
 0x577   :  { %3991 = vmatprep.subr.bf16.mxu1 %v8510_v17 }
 0x578   :  { %6567 = vmatpush3.bf16.msra.mxu0 %v6899_v43 }
 0x579   :  { %6568 = vmatprep.subr.bf16.mxu0 %v9256_v56 }
 0x57a   :  { %3992 = vmatpush1.bf16.msra.mxu1 %v8516_v63 }
 0x57b   :  { %3993 = vmatprep.subr.bf16.mxu1 %v8526_v34 }
 0x57c   :  { %6569 = vmatpush3.bf16.msra.mxu0 %v6900_v61 }
 0x57d   :  { %6570 = vmatprep.subr.bf16.mxu0 %v9256_v56 }
 0x57e   :  { %3994 = vmatpush1.bf16.msra.mxu1 %v8532_v14 }
 0x57f   :  { %3995 = vmatprep.subr.bf16.mxu1 %v8542_v9 }
 0x580   :  { %6571 = vmatpush3.bf16.msra.mxu0 %v6901_v37 }
 0x581   :  { %6572 = vmatprep.subr.bf16.mxu0 %v9256_v56 }
 0x582   :  { %3996 = vmatpush1.bf16.msra.mxu1 %v8548_v60 }
 0x583   :  { %3997 = vmatprep.subr.bf16.mxu1 %v8558_v52 }
 0x584   :  { %6573 = vmatpush3.bf16.msra.mxu0 %v6902_v24 }
 0x585   :  { %6574 = vmatprep.subr.bf16.mxu0 %v9256_v56 }
 0x586   :  { %3998 = vmatpush1.bf16.msra.mxu1 %v8564_v23 }
 0x587   :  { %3999 = vmatprep.subr.bf16.mxu1 %v8574_v29 }
 0x588   :  { %6575 = vmatpush3.bf16.msra.mxu0 %v6903_v57 }
 0x589   :  { %6576 = vmatprep.subr.bf16.mxu0 %v9256_v56 }
 0x58a   :  { %4000 = vmatpush1.bf16.msra.mxu1 %v8580_v19 }
 0x58b   :  { %4261 = vmatprep.subr.bf16.mxu1 %v8590_v1 }
 0x58c   :  { %6577 = vmatpush3.bf16.msra.mxu0 %v6904_v21 }
 0x58d   :  { %6582 = vmatprep.subr.bf16.mxu0 %v9256_v56 }
 0x620   :  { %v3465_v35 = vpop.f32.mrb[60].mxu1  ;;  %v3506_v47 = vpop.f32.mrb[68].mxu0 }
 0x621   :  { %v3512_v59 = vadd.f32 %v3465_v35, %v9268_v11  ;;  %v3467_v51 = vpop.f32.mrb[61].mxu1  ;;  %v6540_v39 = vpop.f32.mrb[69].mxu0  ;;  %v3533_v57 = vadd.f32 %v8384_v50, %v3506_v47  ;;  %v9270_v11 = vld [vmem:[#allocation10_spill] sm:$0xff] }
 0x622   :  { %v3519_v44 = vadd.f32 %v3467_v51, %v9269_v33  ;;  %v3469_v45 = vpop.f32.mrb[62].mxu1  ;;  %v3509_v49 = vpop.f32.mrb[70].mxu0 }
 0x623   :  { %v5922_v22 = vmul.f32 -1.442695, %v3512_v59  ;;  %v3470_v7 = vpop.f32.mrb[63].mxu1  ;;  %v6541_v36 = vpop.f32.mrb[71].mxu0  ;;  %v9271_v59 = vld [vmem:[#allocation16_spill] sm:$0xff] }
 0x624   :  { %v5923_v32 = vmul.f32 -1.442695, %v3519_v44 }
 0x625   :  { %7093 = vpow2.f32 %v5922_v22  ;;  %v9272_v22 = vld [vmem:[#allocation18_spill] sm:$0xff] }
 0x626   :  { %7095 = vpow2.f32 %v5923_v32 }
 0x62f   :  { %v7094_v43 = vpop.eup %7093 }
 0x630   :  { %v3516_v61 = vadd.f32 1.0, %v7094_v43  ;;  %v7096_v37 = vpop.eup %7095 }
 0x631   :  { %v3523_v24 = vadd.f32 1.0, %v7096_v37 }
 0x632   :  { %7097 = vrcp.f32 %v3516_v61 }
 0x633   :  { %7099 = vrcp.f32 %v3523_v24 }
 0x63c   :  { %v7098_v21 = vpop.eup %7097 }
 0x63d   :  { %v3534_v35 = vmul.f32 %v7098_v21, %v3533_v57  ;;  %v7100_v50 = vpop.eup %7099 }
 0x63e   :  { %v3537_v24 = vsub.f32 1.0, %v7100_v50  ;;  %v3539_v21 = vmul.f32 %v7100_v50, %v8601_v40 }
 0x63f   :  { %v3535_v51 = vadd.f32 %v3534_v35, %v9270_v11 }
 0x640   :  { %v3741_v39 = vpop.f32.mrb[64].mxu1  ;;  %v3782_v33 = vpop.f32.mrb[72].mxu0 }
 0x641   :  { %7101 = vtanh.f32 %v3535_v51  ;;  %v3788_v45 = vadd.f32 %v3741_v39, %v9271_v59  ;;  %v3743_v49 = vpop.f32.mrb[65].mxu1  ;;  %v6560_v44 = vpop.f32.mrb[73].mxu0  ;;  %v6905_v39 = vld [vmem:[%s9207_s6 + $0x8] ss:$12 sps:$4 sm:$0xff]  }
 0x642   :  { %v3795_v7 = vadd.f32 %v3743_v49, %v9272_v22  ;;  %v3745_v36 = vpop.f32.mrb[66].mxu1  ;;  %v3785_v32 = vpop.f32.mrb[74].mxu0  ;;  %v6906_v49 = vld [vmem:[%s9207_s6 + $0x20] ss:$12 sps:$4 sm:$0xff]   ;;  %v6907_v22 = vld [vmem:[%s9207_s6 + $0x38] ss:$12 sps:$4 sm:$0xff]  }
 0x643   :  { %v5949_v43 = vmul.f32 -1.442695, %v3788_v45  ;;  %v3746_v61 = vpop.f32.mrb[67].mxu1  ;;  %v6561_v37 = vpop.f32.mrb[75].mxu0  ;;  %v3809_v36 = vadd.f32 %v8414_v10, %v3782_v33  ;;  %v6908_v32 = vld [vmem:[%s9207_s6 + $0x50] ss:$12 sps:$4 sm:$0xff]  }
 0x644   :  { %v5950_v47 = vmul.f32 -1.442695, %v3795_v7  ;;  %v9273_v37 = vld [vmem:[#allocation29_spill] sm:$0xff]  ;;  %v6909_v10 = vld [vmem:[%s9207_s6 + $0x68] ss:$12 sps:$4 sm:$0xff]  }
 0x645   :  { %7103 = vpow2.f32 %v5949_v43  ;;  %v6910_v33 = vld [vmem:[%s9207_s6 + $0x80] ss:$12 sps:$4 sm:$0xff]  }
 0x646   :  { %7105 = vpow2.f32 %v5950_v47 }
 0x64b   :  { %v7102_v57 = vpop.eup %7101 }
 0x64c   :  { %v3538_v35 = vmul.f32 %v7102_v57, %v3537_v24  ;;  %v6911_v24 = vld [vmem:[%s9207_s6 + $0x98] ss:$12 sps:$4 sm:$0xff]  }
 0x64e   :  { %v8796_v11 = vadd.f32 %v3539_v21, %v3538_v35  ;;  %v6912_v35 = vld [vmem:[%s9207_s6 + $0xb0] ss:$12 sps:$4 sm:$0xff]  }
 0x64f   :  { %v7104_v51 = vpop.eup %7103 }
 0x650   :  { %v3792_v59 = vadd.f32 1.0, %v7104_v51  ;;  %v3824_v45 = vpack.c.bf16 %v8796_v11, %v8796_v11  ;;  %v7106_v44 = vpop.eup %7105 }
 0x651   :  { %v3799_v7 = vadd.f32 1.0, %v7106_v44 }
 0x652   :  { %7107 = vrcp.f32 %v3792_v59  ;;  %4018 = vmatmul.mubr.bf16.vlgmr.msra.gmra.mrb[68].mxu1 %v3824_v45  ;;  %6579 = vmatmul.mubr.bf16.vlgmr.msra.gmra.mrb[76].mxu0 %v3824_v45 }
 0x653   :  { %4262 = vmatpush1.bf16.msra.mxu1 %v8606_v30  ;;  %6583 = vmatpush3.bf16.msra.mxu0 %v6905_v39  ;;  %7109 = vrcp.f32 %v3799_v7 }
 0x654   :  { %4263 = vmatprep.subr.bf16.mxu1 %v8616_v0  ;;  %6584 = vmatprep.subr.bf16.mxu0 %v9256_v56 }
 0x655   :  { %4293 = vmatprep.mubr.bf16.mxu1 %v9257_v62  ;;  %6598 = vmatprep.mubr.msk.bf16.mxu0 %vm7219_vm1, %v9256_v56 }
 0x657   :  { %4264 = vmatpush1.bf16.msra.mxu1 %v8622_v12  ;;  %6585 = vmatpush3.bf16.msra.mxu0 %v6906_v49 }
 0x658   :  { %4265 = vmatprep.subr.bf16.mxu1 %v8632_v25  ;;  %6586 = vmatprep.subr.bf16.mxu0 %v9256_v56 }
 0x65b   :  { %4266 = vmatpush1.bf16.msra.mxu1 %v8641_v18  ;;  %6587 = vmatpush3.bf16.msra.mxu0 %v6907_v22 }
 0x65c   :  { %v7108_v43 = vpop.eup %7107  ;;  %4267 = vmatprep.subr.bf16.mxu1 %v8651_v27  ;;  %6588 = vmatprep.subr.bf16.mxu0 %v9256_v56 }
 0x65d   :  { %v3810_v61 = vmul.f32 %v7108_v43, %v3809_v36  ;;  %v7110_v47 = vpop.eup %7109 }
 0x65e   :  { %v3813_v57 = vsub.f32 1.0, %v7110_v47  ;;  %v3815_v51 = vmul.f32 %v7110_v47, %v8731_v3 }
 0x65f   :  { %v3811_v50 = vadd.f32 %v3810_v61, %v9273_v37  ;;  %4268 = vmatpush1.bf16.msra.mxu1 %v8658_v4  ;;  %6589 = vmatpush3.bf16.msra.mxu0 %v6908_v32  ;;  %v8914_v37 = vld [vmem:[%s9210_s4] ss:$0 sm:$0xff] }
 0x660   :  { %4269 = vmatprep.subr.bf16.mxu1 %v8668_v41  ;;  %6590 = vmatprep.subr.bf16.mxu0 %v9256_v56 }
 0x661   :  { %7111 = vtanh.f32 %v3811_v50 }
 0x663   :  { %4270 = vmatpush1.bf16.msra.mxu1 %v8675_v55  ;;  %6591 = vmatpush3.bf16.msra.mxu0 %v6909_v10 }
 0x664   :  { %4271 = vmatprep.subr.bf16.mxu1 %v8685_v20  ;;  %6592 = vmatprep.subr.bf16.mxu0 %v9256_v56 }
 0x667   :  { %4272 = vmatpush1.bf16.msra.mxu1 %v8691_v6  ;;  %6593 = vmatpush3.bf16.msra.mxu0 %v6910_v33 }
 0x668   :  { %4273 = vmatprep.subr.bf16.mxu1 %v8701_v15  ;;  %6594 = vmatprep.subr.bf16.mxu0 %v9256_v56 }
 0x66b   :  { %v7112_v21 = vpop.eup %7111  ;;  %4274 = vmatpush1.bf16.msra.mxu1 %v8707_v16  ;;  %6595 = vmatpush3.bf16.msra.mxu0 %v6911_v24  ;;  %v9276_v24 = vld [vmem:[#allocation7_spill] sm:$0xff] }
 0x66c   :  { %4275 = vmatprep.subr.bf16.mxu1 %v8717_v58  ;;  %6596 = vmatprep.subr.bf16.mxu0 %v9256_v56  ;;  %v3814_v39 = vmul.f32 %v7112_v21, %v3813_v57 }
 0x66e   :  { %v8851_v59 = vadd.f32 %v3815_v51, %v3814_v39  ;;  %v9277_v51 = vld [vmem:[#allocation13_spill] sm:$0xff] }
 0x66f   :  { %4276 = vmatpush1.bf16.msra.mxu1 %v8723_v5  ;;  %6597 = vmatpush3.bf16.msra.mxu0 %v6912_v35 }
 0x670   :  { %v4100_v45 = vpack.c.bf16 %v8851_v59, %v8851_v59  ;;  %4539 = vmatprep.subr.bf16.mxu1 %v8463_v26  ;;  %6602 = vmatprep.subr.bf16.mxu0 %v9256_v56  ;;  %v6913_v26 = vld [vmem:[%s9206_s2 + $0x8] ss:$12 sps:$4 sm:$0xff]  }
 0x672   :  { %4294 = vmatmul.mubr.bf16.vlgmr.msra.gmra.mrb[72].mxu1 %v4100_v45  ;;  %6599 = vmatmul.mubr.bf16.vlgmr.msra.gmra.mrb[80].mxu0 %v4100_v45 }
 0x673   :  { %4540 = vmatpush1.bf16.msra.mxu1 %v8468_v38  ;;  %4571 = vmatprep.mubr.bf16.mxu1 %v9257_v62  ;;  %v6914_v38 = vld [vmem:[%s9206_s2 + $0x20] ss:$12 sps:$4 sm:$0xff]  }
 0x674   :  { %4541 = vmatprep.subr.bf16.mxu1 %v8478_v8  ;;  %6618 = vmatprep.mubr.msk.bf16.mxu0 %vm7219_vm1, %v9256_v56  ;;  %v6915_v8 = vld [vmem:[%s9206_s2 + $0x38] ss:$12 sps:$4 sm:$0xff]  }
 0x675   :  { %6603 = vmatpush3.bf16.msra.mxu0 %v6913_v26 }
 0x676   :  { %6604 = vmatprep.subr.bf16.mxu0 %v9256_v56 }
 0x677   :  { %4542 = vmatpush1.bf16.msra.mxu1 %v8484_v46  ;;  %v6916_v46 = vld [vmem:[%s9206_s2 + $0x50] ss:$12 sps:$4 sm:$0xff]  }
 0x678   :  { %4543 = vmatprep.subr.bf16.mxu1 %v8494_v28  ;;  %v6917_v28 = vld [vmem:[%s9206_s2 + $0x68] ss:$12 sps:$4 sm:$0xff]  }
 0x679   :  { %6605 = vmatpush3.bf16.msra.mxu0 %v6914_v38  ;;  %v9278_v38 = vld [vmem:[#allocation14_spill] sm:$0xff] }
 0x67a   :  { %6606 = vmatprep.subr.bf16.mxu0 %v9256_v56 }
 0x67b   :  { %4544 = vmatpush1.bf16.msra.mxu1 %v8500_v54  ;;  %v6918_v54 = vld [vmem:[%s9206_s2 + $0x80] ss:$12 sps:$4 sm:$0xff]  }
 0x67c   :  { %4545 = vmatprep.subr.bf16.mxu1 %v8510_v17  ;;  %v6919_v17 = vld [vmem:[%s9206_s2 + $0x98] ss:$12 sps:$4 sm:$0xff]  }
 0x67d   :  { %6607 = vmatpush3.bf16.msra.mxu0 %v6915_v8 }
 0x67e   :  { %6608 = vmatprep.subr.bf16.mxu0 %v9256_v56 }
 0x67f   :  { %4546 = vmatpush1.bf16.msra.mxu1 %v8516_v63  ;;  %v6920_v63 = vld [vmem:[%s9206_s2 + $0xb0] ss:$12 sps:$4 sm:$0xff]  }
 0x680   :  { %4547 = vmatprep.subr.bf16.mxu1 %v8526_v34 }
 0x681   :  { %6609 = vmatpush3.bf16.msra.mxu0 %v6916_v46 }
 0x682   :  { %6610 = vmatprep.subr.bf16.mxu0 %v9256_v56 }
 0x683   :  { %4548 = vmatpush1.bf16.msra.mxu1 %v8532_v14 }
 0x684   :  { %4549 = vmatprep.subr.bf16.mxu1 %v8542_v9  ;;  %v9274_v9 = vld [vmem:[#allocation23_spill] sm:$0xff] }
 0x685   :  { %6611 = vmatpush3.bf16.msra.mxu0 %v6917_v28 }
 0x686   :  { %6612 = vmatprep.subr.bf16.mxu0 %v9256_v56 }
 0x687   :  { %4550 = vmatpush1.bf16.msra.mxu1 %v8548_v60 }
 0x688   :  { %4551 = vmatprep.subr.bf16.mxu1 %v8558_v52 }
 0x689   :  { %6613 = vmatpush3.bf16.msra.mxu0 %v6918_v54 }
 0x68a   :  { %6614 = vmatprep.subr.bf16.mxu0 %v9256_v56 }
 0x68b   :  { %4552 = vmatpush1.bf16.msra.mxu1 %v8564_v23 }
 0x68c   :  { %4553 = vmatprep.subr.bf16.mxu1 %v8574_v29  ;;  %v9275_v29 = vld [vmem:[#allocation25_spill] sm:$0xff] }
 0x68d   :  { %6615 = vmatpush3.bf16.msra.mxu0 %v6919_v17 }
 0x68e   :  { %6616 = vmatprep.subr.bf16.mxu0 %v9256_v56 }
 0x68f   :  { %4554 = vmatpush1.bf16.msra.mxu1 %v8580_v19 }
 0x690   :  { %4815 = vmatprep.subr.bf16.mxu1 %v8590_v1 }
 0x691   :  { %6617 = vmatpush3.bf16.msra.mxu0 %v6920_v63 }
 0x692   :  { %6622 = vmatprep.subr.bf16.mxu0 %v9256_v56 }
 0x725   :  { %v4019_v34 = vpop.f32.mrb[68].mxu1  ;;  %v4060_v14 = vpop.f32.mrb[76].mxu0 }
 0x726   :  { %v4066_v60 = vadd.f32 %v4019_v34, %v9274_v9  ;;  %v4021_v52 = vpop.f32.mrb[69].mxu1  ;;  %v6580_v23 = vpop.f32.mrb[77].mxu0  ;;  %v4087_v10 = vadd.f32 %v8914_v37, %v4060_v14 }
 0x727   :  { %v4073_v19 = vadd.f32 %v4021_v52, %v9275_v29  ;;  %v4023_v1 = vpop.f32.mrb[70].mxu1  ;;  %v4063_v49 = vpop.f32.mrb[78].mxu0 }
 0x728   :  { %v5976_v44 = vmul.f32 -1.442695, %v4066_v60  ;;  %v4024_v22 = vpop.f32.mrb[71].mxu1  ;;  %v6581_v7 = vpop.f32.mrb[79].mxu0  ;;  %v6921_v1 = vld [vmem:[%s9207_s6 + $0x8] ss:$12 sps:$4 sm:$0xff]  }
 0x729   :  { %v5977_v36 = vmul.f32 -1.442695, %v4073_v19  ;;  %v6922_v22 = vld [vmem:[%s9207_s6 + $0x20] ss:$12 sps:$4 sm:$0xff]  }
 0x72a   :  { %7113 = vpow2.f32 %v5976_v44 }
 0x72b   :  { %7115 = vpow2.f32 %v5977_v36  ;;  %v8944_v36 = vld [vmem:[%s9211_s8] ss:$0 sm:$0xff] }
 0x734   :  { %v7114_v32 = vpop.eup %7113 }
 0x735   :  { %v4070_v43 = vadd.f32 1.0, %v7114_v32  ;;  %v7116_v61 = vpop.eup %7115 }
 0x736   :  { %v4077_v50 = vadd.f32 1.0, %v7116_v61 }
 0x737   :  { %7117 = vrcp.f32 %v4070_v43 }
 0x738   :  { %7119 = vrcp.f32 %v4077_v50 }
 0x741   :  { %v7118_v33 = vpop.eup %7117 }
 0x742   :  { %v4088_v47 = vmul.f32 %v7118_v33, %v4087_v10  ;;  %v7120_v34 = vpop.eup %7119 }
 0x743   :  { %v4091_v9 = vsub.f32 1.0, %v7120_v34  ;;  %v4093_v52 = vmul.f32 %v7120_v34, %v8796_v11  ;;  %v6961_v34 = vld [vmem:[%s9212_s9 + $0xa4] ss:$8 sps:$4 sm:$0xff]  }
 0x744   :  { %v4089_v57 = vadd.f32 %v4088_v47, %v9276_v24  ;;  %v6937_v47 = vld [vmem:[%s9212_s9 + $0x24] ss:$8 sps:$4 sm:$0xff]   ;;  %v6935_v24 = vld [vmem:[%s9212_s9 + $0x20] ss:$8 sps:$4 sm:$0xff]  }
 0x745   :  { %v4295_v21 = vpop.f32.mrb[72].mxu1  ;;  %v4336_v35 = vpop.f32.mrb[80].mxu0 }
 0x746   :  { %7121 = vtanh.f32 %v4089_v57  ;;  %v4342_v39 = vadd.f32 %v4295_v21, %v9277_v51  ;;  %v4297_v45 = vpop.f32.mrb[73].mxu1  ;;  %v6600_v26 = vpop.f32.mrb[81].mxu0  ;;  %v6940_v57 = vld [vmem:[%s9212_s9 + $0x34] ss:$8 sps:$4 sm:$0xff]   ;;  %v6938_v21 = vld [vmem:[%s9212_s9 + $0x30] ss:$8 sps:$4 sm:$0xff]  }
 0x747   :  { %v4349_v8 = vadd.f32 %v4297_v45, %v9278_v38  ;;  %v4299_v46 = vpop.f32.mrb[74].mxu1  ;;  %v4339_v28 = vpop.f32.mrb[82].mxu0  ;;  %v6941_v51 = vld [vmem:[%s9212_s9 + $0x40] ss:$8 sps:$4 sm:$0xff]   ;;  %v6944_v45 = vld [vmem:[%s9212_s9 + $0x50] ss:$8 sps:$4 sm:$0xff]  }
 0x748   :  { %v6003_v54 = vmul.f32 -1.442695, %v4342_v39  ;;  %v4300_v17 = vpop.f32.mrb[75].mxu1  ;;  %v6601_v63 = vpop.f32.mrb[83].mxu0  ;;  %v6946_v39 = vld [vmem:[%s9212_s9 + $0x54] ss:$8 sps:$4 sm:$0xff]  }
 0x749   :  { %v6004_v14 = vmul.f32 -1.442695, %v4349_v8  ;;  %v6949_v26 = vld [vmem:[%s9212_s9 + $0x64] ss:$8 sps:$4 sm:$0xff]   ;;  %v6947_v38 = vld [vmem:[%s9212_s9 + $0x60] ss:$8 sps:$4 sm:$0xff]  }
 0x74a   :  { %7123 = vpow2.f32 %v6003_v54  ;;  %v6952_v8 = vld [vmem:[%s9212_s9 + $0x74] ss:$8 sps:$4 sm:$0xff]   ;;  %v6950_v46 = vld [vmem:[%s9212_s9 + $0x70] ss:$8 sps:$4 sm:$0xff]   ;;  %v6955_v28 = vld [vmem:[%s9212_s9 + $0x84] ss:$8 sps:$4 sm:$0xff]  }
 0x74b   :  { %7125 = vpow2.f32 %v6004_v14  ;;  %v6953_v54 = vld [vmem:[%s9212_s9 + $0x80] ss:$8 sps:$4 sm:$0xff]   ;;  %v6958_v17 = vld [vmem:[%s9212_s9 + $0x94] ss:$8 sps:$4 sm:$0xff]   ;;  %v6956_v63 = vld [vmem:[%s9212_s9 + $0x90] ss:$8 sps:$4 sm:$0xff]  }
 0x74c   :  { %v6959_v14 = vld [vmem:[%s9212_s9 + $0xa0] ss:$8 sps:$4 sm:$0xff]  }
 0x750   :  { %v7122_v60 = vpop.eup %7121 }
 0x751   :  { %v4092_v23 = vmul.f32 %v7122_v60, %v4091_v9  ;;  %v6964_v9 = vld [vmem:[%s9212_s9 + $0xb4] ss:$8 sps:$4 sm:$0xff]   ;;  %v6962_v60 = vld [vmem:[%s9212_s9 + $0xb0] ss:$8 sps:$4 sm:$0xff]  }
 0x753   :  { %v8921_v29 = vadd.f32 %v4093_v52, %v4092_v23  ;;  %v6965_v52 = vld [vmem:[%s9212_s9 + $0xc0] ss:$8 sps:$4 sm:$0xff]   ;;  %v6967_v23 = vld [vmem:[%s9212_s9 + $0xc4] ss:$8 sps:$4 sm:$0xff]  }
 0x754   :  { %v7124_v19 = vpop.eup %7123 }
 0x755   :  { %v4346_v49 = vadd.f32 1.0, %v7124_v19  ;;  %v4378_v44 = vpack.c.bf16 %v8921_v29, %v8921_v29  ;;  %v7126_v7 = vpop.eup %7125  ;;  %v6970_v19 = vld [vmem:[%s9212_s9 + $0xd4] ss:$8 sps:$4 sm:$0xff]  }
 0x757   :  { %7127 = vrcp.f32 %v4346_v49  ;;  %4572 = vmatmul.mubr.bf16.vlgmr.msra.gmra.mrb[76].mxu1 %v4378_v44  ;;  %6619 = vmatmul.mubr.bf16.vlgmr.msra.gmra.mrb[84].mxu0 %v4378_v44  ;;  %v6973_v49 = vld [vmem:[%s9212_s9 + $0xe4] ss:$8 sps:$4 sm:$0xff]   ;;  %v6971_v44 = vld [vmem:[%s9212_s9 + $0xe0] ss:$8 sps:$4 sm:$0xff]  }
 0x758   :  { %4816 = vmatpush1.bf16.msra.mxu1 %v8606_v30  ;;  %6623 = vmatpush3.bf16.msra.mxu0 %v6921_v1  ;;  %v6923_v30 = vld [vmem:[%s9207_s6 + $0x38] ss:$12 sps:$4 sm:$0xff]  }
 0x759   :  { %4817 = vmatprep.subr.bf16.mxu1 %v8616_v0  ;;  %6624 = vmatprep.subr.bf16.mxu0 %v9256_v56  ;;  %v4363_v0 = vadd.f32 %v8944_v36, %v4336_v35  ;;  %v6943_v35 = vld [vmem:[%s9212_s9 + $0x44] ss:$8 sps:$4 sm:$0xff]   ;;  %v6968_v1 = vld [vmem:[%s9212_s9 + $0xd0] ss:$8 sps:$4 sm:$0xff]  }
 0x75a   :  { %4847 = vmatprep.mubr.bf16.mxu1 %v9257_v62  ;;  %6638 = vmatprep.mubr.msk.bf16.mxu0 %vm7219_vm1, %v9256_v56  ;;  %v4353_v62 = vadd.f32 1.0, %v7126_v7  ;;  %v6974_v7 = vld [vmem:[%s9212_s9 + $0xf0] ss:$8 sps:$4 sm:$0xff]  }
 0x75c   :  { %4818 = vmatpush1.bf16.msra.mxu1 %v8622_v12  ;;  %6625 = vmatpush3.bf16.msra.mxu0 %v6922_v22  ;;  %v6924_v12 = vld [vmem:[%s9207_s6 + $0x50] ss:$12 sps:$4 sm:$0xff]   ;;  %7129 = vrcp.f32 %v4353_v62  ;;  %v6978_v62 = vld [vmem:[%s9213_s11] sm:$0xff]  }
 0x75d   :  { %4819 = vmatprep.subr.bf16.mxu1 %v8632_v25  ;;  %6626 = vmatprep.subr.bf16.mxu0 %v9256_v56  ;;  %v9279_v25 = vld [vmem:[#allocation32_spill] sm:$0xff] }
 0x75e   :  { %v6976_v22 = vld [vmem:[%s9212_s9 + $0xf4] ss:$8 sps:$4 sm:$0xff]  }
 0x760   :  { %4820 = vmatpush1.bf16.msra.mxu1 %v8641_v18  ;;  %6627 = vmatpush3.bf16.msra.mxu0 %v6923_v30  ;;  %v6925_v18 = vld [vmem:[%s9207_s6 + $0x68] ss:$12 sps:$4 sm:$0xff]   ;;  %v6977_v30 = vld [vmem:[%s9213_s11 + $0x40] sm:$0xff]  }
 0x761   :  { %v7128_v32 = vpop.eup %7127  ;;  %4821 = vmatprep.subr.bf16.mxu1 %v8651_v27  ;;  %6628 = vmatprep.subr.bf16.mxu0 %v9256_v56  ;;  %v6926_v27 = vld [vmem:[%s9207_s6 + $0x80] ss:$12 sps:$4 sm:$0xff]  }
 0x762   :  { %v4364_v43 = vmul.f32 %v7128_v32, %v4363_v0  ;;  %v6979_v0 = vld [vmem:[%s9213_s11 + $0x48] sm:$0xff]   ;;  %v6981_v32 = vld [vmem:[%s9213_s11 + $0x50] sm:$0xff]  }
 0x764   :  { %v4365_v61 = vadd.f32 %v4364_v43, %v9279_v25  ;;  %4822 = vmatpush1.bf16.msra.mxu1 %v8658_v4  ;;  %6629 = vmatpush3.bf16.msra.mxu0 %v6924_v12  ;;  %v6980_v12 = vld [vmem:[%s9213_s11 + $0x8] sm:$0xff]   ;;  %v6982_v43 = vld [vmem:[%s9213_s11 + $0x10] sm:$0xff]  }
 0x765   :  { %4823 = vmatprep.subr.bf16.mxu1 %v8668_v41  ;;  %6630 = vmatprep.subr.bf16.mxu0 %v9256_v56  ;;  %v6927_v41 = vld [vmem:[%s9207_s6 + $0x98] ss:$12 sps:$4 sm:$0xff]  }
 0x766   :  { %7131 = vtanh.f32 %v4365_v61  ;;  %v7130_v4 = vpop.eup %7129 }
 0x768   :  { %4824 = vmatpush1.bf16.msra.mxu1 %v8675_v55  ;;  %6631 = vmatpush3.bf16.msra.mxu0 %v6925_v18  ;;  %v4367_v55 = vsub.f32 1.0, %v7130_v4  ;;  %v9280_v18 = vld [vmem:[#allocation27_spill] sm:$0xff] }
 0x769   :  { %4825 = vmatprep.subr.bf16.mxu1 %v8685_v20  ;;  %6632 = vmatprep.subr.bf16.mxu0 %v9256_v56  ;;  %v6928_v20 = vld [vmem:[%s9207_s6 + $0xb0] ss:$12 sps:$4 sm:$0xff]  }
 0x76c   :  { %4826 = vmatpush1.bf16.msra.mxu1 %v8691_v6  ;;  %6633 = vmatpush3.bf16.msra.mxu0 %v6926_v27  ;;  %v4369_v6 = vmul.f32 %v7130_v4, %v8851_v59 }
 0x76d   :  { %4827 = vmatprep.subr.bf16.mxu1 %v8701_v15  ;;  %6634 = vmatprep.subr.bf16.mxu0 %v9256_v56 }
 0x770   :  { %v7132_v50 = vpop.eup %7131  ;;  %4828 = vmatpush1.bf16.msra.mxu1 %v8707_v16  ;;  %6635 = vmatpush3.bf16.msra.mxu0 %v6927_v41  ;;  %v6931_v16 = vld [vmem:[%s9212_s9 + $0x4] ss:$8 sps:$4 sm:$0xff]  }
 0x771   :  { %4829 = vmatprep.subr.bf16.mxu1 %v8717_v58  ;;  %6636 = vmatprep.subr.bf16.mxu0 %v9256_v56  ;;  %v4368_v10 = vmul.f32 %v7132_v50, %v4367_v55  ;;  %v6929_v58 = vld [vmem:[%s9212_s9] ss:$8 sps:$4 sm:$0xff]   ;;  %v6934_v56 = vld [vmem:[%s9212_s9 + $0x14] ss:$8 sps:$4 sm:$0xff]  }
 0x772   :  { %v9281_v55 = vld [vmem:[#allocation28_spill] sm:$0xff] }
 0x773   :  { %v8981_v33 = vadd.f32 %v4369_v6, %v4368_v10 }
 0x774   :  { %4830 = vmatpush1.bf16.msra.mxu1 %v8723_v5  ;;  %6637 = vmatpush3.bf16.msra.mxu0 %v6928_v20  ;;  %v6932_v5 = vld [vmem:[%s9212_s9 + $0x10] ss:$8 sps:$4 sm:$0xff]  }
 0x775   :  { %v4654_v15 = vpack.c.bf16 %v8981_v33, %v8981_v33  ;;  %5155 = vmatprep.subr.bf16.mxu1 %v6931_v16  ;;  %6262 = vmatprep.subr.bf16.mxu0 %v6977_v30 }
 0x777   :  { %4848 = vmatmul.mubr.bf16.vlgmr.msra.gmra.mrb[80].mxu1 %v4654_v15  ;;  %6639 = vmatmul.mubr.bf16.vlgmr.msra.gmra.mrb[88].mxu0 %v4654_v15 }
 0x778   :  { %5156 = vmatpush1.bf16.msra.mxu1 %v6929_v58  ;;  %6263 = vmatpush3.bf16.msra.mxu0 %v6978_v62 }
 0x779   :  { %5157 = vmatprep.subr.bf16.mxu1 %v6934_v56  ;;  %6264 = vmatprep.subr.bf16.mxu0 %v6979_v0 }
 0x77c   :  { %5158 = vmatpush1.bf16.msra.mxu1 %v6932_v5  ;;  %6265 = vmatpush3.bf16.msra.mxu0 %v6980_v12 }
 0x77d   :  { %5159 = vmatprep.subr.bf16.mxu1 %v6937_v47  ;;  %6266 = vmatprep.subr.bf16.mxu0 %v6981_v32 }
 0x780   :  { %5160 = vmatpush1.bf16.msra.mxu1 %v6935_v24  ;;  %6267 = vmatpush3.bf16.msra.mxu0 %v6982_v43  ;;  %v9285_v43 = vld [vmem:[#allocation30_spill] sm:$0xff] }
 0x781   :  { %5161 = vmatprep.subr.bf16.mxu1 %v6940_v57 }
 0x784   :  { %5162 = vmatpush1.bf16.msra.mxu1 %v6938_v21 }
 0x785   :  { %5163 = vmatprep.subr.bf16.mxu1 %v6943_v35 }
 0x788   :  { %5164 = vmatpush1.bf16.msra.mxu1 %v6941_v51  ;;  %v9282_v51 = vld [vmem:[#allocation9_spill] sm:$0xff] }
 0x789   :  { %5165 = vmatprep.subr.bf16.mxu1 %v6946_v39 }
 0x78c   :  { %5166 = vmatpush1.bf16.msra.mxu1 %v6944_v45 }
 0x78d   :  { %5167 = vmatprep.subr.bf16.mxu1 %v6949_v26 }
 0x790   :  { %5168 = vmatpush1.bf16.msra.mxu1 %v6947_v38  ;;  %v9283_v38 = vld [vmem:[#allocation11_spill] sm:$0xff] }
 0x791   :  { %5169 = vmatprep.subr.bf16.mxu1 %v6952_v8 }
 0x794   :  { %5170 = vmatpush1.bf16.msra.mxu1 %v6950_v46 }
 0x795   :  { %5171 = vmatprep.subr.bf16.mxu1 %v6955_v28 }
 0x798   :  { %5172 = vmatpush1.bf16.msra.mxu1 %v6953_v54  ;;  %v9284_v54 = vld [vmem:[#allocation12_spill] sm:$0xff] }
 0x799   :  { %5173 = vmatprep.subr.bf16.mxu1 %v6958_v17 }
 0x79c   :  { %5174 = vmatpush1.bf16.msra.mxu1 %v6956_v63 }
 0x79d   :  { %5175 = vmatprep.subr.bf16.mxu1 %v6961_v34 }
 0x7a0   :  { %5176 = vmatpush1.bf16.msra.mxu1 %v6959_v14 }
 0x7a1   :  { %5177 = vmatprep.subr.bf16.mxu1 %v6964_v9 }
 0x7a4   :  { %5178 = vmatpush1.bf16.msra.mxu1 %v6962_v60 }
 0x7a5   :  { %5179 = vmatprep.subr.bf16.mxu1 %v6967_v23 }
 0x7a8   :  { %5180 = vmatpush1.bf16.msra.mxu1 %v6965_v52 }
 0x7a9   :  { %5181 = vmatprep.subr.bf16.mxu1 %v6970_v19 }
 0x7ac   :  { %5182 = vmatpush1.bf16.msra.mxu1 %v6968_v1 }
 0x7ad   :  { %5183 = vmatprep.subr.bf16.mxu1 %v6973_v49 }
 0x7b0   :  { %5184 = vmatpush1.bf16.msra.mxu1 %v6971_v44 }
 0x7b1   :  { %5185 = vmatprep.subr.bf16.mxu1 %v6976_v22 }
 0x7b4   :  { %5186 = vmatpush1.bf16.msra.mxu1 %v6974_v7 }
 0x82a   :  { %v4573_v25 = vpop.f32.mrb[76].mxu1  ;;  %v4614_v61 = vpop.f32.mrb[84].mxu0 }
 0x82b   :  { %v4620_v27 = vadd.f32 %v4573_v25, %v9280_v18  ;;  %v4575_v4 = vpop.f32.mrb[77].mxu1  ;;  %v6620_v41 = vpop.f32.mrb[85].mxu0  ;;  %v4641_v57 = vadd.f32 %v8914_v37, %v4614_v61 }
 0x82c   :  { %v4627_v50 = vadd.f32 %v4575_v4, %v9281_v55  ;;  %v4577_v20 = vpop.f32.mrb[78].mxu1  ;;  %v4617_v6 = vpop.f32.mrb[86].mxu0 }
 0x82d   :  { %v6030_v10 = vmul.f32 -1.442695, %v4620_v27  ;;  %v4578_v15 = vpop.f32.mrb[79].mxu1  ;;  %v6621_v16 = vpop.f32.mrb[87].mxu0  ;;  %v9286_v20 = vld [vmem:[#allocation34_spill] sm:$0xff]  ;;  %v4946_v6 = vpack.c.bf16 %v8731_v3, %v8851_v59 }
 0x82e   :  { %v6031_v58 = vmul.f32 -1.442695, %v4627_v50  ;;  %v4948_v15 = vpack.c.bf16 %v8321_v53, %v8451_v42  ;;  %v4947_v16 = vpack.c.bf16 %v8796_v11, %v8601_v40 }
 0x82f   :  { %7133 = vpow2.f32 %v6030_v10  ;;  %v4945_v10 = vpack.c.bf16 %v8391_v13, %v8266_v2 }
 0x830   :  { %7135 = vpow2.f32 %v6031_v58  ;;  %v9287_v58 = vld [vmem:[#allocation35_spill] sm:$0xff] }
 0x839   :  { %v7134_v56 = vpop.eup %7133 }
 0x83a   :  { %v4624_v5 = vadd.f32 1.0, %v7134_v56  ;;  %v7136_v47 = vpop.eup %7135  ;;  %v4950_v56 = vpack.c.bf16 %v9287_v58, %v8201_v48 }
 0x83b   :  { %v4631_v24 = vadd.f32 1.0, %v7136_v47  ;;  %v6983_v47 = vld [vmem:[%s9213_s11 + $0x58] sm:$0xff]  }
 0x83c   :  { %7137 = vrcp.f32 %v4624_v5  ;;  %6268 = vmatprep.subr.bf16.mxu0 %v6983_v47 }
 0x83d   :  { %7139 = vrcp.f32 %v4631_v24  ;;  %v6984_v24 = vld [vmem:[%s9213_s11 + $0x18] sm:$0xff]  }
 0x83e   :  { %6269 = vmatpush3.bf16.msra.mxu0 %v6984_v24 }
 0x846   :  { %v7138_v21 = vpop.eup %7137 }
 0x847   :  { %v4642_v35 = vmul.f32 %v7138_v21, %v4641_v57  ;;  %v7140_v37 = vpop.eup %7139  ;;  %v6985_v57 = vld [vmem:[%s9213_s11 + $0x60] sm:$0xff]  }
 0x848   :  { %v4645_v23 = vsub.f32 1.0, %v7140_v37  ;;  %v4647_v49 = vmul.f32 %v7140_v37, %v8921_v29  ;;  %v6986_v21 = vld [vmem:[%s9213_s11 + $0x20] sm:$0xff]   ;;  %6270 = vmatprep.subr.bf16.mxu0 %v6985_v57 }
 0x849   :  { %v4643_v39 = vadd.f32 %v4642_v35, %v9282_v51  ;;  %6271 = vmatpush3.bf16.msra.mxu0 %v6986_v21  ;;  %v6987_v35 = vld [vmem:[%s9213_s11 + $0x68] sm:$0xff]  }
 0x84a   :  { %v4849_v45 = vpop.f32.mrb[80].mxu1  ;;  %v4890_v26 = vpop.f32.mrb[88].mxu0  ;;  %v6988_v51 = vld [vmem:[%s9213_s11 + $0x28] sm:$0xff]   ;;  %6272 = vmatprep.subr.bf16.mxu0 %v6987_v35 }
 0x84b   :  { %7141 = vtanh.f32 %v4643_v39  ;;  %v4896_v8 = vadd.f32 %v4849_v45, %v9283_v38  ;;  %v4851_v46 = vpop.f32.mrb[81].mxu1  ;;  %v6640_v28 = vpop.f32.mrb[89].mxu0  ;;  %v4917_v0 = vadd.f32 %v8944_v36, %v4890_v26  ;;  %v4943_v36 = vpack.c.bf16 %v8071_v31, %v9286_v20  ;;  %v6989_v39 = vld [vmem:[%s9213_s11 + $0x70] sm:$0xff]   ;;  %v6991_v26 = vld [vmem:[%s9213_s11 + $0x78] sm:$0xff]  }
 0x84c   :  { %v4903_v17 = vadd.f32 %v4851_v46, %v9284_v54  ;;  %v4853_v63 = vpop.f32.mrb[82].mxu1  ;;  %v4893_v34 = vpop.f32.mrb[90].mxu0  ;;  %v6990_v45 = vld [vmem:[%s9213_s11 + $0x30] sm:$0xff]   ;;  %v6992_v38 = vld [vmem:[%s9213_s11 + $0x38] sm:$0xff]   ;;  %v9288_v46 = vld [vmem:[#allocation5_spill] sm:$0xff] }
 0x84d   :  { %v6057_v14 = vmul.f32 -1.442695, %v4896_v8  ;;  %v4854_v9 = vpop.f32.mrb[83].mxu1  ;;  %v6641_v60 = vpop.f32.mrb[91].mxu0  ;;  %6273 = vmatpush3.bf16.msra.mxu0 %v6988_v51  ;;  %v4983_v8 = vld [vmem:[%s9214_s10] sm:$0x3] }
 0x84e   :  { %v6058_v52 = vmul.f32 -1.442695, %v4903_v17  ;;  %6274 = vmatprep.subr.bf16.mxu0 %v6989_v39  ;;  %v4988_v28 = vrot.slane %v4983_v8, %v9288_v46  ;;  %v9289_v54 = vld [vmem:[#allocation6_spill] sm:$0xff] }
 0x84f   :  { %7143 = vpow2.f32 %v6057_v14  ;;  %v4992_v17 = vrot.slane %v4983_v8, %v9289_v54 }
 0x850   :  { %7145 = vpow2.f32 %v6058_v52 }
 0x851   :  { %6275 = vmatpush3.bf16.msra.mxu0 %v6990_v45 }
 0x852   :  { %6276 = vmatprep.subr.bf16.mxu0 %v6991_v26 }
 0x855   :  { %v7142_v19 = vpop.eup %7141  ;;  %6277 = vmatpush3.bf16.msra.mxu0 %v6992_v38 }
 0x856   :  { %v4646_v1 = vmul.f32 %v7142_v19, %v4645_v23 }
 0x858   :  { %v9107_v44 = vadd.f32 %v4647_v49, %v4646_v1 }
 0x859   :  { %v7144_v22 = vpop.eup %7143 }
 0x85a   :  { %v4900_v7 = vadd.f32 1.0, %v7144_v22  ;;  %v7146_v30 = vpop.eup %7145  ;;  %v4949_v5 = vpack.c.bf16 %v9107_v44, %v8921_v29 }
 0x85b   :  { %v4907_v62 = vadd.f32 1.0, %v7146_v30 }
 0x85c   :  { %7147 = vrcp.f32 %v4900_v7 }
 0x85d   :  { %7149 = vrcp.f32 %v4907_v62 }
 0x866   :  { %v7148_v12 = vpop.eup %7147 }
 0x867   :  { %v4918_v32 = vmul.f32 %v7148_v12, %v4917_v0  ;;  %v7150_v61 = vpop.eup %7149 }
 0x868   :  { %v4921_v18 = vsub.f32 1.0, %v7150_v61  ;;  %v4923_v41 = vmul.f32 %v7150_v61, %v8981_v33 }
 0x869   :  { %v4919_v25 = vadd.f32 %v4918_v32, %v9285_v43 }
 0x86b   :  { %7151 = vtanh.f32 %v4919_v25 }
 0x875   :  { %v7152_v27 = vpop.eup %7151 }
 0x876   :  { %v4922_v4 = vmul.f32 %v7152_v27, %v4921_v18 }
 0x878   :  { %v9112_v55 = vadd.f32 %v4923_v41, %v4922_v4 }
 0x87a   :  { %v4944_v50 = vpack.c.bf16 %v8981_v33, %v9112_v55 }
 0x87c   :  { %5187 = vmatprep.mubr.bf16.mxu1 %v4944_v50 }
 0x87d   :  { %5188 = vmatmul.mubr.bf16.vlgmr.msra.gmra.mrb[84].mxu1 %v4943_v36 }
 0x87e   :  { %5197 = vmatprep.mubr.bf16.mxu1 %v4946_v6 }
 0x885   :  { %5198 = vmatmul.mubr.bf16.gmra.mrb[88].mxu1 %v4945_v10 }
 0x886   :  { %5207 = vmatprep.mubr.bf16.mxu1 %v4948_v15 }
 0x88d   :  { %5208 = vmatmul.mubr.bf16.gmra.mrb[92].mxu1 %v4947_v16 }
 0x88e   :  { %5217 = vmatprep.mubr.bf16.mxu1 %v4950_v56 }
 0x895   :  { %5218 = vmatmul.mubr.bf16.gmra.mrb[96].mxu1 %v4949_v5 }
 0x950   :  { %v5189_v63 = vpop.f32.mrb[84].mxu1 }
 0x951   :  { %v5190_v34 = vadd.f32 %v5189_v63, %v4988_v28  ;;  %v5191_v14 = vpop.f32.mrb[85].mxu1 }
 0x952   :  { %v5192_v9 = vadd.f32 %v5191_v14, %v4992_v17  ;;  %v5193_v60 = vpop.f32.mrb[86].mxu1 }
 0x953   :  { %7153 = vtanh.f32 %v5190_v34  ;;  %v5194_v37 = vadd.f32 %v5193_v60, %v4988_v28  ;;  %v5195_v52 = vpop.f32.mrb[87].mxu1 }
 0x954   :  { %7155 = vtanh.f32 %v5192_v9  ;;  %v5196_v23 = vadd.f32 %v5195_v52, %v4992_v17 }
 0x955   :  { %7157 = vtanh.f32 %v5194_v37 }
 0x956   :  { %7159 = vtanh.f32 %v5196_v23 }
 0x958   :  { %v5199_v19 = vpop.f32.mrb[88].mxu1 }
 0x959   :  { %v5200_v1 = vadd.f32 %v5199_v19, %v4988_v28  ;;  %v5201_v49 = vpop.f32.mrb[89].mxu1 }
 0x95a   :  { %v5202_v22 = vadd.f32 %v5201_v49, %v4992_v17  ;;  %v5203_v7 = vpop.f32.mrb[90].mxu1 }
 0x95b   :  { %7161 = vtanh.f32 %v5200_v1  ;;  %v5204_v30 = vadd.f32 %v5203_v7, %v4988_v28  ;;  %v5205_v62 = vpop.f32.mrb[91].mxu1 }
 0x95c   :  { %7163 = vtanh.f32 %v5202_v22  ;;  %v5206_v0 = vadd.f32 %v5205_v62, %v4992_v17 }
 0x95d   :  { %v7154_v12 = vpop.eup %7153  ;;  %7165 = vtanh.f32 %v5204_v30 }
 0x95e   :  { %v7156_v32 = vpop.eup %7155  ;;  %7167 = vtanh.f32 %v5206_v0 }
 0x95f   :  { %v7158_v43 = vpop.eup %7157 }
 0x960   :  { %v7160_v25 = vpop.eup %7159  ;;  %v5209_v61 = vpop.f32.mrb[92].mxu1  ;;  %v5244_v18 = vpack.c.bf16 %v7158_v43, %v7154_v12 }
 0x961   :  { %v5210_v27 = vadd.f32 %v5209_v61, %v4988_v28  ;;  %v5211_v4 = vpop.f32.mrb[93].mxu1  ;;  %v5245_v41 = vpack.c.bf16 %v7160_v25, %v7156_v32 }
 0x962   :  { %v5212_v50 = vadd.f32 %v5211_v4, %v4992_v17  ;;  %v5213_v36 = vpop.f32.mrb[94].mxu1 }
 0x963   :  { %7169 = vtanh.f32 %v5210_v27  ;;  %v5214_v6 = vadd.f32 %v5213_v36, %v4988_v28  ;;  %v5215_v10 = vpop.f32.mrb[95].mxu1  ;;  %5412 = vmatprep.mubr.bf16.mxu0 %v5245_v41 }
 0x964   :  { %7171 = vtanh.f32 %v5212_v50  ;;  %v5216_v15 = vadd.f32 %v5215_v10, %v4992_v17  ;;  %5413 = vmatmul.mubr.bf16.vlgmr.msra.gmra.mrb[92].mxu0 %v5244_v18 }
 0x965   :  { %v7162_v16 = vpop.eup %7161  ;;  %7173 = vtanh.f32 %v5214_v6 }
 0x966   :  { %v7164_v56 = vpop.eup %7163  ;;  %7175 = vtanh.f32 %v5216_v15 }
 0x967   :  { %v7166_v5 = vpop.eup %7165 }
 0x968   :  { %v7168_v47 = vpop.eup %7167  ;;  %v5219_v24 = vpop.f32.mrb[96].mxu1  ;;  %v5246_v57 = vpack.c.bf16 %v7166_v5, %v7162_v16 }
 0x969   :  { %v5220_v21 = vadd.f32 %v5219_v24, %v4988_v28  ;;  %v5221_v35 = vpop.f32.mrb[97].mxu1  ;;  %v5247_v51 = vpack.c.bf16 %v7168_v47, %v7164_v56 }
 0x96a   :  { %v5222_v39 = vadd.f32 %v5221_v35, %v4992_v17  ;;  %v5223_v45 = vpop.f32.mrb[98].mxu1 }
 0x96b   :  { %7177 = vtanh.f32 %v5220_v21  ;;  %v5224_v26 = vadd.f32 %v5223_v45, %v4988_v28  ;;  %v5225_v38 = vpop.f32.mrb[99].mxu1  ;;  %5420 = vmatprep.mubr.bf16.mxu0 %v5247_v51 }
 0x96c   :  { %7179 = vtanh.f32 %v5222_v39  ;;  %v5226_v8 = vadd.f32 %v5225_v38, %v4992_v17  ;;  %5421 = vmatmul.mubr.bf16.gmra.mrb[96].mxu0 %v5246_v57 }
 0x96d   :  { %v7170_v46 = vpop.eup %7169  ;;  %7181 = vtanh.f32 %v5224_v26 }
 0x96e   :  { %v7172_v54 = vpop.eup %7171  ;;  %7183 = vtanh.f32 %v5226_v8 }
 0x96f   :  { %v7174_v63 = vpop.eup %7173 }
 0x970   :  { %v7176_v34 = vpop.eup %7175  ;;  %v5248_v14 = vpack.c.bf16 %v7174_v63, %v7170_v46 }
 0x971   :  { %v5249_v9 = vpack.c.bf16 %v7176_v34, %v7172_v54 }
 0x973   :  { %5428 = vmatprep.mubr.bf16.mxu0 %v5249_v9 }
 0x974   :  { %5429 = vmatmul.mubr.bf16.gmra.mrb[100].mxu0 %v5248_v14 }
 0x975   :  { %v7178_v60 = vpop.eup %7177 }
 0x976   :  { %v7180_v37 = vpop.eup %7179 }
 0x977   :  { %v7182_v52 = vpop.eup %7181 }
 0x978   :  { %v7184_v23 = vpop.eup %7183  ;;  %v5250_v28 = vpack.c.bf16 %v7182_v52, %v7178_v60 }
 0x979   :  { %v5251_v19 = vpack.c.bf16 %v7184_v23, %v7180_v37 }
 0x97b   :  { %5436 = vmatprep.mubr.bf16.mxu0 %v5251_v19 }
 0x97c   :  { %5437 = vmatmul.mubr.bf16.gmra.mrb[104].mxu0 %v5250_v28 }
 0xa37   :  { %v6278_v17 = vpop.f32.mrb[92].mxu0 }
 0xa38   :  { %v6279_v1 = vpop.f32.mrb[93].mxu0 }
 0xa39   :  { %v6280_v49 = vadd.f32 %v6279_v1, %v6278_v17  ;;  %v6281_v22 = vpop.f32.mrb[94].mxu0 }
 0xa3a   :  { %v6282_v7 = vpop.f32.mrb[95].mxu0 }
 0xa3b   :  { %v6283_v30 = vadd.f32 %v6282_v7, %v6281_v22  ;;  %v5446_v50 = vsel %vm5445_vm2, %v6280_v49, -inf }
 0xa3d   :  { %v5447_v15 = vsel %vm5445_vm2, %v6283_v30, -inf }
 0xa3f   :  { %v6284_v62 = vpop.f32.mrb[96].mxu0 }
 0xa40   :  { %v6285_v0 = vpop.f32.mrb[97].mxu0 }
 0xa41   :  { %v6286_v12 = vadd.f32 %v6285_v0, %v6284_v62  ;;  %v6287_v32 = vpop.f32.mrb[98].mxu0 }
 0xa42   :  { %v6288_v43 = vpop.f32.mrb[99].mxu0 }
 0xa43   :  { %v6289_v25 = vadd.f32 %v6288_v43, %v6287_v32  ;;  %v5448_v51 = vsel %vm5445_vm2, %v6286_v12, -inf }
 0xa45   :  { %v5449_v38 = vsel %vm5445_vm2, %v6289_v25, -inf }
 0xa47   :  { %v6290_v61 = vpop.f32.mrb[100].mxu0 }
 0xa48   :  { %v6291_v18 = vpop.f32.mrb[101].mxu0 }
 0xa49   :  { %v6292_v27 = vadd.f32 %v6291_v18, %v6290_v61  ;;  %v6293_v4 = vpop.f32.mrb[102].mxu0 }
 0xa4a   :  { %v6294_v41 = vpop.f32.mrb[103].mxu0 }
 0xa4b   :  { %v5450_v36 = vsel %vm5445_vm2, %v6292_v27, -inf  ;;  %v6295_v6 = vadd.f32 %v6294_v41, %v6293_v4 }
 0xa4c   :  { %v5451_v10 = vmax.f32 %v5446_v50, %v5450_v36 }
 0xa4d   :  { %v5452_v16 = vsel %vm5445_vm2, %v6295_v6, -inf }
 0xa4e   :  { %v5453_v56 = vmax.f32 %v5447_v15, %v5452_v16 }
 0xa4f   :  { %v6296_v5 = vpop.f32.mrb[104].mxu0 }
 0xa50   :  { %v5458_v47 = vmax.f32 %v5451_v10, %v5453_v56  ;;  %v6297_v24 = vpop.f32.mrb[105].mxu0 }
 0xa51   :  { %v6298_v57 = vadd.f32 %v6297_v24, %v6296_v5  ;;  %v6299_v21 = vpop.f32.mrb[106].mxu0 }
 0xa52   :  { %v6300_v35 = vpop.f32.mrb[107].mxu0 }
 0xa53   :  { %v5454_v39 = vsel %vm5445_vm2, %v6298_v57, -inf  ;;  %v6301_v45 = vadd.f32 %v6300_v35, %v6299_v21 }
 0xa54   :  { %v5455_v26 = vmax.f32 %v5448_v51, %v5454_v39 }
 0xa55   :  { %v5456_v8 = vsel %vm5445_vm2, %v6301_v45, -inf }
 0xa56   :  { %v5457_v46 = vmax.f32 %v5449_v38, %v5456_v8 }
 0xa58   :  { %v5459_v54 = vmax.f32 %v5455_v26, %v5457_v46 }
 0xa5a   :  { %v5460_v63 = vmax.f32 %v5458_v47, %v5459_v54 }
 0xa5c   :  { %v5465_v34 = vsub.f32 %v6292_v27, %v5460_v63  ;;  %v5466_v14 = vsub.f32 %v6295_v6, %v5460_v63  ;;  %v5467_v9 = vsub.f32 %v6298_v57, %v5460_v63  ;;  %v5468_v60 = vsub.f32 %v6301_v45, %v5460_v63 }
 0xa5d   :  { %v5461_v37 = vsub.f32 %v6280_v49, %v5460_v63  ;;  %v5462_v52 = vsub.f32 %v6283_v30, %v5460_v63  ;;  %v5463_v23 = vsub.f32 %v6286_v12, %v5460_v63  ;;  %v5464_v28 = vsub.f32 %v6289_v25, %v5460_v63 }
 0xa5e   :  { %v5477_v7 = vmul.f32 1.442695, %v5465_v34  ;;  %v5479_v62 = vmul.f32 1.442695, %v5466_v14  ;;  %v5481_v0 = vmul.f32 1.442695, %v5467_v9 }
 0xa5f   :  { %v5469_v19 = vmul.f32 1.442695, %v5461_v37  ;;  %v5471_v17 = vmul.f32 1.442695, %v5462_v52  ;;  %v5473_v1 = vmul.f32 1.442695, %v5463_v23 }
 0xa60   :  { %v5475_v22 = vmul.f32 1.442695, %v5464_v28  ;;  %v5483_v32 = vmul.f32 1.442695, %v5468_v60 }
 0xa61   :  { %7185 = vpow2.f32 %v5469_v19 }
 0xa62   :  { %7187 = vpow2.f32 %v5471_v17 }
 0xa63   :  { %7189 = vpow2.f32 %v5473_v1 }
 0xa64   :  { %7191 = vpow2.f32 %v5475_v22 }
 0xa65   :  { %7193 = vpow2.f32 %v5477_v7 }
 0xa66   :  { %7195 = vpow2.f32 %v5479_v62 }
 0xa67   :  { %7197 = vpow2.f32 %v5481_v0 }
 0xa68   :  { %7199 = vpow2.f32 %v5483_v32 }
 0xa6b   :  { %v7186_v43 = vpop.eup %7185 }
 0xa6c   :  { %v7188_v49 = vpop.eup %7187  ;;  %v5485_v30 = vsel %vm5445_vm2, %v7186_v43, 0.0 }
 0xa6d   :  { %v7190_v12 = vpop.eup %7189  ;;  %v5486_v25 = vsel %vm5445_vm2, %v7188_v49, 0.0 }
 0xa6e   :  { %v7192_v61 = vpop.eup %7191  ;;  %v5487_v18 = vadd.f32 %v5486_v25, %v5485_v30  ;;  %v5488_v27 = vsel %vm5445_vm2, %v7190_v12, 0.0 }
 0xa6f   :  { %v7194_v4 = vpop.eup %7193  ;;  %v5490_v50 = vsel %vm5445_vm2, %v7192_v61, 0.0 }
 0xa70   :  { %v5489_v41 = vadd.f32 %v5488_v27, %v5487_v18  ;;  %v7196_v36 = vpop.eup %7195  ;;  %v5492_v10 = vsel %vm5445_vm2, %v7194_v4, 0.0 }
 0xa71   :  { %v7198_v15 = vpop.eup %7197  ;;  %v5494_v56 = vsel %vm5445_vm2, %v7196_v36, 0.0 }
 0xa72   :  { %v5491_v6 = vadd.f32 %v5490_v50, %v5489_v41  ;;  %v7200_v5 = vpop.eup %7199  ;;  %v5496_v24 = vsel %vm5445_vm2, %v7198_v15, 0.0 }
 0xa73   :  { %v5498_v21 = vsel %vm5445_vm2, %v7200_v5, 0.0 }
 0xa74   :  { %v5493_v16 = vadd.f32 %v5492_v10, %v5491_v6 }
 0xa76   :  { %v5495_v47 = vadd.f32 %v5494_v56, %v5493_v16 }
 0xa78   :  { %v5497_v57 = vadd.f32 %v5496_v24, %v5495_v47 }
 0xa7a   :  { %v5499_v35 = vadd.f32 %v5498_v21, %v5497_v57 }
 0xa7c   :  { %7201 = vrcp.f32 %v5499_v35 }
 0xa86   :  { %v7202_v51 = vpop.eup %7201 }
 0xa87   :  { %v5503_v39 = vmul.f32 %v7202_v51, %v7190_v12  ;;  %v5501_v45 = vmul.f32 %v7202_v51, %v7186_v43  ;;  %v5504_v26 = vmul.f32 %v7202_v51, %v7192_v61  ;;  %v5502_v38 = vmul.f32 %v7202_v51, %v7188_v49 }
 0xa88   :  { %v5506_v8 = vmul.f32 %v7202_v51, %v7196_v36  ;;  %v5505_v46 = vmul.f32 %v7202_v51, %v7194_v4  ;;  %v5508_v54 = vmul.f32 %v7202_v51, %v7200_v5  ;;  %v5507_v63 = vmul.f32 %v7202_v51, %v7198_v15 }
 0xa89   :  { %5521 = vperm.xlu1 %6648, %v5503_v39   ;;  %5511 = vperm.xlu0 %6647, %v5501_v45  }
 0xa8d   :  { %5526 = vperm.xlu1 %6648, %v5504_v26   ;;  %5516 = vperm.xlu0 %6647, %v5502_v38  }
 0xa91   :  { %5536 = vperm.xlu1 %6648, %v5506_v8   ;;  %5531 = vperm.xlu0 %6647, %v5505_v46  }
 0xa95   :  { %5546 = vperm.xlu1 %6648, %v5508_v54   ;;  %5541 = vperm.xlu0 %6647, %v5507_v63  }
 0xb08   :  { %v5522_v34 = vpop.permute.xlu1 %5521  ;;  %v5512_v14 = vpop.permute.xlu0 %5511 }
 0xb09   :  { %v5549_v37 = vmul.f32 %v5512_v14, %v9286_v20  ;;  %v5550_v52 = vmul.f32 %v5512_v14, %v9112_v55  ;;  %v5553_v19 = vmul.f32 %v5522_v34, %v8266_v2  ;;  %v5554_v17 = vmul.f32 %v5522_v34, %v8851_v59 }
 0xb0c   :  { %v5527_v9 = vpop.permute.xlu1 %5526  ;;  %v5517_v60 = vpop.permute.xlu0 %5516 }
 0xb0d   :  { %v5551_v23 = vmul.f32 %v5517_v60, %v8071_v31  ;;  %v5552_v28 = vmul.f32 %v5517_v60, %v8981_v33  ;;  %v5555_v0 = vmul.f32 %v5527_v9, %v8391_v13  ;;  %v5556_v32 = vmul.f32 %v5527_v9, %v8731_v3 }
 0xb0f   :  { %v5565_v1 = vadd.f32 %v5551_v23, %v5549_v37  ;;  %v5572_v22 = vadd.f32 %v5552_v28, %v5550_v52 }
 0xb10   :  { %v5537_v7 = vpop.permute.xlu1 %5536  ;;  %v5532_v62 = vpop.permute.xlu0 %5531 }
 0xb11   :  { %v5566_v43 = vadd.f32 %v5565_v1, %v5553_v19  ;;  %v5573_v20 = vadd.f32 %v5572_v22, %v5554_v17  ;;  %v5557_v31 = vmul.f32 %v5532_v62, %v8601_v40  ;;  %v5558_v33 = vmul.f32 %v5532_v62, %v8451_v42 }
 0xb12   :  { %v5559_v2 = vmul.f32 %v5537_v7, %v8796_v11  ;;  %v5560_v59 = vmul.f32 %v5537_v7, %v8321_v53 }
 0xb13   :  { %v5567_v49 = vadd.f32 %v5566_v43, %v5555_v0  ;;  %v5574_v55 = vadd.f32 %v5573_v20, %v5556_v32 }
 0xb14   :  { %v5542_v30 = vpop.permute.xlu0 %5541  ;;  %v5547_v61 = vpop.permute.xlu1 %5546 }
 0xb15   :  { %v5568_v12 = vadd.f32 %v5567_v49, %v5557_v31  ;;  %v5575_v25 = vadd.f32 %v5574_v55, %v5558_v33  ;;  %v5561_v3 = vmul.f32 %v5542_v30, %v8921_v29  ;;  %v5562_v27 = vmul.f32 %v5542_v30, %v8201_v48 }
 0xb16   :  { %v5563_v4 = vmul.f32 %v5547_v61, %v9107_v44  ;;  %v5564_v40 = vmul.f32 %v5547_v61, %v9287_v58 }
 0xb17   :  { %v5569_v18 = vadd.f32 %v5568_v12, %v5559_v2  ;;  %v5576_v13 = vadd.f32 %v5575_v25, %v5560_v59 }
 0xb19   :  { %v5570_v41 = vadd.f32 %v5569_v18, %v5561_v3  ;;  %v5577_v42 = vadd.f32 %v5576_v13, %v5562_v27 }
 0xb1b   :  { %v5571_v50 = vadd.f32 %v5570_v41, %v5563_v4  ;;  %v5578_v36 = vadd.f32 %v5577_v42, %v5564_v40 }
 0xb1d   :  { %5579 = vst [vmem:[%s9215_s12] sm:$0xff] %v5571_v50  ;;  %5580 = vst [vmem:[%s9215_s12 + $0x8] sm:$0xff] %v5578_v36 }

</bundles_post_ra>
